<compile_context>
chip_gen: v7x
topology: tpu7x:2x2x1
jax: 0.10.0
libtpu: 0.0.40
codegen_flags: <defaults>
</compile_context>

<pallas_src>
import math

import jax
import jax.numpy as jnp
import numpy as np
from jax.experimental import pallas as pl
from jax.experimental.pallas import tpu as pltpu


_LANES = 128
_SUBLANES = 8
# Keep each output tile <= 6 MiB so the double-buffered writeback (2 buffers)
# stays under every generation's default scoped-VMEM limit (v5e: 16 MiB).
_MAX_TILE_BYTES = 6 * 1024 * 1024


def _round_up(x, m):
    return -(-x // m) * m


def _choose_tiling(max_len, d_model, align):
    """Pick (tile_pos, steps, pad_len).

    steps is even (>= 4) so a "parallel" grid axis balances across v7x's two
    TensorCores; tile_pos is `align`-aligned (keeps the block shape a clean
    multiple of (8, 128)); pad_len = tile_pos * steps >= max_len, so every
    grid block is full (no masked partial stores, no OOB-masking reliance).
    """
    steps = 4
    while True:
        tile_pos = _round_up(-(-max_len // steps), align)
        if tile_pos * d_model * 4 <= _MAX_TILE_BYTES or tile_pos <= align:
            return tile_pos, steps, tile_pos * steps
        steps += 2


def _pe_std_kernel(const_ref, out_ref):
    # out_ref: (TILE_L, D) rows of the PE table (D >= 128 or D not dividing 128).
    # const_ref: (2, D) resident constants [inv_freq ; parity] (exp hoisted out).
    tile_l = out_ref.shape[0]
    inv_freq = const_ref[0:1, :]            # (1, D)
    is_odd = const_ref[1:2, :] > 0.5        # (1, D)
    row = jax.lax.broadcasted_iota(jnp.int32, (tile_l, 1), 0)
    pos = (row + pl.program_id(0) * tile_l).astype(jnp.float32)
    angle = pos * inv_freq                  # (TILE_L, D)
    out_ref[...] = jnp.where(is_odd, jnp.cos(angle), jnp.sin(angle)).astype(out_ref.dtype)


def _make_flat_kernel(pos_per_row):
    # Lane-dense variant for small d_model (128 % d_model == 0): the table is
    # written as a row-major flat (rows, 128) slab; each 128-lane row covers
    # pos_per_row consecutive positions.
    def kernel(const_ref, out_ref):
        tile_r = out_ref.shape[0]
        inv_freq = const_ref[0:1, :]        # (1, 128): inv_freq[lane % D]
        is_odd = const_ref[1:2, :] > 0.5    # (1, 128): (lane % D) % 2
        col_pos = const_ref[2:3, :]         # (1, 128): lane // D (position offset)
        row = jax.lax.broadcasted_iota(jnp.int32, (tile_r, 1), 0)
        base = ((row + pl.program_id(0) * tile_r) * pos_per_row).astype(jnp.float32)
        angle = (base + col_pos) * inv_freq
        out_ref[...] = jnp.where(is_odd, jnp.cos(angle), jnp.sin(angle)).astype(out_ref.dtype)

    return kernel


def build_pe_table(d_model, max_len=5000):
    """Build the full (1, max_len, d_model) sinusoidal PE table with Pallas."""
    assert d_model % 2 == 0, "d_model must be even (same assumption as the PyTorch module)"

    scale = np.float32(-(math.log(10000.0) / float(d_model)))
    div_term = np.exp(np.arange(0, d_model, 2, dtype=np.float32) * scale)   # (D/2,)
    inv_freq = np.repeat(div_term, 2)                                        # (D,)
    parity = (np.arange(d_model) % 2).astype(np.float32)                     # (D,)

    use_flat = (d_model < _LANES) and (_LANES % d_model == 0)

    if use_flat:
        pos_per_row = _LANES // d_model
        consts = np.stack(
            [
                np.tile(inv_freq, pos_per_row),
                np.tile(parity, pos_per_row),
                (np.arange(_LANES) // d_model).astype(np.float32),
            ]
        ).astype(np.float32)                                                 # (3, 128)
        # Positions per tile must map to whole, 8-aligned flat rows.
        align = (_SUBLANES * _LANES) // d_model
        tile_pos, steps, pad_len = _choose_tiling(max_len, d_model, align)
        tile_r = tile_pos * d_model // _LANES
        rows = pad_len * d_model // _LANES

        pe = pl.pallas_call(
            _make_flat_kernel(pos_per_row),
            out_shape=jax.ShapeDtypeStruct((rows, _LANES), jnp.float32),
            grid=(steps,),
            in_specs=[pl.BlockSpec((3, _LANES), lambda i: (0, 0))],
            out_specs=pl.BlockSpec((tile_r, _LANES), lambda i: (i, 0)),
            compiler_params=pltpu.CompilerParams(dimension_semantics=("parallel",)),
        )(jnp.asarray(consts))
        pe = pe.reshape(pad_len, d_model)
    else:
        # TODO(synk): small d_model that does not divide 128 (e.g. 96) uses the
        # standard layout and pays masked partial stores; acceptable (one-time).
        consts = np.stack([inv_freq, parity]).astype(np.float32)             # (2, D)
        tile_pos, steps, pad_len = _choose_tiling(max_len, d_model, _SUBLANES)

        pe = pl.pallas_call(
            _pe_std_kernel,
            out_shape=jax.ShapeDtypeStruct((pad_len, d_model), jnp.float32),
            grid=(steps,),
            in_specs=[pl.BlockSpec((2, d_model), lambda i: (0, 0))],
            out_specs=pl.BlockSpec((tile_pos, d_model), lambda i: (i, 0)),
            compiler_params=pltpu.CompilerParams(dimension_semantics=("parallel",)),
        )(jnp.asarray(consts))

    return pe[:max_len][None]   # (1, max_len, d_model)


# Table cache keyed by (d_model, max_len) — mirrors the PyTorch register_buffer:
# the table is built once; forward is just a slice.
_PE_CACHE = {}


def positional_embedding(x, d_model, max_len=5000):
    """Return pe[:, :x.shape[1]] of shape (1, seq_len, d_model), float32.

    `x` is consumed only for its shape (never passed through the kernel).
    NOTE: consumers running under jit should index the cached table directly
    so XLA fuses the slice with the downstream add (zero-copy steady state).
    """
    seq_len = x.shape[1]
    assert seq_len <= max_len
    key = (d_model, max_len)
    if key not in _PE_CACHE:
        _PE_CACHE[key] = jax.block_until_ready(build_pe_table(d_model, max_len))
    return _PE_CACHE[key][:, :seq_len]


def _reference_pe(seq_len, d_model):
    pe = np.zeros((seq_len, d_model), dtype=np.float32)
    position = np.arange(0, seq_len, dtype=np.float32)[:, None]
    div_term = np.exp(
        np.arange(0, d_model, 2, dtype=np.float32) * -(math.log(10000.0) / d_model)
    )
    pe[:, 0::2] = np.sin(position * div_term)
    pe[:, 1::2] = np.cos(position * div_term)
    return pe[None]


if __name__ == "__main__":
    batch, seq_len, d_model = 2, 8, 32
    max_len = 5000

    key = jax.random.PRNGKey(0)
    x = jax.random.normal(key, (batch, seq_len, d_model), dtype=jnp.float32)

    out = jax.block_until_ready(positional_embedding(x, d_model=d_model, max_len=max_len))
    assert out.shape == (1, seq_len, d_model), out.shape
    np.testing.assert_allclose(
        np.asarray(out), _reference_pe(seq_len, d_model), rtol=1e-5, atol=1e-5
    )

    # Cached table (lane-dense flat path): tight tolerance at shallow positions,
    # and the FULL table at a tolerance bounded only by f32 sin/cos range
    # reduction at ~5000 rad (no phase-shift trick involved any more).
    tab = np.asarray(_PE_CACHE[(d_model, max_len)])
    np.testing.assert_allclose(tab[:, :256], _reference_pe(256, d_model), rtol=1e-5, atol=1e-5)
    np.testing.assert_allclose(tab, _reference_pe(max_len, d_model), rtol=0.0, atol=2e-3)

    # Exercise the standard (d_model >= 128, already lane-dense) path too.
    tab128 = np.asarray(build_pe_table(128, max_len=512))
    np.testing.assert_allclose(
        tab128[:, :256], _reference_pe(256, 128), rtol=1e-5, atol=1e-5
    )
    np.testing.assert_allclose(tab128, _reference_pe(512, 128), rtol=0.0, atol=1e-3)

    # Second forward reuses the cached table (no kernel re-execution).
    out2 = positional_embedding(x, d_model=d_model, max_len=max_len)
    np.testing.assert_allclose(np.asarray(out2), np.asarray(out), rtol=0.0, atol=0.0)

    print("KERNEL_OK")
</pallas_src>

<mosaic_0001>
module attributes {stable_mosaic.version = 11 : i64} {
  func.func @kernel(%arg0: i32, %arg1: memref<3x128xf32, #tpu.memory_space<vmem>>, %arg2: memref<320x128xf32, #tpu.memory_space<vmem>>) attributes {dimension_semantics = [#tpu.dimension_semantics<parallel>], iteration_bounds = array<i64: 4>, scalar_prefetch = 0 : i64, scratch_operands = 0 : i64, tpu.core_type = #tpu.core_type<tc>, window_params = [{pipeline_mode = #tpu.pipeline_mode<synchronous>, transform_indices = @transform_0, window_bounds = array<i64: 3, 128>}, {transform_indices = @transform_1, window_bounds = array<i64: 320, 128>}]} {
    %c0 = arith.constant 0 : index
    %c0_0 = arith.constant 0 : index
    %0 = vector.load %arg1[%c0, %c0_0] : memref<3x128xf32, #tpu.memory_space<vmem>>, vector<1x128xf32>
    %c1 = arith.constant 1 : index
    %c0_1 = arith.constant 0 : index
    %1 = vector.load %arg1[%c1, %c0_1] : memref<3x128xf32, #tpu.memory_space<vmem>>, vector<1x128xf32>
    %cst = arith.constant 5.000000e-01 : f32
    %2 = vector.broadcast %cst : f32 to vector<1x128xf32>
    %3 = arith.cmpf ogt, %1, %2 : vector<1x128xf32>
    %c2 = arith.constant 2 : index
    %c0_2 = arith.constant 0 : index
    %4 = vector.load %arg1[%c2, %c0_2] : memref<3x128xf32, #tpu.memory_space<vmem>>, vector<1x128xf32>
    %5 = tpu.iota {dimensions = array<i32: 0>} : vector<320x1xi32>
    %c320_i32 = arith.constant 320 : i32
    %6 = arith.muli %arg0, %c320_i32 : i32
    %7 = vector.broadcast %6 : i32 to vector<320x1xi32>
    %8 = arith.addi %5, %7 : vector<320x1xi32>
    %c4_i32 = arith.constant 4 : i32
    %9 = vector.broadcast %c4_i32 : i32 to vector<320x1xi32>
    %10 = arith.muli %8, %9 : vector<320x1xi32>
    %11 = arith.sitofp %10 : vector<320x1xi32> to vector<320x1xf32>
    %12 = vector.broadcast %11 : vector<320x1xf32> to vector<320x128xf32>
    %13 = vector.broadcast %4 : vector<1x128xf32> to vector<320x128xf32>
    %14 = arith.addf %12, %13 : vector<320x128xf32>
    %15 = vector.broadcast %0 : vector<1x128xf32> to vector<320x128xf32>
    %16 = arith.mulf %14, %15 : vector<320x128xf32>
    %17 = math.cos %16 : vector<320x128xf32>
    %18 = math.sin %16 : vector<320x128xf32>
    %19 = vector.shape_cast %3 : vector<1x128xi1> to vector<1x128xi1>
    %20 = vector.broadcast %19 : vector<1x128xi1> to vector<320x128xi1>
    %21 = arith.select %20, %17, %18 : vector<320x128xi1>, vector<320x128xf32>
    %c0_3 = arith.constant 0 : index
    %c0_4 = arith.constant 0 : index
    %22 = vector.load %arg2[%c0_3, %c0_4] : memref<320x128xf32, #tpu.memory_space<vmem>>, vector<320x128xf32>
    tpu.vector_store %arg2[%c0_3, %c0_4], %21 {strides = array<i32>} : memref<320x128xf32, #tpu.memory_space<vmem>>, vector<320x128xf32>,
    return
  }
  func.func @transform_0(%arg0: i32) -> (i32, i32) {
    %c0_i32 = arith.constant 0 : i32
    %c0_i32_0 = arith.constant 0 : i32
    %c0_i32_1 = arith.constant 0 : i32
    return %c0_i32, %c0_i32_0 : i32, i32
  }
  func.func @transform_1(%arg0: i32) -> (i32, i32) {
    %c0_i32 = arith.constant 0 : i32
    %c0_i32_0 = arith.constant 0 : i32
    return %arg0, %c0_i32 : i32, i32
  }
}

</mosaic_0001>

<bundles_post_ra>
// kernel: tpu_custom_call.1
= control target key start
LH: loop header
LB: loop body
LE: loop exit
PB: predicated region body
PF: predicated region fallthrough
CT: control target
= control target key end

     0   :  { %6 = vsyncpa [#allocation3], 0  ;;  %s16375_s0 = inlined_call_operand.hbm [shape: f32[3,128], index: 0, kind: input, shape index: {}]   ;;  %s16376_s1 = inlined_call_operand.hbm [shape: f32[1280,128], index: 1, kind: output, shape index: {}]  }
   0x1   :  { %7 = vsyncpa [#allocation4], 0 }
   0x2   :  { %9 = vsyncpa [#allocation4 + $0x1], 0  ;;  %s9635_s6 = smov 0   ;;  %s9637_s7 = smov 0  }
   0x3   :  { %s9639_s8 = smov 0   ;;  %s9641_s9 = smov 0  }
   0x4 LB: > { %s9656_s10 = sadd.s32 4294967295, %s9612_s9   ;;  %s8806_s11 = sadd.s32 4294967294, %s9612_s9   ;;  %s9612_s9 = sphi %s9641_s9, %s17571_s9   ;;  %s9608_s8 = sphi %s9639_s8, %s17570_s8   ;;  %s9604_s7 = sphi %s9637_s7, %s17569_s7   ;;  %s9600_s6 = sphi %s9635_s6, %s17568_s6  }
   0x5   : > { %s9660_s12 = sadd.s32 1, %s9612_s9   ;;  %s43_s13 = sadd.s32 1, %s9608_s8 }
   0x6   : > { %s40_s14 = ssub.s32 %s9612_s9, %s9660_s12  ;;  %p53_p0 = scmp.ne.s32.totalorder %s9608_s8, %s9604_s7 }
   0x7   : > { %p41_p1 = scmp.eq.s32.totalorder %s40_s14, 0  ;;  %p54_p2 = scmp.eq.s32.totalorder %s9656_s10, 3 }
   0x8   : > { %p59_p3 = scmp.ne.s32.totalorder %s9604_s7, %s9600_s6  ;;  %p60_p4 = scmp.eq.s32.totalorder %s8806_s11, 3 }
   0x9   : > { %s9671_s15 = scalar_select %p41_p1, %s9608_s8, %s43_s13  }
   0xa   : > { %p9673_p5 = por %p54_p2, %p53_p0  ;;  %p9677_p6 = por %p60_p4, %p59_p3 }
   0xb   : > { %p8807_p7 = scmp.ge.s32.totalorder %s9612_s9, 1  ;;  %p67_p8 = scmp.lt.s32.totalorder %s9612_s9, 5 }
   0xc   : > { %s16786_s16 = scalar_select %p9673_p5, 1, 0 }
   0xd   : > { %s16787_s17 = scalar_select %p9677_p6, 1, 0 }
   0xe   : > { %p16377_p9 = scmp.eq.s32.totalorder %s9656_s10, 0  ;;  %p9684_p10 = pnand %p8807_p7, %p67_p8 }
   0xf   : > { %s9614_s19 = smov [#allocation2]   ;;  %s9518_s24 = scalar_lea.hbm %s16375_s0, 64 }
  0x10   : > { %s16788_s18 = scalar_select %p9684_p10, 1, 0 }
  0x11   : > { %s80_s20 = sshll.u32 %s9614_s19, 4  ;;  %p9304_p11 = pneg %p9684_p10  ;;  %s81_s20 = int_to_ptr.vmem [resolvable:$true] %s80_s20 }
  0x12   : > { %p9519_p13 = scmp.ne.s32.totalorder %s16375_s0, %s9518_s24  ;;  %p9525_p3 = scmp.lt.u32.totalorder %s9518_s24, %s16375_s0 }
  0x13   : > { %p9692_p12 = pnand %p16377_p9, %p9304_p11 }
  0x15   : > { %p9520_p0 = pneg %p9692_p12 }
  0x17   : > { %p9521_p1 = pnand %p9520_p0, %p9519_p13 }
  0x19   : > { %p9522_p2 = pneg %p9521_p1 }
  0x1b   : > { %p9527_p4 = pnand %p9525_p3, %p9522_p2 }
  0x1d   : > { %9530 = shalt.err (!%p9527_p4)
}
  0x1e   : > { %s9531_s29 = scalar_lea.vmem %s81_s20, 64  ;;  %p9539_p9 = scmp.lt.s32.totalorder %s81_s20, %s81_s20 }
  0x1f   : > { %p9532_p7 = scmp.ne.s32.totalorder %s81_s20, %s9531_s29  ;;  %p9540_p6 = scmp.lt.s32.totalorder %s9531_s29, %s9531_s29 }
  0x21   : > { %p9534_p8 = pnand %p9532_p7, %p9520_p0  ;;  %p9541_p5 = por %p9540_p6, %p9539_p9 }
  0x23   : > { %p9535_p11 = pneg %p9534_p8 }
  0x25   : > { %p9542_p10 = pnand %p9541_p5, %p9535_p11 }
  0x27   : > { %9545 = shalt.err (!%p9542_p10)
}
  0x28   : > { %9307 = dma.hbm_to_vmem [thread:$0]  (!%p9692_p12), %s16375_s0, 64, %s81_s20, [#allocation3]  }
  0x29   : > { %p16790_p13 = scmp.ne.s32.totalorder %s16788_s18, 0 }
  0x2b   : > { %93 = sbr.rel (%p16790_p13) target bundleno = 1258 (0x4ea), region = 24 }
  0x32   : > { %p16791_p1 = scmp.eq.s32.totalorder %s9656_s10, 0 }
  0x34   : > { %9591 = dma.done.wait (%p16791_p1), [#allocation3], 64   ;;  %p16792_p0 = pmov %p16791_p1 }
  0x35   : > { %v113_v0 = vlaneseq  ;;  %s154_s3 = smul.u32 320, %s9656_s10  ;;  %v9727_v9 = vld [vmem:[#allocation2 + $0x2] ss:$0 sm:$0xff]  ;;  %v9732_v14 = vld [vmem:[#allocation2] ss:$0 sm:$0xff]  ;;  %s105_s4 = sand.u32 1, %s9604_s7  }
  0x36   : > { %9593 = vsyncadd (%p16792_p0), [#allocation3], 4294967232  ;;  %s16062_s5 = smul.u32 320, %s105_s4  ;;  %p17566_p6 = scmp.ne.s32.totalorder %s16786_s16, 0 }
  0x37   : > { %v9718_v1 = vshrl.u32 %v113_v0, 7  ;;  %v9722_v3 = vstv %s154_s3  ;;  %s9136_s13 = smul.u32 5120, %s9656_s10  ;;  %s16334_s10 = scalar_lea.sflag [#allocation4], %s105_s4 }
  0x38   : > { %s16151_s11 = scalar_lea.vmem [#allocation5], %s16062_s5  ;;  %s9622_s22 = smov [#allocation5]  }
  0x39   : > { %16793 = vst [vmem:[#allocation8_spill] sm:$0xff] %v9718_v1  ;;  %v115_v2 = vadd.s32 8, %v9718_v1  ;;  %v156_v4 = vadd.s32 %v9722_v3, %v9718_v1  ;;  %v116_v11 = vadd.s32 16, %v9718_v1  ;;  %v117_v12 = vadd.s32 24, %v9718_v1  ;;  %s8744_s14 = sshll.u32 %s16151_s11, 4  ;;  %s16284_s20 = scalar_lea.hbm %s16376_s1, %s9136_s13  ;;  %s16286_s14 = int_to_ptr.vmem [resolvable:$true] %s8744_s14 }
  0x3a   : > { %v118_v15 = vadd.s32 32, %v9718_v1  ;;  %v119_v16 = vadd.s32 40, %v9718_v1  ;;  %v120_v17 = vadd.s32 48, %v9718_v1  ;;  %v121_v19 = vadd.s32 56, %v9718_v1  ;;  %s9546_s21 = scalar_lea.vmem %s16286_s14, 5120  ;;  %s9550_s23 = sshll.u32 %s9622_s22, 4  ;;  %s9551_s23 = int_to_ptr.vmem [resolvable:$false] %s9550_s23 }
  0x3b   : > { %v157_v5 = vadd.s32 %v9722_v3, %v115_v2  ;;  %v196_v6 = vmul.u32 4, %v156_v4  ;;  %v122_v20 = vadd.s32 64, %v9718_v1  ;;  %v123_v21 = vadd.s32 72, %v9718_v1  ;;  %p9547_p5 = scmp.ne.s32.totalorder %s16286_s14, %s9546_s21  ;;  %s9552_s24 = scalar_lea.vmem %s9551_s23, 10240 }
  0x3c   : > { %v124_v22 = vadd.s32 80, %v9718_v1  ;;  %v125_v23 = vadd.s32 88, %v9718_v1  ;;  %v126_v24 = vadd.s32 96, %v9718_v1  ;;  %v9745_v25 = vadd.s32 %v9722_v3, %v116_v11  ;;  %p9553_p12 = scmp.lt.s32.totalorder %s16286_s14, %s9551_s23  ;;  %p9554_p2 = scmp.lt.s32.totalorder %s9552_s24, %s9546_s21 }
  0x3d   : > { %v197_v7 = vmul.u32 4, %v157_v5  ;;  %v236_v8 = vcvt.s32.f32 %v196_v6  ;;  %v9748_v26 = vadd.s32 %v9722_v3, %v117_v12  ;;  %v127_v27 = vadd.s32 104, %v9718_v1  ;;  %p9548_p9 = pnand %p9547_p5, %p17566_p6 }
  0x3e   : > { %v128_v28 = vadd.s32 112, %v9718_v1  ;;  %v129_v29 = vadd.s32 120, %v9718_v1  ;;  %v130_v31 = vadd.s32 128, %v9718_v1  ;;  %v131_v32 = vadd.s32 136, %v9718_v1  ;;  %p9555_p3 = por %p9554_p2, %p9553_p12 }
  0x3f   : > { %v237_v10 = vcvt.s32.f32 %v197_v7  ;;  %v280_v13 = vadd.f32 %v9727_v9, %v236_v8  ;;  %v132_v33 = vadd.s32 144, %v9718_v1  ;;  %v133_v35 = vadd.s32 152, %v9718_v1  ;;  %p9549_p10 = pneg %p9548_p9 }
  0x40   : > { %v134_v36 = vadd.s32 160, %v9718_v1  ;;  %v135_v37 = vadd.s32 168, %v9718_v1  ;;  %v136_v38 = vadd.s32 176, %v9718_v1  ;;  %v137_v39 = vadd.s32 184, %v9718_v1 }
  0x41   : > { %v281_v18 = vadd.f32 %v9727_v9, %v237_v10  ;;  %v9754_v30 = vmul.f32 %v9732_v14, %v280_v13  ;;  %v138_v40 = vadd.s32 192, %v9718_v1  ;;  %v139_v41 = vadd.s32 200, %v9718_v1  ;;  %p9556_p4 = pnand %p9555_p3, %p9549_p10 }
  0x42   : > { %v9770_v42 = vadd.s32 208, %v9718_v1  ;;  %v9773_v43 = vadd.s32 216, %v9718_v1  ;;  %v9776_v44 = vadd.s32 224, %v9718_v1  ;;  %v9779_v45 = vadd.s32 232, %v9718_v1 }
  0x43   : > { %16794 = vst [vmem:[#allocation9_spill] sm:$0xff] %v9754_v30  ;;  %v9760_v34 = vmul.f32 %v9732_v14, %v281_v18  ;;  %v367_v46 = vand.u32 2139095040, %v9754_v30  ;;  %v9783_v47 = vadd.s32 240, %v9718_v1  ;;  %v9786_v48 = vadd.s32 248, %v9718_v1 }
  0x44   : > { %v9789_v49 = vadd.s32 256, %v9718_v1  ;;  %v9793_v51 = vadd.s32 264, %v9718_v1  ;;  %v9796_v52 = vadd.s32 272, %v9718_v1  ;;  %v9799_v53 = vadd.s32 280, %v9718_v1 }
  0x45   : > { %16795 = vst [vmem:[#allocation10_spill] sm:$0xff] %v9760_v34  ;;  %v470_v50 = vand.u32 2139095040, %v9760_v34  ;;  %v368_v54 = vshrl.u32 %v367_v46, 23  ;;  %v9802_v55 = vadd.s32 288, %v9718_v1  ;;  %v9805_v56 = vadd.s32 296, %v9718_v1 }
  0x46   : > { %v9808_v57 = vadd.s32 304, %v9718_v1  ;;  %v9811_v59 = vadd.s32 312, %v9718_v1  ;;  %v9814_v60 = vadd.s32 %v9722_v3, %v118_v15  ;;  %v9817_v61 = vadd.s32 %v9722_v3, %v119_v16 }
  0x47   : > { %v471_v58 = vshrl.u32 %v470_v50, 23  ;;  %v8813_v62 = vadd.s32 4294967169, %v368_v54  ;;  %v9820_v63 = vadd.s32 %v9722_v3, %v120_v17  ;;  %v9823_v0 = vadd.s32 %v9722_v3, %v121_v19 }
  0x48   : > { %v9826_v2 = vadd.s32 %v9722_v3, %v122_v20  ;;  %v9829_v5 = vadd.s32 %v9722_v3, %v123_v21  ;;  %v9832_v6 = vadd.s32 %v9722_v3, %v124_v22  ;;  %v9835_v7 = vadd.s32 %v9722_v3, %v125_v23 }
  0x49   : > { %v8817_v4 = vadd.s32 4294967169, %v471_v58  ;;  %v374_v8 = vadd.s32 1, %v8813_v62  ;;  %v9838_v10 = vadd.s32 %v9722_v3, %v126_v24  ;;  %v9841_v11 = vadd.s32 %v9722_v3, %v127_v27 }
  0x4a   : > { %v9844_v12 = vadd.s32 %v9722_v3, %v128_v28  ;;  %v9847_v15 = vadd.s32 %v9722_v3, %v129_v29  ;;  %v9850_v16 = vadd.s32 %v9722_v3, %v130_v31  ;;  %v9853_v17 = vadd.s32 %v9722_v3, %v131_v32 }
  0x4b   : > { %v477_v13 = vadd.s32 1, %v8817_v4  ;;  %vm375_vm0 = vcmp.gt.s32.totalorder %v374_v8, 0  ;;  %v9856_v18 = vadd.s32 %v9722_v3, %v132_v33  ;;  %v9859_v19 = vadd.s32 %v9722_v3, %v133_v35 }
  0x4c   : > { %v376_v20 = vsel %vm375_vm0, %v374_v8, 0  ;;  %v9862_v21 = vadd.s32 %v9722_v3, %v134_v36  ;;  %v9865_v22 = vadd.s32 %v9722_v3, %v135_v37  ;;  %v16385_v23 = vand.u32 2147483647, %v9754_v30 }
  0x4d   : > { %vm478_vm1 = vcmp.gt.s32.totalorder %v477_v13, 0  ;;  %v378_v24 = vand.u32 31, %v376_v20  ;;  %v9869_v27 = vadd.s32 %v9722_v3, %v136_v38  ;;  %v9872_v28 = vadd.s32 %v9722_v3, %v137_v39 }
  0x4e   : > { %v9874_v29 = vshrl.u32 %v376_v20, 5  ;;  %v479_v31 = vsel %vm478_vm1, %v477_v13, 0  ;;  %v16380_v33 = vmov 683565275   ;;  %v16386_v36 = vmov 2475754826  }
  0x4f   : > { %16796 = vst [vmem:[#allocation11_spill] sm:$0xff] %v9872_v28  ;;  %v379_v32 = vsub.s32 32, %v378_v24  ;;  %v381_v35 = vshll.u32 %v16380_v33, %v378_v24  ;;  %v384_v37 = vshll.u32 %v16386_v36, %v378_v24  ;;  %v16388_v46 = vmov 2131351028  }
  0x50   : > { %v387_v50 = vshll.u32 %v16388_v46, %v378_v24  ;;  %v9880_v54 = vadd.s32 %v9722_v3, %v138_v40  ;;  %v9883_v38 = vadd.s32 %v9722_v3, %v139_v41  ;;  %v16392_v39 = vmov 2102212464  }
  0x51   : > { %v390_v58 = vshll.u32 %v16392_v39, %v378_v24  ;;  %v16394_v62 = vmov 920167782   ;;  %v371_v8 = vand.u32 8388607, %v16385_v23  ;;  %v382_v13 = vshrl.u32 %v16386_v36, %v379_v32 }
  0x52   : > { %16797 = vst [vmem:[#allocation12_spill] sm:$0xff] %v9880_v54  ;;  %16798 = vst [vmem:[#allocation13_spill] sm:$0xff] %v9883_v38  ;;  %v393_v4 = vshll.u32 %v16394_v62, %v378_v24  ;;  %v385_v20 = vshrl.u32 %v16388_v46, %v379_v32  ;;  %v388_v33 = vshrl.u32 %v16392_v39, %v379_v32  ;;  %v16390_v1 = vmov 1326507024  }
  0x53   : > { %v9894_v40 = vadd.s32 %v9722_v3, %v9770_v42  ;;  %v391_v41 = vshrl.u32 %v16394_v62, %v379_v32  ;;  %v394_v38 = vshrl.u32 %v16390_v1, %v379_v32  ;;  %v481_v54 = vand.u32 31, %v479_v31 }
  0x54   : > { %v383_v24 = vor.u32 %v382_v13, %v381_v35  ;;  %v386_v28 = vor.u32 %v385_v20, %v384_v37  ;;  %v389_v30 = vor.u32 %v388_v33, %v387_v50  ;;  %vm399_vm2 = vcmp.lt.s32.totalorder %v9874_v29, 4 }
  0x55   : > { %v392_v23 = vor.u32 %v391_v41, %v390_v58  ;;  %v395_v36 = vor.u32 %v394_v38, %v393_v4  ;;  %vm396_vm3 = vcmp.lt.s32.totalorder %v9874_v29, 1  ;;  %vm398_vm4 = vcmp.lt.s32.totalorder %v9874_v29, 3 }
  0x56   : > { %v9903_v42 = vadd.s32 %v9722_v3, %v9773_v43  ;;  %v9907_v46 = vadd.s32 %v9722_v3, %v9776_v44  ;;  %v9911_v35 = vadd.s32 %v9722_v3, %v9779_v45  ;;  %v372_v33 = vor.u32 8388608, %v371_v8 }
  0x57   : > { %v9915_v37 = vadd.s32 %v9722_v3, %v9783_v47  ;;  %v9919_v50 = vadd.s32 %v9722_v3, %v9786_v48  ;;  %v405_v43 = vsel %vm399_vm2, %v392_v23, 920167782  ;;  %v409_v44 = vsel %vm399_vm2, %v395_v36, 1326507024 }
  0x58   : > { %v198_v38 = vmul.u32 4, %v9745_v25  ;;  %vm397_vm5 = vcmp.lt.s32.totalorder %v9874_v29, 2  ;;  %v404_v45 = vsel %vm396_vm3, %v383_v24, %v386_v28  ;;  %v406_v47 = vsel %vm398_vm4, %v389_v30, %v405_v43 }
  0x59   : > { %16799 = vst [vmem:[#allocation14_spill] sm:$0xff] %v9919_v50  ;;  %v9933_v48 = vadd.s32 %v9722_v3, %v9789_v49  ;;  %v408_v58 = vsel %vm396_vm3, %v386_v28, %v389_v30  ;;  %v410_v36 = vsel %vm398_vm4, %v392_v23, %v409_v44  ;;  %v9939_v4 = vsub.s32 32, %v481_v54 }
  0x5a   : > { %v9943_v25 = vadd.s32 %v9722_v3, %v9793_v51  ;;  %v9947_v8 = vadd.s32 %v9722_v3, %v9796_v52  ;;  %v9951_v49 = vadd.s32 %v9722_v3, %v9799_v53  ;;  %v9953_v13 = vshll.u32 %v372_v33, 8 }
  0x5b   : > { %16800 = vst [vmem:[#allocation15_spill] sm:$0xff] %v9933_v48  ;;  %v9957_v20 = vadd.s32 %v9722_v3, %v9802_v55  ;;  %v9961_v23 = vadd.s32 %v9722_v3, %v9805_v56  ;;  %v9965_v51 = vadd.s32 %v9722_v3, %v9808_v57  ;;  %v407_v52 = vsel %vm397_vm5, %v404_v45, %v406_v47 }
  0x5c   : > { %16801 = vst [vmem:[#allocation16_spill] sm:$0xff] %v9943_v25  ;;  %16802 = vst [vmem:[#allocation17_spill] sm:$0xff] %v9947_v8  ;;  %v238_v41 = vcvt.s32.f32 %v198_v38  ;;  %v411_v53 = vsel %vm397_vm5, %v408_v58, %v410_v36  ;;  %v9972_v43 = vshrl.u32 %v479_v31, 5  ;;  %v16807_v55 = vmov 683565275  }
  0x5d   : > { %16803 = vst [vmem:[#allocation18_spill] sm:$0xff] %v9951_v49  ;;  %16804 = vst [vmem:[#allocation19_spill] sm:$0xff] %v9957_v20  ;;  %v380_v44 = vshrl.u32 %v16807_v55, %v379_v32  ;;  %v484_v56 = vshll.u32 %v16807_v55, %v481_v54  ;;  %v493_v1 = vshll.u32 %v16392_v39, %v481_v54  ;;  %v16808_v47 = vmov 1326507024  }
  0x5e   : > { %16805 = vst [vmem:[#allocation20_spill] sm:$0xff] %v9961_v23  ;;  %16806 = vst [vmem:[#allocation21_spill] sm:$0xff] %v9965_v51  ;;  %v494_v57 = vshrl.u32 %v16394_v62, %v9939_v4  ;;  %v9980_v51 = vmul.u32.u64.low %v9953_v13, %v407_v52  ;;  %v9981_v45 = vmul.u32.u64.high %v9953_v13, %v407_v52, %v9980_v51  ;;  %v496_v38 = vshll.u32 %v16394_v62, %v481_v54 }
  0x5f   : > { %v497_v31 = vshrl.u32 %v16808_v47, %v9939_v4  ;;  %v401_v32 = vsel %vm399_vm2, %v389_v30, 2102212464  ;;  %v9990_v58 = vmul.u32.u64.low %v9953_v13, %v411_v53  ;;  %v9991_v36 = vmul.u32.u64.high %v9953_v13, %v411_v53, %v9990_v58 }
  0x60   : > { %v16809_v33 = vmov 2475754826   ;;  %v16810_v52 = vmov 2131351028   ;;  %v16811_v49 = vmov 2102212464   ;;  %v10003_v30 = vadd.s32 %v9722_v3, %v9811_v59 }
  0x61   : > { %v487_v39 = vshll.u32 %v16809_v33, %v481_v54  ;;  %v485_v23 = vshrl.u32 %v16809_v33, %v9939_v4  ;;  %v488_v20 = vshrl.u32 %v16810_v52, %v9939_v4  ;;  %v490_v62 = vshll.u32 %v16810_v52, %v481_v54 }
  0x62   : > { %v491_v47 = vshrl.u32 %v16811_v49, %v9939_v4  ;;  %v199_v53 = vmul.u32 4, %v9748_v26  ;;  %v200_v58 = vmul.u32 4, %v9814_v60  ;;  %v495_v8 = vor.u32 %v494_v57, %v493_v1 }
  0x63   : > { %v201_v25 = vmul.u32 4, %v9817_v61  ;;  %v16812_v33 = vand.u32 2147483647, %v9760_v34  ;;  %v498_v50 = vor.u32 %v497_v31, %v496_v38  ;;  %vm502_vm6 = vcmp.lt.s32.totalorder %v9972_v43, 4 }
  0x64   : > { %v202_v54 = vmul.u32 4, %v9820_v63  ;;  %v282_v52 = vadd.f32 %v9727_v9, %v238_v41  ;;  %v400_v3 = vsel %vm396_vm3, %v380_v44, %v383_v24  ;;  %v402_v26 = vsel %vm398_vm4, %v386_v28, %v401_v32 }
  0x65   : > { %v474_v48 = vand.u32 8388607, %v16812_v33  ;;  %v203_v1 = vmul.u32 4, %v9823_v0  ;;  %v486_v59 = vor.u32 %v485_v23, %v484_v56  ;;  %v489_v60 = vor.u32 %v488_v20, %v487_v39 }
  0x66   : > { %v492_v61 = vor.u32 %v491_v47, %v490_v62  ;;  %v239_v57 = vcvt.s32.f32 %v199_v53  ;;  %vm499_vm7 = vcmp.lt.s32.totalorder %v9972_v43, 1  ;;  %vm501_vm8 = vcmp.lt.s32.totalorder %v9972_v43, 3 }
  0x67   : > { %v508_v63 = vsel %vm502_vm6, %v495_v8, 920167782  ;;  %v403_v41 = vsel %vm397_vm5, %v400_v3, %v402_v26  ;;  %v422_v24 = vadd.s32 1, %v9981_v45  ;;  %v475_v33 = vor.u32 8388608, %v474_v48 }
  0x68   : > { %v512_v0 = vsel %vm502_vm6, %v498_v50, 1326507024  ;;  %v204_v28 = vmul.u32 4, %v9826_v2  ;;  %v205_v39 = vmul.u32 4, %v9829_v5  ;;  %v10030_v62 = vmul.f32 %v9732_v14, %v282_v52 }
  0x69   : > { %vm421_vm9 = vc.u32 %v9991_v36, %v9980_v51  ;;  %v10034_v20 = vcvt.s32.f32 %v200_v58  ;;  %vm500_vm10 = vcmp.lt.s32.totalorder %v9972_v43, 2  ;;  %v507_v29 = vsel %vm499_vm7, %v486_v59, %v489_v60 }
  0x6a   : > { %16813 = vst [vmem:[#allocation22_spill] sm:$0xff] %v10030_v62  ;;  %v509_v50 = vsel %vm501_vm8, %v492_v61, %v508_v63  ;;  %v10041_v48 = vcvt.s32.f32 %v201_v25  ;;  %v419_v2 = vmul.u32 %v9953_v13, %v403_v41  ;;  %v511_v5 = vsel %vm499_vm7, %v489_v60, %v492_v61 }
  0x6b   : > { %v513_v23 = vsel %vm501_vm8, %v495_v8, %v512_v0  ;;  %v206_v44 = vmul.u32 4, %v9832_v6  ;;  %v207_v56 = vmul.u32 4, %v9835_v7  ;;  %v423_v38 = vsel %vm421_vm9, %v422_v24, %v9981_v45 }
  0x6c   : > { %v10051_v47 = vshll.u32 %v475_v33, 8  ;;  %v10053_v31 = vcvt.s32.f32 %v202_v54  ;;  %v10055_v25 = vcvt.s32.f32 %v203_v1  ;;  %v510_v13 = vsel %vm500_vm10, %v507_v29, %v509_v50 }
  0x6d   : > { %v573_v32 = vand.u32 2139095040, %v10030_v62  ;;  %v208_v52 = vmul.u32 4, %v9838_v10  ;;  %v209_v8 = vmul.u32 4, %v9841_v11  ;;  %v10062_v6 = vcvt.s32.f32 %v204_v28 }
  0x6e   : > { %v514_v7 = vsel %vm500_vm10, %v511_v5, %v513_v23  ;;  %v210_v45 = vmul.u32 4, %v9844_v12  ;;  %v211_v53 = vmul.u32 4, %v9847_v15  ;;  %v10068_v58 = vcvt.s32.f32 %v205_v39  ;;  %v16814_v23 = vld [vmem:[#allocation11_spill] sm:$0xff] }
  0x6f   : > { %v424_v54 = vadd.s32 %v423_v38, %v419_v2  ;;  %v10070_v3 = vcvt.s32.f32 %v206_v44  ;;  %v10072_v26 = vcvt.s32.f32 %v207_v56  ;;  %v483_v11 = vshrl.u32 %v16807_v55, %v9939_v4 }
  0x70   : > { %v10075_v10 = vmul.u32.u64.low %v10051_v47, %v510_v13  ;;  %v10076_v1 = vmul.u32.u64.high %v10051_v47, %v510_v13, %v10075_v10  ;;  %v10082_v63 = vmul.u32.u64.low %v10051_v47, %v514_v7  ;;  %v10083_v12 = vmul.u32.u64.high %v10051_v47, %v514_v7, %v10082_v63 }
  0x71   : > { %v574_v15 = vshrl.u32 %v573_v32, 23  ;;  %v212_v41 = vmul.u32 4, %v9850_v16  ;;  %v213_v24 = vmul.u32 4, %v9853_v17  ;;  %v10087_v33 = vcvt.s32.f32 %v208_v52  ;;  %v16817_v32 = vld [vmem:[#allocation12_spill] sm:$0xff]  ;;  %v16818_v52 = vld [vmem:[#allocation13_spill] sm:$0xff] }
  0x72   : > { %v504_v0 = vsel %vm502_vm6, %v492_v61, 2102212464  ;;  %v214_v28 = vmul.u32 4, %v9856_v18  ;;  %v215_v39 = vmul.u32 4, %v9859_v19  ;;  %v283_v4 = vadd.f32 %v9727_v9, %v239_v57 }
  0x73   : > { %v425_v29 = vadd.s32 536870912, %v424_v54  ;;  %v216_v50 = vmul.u32 4, %v9862_v21  ;;  %v10095_v2 = vcvt.s32.f32 %v209_v8  ;;  %v10097_v5 = vcvt.s32.f32 %v210_v45 }
  0x74   : > { %v10099_v16 = vcvt.s32.f32 %v211_v53  ;;  %v217_v17 = vmul.u32 4, %v9865_v22  ;;  %v503_v61 = vsel %vm499_vm7, %v483_v11, %v486_v59  ;;  %v505_v18 = vsel %vm501_vm8, %v489_v60, %v504_v0 }
  0x75   : > { %v8821_v19 = vadd.s32 4294967169, %v574_v15  ;;  %v218_v57 = vmul.u32 4, %v9869_v27  ;;  %v219_v44 = vmul.u32 4, %v16814_v23  ;;  %v10108_v21 = vcvt.s32.f32 %v212_v41 }
  0x76   : > { %v10110_v56 = vcvt.s32.f32 %v213_v24  ;;  %v10112_v38 = vcvt.s32.f32 %v214_v28  ;;  %v10114_v13 = vcvt.s32.f32 %v215_v39  ;;  %v10117_v22 = vmul.f32 %v9732_v14, %v283_v4  ;;  %v16819_v4 = vld [vmem:[#allocation14_spill] sm:$0xff] }
  0x77   : > { %v10119_v59 = vshrl.u32 %v425_v29, 30  ;;  %v220_v60 = vmul.u32 4, %v16817_v32  ;;  %v221_v8 = vmul.u32 4, %v16818_v52  ;;  %v506_v27 = vsel %vm500_vm10, %v503_v61, %v505_v18  ;;  %v16821_v61 = vld [vmem:[#allocation16_spill] sm:$0xff]  ;;  %v16824_v52 = vld [vmem:[#allocation19_spill] sm:$0xff] }
  0x78   : > { %16815 = vst [vmem:[#allocation11_spill] sm:$0xff] %v10117_v22  ;;  %v525_v7 = vadd.s32 1, %v10076_v1  ;;  %v222_v45 = vmul.u32 4, %v9894_v40  ;;  %v10127_v53 = vcvt.s32.f32 %v216_v50  ;;  %vm524_vm11 = vc.u32 %v10083_v12, %v10075_v10 }
  0x79   : > { %16816 = vst [vmem:[#allocation23_spill] sm:$0xff] %v10119_v59  ;;  %v580_v11 = vadd.s32 1, %v8821_v19  ;;  %v223_v63 = vmul.u32 4, %v9903_v42  ;;  %v224_v15 = vmul.u32 4, %v9907_v46  ;;  %v10133_v41 = vcvt.s32.f32 %v217_v17  ;;  %v16820_v42 = vld [vmem:[#allocation15_spill] sm:$0xff] }
  0x7a   : > { %v10135_v24 = vcvt.s32.f32 %v218_v57  ;;  %v225_v43 = vmul.u32 4, %v9911_v35  ;;  %v427_v0 = vshll.u32 %v10119_v59, 30  ;;  %v522_v40 = vmul.u32 %v10051_v47, %v506_v27  ;;  %v16822_v35 = vld [vmem:[#allocation17_spill] sm:$0xff]  ;;  %v16823_v47 = vld [vmem:[#allocation18_spill] sm:$0xff] }
  0x7b   : > { %v676_v28 = vand.u32 2139095040, %v10117_v22  ;;  %v226_v39 = vmul.u32 4, %v9915_v37  ;;  %v227_v29 = vmul.u32 4, %v16819_v4  ;;  %v10143_v50 = vcvt.s32.f32 %v219_v44  ;;  %v16825_v4 = vld [vmem:[#allocation20_spill] sm:$0xff] }
  0x7c   : > { %v526_v46 = vsel %vm524_vm11, %v525_v7, %v10076_v1  ;;  %v228_v17 = vmul.u32 4, %v16820_v42  ;;  %v229_v18 = vmul.u32 4, %v16821_v61  ;;  %v10148_v19 = vcvt.s32.f32 %v220_v60  ;;  %v16826_v60 = vld [vmem:[#allocation21_spill] sm:$0xff] }
  0x7d   : > { %vm581_vm12 = vcmp.gt.s32.totalorder %v580_v11, 0  ;;  %v230_v57 = vmul.u32 4, %v16822_v35  ;;  %v231_v23 = vmul.u32 4, %v16823_v47  ;;  %v10152_v32 = vcvt.s32.f32 %v221_v8 }
  0x7e   : > { %v10154_v37 = vcvt.s32.f32 %v222_v45  ;;  %v232_v44 = vmul.u32 4, %v16824_v52  ;;  %v10157_v27 = vsub.s32 %v424_v54, %v427_v0  ;;  %v10159_v1 = vadd.s32 %v526_v46, %v522_v40 }
  0x7f   : > { %v677_v7 = vshrl.u32 %v676_v28, 23  ;;  %v233_v42 = vmul.u32 4, %v16825_v4  ;;  %v234_v61 = vmul.u32 4, %v16826_v60  ;;  %v10163_v34 = vcvt.s32.f32 %v223_v63 }
  0x80   : > { %v582_v35 = vsel %vm581_vm12, %v580_v11, 0  ;;  %v235_v47 = vmul.u32 4, %v10003_v30  ;;  %v10166_v8 = vcvt.s32.f32 %v224_v15  ;;  %v10168_v45 = vcvt.s32.f32 %v225_v43 }
  0x81   : > { %v10170_v59 = vcvt.s32.f32 %v226_v39  ;;  %v10172_v54 = vcvt.s32.f32 %v227_v29  ;;  %v10174_v0 = vcvt.s32.f32 %v228_v17  ;;  %v10176_v40 = vcvt.s32.f32 %v229_v18 }
  0x82   : > { %v10178_v28 = vcvt.s32.f32 %v230_v57  ;;  %v430_v63 = vsub.s32 0, %v10157_v27  ;;  %v528_v11 = vadd.s32 536870912, %v10159_v1  ;;  %v584_v46 = vand.u32 31, %v582_v35 }
  0x83   : > { %v8825_v30 = vadd.s32 4294967169, %v677_v7  ;;  %v10182_v15 = vcvt.s32.f32 %v231_v23  ;;  %v10184_v43 = vcvt.s32.f32 %v232_v44  ;;  %v10186_v39 = vcvt.s32.f32 %v233_v42 }
  0x84   : > { %v10188_v29 = vcvt.s32.f32 %v234_v61  ;;  %v10190_v17 = vcvt.s32.f32 %v235_v47  ;;  %v10194_v18 = vadd.f32 %v9727_v9, %v10034_v20  ;;  %v10198_v57 = vadd.f32 %v9727_v9, %v10041_v48 }
  0x85   : > { %v10202_v23 = vadd.f32 %v9727_v9, %v10053_v31  ;;  %v10206_v52 = vadd.f32 %v9727_v9, %v10055_v25  ;;  %v10210_v44 = vadd.f32 %v9727_v9, %v10062_v6  ;;  %v10214_v20 = vadd.f32 %v9727_v9, %v10068_v58 }
  0x86   : > { %v10218_v48 = vadd.f32 %v9727_v9, %v10070_v3  ;;  %v8814_v7 = vmin.u32 %v430_v63, %v10157_v27  ;;  %v10221_v31 = vshrl.u32 %v528_v11, 30  ;;  %v10223_v4 = vsub.s32 32, %v584_v46 }
  0x87   : > { %v683_v25 = vadd.s32 1, %v8825_v30  ;;  %v10227_v42 = vadd.f32 %v9727_v9, %v10072_v26  ;;  %v10231_v6 = vadd.f32 %v9727_v9, %v10087_v33  ;;  %v10235_v58 = vadd.f32 %v9727_v9, %v10095_v2 }
  0x88   : > { %16827 = vst [vmem:[#allocation12_spill] sm:$0xff] %v10221_v31  ;;  %v16406_v3 = vand.u32 2147483647, %v10030_v62  ;;  %v10240_v60 = vadd.f32 %v9727_v9, %v10097_v5  ;;  %v10244_v61 = vadd.f32 %v9727_v9, %v10099_v16  ;;  %v10248_v26 = vadd.f32 %v9727_v9, %v10108_v21 }
  0x89   : > { %16828 = vst [vmem:[#allocation13_spill] sm:$0xff] %v10231_v6  ;;  %16829 = vst [vmem:[#allocation14_spill] sm:$0xff] %v10235_v58  ;;  %v10252_v33 = vadd.f32 %v9727_v9, %v10110_v56  ;;  %v10256_v2 = vadd.f32 %v9727_v9, %v10112_v38  ;;  %v10260_v5 = vadd.f32 %v9727_v9, %v10114_v13  ;;  %v432_v21 = vclz %v8814_v7 }
  0x8a   : > { %16830 = vst [vmem:[#allocation15_spill] sm:$0xff] %v10240_v60  ;;  %16831 = vst [vmem:[#allocation16_spill] sm:$0xff] %v10244_v61  ;;  %v10264_v16 = vadd.f32 %v9727_v9, %v10127_v53  ;;  %v596_v47 = vshll.u32 %v16811_v49, %v584_v46  ;;  %v530_v63 = vshll.u32 %v10221_v31, 30  ;;  %v16837_v56 = vmov 920167782  }
  0x8b   : > { %16832 = vst [vmem:[#allocation17_spill] sm:$0xff] %v10248_v26  ;;  %16833 = vst [vmem:[#allocation18_spill] sm:$0xff] %v10252_v33  ;;  %v597_v11 = vshrl.u32 %v16837_v56, %v10223_v4  ;;  %vm684_vm13 = vcmp.gt.s32.totalorder %v683_v25, 0  ;;  %v10272_v38 = vadd.f32 %v9727_v9, %v10133_v41  ;;  %v577_v13 = vand.u32 8388607, %v16406_v3 }
  0x8c   : > { %16834 = vst [vmem:[#allocation19_spill] sm:$0xff] %v10256_v2  ;;  %16835 = vst [vmem:[#allocation20_spill] sm:$0xff] %v10260_v5  ;;  %v10276_v30 = vshrl.u32 %v582_v35, 5  ;;  %v587_v53 = vshll.u32 %v16807_v55, %v584_v46  ;;  %v599_v5 = vshll.u32 %v16837_v56, %v584_v46  ;;  %v16840_v2 = vmov 1326507024  }
  0x8d   : > { %16836 = vst [vmem:[#allocation21_spill] sm:$0xff] %v10264_v16  ;;  %16838 = vst [vmem:[#allocation24_spill] sm:$0xff] %v10272_v38  ;;  %v16839_v16 = vmov 2475754826   ;;  %v600_v33 = vshrl.u32 %v16840_v2, %v10223_v4  ;;  %v16841_v41 = vmov 2131351028   ;;  %v594_v35 = vshrl.u32 %v16811_v49, %v10223_v4 }
  0x8e   : > { %v588_v7 = vshrl.u32 %v16839_v16, %v10223_v4  ;;  %v590_v31 = vshll.u32 %v16839_v16, %v584_v46  ;;  %v591_v38 = vshrl.u32 %v16841_v41, %v10223_v4  ;;  %v593_v62 = vshll.u32 %v16841_v41, %v584_v46 }
  0x8f   : > { %v685_v3 = vsel %vm684_vm13, %v683_v25, 0  ;;  %v10292_v26 = vadd.f32 %v9727_v9, %v10135_v24  ;;  %v8815_v61 = vadd.s32 4294967294, %v432_v21  ;;  %v10295_v60 = vsub.s32 %v10159_v1, %v530_v63 }
  0x90   : > { %v598_v58 = vor.u32 %v597_v11, %v596_v47  ;;  %v10299_v6 = vadd.f32 %v9727_v9, %v10143_v50  ;;  %v10303_v46 = vadd.f32 %v9727_v9, %v10148_v19  ;;  %v10307_v25 = vadd.f32 %v9727_v9, %v10152_v32 }
  0x91   : > { %16842 = vst [vmem:[#allocation25_spill] sm:$0xff] %v10292_v26  ;;  %vm605_vm14 = vcmp.lt.s32.totalorder %v10276_v30, 4  ;;  %v578_v24 = vor.u32 8388608, %v577_v13  ;;  %v601_v21 = vor.u32 %v600_v33, %v599_v5  ;;  %v16407_v1 = vand.u32 2147483647, %v10117_v22 }
  0x92   : > { %v687_v63 = vand.u32 31, %v685_v3  ;;  %v589_v47 = vor.u32 %v588_v7, %v587_v53  ;;  %v592_v11 = vor.u32 %v591_v38, %v590_v31  ;;  %v595_v26 = vor.u32 %v594_v35, %v593_v62 }
  0x93   : > { %vm602_vm15 = vcmp.lt.s32.totalorder %v10276_v30, 1  ;;  %vm8816_vm0 = vcmp.lt.s32.totalorder %v8815_v61, 0  ;;  %v533_v50 = vsub.s32 0, %v10295_v60  ;;  %vm604_vm1 = vcmp.lt.s32.totalorder %v10276_v30, 3 }
  0x94   : > { %v611_v19 = vsel %vm605_vm14, %v598_v58, 920167782  ;;  %v10318_v32 = vadd.f32 %v9727_v9, %v10154_v37  ;;  %v10322_v33 = vadd.f32 %v9727_v9, %v10163_v34  ;;  %v10326_v62 = vadd.f32 %v9727_v9, %v10166_v8 }
  0x95   : > { %v10330_v31 = vadd.f32 %v9727_v9, %v10168_v45  ;;  %v10334_v5 = vadd.f32 %v9727_v9, %v10170_v59  ;;  %v10338_v37 = vmul.f32 %v9732_v14, %v10194_v18  ;;  %v615_v34 = vsel %vm605_vm14, %v601_v21, 1326507024 }
  0x96   : > { %16843 = vst [vmem:[#allocation26_spill] sm:$0xff] %v10318_v32  ;;  %16844 = vst [vmem:[#allocation27_spill] sm:$0xff] %v10322_v33  ;;  %v10342_v38 = vsub.s32 32, %v687_v63  ;;  %v435_v13 = vsel %vm8816_vm0, 0, %v8815_v61  ;;  %vm603_vm2 = vcmp.lt.s32.totalorder %v10276_v30, 2  ;;  %v610_v8 = vsel %vm602_vm15, %v589_v47, %v592_v11 }
  0x97   : > { %16845 = vst [vmem:[#allocation28_spill] sm:$0xff] %v10326_v62  ;;  %16846 = vst [vmem:[#allocation29_spill] sm:$0xff] %v10330_v31  ;;  %v612_v45 = vsel %vm604_vm1, %v595_v26, %v611_v19  ;;  %v420_v59 = vadd.s32 %v9980_v51, %v9991_v36  ;;  %v8818_v18 = vmin.u32 %v533_v50, %v10295_v60  ;;  %v10352_v53 = vshll.u32 %v578_v24, 8 }
  0x98   : > { %16847 = vst [vmem:[#allocation30_spill] sm:$0xff] %v10334_v5  ;;  %16848 = vst [vmem:[#allocation31_spill] sm:$0xff] %v10338_v37  ;;  %v680_v7 = vand.u32 8388607, %v16407_v1  ;;  %v586_v61 = vshrl.u32 %v16807_v55, %v10223_v4  ;;  %v607_v35 = vsel %vm605_vm14, %v595_v26, 2102212464  ;;  %v614_v21 = vsel %vm602_vm15, %v592_v11, %v595_v26 }
  0x99   : > { %v616_v19 = vsel %vm604_vm1, %v598_v58, %v615_v34  ;;  %v440_v51 = vsub.s32 4294967266, %v435_v13  ;;  %v613_v36 = vsel %vm603_vm2, %v610_v8, %v612_v45  ;;  %v699_v24 = vshll.u32 %v16811_v49, %v687_v63 }
  0x9a   : > { %v700_v50 = vshrl.u32 %v16837_v56, %v10342_v38  ;;  %v436_v1 = vsub.s32 32, %v435_v13  ;;  %v10369_v4 = vshrl.u32 %v685_v3, 5  ;;  %v702_v22 = vshll.u32 %v16837_v56, %v687_v63 }
  0x9b   : > { %v703_v26 = vshrl.u32 %v16840_v2, %v10342_v38  ;;  %v535_v5 = vclz %v8818_v18  ;;  %v617_v58 = vsel %vm603_vm2, %v614_v21, %v616_v19  ;;  %v690_v34 = vshll.u32 %v16807_v55, %v687_v63 }
  0x9c   : > { %v693_v8 = vshll.u32 %v16839_v16, %v687_v63  ;;  %v691_v45 = vshrl.u32 %v16839_v16, %v10342_v38  ;;  %v694_v3 = vshrl.u32 %v16841_v41, %v10342_v38  ;;  %v696_v31 = vshll.u32 %v16841_v41, %v687_v63 }
  0x9d   : > { %v697_v56 = vshrl.u32 %v16811_v49, %v10342_v38  ;;  %v441_v2 = vadd.s32 127, %v440_v51  ;;  %v10386_v18 = vmul.u32.u64.low %v10352_v53, %v613_v36  ;;  %v10387_v62 = vmul.u32.u64.high %v10352_v53, %v613_v36, %v10386_v18 }
  0x9e   : > { %v701_v21 = vor.u32 %v700_v50, %v699_v24  ;;  %v10391_v19 = vmul.u32.u64.low %v10352_v53, %v617_v58  ;;  %v10392_v33 = vmul.u32.u64.high %v10352_v53, %v617_v58, %v10391_v19  ;;  %v704_v16 = vor.u32 %v703_v26, %v702_v22 }
  0x9f   : > { %vm708_vm3 = vcmp.lt.s32.totalorder %v10369_v4, 4  ;;  %v437_v32 = vshll.u32 %v10157_v27, %v435_v13  ;;  %v438_v63 = vshrl.u32 %v420_v59, %v436_v1  ;;  %v8819_v41 = vadd.s32 4294967294, %v535_v5 }
  0xa0   : > { %v606_v51 = vsel %vm602_vm15, %v586_v61, %v589_v47  ;;  %v608_v36 = vsel %vm604_vm1, %v592_v11, %v607_v35  ;;  %v10400_v49 = vor.u32 %v691_v45, %v690_v34  ;;  %v10402_v24 = vor.u32 %v694_v3, %v693_v8 }
  0xa1   : > { %v698_v50 = vor.u32 %v697_v56, %v696_v31  ;;  %v442_v58 = vshll.u32 %v441_v2, 23  ;;  %vm705_vm4 = vcmp.lt.s32.totalorder %v10369_v4, 1  ;;  %vm707_vm5 = vcmp.lt.s32.totalorder %v10369_v4, 3 }
  0xa2   : > { %v714_v22 = vsel %vm708_vm3, %v701_v21, 920167782  ;;  %v10410_v27 = vadd.f32 %v9727_v9, %v10172_v54  ;;  %v10414_v1 = vadd.f32 %v9727_v9, %v10174_v0  ;;  %v681_v47 = vor.u32 8388608, %v680_v7 }
  0xa3   : > { %v718_v56 = vsel %vm708_vm3, %v704_v16, 1326507024  ;;  %v10420_v2 = vadd.f32 %v9727_v9, %v10176_v40  ;;  %v439_v11 = vor.u32 %v438_v63, %v437_v32  ;;  %vm8820_vm6 = vcmp.lt.s32.totalorder %v8819_v41, 0 }
  0xa4   : > { %v609_v31 = vsel %vm603_vm2, %v606_v51, %v608_v36  ;;  %vm706_vm7 = vcmp.lt.s32.totalorder %v10369_v4, 2  ;;  %v713_v54 = vsel %vm705_vm4, %v10400_v49, %v10402_v24  ;;  %v715_v0 = vsel %vm707_vm5, %v698_v50, %v714_v22 }
  0xa5   : > { %v779_v16 = vand.u32 2139095040, %v10338_v37  ;;  %v443_v5 = vor.u32 4788187, %v442_v58  ;;  %v628_v40 = vadd.s32 1, %v10387_v62  ;;  %v717_v30 = vsel %vm705_vm4, %v10402_v24, %v698_v50 }
  0xa6   : > { %v719_v32 = vsel %vm707_vm5, %v701_v21, %v718_v56  ;;  %v10440_v13 = vadd.f32 %v9727_v9, %v10178_v28  ;;  %v538_v59 = vsel %vm8820_vm6, 0, %v8819_v41  ;;  %vm627_vm8 = vc.u32 %v10392_v33, %v10386_v18 }
  0xa7   : > { %v10444_v7 = vshll.u32 %v681_v47, 8  ;;  %v10448_v61 = vadd.f32 %v9727_v9, %v10182_v15  ;;  %v10452_v35 = vadd.f32 %v9727_v9, %v10184_v43  ;;  %v10456_v26 = vadd.f32 %v9727_v9, %v10186_v39 }
  0xa8   : > { %v716_v28 = vsel %vm706_vm7, %v713_v54, %v715_v0  ;;  %v10462_v41 = vmul.f32 %v9732_v14, %v10198_v57  ;;  %v625_v34 = vmul.u32 %v10352_v53, %v609_v31  ;;  %v720_v15 = vsel %vm706_vm7, %v717_v30, %v719_v32  ;;  %v16856_v31 = vld [vmem:[#allocation13_spill] sm:$0xff] }
  0xa9   : > { %v780_v8 = vshrl.u32 %v779_v16, 23  ;;  %v444_v45 = vand.u32 2147483647, %v443_v5  ;;  %v446_v43 = vcvt.s32.f32 %v439_v11  ;;  %v543_v3 = vsub.s32 4294967266, %v538_v59 }
  0xaa   : > { %16849 = vst [vmem:[#allocation32_spill] sm:$0xff] %v10462_v41  ;;  %v629_v21 = vsel %vm627_vm8, %v628_v40, %v10387_v62  ;;  %v10470_v39 = vadd.f32 %v9727_v9, %v10188_v29  ;;  %v10474_v19 = vadd.f32 %v9727_v9, %v10190_v17  ;;  %v523_v63 = vadd.s32 %v10075_v10, %v10083_v12 }
  0xab   : > { %v10477_v57 = vmul.u32.u64.low %v10444_v7, %v716_v28  ;;  %v10478_v53 = vmul.u32.u64.high %v10444_v7, %v716_v28, %v10477_v57  ;;  %v689_v51 = vshrl.u32 %v16807_v55, %v10342_v38  ;;  %v539_v29 = vsub.s32 32, %v538_v59  ;;  %v16860_v28 = vld [vmem:[#allocation15_spill] sm:$0xff] }
  0xac   : > { %v10486_v62 = vmul.u32.u64.low %v10444_v7, %v720_v15  ;;  %v10487_v36 = vmul.u32.u64.high %v10444_v7, %v720_v15, %v10486_v62  ;;  %v10489_v58 = vadd.s32 %v629_v21, %v625_v34  ;;  %v710_v9 = vsel %vm708_vm3, %v698_v50, 2102212464  ;;  %v16862_v34 = vld [vmem:[#allocation9_spill] sm:$0xff] }
  0xad   : > { %v8829_v17 = vadd.s32 4294967169, %v780_v8  ;;  %v10495_v22 = vmul.f32 %v9732_v14, %v10202_v23  ;;  %v447_v47 = vmul.f32 %v446_v43, %v444_v45  ;;  %v544_v10 = vadd.s32 127, %v543_v3  ;;  %v16865_v8 = vld [vmem:[#allocation17_spill] sm:$0xff]  ;;  %v16867_v43 = vld [vmem:[#allocation18_spill] sm:$0xff] }
  0xae   : > { %v882_v12 = vand.u32 2139095040, %v10462_v41  ;;  %v10500_v38 = vmul.f32 %v9732_v14, %v10206_v52  ;;  %v10504_v56 = vmul.f32 %v9732_v14, %v10210_v44  ;;  %v10508_v50 = vmul.f32 %v9732_v14, %v10214_v20 }
  0xaf   : > { %16850 = vst [vmem:[#allocation33_spill] sm:$0xff] %v10495_v22  ;;  %v10512_v23 = vmul.f32 %v9732_v14, %v10218_v48  ;;  %v10516_v11 = vmul.f32 %v9732_v14, %v10227_v42  ;;  %v10520_v52 = vmul.f32 %v9732_v14, %v16856_v31  ;;  %v709_v44 = vsel %vm705_vm4, %v689_v51, %v10400_v49  ;;  %v16858_v42 = vld [vmem:[#allocation14_spill] sm:$0xff]  ;;  %v16874_v31 = vld [vmem:[#allocation20_spill] sm:$0xff] }
  0xb0   : > { %16851 = vst [vmem:[#allocation34_spill] sm:$0xff] %v10500_v38  ;;  %16852 = vst [vmem:[#allocation35_spill] sm:$0xff] %v10504_v56  ;;  %v711_v20 = vsel %vm707_vm5, %v10402_v24, %v710_v9  ;;  %v540_v54 = vshll.u32 %v10295_v60, %v538_v59  ;;  %v541_v48 = vshrl.u32 %v523_v63, %v539_v29  ;;  %v631_v0 = vadd.s32 536870912, %v10489_v58  ;;  %v16863_v59 = vld [vmem:[#allocation16_spill] sm:$0xff] }
  0xb1   : > { %16853 = vst [vmem:[#allocation36_spill] sm:$0xff] %v10508_v50  ;;  %16854 = vst [vmem:[#allocation37_spill] sm:$0xff] %v10512_v23  ;;  %v786_v16 = vadd.s32 1, %v8829_v17  ;;  %v10532_v5 = vmul.f32 %v9732_v14, %v16858_v42  ;;  %v448_v40 = vxor.u32 2147483648, %v447_v47  ;;  %v545_v30 = vshll.u32 %v544_v10, 23  ;;  %v16872_v10 = vld [vmem:[#allocation19_spill] sm:$0xff] }
  0xb2   : > { %16855 = vst [vmem:[#allocation38_spill] sm:$0xff] %v10516_v11  ;;  %16857 = vst [vmem:[#allocation13_spill] sm:$0xff] %v10520_v52  ;;  %v883_v32 = vshrl.u32 %v882_v12, 23  ;;  %v10536_v49 = vmul.f32 %v9732_v14, %v16860_v28  ;;  %vm366_vm9 = vcmp.lt.s32.totalorder %v16862_v34, 0  ;;  %v712_v60 = vsel %vm706_vm7, %v709_v44, %v711_v20  ;;  %v16876_v20 = vld [vmem:[#allocation21_spill] sm:$0xff]  ;;  %v16884_v28 = vld [vmem:[#allocation23_spill] sm:$0xff] }
  0xb3   : > { %16859 = vst [vmem:[#allocation14_spill] sm:$0xff] %v10532_v5  ;;  %v731_v24 = vadd.s32 1, %v10478_v53  ;;  %v10544_v15 = vmul.f32 %v9732_v14, %v16863_v59  ;;  %v10548_v45 = vmul.f32 %v9732_v14, %v16865_v8  ;;  %v10552_v3 = vmul.f32 %v9732_v14, %v16867_v43 }
  0xb4   : > { %16861 = vst [vmem:[#allocation15_spill] sm:$0xff] %v10536_v49  ;;  %vm730_vm10 = vc.u32 %v10487_v36, %v10477_v57  ;;  %v16869_v4 = vand.u32 2147483647, %v16862_v34  ;;  %v542_v63 = vor.u32 %v541_v48, %v540_v54  ;;  %v10562_v51 = vshrl.u32 %v631_v0, 30  ;;  %v16878_v0 = vld [vmem:[#allocation24_spill] sm:$0xff] }
  0xb5   : > { %16864 = vst [vmem:[#allocation16_spill] sm:$0xff] %v10544_v15  ;;  %16866 = vst [vmem:[#allocation17_spill] sm:$0xff] %v10548_v45  ;;  %vm787_vm12 = vcmp.gt.s32.totalorder %v786_v16, 0  ;;  %v449_v62 = vsel %vm366_vm9, %v448_v40, %v447_v47  ;;  %v546_v29 = vor.u32 4788187, %v545_v30  ;;  %v728_v9 = vmul.u32 %v10444_v7, %v712_v60  ;;  %v16880_v7 = vld [vmem:[#allocation25_spill] sm:$0xff] }
  0xb6   : > { %16868 = vst [vmem:[#allocation18_spill] sm:$0xff] %v10552_v3  ;;  %vm10558_vm11 = vcmp.le.f32.partialorder %v16869_v4, 0.7853982  ;;  %v8833_v17 = vadd.s32 4294967169, %v883_v32  ;;  %v10569_v12 = vmul.f32 %v9732_v14, %v16872_v10  ;;  %v10573_v44 = vmul.f32 %v9732_v14, %v16874_v31  ;;  %v16888_v10 = vld [vmem:[#allocation27_spill] sm:$0xff] }
  0xb7   : > { %v10577_v54 = vmul.f32 %v9732_v14, %v16876_v20  ;;  %v732_v48 = vsel %vm730_vm10, %v731_v24, %v10478_v53  ;;  %v10582_v47 = vmul.f32 %v9732_v14, %v16878_v0  ;;  %v10586_v42 = vmul.f32 %v9732_v14, %v16880_v7  ;;  %v16890_v20 = vld [vmem:[#allocation28_spill] sm:$0xff] }
  0xb8   : > { %16873 = vst [vmem:[#allocation19_spill] sm:$0xff] %v10569_v12  ;;  %16875 = vst [vmem:[#allocation20_spill] sm:$0xff] %v10573_v44  ;;  %v10590_v40 = vmul.f32 %v9732_v14, %v10299_v6  ;;  %v788_v30 = vsel %vm787_vm12, %v786_v16, 0  ;;  %v10594_v32 = vmul.f32 %v9732_v14, %v10303_v46  ;;  %v450_v60 = vsub.s32 4, %v16884_v28  ;;  %v16886_v16 = vld [vmem:[#allocation26_spill] sm:$0xff] }
  0xb9   : > { %16877 = vst [vmem:[#allocation21_spill] sm:$0xff] %v10577_v54  ;;  %16879 = vst [vmem:[#allocation24_spill] sm:$0xff] %v10582_v47  ;;  %v452_v53 = vsel %vm10558_vm11, %v16862_v34, %v449_v62  ;;  %v633_v24 = vshll.u32 %v10562_v51, 30  ;;  %v547_v59 = vand.u32 2147483647, %v546_v29  ;;  %v549_v8 = vcvt.s32.f32 %v542_v63  ;;  %v16892_v63 = vld [vmem:[#allocation29_spill] sm:$0xff] }
  0xba   : > { %16881 = vst [vmem:[#allocation25_spill] sm:$0xff] %v10586_v42  ;;  %16882 = vst [vmem:[#allocation39_spill] sm:$0xff] %v10590_v40  ;;  %v10601_v43 = vadd.s32 %v732_v48, %v728_v9  ;;  %v889_v4 = vadd.s32 1, %v8833_v17  ;;  %v10605_v6 = vmul.f32 %v9732_v14, %v10307_v25  ;;  %v10609_v46 = vmul.f32 %v9732_v14, %v16886_v16  ;;  %v16894_v17 = vld [vmem:[#allocation30_spill] sm:$0xff] }
  0xbb   : > { %16883 = vst [vmem:[#allocation40_spill] sm:$0xff] %v10594_v32  ;;  %v10613_v31 = vmul.f32 %v9732_v14, %v16888_v10  ;;  %v790_v62 = vand.u32 31, %v788_v30  ;;  %v10617_v29 = vmul.f32 %v9732_v14, %v16890_v20  ;;  %v10621_v9 = vmul.f32 %v9732_v14, %v16892_v63  ;;  %v9517_v63 = vld [vmem:[#allocation2] ss:$0 sm:$0xff] }
  0xbc   : > { %16885 = vst [vmem:[#allocation23_spill] sm:$0xff] %v10605_v6  ;;  %16887 = vst [vmem:[#allocation26_spill] sm:$0xff] %v10609_v46  ;;  %v10625_v25 = vmul.f32 %v9732_v14, %v16894_v17  ;;  %v10629_v48 = vmul.f32 %v9732_v14, %v10410_v27  ;;  %v10633_v0 = vmul.f32 %v9732_v14, %v10414_v1  ;;  %9357 = vcosq.f32 %v452_v53  ;;  %v16910_v17 = vld [vmem:[#allocation12_spill] sm:$0xff] }
  0xbd   : > { %16889 = vst [vmem:[#allocation27_spill] sm:$0xff] %v10613_v31  ;;  %16891 = vst [vmem:[#allocation28_spill] sm:$0xff] %v10617_v29  ;;  %v10637_v7 = vmul.f32 %v9732_v14, %v10420_v2  ;;  %v10640_v16 = vsub.s32 %v10489_v58, %v633_v24  ;;  %v451_v10 = vsel %vm366_vm9, %v450_v60, %v16884_v28  ;;  %v734_v27 = vadd.s32 536870912, %v10601_v43 }
  0xbe   : > { %16893 = vst [vmem:[#allocation29_spill] sm:$0xff] %v10621_v9  ;;  %16895 = vst [vmem:[#allocation30_spill] sm:$0xff] %v10625_v25  ;;  %v550_v20 = vmul.f32 %v549_v8, %v547_v59  ;;  %vm890_vm13 = vcmp.gt.s32.totalorder %v889_v4, 0  ;;  %v10648_v1 = vmul.f32 %v9732_v14, %v10440_v13  ;;  %v10652_v2 = vmul.f32 %v9732_v14, %v10448_v61  ;;  %v16905_v59 = vld [vmem:[#allocation10_spill] sm:$0xff] }
  0xbf   : > { %16896 = vst [vmem:[#allocation41_spill] sm:$0xff] %v10629_v48  ;;  %16897 = vst [vmem:[#allocation42_spill] sm:$0xff] %v10633_v0  ;;  %v10656_v58 = vmul.f32 %v9732_v14, %v10452_v35  ;;  %v10658_v24 = vsub.s32 32, %v790_v62  ;;  %v10661_v28 = vmul.f32 %v9517_v63, %v10456_v26  ;;  %v10664_v60 = vmul.f32 %v9517_v63, %v10470_v39 }
  0xc0   : > { %16898 = vst [vmem:[#allocation43_spill] sm:$0xff] %v10637_v7  ;;  %16899 = vst [vmem:[#allocation44_spill] sm:$0xff] %v10648_v1  ;;  %v10667_v13 = vmul.f32 %v9517_v63, %v10474_v19  ;;  %vm469_vm14 = vcmp.lt.s32.totalorder %v16905_v59, 0  ;;  %v10672_v61 = vsel %vm10558_vm11, 0, %v451_v10  ;;  %v16907_v14 = vand.u32 2147483647, %v16905_v59 }
  0xc1   : > { %16900 = vst [vmem:[#allocation45_spill] sm:$0xff] %v10652_v2  ;;  %16901 = vst [vmem:[#allocation46_spill] sm:$0xff] %v10656_v58  ;;  %v636_v26 = vsub.s32 0, %v10640_v16  ;;  %v891_v8 = vsel %vm890_vm13, %v889_v4, 0  ;;  %v551_v39 = vxor.u32 2147483648, %v550_v20  ;;  %v10682_v19 = vshrl.u32 %v734_v27, 30 }
  0xc2   : > { %16902 = vst [vmem:[#allocation47_spill] sm:$0xff] %v10661_v28  ;;  %16903 = vst [vmem:[#allocation48_spill] sm:$0xff] %v10664_v60  ;;  %vm10676_vm15 = vcmp.le.f32.partialorder %v16907_v14, 0.7853982  ;;  %v553_v60 = vsub.s32 4, %v16910_v17  ;;  %v793_v21 = vshll.u32 %v16807_v55, %v790_v62  ;;  %v893_v0 = vand.u32 31, %v891_v8 }
  0xc3   : > { %16904 = vst [vmem:[#allocation49_spill] sm:$0xff] %v10667_v13  ;;  %16906 = vst [vmem:[#allocation50_spill] sm:$0xff] %v10672_v61  ;;  %v10685_v13 = vshrl.u32 %v788_v30, 5  ;;  %v16911_v10 = vmov 2102212464   ;;  %9359 = vsinq.f32 %v452_v53  ;;  %v8822_v30 = vmin.u32 %v636_v26, %v10640_v16 }
  0xc4   : > { %v802_v28 = vshll.u32 %v16911_v10, %v790_v62  ;;  %v16912_v14 = vmov 920167782   ;;  %v16913_v2 = vmov 2475754826   ;;  %v16914_v7 = vmov 2131351028  }
  0xc5   : > { %v803_v58 = vshrl.u32 %v16912_v14, %v10658_v24  ;;  %v794_v1 = vshrl.u32 %v16913_v2, %v10658_v24  ;;  %v796_v4 = vshll.u32 %v16913_v2, %v790_v62  ;;  %v797_v27 = vshrl.u32 %v16914_v7, %v10658_v24 }
  0xc6   : > { %v805_v63 = vshll.u32 %v16912_v14, %v790_v62  ;;  %v16915_v48 = vmov 1326507024   ;;  %v552_v9 = vsel %vm469_vm14, %v551_v39, %v550_v20  ;;  %v16916_v29 = vand.u32 2147483647, %v10338_v37  ;;  %v10707_v32 = vpop.eup %9357 }
  0xc7   : > { %v806_v25 = vshrl.u32 %v16915_v48, %v10658_v24  ;;  %v799_v46 = vshll.u32 %v16914_v7, %v790_v62  ;;  %v800_v6 = vshrl.u32 %v16911_v10, %v10658_v24  ;;  %16917 = vst [vmem:[#allocation12_spill] sm:$0xff] %v10707_v32  ;;  %v10710_v53 = vand.u32 3, %v10672_v61 }
  0xc8   : > { %v783_v31 = vand.u32 8388607, %v16916_v29  ;;  %v10715_v26 = vsel %vm469_vm14, %v553_v60, %v16910_v17  ;;  %v736_v20 = vshll.u32 %v10682_v19, 30  ;;  %v804_v39 = vor.u32 %v803_v58, %v802_v28 }
  0xc9   : > { %v10718_v40 = vor.u32 %v794_v1, %v793_v21  ;;  %v10720_v29 = vor.u32 %v797_v27, %v796_v4  ;;  %vm811_vm0 = vcmp.lt.s32.totalorder %v10685_v13, 4  ;;  %v10723_v62 = vsub.s32 32, %v893_v0 }
  0xca   : > { %v10728_v61 = vsel %vm10676_vm15, %v16905_v59, %v552_v9  ;;  %v638_v42 = vclz %v8822_v30  ;;  %v807_v47 = vor.u32 %v806_v25, %v805_v63  ;;  %vm808_vm1 = vcmp.lt.s32.totalorder %v10685_v13, 1 }
  0xcb   : > { %v784_v58 = vor.u32 8388608, %v783_v31  ;;  %v801_v1 = vor.u32 %v800_v6, %v799_v46  ;;  %v985_v28 = vand.u32 2139095040, %v10495_v22  ;;  %v10734_v17 = vsub.s32 %v10601_v43, %v736_v20 }
  0xcc   : > { %vm810_vm2 = vcmp.lt.s32.totalorder %v10685_v13, 3  ;;  %v817_v21 = vsel %vm811_vm0, %v804_v39, 920167782  ;;  %vm809_vm3 = vcmp.lt.s32.totalorder %v10685_v13, 2  ;;  %v816_v31 = vsel %vm808_vm1, %v10718_v40, %v10720_v29 }
  0xcd   : > { %v905_v6 = vshll.u32 %v16911_v10, %v893_v0  ;;  %v906_v43 = vshrl.u32 %v16912_v14, %v10723_v62  ;;  %v821_v46 = vsel %vm811_vm0, %v807_v47, 1326507024  ;;  %v10750_v25 = vshrl.u32 %v891_v8, 5  ;;  %v10759_v9 = vpop.eup %9359 }
  0xce   : > { %v908_v63 = vshll.u32 %v16912_v14, %v893_v0  ;;  %v909_v4 = vshrl.u32 %v16915_v48, %v10723_v62  ;;  %v818_v27 = vsel %vm810_vm2, %v801_v1, %v817_v21  ;;  %v896_v30 = vshll.u32 %v16807_v55, %v893_v0  ;;  %16918 = vst [vmem:[#allocation51_spill] sm:$0xff] %v10759_v9 }
  0xcf   : > { %v899_v20 = vshll.u32 %v16913_v2, %v893_v0  ;;  %v986_v60 = vshrl.u32 %v985_v28, 23  ;;  %v897_v47 = vshrl.u32 %v16913_v2, %v10723_v62  ;;  %v900_v8 = vshrl.u32 %v16914_v7, %v10723_v62 }
  0xd0   : > { %v902_v54 = vshll.u32 %v16914_v7, %v893_v0  ;;  %v903_v44 = vshrl.u32 %v16911_v10, %v10723_v62  ;;  %vm462_vm4 = vcmp.eq.s32.totalorder %v10710_v53, 2  ;;  %v8823_v21 = vadd.s32 4294967294, %v638_v42 }
  0xd1   : > { %v820_v28 = vsel %vm808_vm1, %v10720_v29, %v801_v1  ;;  %v822_v12 = vsel %vm810_vm2, %v804_v39, %v821_v46  ;;  %v907_v3 = vor.u32 %v906_v43, %v905_v6  ;;  %vm459_vm5 = vcmp.eq.s32.totalorder %v10710_v53, 0 }
  0xd2   : > { %v10775_v45 = vshll.u32 %v784_v58, 8  ;;  %v16919_v0 = vand.u32 2147483647, %v10462_v41  ;;  %v910_v49 = vor.u32 %v909_v4, %v908_v63  ;;  %vm914_vm6 = vcmp.lt.s32.totalorder %v10750_v25, 4 }
  0xd3   : > { %v16445_v42 = vxor.u32 2147483648, %v10759_v9  ;;  %v739_v5 = vsub.s32 0, %v10734_v17  ;;  %v819_v52 = vsel %vm809_vm3, %v816_v31, %v818_v27  ;;  %v8837_v11 = vadd.s32 4294967169, %v986_v60 }
  0xd4   : > { %v886_v15 = vand.u32 8388607, %v16919_v0  ;;  %v823_v39 = vsel %vm809_vm3, %v820_v28, %v822_v12  ;;  %v10786_v6 = vor.u32 %v897_v47, %v896_v30  ;;  %v10788_v58 = vor.u32 %v900_v8, %v899_v20 }
  0xd5   : > { %v904_v43 = vor.u32 %v903_v44, %v902_v54  ;;  %v792_v46 = vshrl.u32 %v16807_v55, %v10658_v24  ;;  %vm911_vm7 = vcmp.lt.s32.totalorder %v10750_v25, 1  ;;  %vm913_vm8 = vcmp.lt.s32.totalorder %v10750_v25, 3 }
  0xd6   : > { %v920_v63 = vsel %vm914_vm6, %v907_v3, 920167782  ;;  %v10797_v60 = vmul.u32.u64.low %v10775_v45, %v819_v52  ;;  %v10798_v31 = vmul.u32.u64.high %v10775_v45, %v819_v52, %v10797_v60  ;;  %v887_v12 = vor.u32 8388608, %v886_v15 }
  0xd7   : > { %v924_v4 = vsel %vm914_vm6, %v910_v49, 1326507024  ;;  %vm458_vm9 = vcmp.lt.s32.totalorder %v10710_v53, 2  ;;  %v813_v44 = vsel %vm811_vm0, %v801_v1, 2102212464  ;;  %v992_v27 = vadd.s32 1, %v8837_v11 }
  0xd8   : > { %v10807_v54 = vmul.u32.u64.low %v10775_v45, %v823_v39  ;;  %v10808_v24 = vmul.u32.u64.high %v10775_v45, %v823_v39, %v10807_v54  ;;  %vm912_vm10 = vcmp.lt.s32.totalorder %v10750_v25, 2  ;;  %v919_v52 = vsel %vm911_vm7, %v10786_v6, %v10788_v58 }
  0xd9   : > { %v921_v49 = vsel %vm913_vm8, %v904_v43, %v920_v63  ;;  %v1088_v15 = vand.u32 2139095040, %v10500_v38  ;;  %vm8824_vm11 = vcmp.lt.s32.totalorder %v8823_v21, 0  ;;  %v8826_v1 = vmin.u32 %v739_v5, %v10734_v17 }
  0xda   : > { %v923_v30 = vsel %vm911_vm7, %v10788_v58, %v904_v43  ;;  %v925_v11 = vsel %vm913_vm8, %v907_v3, %v924_v4  ;;  %v626_v20 = vadd.s32 %v10386_v18, %v10392_v33  ;;  %v812_v47 = vsel %vm808_vm1, %v792_v46, %v10718_v40 }
  0xdb   : > { %v814_v8 = vsel %vm810_vm2, %v10720_v29, %v813_v44  ;;  %v10832_v28 = vshll.u32 %v887_v12, 8  ;;  %vm16470_vm12 = vweird.f32 %v16862_v34  ;;  %9361 = vcosq.f32 %v10728_v61 }
  0xdc   : > { %v656_v5 = vsub.s32 4, %v10562_v51  ;;  %v922_v3 = vsel %vm912_vm10, %v919_v52, %v921_v49  ;;  %vm993_vm13 = vcmp.gt.s32.totalorder %v992_v27, 0  ;;  %v16920_v33 = vxor.u32 2147483648, %v10707_v32 }
  0xdd   : > { %v641_v40 = vsel %vm8824_vm11, 0, %v8823_v21  ;;  %v926_v29 = vsel %vm912_vm10, %v923_v30, %v925_v11  ;;  %v1089_v0 = vshrl.u32 %v1088_v15, 23  ;;  %v461_v39 = vsel %vm459_vm5, %v10707_v32, %v16445_v42  ;;  %v16921_v11 = vld [vmem:[#allocation22_spill] sm:$0xff] }
  0xde   : > { %v464_v18 = vsel %vm462_vm4, %v16920_v33, %v10759_v9  ;;  %v642_v46 = vsub.s32 32, %v641_v40  ;;  %v741_v63 = vclz %v8826_v1  ;;  %v815_v12 = vsel %vm809_vm3, %v812_v47, %v814_v8 }
  0xdf   : > { %v834_v4 = vadd.s32 1, %v10798_v31  ;;  %v10856_v44 = vmul.u32.u64.low %v10832_v28, %v922_v3  ;;  %v10857_v21 = vmul.u32.u64.high %v10832_v28, %v922_v3, %v10856_v44  ;;  %v994_v54 = vsel %vm993_vm13, %v992_v27, 0 }
  0xe0   : > { %vm833_vm14 = vc.u32 %v10808_v24, %v10797_v60  ;;  %v895_v52 = vshrl.u32 %v16807_v55, %v10723_v62  ;;  %v10865_v49 = vmul.u32.u64.low %v10832_v28, %v926_v29  ;;  %v10866_v15 = vmul.u32.u64.high %v10832_v28, %v926_v29, %v10865_v49 }
  0xe1   : > { %9363 = vsinq.f32 %v10728_v61  ;;  %v646_v13 = vsub.s32 4294967266, %v641_v40  ;;  %v916_v1 = vsel %vm914_vm6, %v904_v43, 2102212464  ;;  %v8841_v30 = vadd.s32 4294967169, %v1089_v0 }
  0xe2   : > { %vm572_vm0 = vcmp.lt.s32.totalorder %v16921_v11, 0  ;;  %v8827_v27 = vadd.s32 4294967294, %v741_v63  ;;  %v831_v47 = vmul.u32 %v10775_v45, %v815_v12  ;;  %v996_v8 = vand.u32 31, %v994_v54 }
  0xe3   : > { %v465_v62 = vsel %vm458_vm9, %v461_v39, %v464_v18  ;;  %v10878_v3 = vsel %vm10676_vm15, 0, %v10715_v26  ;;  %v657_v61 = vsel %vm572_vm0, %v656_v5, %v10562_v51  ;;  %v835_v43 = vsel %vm833_vm14, %v834_v4, %v10798_v31 }
  0xe4   : > { %16922 = vst [vmem:[#allocation52_spill] sm:$0xff] %v10878_v3  ;;  %v643_v33 = vshll.u32 %v10640_v16, %v641_v40  ;;  %v644_v29 = vshrl.u32 %v626_v20, %v642_v46  ;;  %v915_v45 = vsel %vm911_vm7, %v895_v52, %v10786_v6  ;;  %v917_v53 = vsel %vm913_vm8, %v10788_v58, %v916_v1 }
  0xe5   : > { %v10892_v35 = vand.u32 3, %v10878_v3  ;;  %v16923_v26 = vand.u32 2147483647, %v16921_v11  ;;  %v647_v31 = vadd.s32 127, %v646_v13  ;;  %v1095_v16 = vadd.s32 1, %v8841_v30  ;;  %v10900_v20 = vpop.eup %9361 }
  0xe6   : > { %16926 = vst [vmem:[#allocation53_spill] sm:$0xff] %v10900_v20  ;;  %vm8828_vm1 = vcmp.lt.s32.totalorder %v8827_v27, 0  ;;  %v10906_v5 = vadd.s32 %v835_v43, %v831_v47  ;;  %v10908_v58 = vsub.s32 32, %v996_v8  ;;  %v10912_v18 = vsel %vm16470_vm12, nan, %v465_v62 }
  0xe7   : > { %vm10896_vm15 = vcmp.le.f32.partialorder %v16923_v26, 0.7853982  ;;  %16928 = vst [vmem:[#allocation55_spill] sm:$0xff] %v10912_v18  ;;  %v918_v0 = vsel %vm912_vm10, %v915_v45, %v917_v53  ;;  %v937_v39 = vadd.s32 1, %v10857_v21  ;;  %v10920_v46 = vor.u32 %v644_v29, %v643_v33 }
  0xe8   : > { %v10904_v6 = vsel %vm10896_vm15, 0, %v657_v61  ;;  %v729_v63 = vadd.s32 %v10477_v57, %v10487_v36  ;;  %vm936_vm2 = vc.u32 %v10866_v15, %v10856_v44  ;;  %v16446_v12 = vand.u32 2147483647, %v10495_v22 }
  0xe9   : > { %16927 = vst [vmem:[#allocation54_spill] sm:$0xff] %v10904_v6  ;;  %v10915_v40 = vand.u32 3, %v10904_v6  ;;  %v648_v52 = vshll.u32 %v647_v31, 23  ;;  %v10928_v49 = vsel %vm8828_vm1, 0, %v8827_v27  ;;  %vm1096_vm3 = vcmp.gt.s32.totalorder %v1095_v16, 0 }
  0xea   : > { %v837_v25 = vadd.s32 536870912, %v10906_v5  ;;  %v934_v13 = vmul.u32 %v10832_v28, %v918_v0  ;;  %v1008_v1 = vshll.u32 %v16911_v10, %v996_v8  ;;  %v1009_v57 = vshrl.u32 %v16912_v14, %v10908_v58 }
  0xeb   : > { %v10935_v36 = vpop.eup %9363  ;;  %v938_v30 = vsel %vm936_vm2, %v937_v39, %v10857_v21  ;;  %v10938_v47 = vshrl.u32 %v994_v54, 5  ;;  %v1011_v62 = vshll.u32 %v16912_v14, %v996_v8  ;;  %v1012_v27 = vshrl.u32 %v16915_v48, %v10908_v58 }
  0xec   : > { %16929 = vst [vmem:[#allocation56_spill] sm:$0xff] %v10935_v36  ;;  %v989_v61 = vand.u32 8388607, %v16446_v12  ;;  %v999_v28 = vshll.u32 %v16807_v55, %v996_v8  ;;  %v1002_v43 = vshll.u32 %v16913_v2, %v996_v8  ;;  %v1097_v33 = vsel %vm1096_vm3, %v1095_v16, 0 }
  0xed   : > { %v1000_v29 = vshrl.u32 %v16913_v2, %v10908_v58  ;;  %v1003_v21 = vshrl.u32 %v16914_v7, %v10908_v58  ;;  %v1005_v54 = vshll.u32 %v16914_v7, %v996_v8  ;;  %v1006_v45 = vshrl.u32 %v16911_v10, %v10908_v58 }
  0xee   : > { %v10955_v26 = vor.u32 4788187, %v648_v52  ;;  %v10957_v31 = vadd.s32 %v938_v30, %v934_v13  ;;  %v1010_v0 = vor.u32 %v1009_v57, %v1008_v1  ;;  %v1013_v39 = vor.u32 %v1012_v27, %v1011_v62 }
  0xef   : > { %vm1017_vm4 = vcmp.lt.s32.totalorder %v10938_v47, 4  ;;  %v1099_v42 = vand.u32 31, %v1097_v33  ;;  %v745_v12 = vsub.s32 32, %v10928_v49  ;;  %v749_v8 = vsub.s32 4294967266, %v10928_v49 }
  0xf0   : > { %v10963_v4 = vshrl.u32 %v837_v25, 30  ;;  %v16448_v18 = vand.u32 2147483647, %v10500_v38  ;;  %v990_v53 = vor.u32 8388608, %v989_v61  ;;  %v1001_v52 = vor.u32 %v1000_v29, %v999_v28 }
  0xf1   : > { %v1004_v34 = vor.u32 %v1003_v21, %v1002_v43  ;;  %v1007_v13 = vor.u32 %v1006_v45, %v1005_v54  ;;  %v940_v1 = vadd.s32 536870912, %v10957_v31  ;;  %vm1014_vm5 = vcmp.lt.s32.totalorder %v10938_v47, 1 }
  0xf2   : > { %16930 = vst [vmem:[#allocation57_spill] sm:$0xff] %v10963_v4  ;;  %vm1016_vm6 = vcmp.lt.s32.totalorder %v10938_v47, 3  ;;  %v1023_v57 = vsel %vm1017_vm4, %v1010_v0, 920167782  ;;  %v1027_v25 = vsel %vm1017_vm4, %v1013_v39, 1326507024  ;;  %v746_v61 = vshll.u32 %v10734_v17, %v10928_v49 }
  0xf3   : > { %v10974_v62 = vsub.s32 32, %v1099_v42  ;;  %v1191_v27 = vand.u32 2139095040, %v10504_v56  ;;  %v747_v28 = vshrl.u32 %v729_v63, %v745_v12  ;;  %v750_v43 = vadd.s32 127, %v749_v8 }
  0xf4   : > { %v839_v29 = vshll.u32 %v10963_v4, 30  ;;  %vm1015_vm7 = vcmp.lt.s32.totalorder %v10938_v47, 2  ;;  %v1022_v21 = vsel %vm1014_vm5, %v1001_v52, %v1004_v34  ;;  %v1024_v54 = vsel %vm1016_vm6, %v1007_v13, %v1023_v57 }
  0xf5   : > { %v1092_v45 = vand.u32 8388607, %v16448_v18  ;;  %v10987_v39 = vshrl.u32 %v940_v1, 30  ;;  %v1026_v17 = vsel %vm1014_vm5, %v1004_v34, %v1007_v13  ;;  %v1028_v63 = vsel %vm1016_vm6, %v1010_v0, %v1027_v25 }
  0xf6   : > { %v10993_v12 = vshll.u32 %v990_v53, 8  ;;  %v998_v49 = vshrl.u32 %v16807_v55, %v10908_v58  ;;  %v1111_v8 = vshll.u32 %v16911_v10, %v1099_v42  ;;  %v1112_v57 = vshrl.u32 %v16912_v14, %v10974_v62 }
  0xf7   : > { %16931 = vst [vmem:[#allocation58_spill] sm:$0xff] %v10987_v39  ;;  %v1192_v16 = vshrl.u32 %v1191_v27, 23  ;;  %v1025_v1 = vsel %vm1015_vm7, %v1022_v21, %v1024_v54  ;;  %v11002_v18 = vshrl.u32 %v1097_v33, 5  ;;  %v1114_v30 = vshll.u32 %v16912_v14, %v1099_v42 }
  0xf8   : > { %v1115_v53 = vshrl.u32 %v16915_v48, %v10974_v62  ;;  %vm565_vm8 = vcmp.eq.s32.totalorder %v10892_v35, 2  ;;  %v1029_v58 = vsel %vm1015_vm7, %v1026_v17, %v1028_v63  ;;  %v1102_v0 = vshll.u32 %v16807_v55, %v1099_v42 }
  0xf9   : > { %v1103_v25 = vshrl.u32 %v16913_v2, %v10974_v62  ;;  %v8845_v27 = vadd.s32 4294967169, %v1192_v16  ;;  %v1105_v21 = vshll.u32 %v16913_v2, %v1099_v42  ;;  %v1106_v33 = vshrl.u32 %v16914_v7, %v10974_v62 }
  0xfa   : > { %v1108_v54 = vshll.u32 %v16914_v7, %v1099_v42  ;;  %v1109_v32 = vshrl.u32 %v16911_v10, %v10974_v62  ;;  %v11020_v9 = vmul.u32.u64.low %v10993_v12, %v1025_v1  ;;  %v11021_v6 = vmul.u32.u64.high %v10993_v12, %v1025_v1, %v11020_v9 }
  0xfb   : > { %v1113_v17 = vor.u32 %v1112_v57, %v1111_v8  ;;  %v1198_v63 = vadd.s32 1, %v8845_v27  ;;  %v11025_v3 = vmul.u32.u64.low %v10993_v12, %v1029_v58  ;;  %v11026_v16 = vmul.u32.u64.high %v10993_v12, %v1029_v58, %v11025_v3 }
  0xfc   : > { %16932 = vst [vmem:[#allocation59_spill] sm:$0xff] %v11020_v9  ;;  %v1116_v38 = vor.u32 %v1115_v53, %v1114_v30  ;;  %vm1120_vm9 = vcmp.lt.s32.totalorder %v11002_v18, 4  ;;  %v751_v22 = vshll.u32 %v750_v43, 23  ;;  %v11030_v42 = vsub.s32 %v10906_v5, %v839_v29 }
  0xfd   : > { %16933 = vst [vmem:[#allocation60_spill] sm:$0xff] %v11026_v16  ;;  %v1019_v41 = vsel %vm1017_vm4, %v1007_v13, 2102212464  ;;  %vm1199_vm10 = vcmp.gt.s32.totalorder %v1198_v63, 0  ;;  %v942_v1 = vshll.u32 %v10987_v39, 30  ;;  %v11035_v4 = vor.u32 %v1103_v25, %v1102_v0 }
  0xfe   : > { %v11037_v8 = vor.u32 %v1106_v33, %v1105_v21  ;;  %v1110_v57 = vor.u32 %v1109_v32, %v1108_v54  ;;  %vm1117_vm11 = vcmp.lt.s32.totalorder %v11002_v18, 1  ;;  %vm1119_vm13 = vcmp.lt.s32.totalorder %v11002_v18, 3 }
  0xff   : > { %v1126_v3 = vsel %vm1120_vm9, %v1113_v17, 920167782  ;;  %v1200_v5 = vsel %vm1199_vm10, %v1198_v63, 0  ;;  %v1018_v30 = vsel %vm1014_vm5, %v998_v49, %v1001_v52  ;;  %v1020_v13 = vsel %vm1016_vm6, %v1004_v34, %v1019_v41 }
 0x100   : > { %v1093_v43 = vor.u32 8388608, %v1092_v45  ;;  %v1130_v29 = vsel %vm1120_vm9, %v1116_v38, 1326507024  ;;  %v748_v53 = vor.u32 %v747_v28, %v746_v61  ;;  %v752_v32 = vor.u32 4788187, %v751_v22 }
 0x101   : > { %v842_v58 = vsub.s32 0, %v11030_v42  ;;  %v1202_v0 = vand.u32 31, %v1200_v5  ;;  %v11051_v25 = vsub.s32 %v10957_v31, %v942_v1  ;;  %vm1118_vm14 = vcmp.lt.s32.totalorder %v11002_v18, 2 }
 0x102   : > { %v1125_v52 = vsel %vm1117_vm11, %v11035_v4, %v11037_v8  ;;  %v1127_v41 = vsel %vm1119_vm13, %v1110_v57, %v1126_v3  ;;  %v1021_v38 = vsel %vm1015_vm7, %v1018_v30, %v1020_v13  ;;  %v1040_v22 = vadd.s32 1, %v11021_v6 }
 0x103   : > { %v1129_v34 = vsel %vm1117_vm11, %v11037_v8, %v1110_v57  ;;  %v1131_v31 = vsel %vm1119_vm13, %v1113_v17, %v1130_v29  ;;  %v16934_v61 = vxor.u32 2147483648, %v10900_v20  ;;  %vm1039_vm1 = vc.u32 %v11026_v16, %v11020_v9 }
 0x104   : > { %v11077_v47 = vshll.u32 %v1093_v43, 8  ;;  %v11079_v45 = vsub.s32 32, %v1202_v0  ;;  %v16935_v49 = vand.u32 2147483647, %v10955_v26  ;;  %v16936_v27 = vcvt.s32.f32 %v10920_v46 }
 0x105   : > { %v11073_v28 = vsel %vm565_vm8, %v16934_v61, %v10935_v36  ;;  %v753_v33 = vand.u32 2147483647, %v752_v32  ;;  %v755_v54 = vcvt.s32.f32 %v748_v53  ;;  %v1128_v17 = vsel %vm1118_vm14, %v1125_v52, %v1127_v41 }
 0x106   : > { %v11085_v21 = vmul.f32 %v16936_v27, %v16935_v49  ;;  %v8830_v63 = vmin.u32 %v842_v58, %v11030_v42  ;;  %v945_v1 = vsub.s32 0, %v11051_v25  ;;  %v1037_v3 = vmul.u32 %v10993_v12, %v1021_v38 }
 0x107   : > { %v1132_v30 = vsel %vm1118_vm14, %v1129_v34, %v1131_v31  ;;  %v1041_v26 = vsel %vm1039_vm1, %v1040_v22, %v11021_v6  ;;  %v1101_v46 = vshrl.u32 %v16807_v55, %v10974_v62  ;;  %v1122_v13 = vsel %vm1120_vm9, %v1110_v57, 2102212464  ;;  %v16937_v34 = vld [vmem:[#allocation11_spill] sm:$0xff] }
 0x108   : > { %v11101_v29 = vmul.u32.u64.low %v11077_v47, %v1128_v17  ;;  %v11102_v53 = vmul.u32.u64.high %v11077_v47, %v1128_v17, %v11101_v29  ;;  %v1214_v12 = vshll.u32 %v16911_v10, %v1202_v0  ;;  %v1215_v32 = vshrl.u32 %v16912_v14, %v11079_v45 }
 0x109   : > { %v11109_v6 = vmul.u32.u64.low %v11077_v47, %v1132_v30  ;;  %v11110_v58 = vmul.u32.u64.high %v11077_v47, %v1132_v30, %v11109_v6  ;;  %v11112_v62 = vshrl.u32 %v1200_v5, 5  ;;  %v1294_v57 = vand.u32 2139095040, %v10508_v50 }
 0x10a   : > { %v1205_v52 = vshll.u32 %v16807_v55, %v1202_v0  ;;  %v1206_v41 = vshrl.u32 %v16913_v2, %v11079_v45  ;;  %v1208_v38 = vshll.u32 %v16913_v2, %v1202_v0  ;;  %v1211_v22 = vshll.u32 %v16914_v7, %v1202_v0 }
 0x10b   : > { %vm675_vm2 = vcmp.lt.s32.totalorder %v16937_v34, 0  ;;  %v1209_v31 = vshrl.u32 %v16914_v7, %v11079_v45  ;;  %v1212_v5 = vshrl.u32 %v16911_v10, %v11079_v45  ;;  %v1217_v61 = vshll.u32 %v16912_v14, %v1202_v0 }
 0x10c   : > { %v1218_v49 = vshrl.u32 %v16915_v48, %v11079_v45  ;;  %vm562_vm3 = vcmp.eq.s32.totalorder %v10892_v35, 0  ;;  %v654_v27 = vxor.u32 2147483648, %v11085_v21  ;;  %v759_v17 = vsub.s32 4, %v10682_v19 }
 0x10d   : > { %v11131_v30 = vadd.s32 %v1041_v26, %v1037_v3  ;;  %v1216_v6 = vor.u32 %v1215_v32, %v1214_v12  ;;  %v756_v43 = vmul.f32 %v755_v54, %v753_v33  ;;  %v844_v39 = vclz %v8830_v63 }
 0x10e   : > { %v16938_v9 = vand.u32 2147483647, %v10504_v56  ;;  %vm1223_vm4 = vcmp.lt.s32.totalorder %v11112_v62, 4  ;;  %v8834_v0 = vmin.u32 %v945_v1, %v11051_v25  ;;  %v1121_v59 = vsel %vm1117_vm11, %v1101_v46, %v11035_v4 }
 0x10f   : > { %v1123_v37 = vsel %vm1119_vm13, %v11037_v8, %v1122_v13  ;;  %v1295_v3 = vshrl.u32 %v1294_v57, 23  ;;  %v16939_v26 = vand.u32 2147483647, %v16937_v34  ;;  %v11151_v54 = vor.u32 %v1209_v31, %v1208_v38 }
 0x110   : > { %v1195_v16 = vand.u32 8388607, %v16938_v9  ;;  %v11149_v9 = vor.u32 %v1206_v41, %v1205_v52  ;;  %v1213_v63 = vor.u32 %v1212_v5, %v1211_v22  ;;  %v1219_v1 = vor.u32 %v1218_v49, %v1217_v61 }
 0x111   : > { %vm11145_vm5 = vcmp.le.f32.partialorder %v16939_v26, 0.7853982  ;;  %v1043_v12 = vadd.s32 536870912, %v11131_v30  ;;  %vm1220_vm6 = vcmp.lt.s32.totalorder %v11112_v62, 1  ;;  %vm1222_vm7 = vcmp.lt.s32.totalorder %v11112_v62, 3 }
 0x112   : > { %v1229_v4 = vsel %vm1223_vm4, %v1216_v6, 920167782  ;;  %v757_v8 = vxor.u32 2147483648, %v756_v43  ;;  %v8831_v46 = vadd.s32 4294967294, %v844_v39  ;;  %v1143_v13 = vadd.s32 1, %v11102_v53 }
 0x113   : > { %v1196_v32 = vor.u32 8388608, %v1195_v16  ;;  %vm561_vm8 = vcmp.lt.s32.totalorder %v10892_v35, 2  ;;  %v947_v57 = vclz %v8834_v0  ;;  %v1124_v52 = vsel %vm1118_vm14, %v1121_v59, %v1123_v37 }
 0x114   : > { %vm1142_vm9 = vc.u32 %v11110_v58, %v11101_v29  ;;  %v8849_v41 = vadd.s32 4294967169, %v1295_v3  ;;  %vm1221_vm10 = vcmp.lt.s32.totalorder %v11112_v62, 2  ;;  %v1228_v39 = vsel %vm1220_vm6, %v11149_v9, %v11151_v54 }
 0x115   : > { %v1230_v16 = vsel %vm1222_vm7, %v1213_v63, %v1229_v4  ;;  %v1233_v38 = vsel %vm1223_vm4, %v1219_v1, 1326507024  ;;  %v655_v37 = vsel %vm572_vm0, %v654_v27, %v11085_v21  ;;  %v760_v59 = vsel %vm675_vm2, %v759_v17, %v10682_v19 }
 0x116   : > { %v11179_v18 = vshrl.u32 %v1043_v12, 30  ;;  %v1301_v22 = vadd.s32 1, %v8849_v41  ;;  %vm8832_vm11 = vcmp.lt.s32.totalorder %v8831_v46, 0  ;;  %v1140_v31 = vmul.u32 %v11077_v47, %v1124_v52 }
 0x117   : > { %v1144_v5 = vsel %vm1142_vm9, %v1143_v13, %v11102_v53  ;;  %v11183_v61 = vshll.u32 %v1196_v32, 8  ;;  %v1231_v49 = vsel %vm1221_vm10, %v1228_v39, %v1230_v16  ;;  %v1232_v21 = vsel %vm1220_vm6, %v11151_v54, %v1213_v63 }
 0x118   : > { %v1234_v19 = vsel %vm1222_vm7, %v1216_v6, %v1233_v38  ;;  %vm1302_vm0 = vcmp.gt.s32.totalorder %v1301_v22, 0  ;;  %v16942_v27 = vxor.u32 2147483648, %v10935_v36  ;;  %v658_v53 = vsel %vm10896_vm15, %v16921_v11, %v655_v37 }
 0x119   : > { %v758_v17 = vsel %vm675_vm2, %v757_v8, %v756_v43  ;;  %v8835_v0 = vadd.s32 4294967294, %v947_v57  ;;  %v11204_v3 = vsel %vm11145_vm5, 0, %v760_v59  ;;  %v11206_v6 = vsel %vm8832_vm11, 0, %v8831_v46 }
 0x11a   : > { %v564_v47 = vsel %vm562_vm3, %v10900_v20, %v16942_v27  ;;  %16943 = vst [vmem:[#allocation61_spill] sm:$0xff] %v11204_v3  ;;  %v1045_v26 = vshll.u32 %v11179_v18, 30  ;;  %v1303_v1 = vsel %vm1302_vm0, %v1301_v22, 0  ;;  %v11209_v12 = vadd.s32 %v1144_v5, %v1140_v31 }
 0x11b   : > { %v1235_v4 = vsel %vm1221_vm10, %v1232_v21, %v1234_v19  ;;  %v11214_v51 = vmul.u32.u64.low %v11183_v61, %v1231_v49  ;;  %v11215_v13 = vmul.u32.u64.high %v11183_v61, %v1231_v49, %v11214_v51  ;;  %9365 = vcosq.f32 %v658_v53 }
 0x11c   : > { %v761_v43 = vsel %vm11145_vm5, %v16937_v34, %v758_v17  ;;  %v1204_v8 = vshrl.u32 %v16807_v55, %v11079_v45  ;;  %v1305_v46 = vand.u32 31, %v1303_v1  ;;  %9367 = vsinq.f32 %v658_v53 }
 0x11d   : > { %v852_v32 = vsub.s32 4294967266, %v11206_v6  ;;  %vm8836_vm15 = vcmp.lt.s32.totalorder %v8835_v0, 0  ;;  %v1225_v57 = vsel %vm1223_vm4, %v1213_v63, 2102212464  ;;  %v11227_v52 = vsub.s32 %v11131_v30, %v1045_v26 }
 0x11e   : > { %v11230_v41 = vmul.u32.u64.low %v11183_v61, %v1235_v4  ;;  %v11231_v39 = vmul.u32.u64.high %v11183_v61, %v1235_v4, %v11230_v41  ;;  %v11233_v33 = vsub.s32 32, %v1305_v46  ;;  %v11238_v45 = vsel %vm561_vm8, %v564_v47, %v11073_v28 }
 0x11f   : > { %9369 = vcosq.f32 %v761_v43  ;;  %v11241_v16 = vand.u32 3, %v11204_v3  ;;  %v1146_v63 = vadd.s32 536870912, %v11209_v12  ;;  %v832_v30 = vadd.s32 %v10797_v60, %v10808_v24 }
 0x120   : > { %9371 = vsinq.f32 %v761_v43  ;;  %v1224_v38 = vsel %vm1220_vm6, %v1204_v8, %v11149_v9  ;;  %v1226_v35 = vsel %vm1222_vm7, %v11151_v54, %v1225_v57  ;;  %v848_v28 = vsub.s32 32, %v11206_v6 }
 0x121   : > { %v849_v37 = vshll.u32 %v11030_v42, %v11206_v6  ;;  %v853_v59 = vadd.s32 127, %v852_v32  ;;  %v11256_v22 = vsel %vm8836_vm15, 0, %v8835_v0  ;;  %v1048_v31 = vsub.s32 0, %v11227_v52 }
 0x122   : > { %v16473_v60 = vand.u32 2147483647, %v10508_v50  ;;  %v1317_v24 = vshll.u32 %v16911_v10, %v1305_v46  ;;  %v1318_v9 = vshrl.u32 %v16912_v14, %v11233_v33  ;;  %v11263_v5 = vshrl.u32 %v1146_v63, 30 }
 0x123   : > { %v1227_v54 = vsel %vm1221_vm10, %v1224_v38, %v1226_v35  ;;  %v1246_v42 = vadd.s32 1, %v11215_v13  ;;  %v11268_v49 = vshrl.u32 %v1303_v1, 5  ;;  %v1308_v21 = vshll.u32 %v16807_v55, %v1305_v46 }
 0x124   : > { %v1311_v19 = vshll.u32 %v16913_v2, %v1305_v46  ;;  %v1320_v27 = vshll.u32 %v16912_v14, %v1305_v46  ;;  %v1321_v47 = vshrl.u32 %v16915_v48, %v11233_v33  ;;  %v1309_v53 = vshrl.u32 %v16913_v2, %v11233_v33 }
 0x125   : > { %v1312_v62 = vshrl.u32 %v16914_v7, %v11233_v33  ;;  %v1314_v17 = vshll.u32 %v16914_v7, %v1305_v46  ;;  %v1315_v0 = vshrl.u32 %v16911_v10, %v11233_v33  ;;  %v11282_v6 = vpop.eup %9365  ;;  %v850_v26 = vshrl.u32 %v832_v30, %v848_v28 }
 0x126   : > { %16944 = vst [vmem:[#allocation62_spill] sm:$0xff] %v11282_v6  ;;  %vm1245_vm13 = vc.u32 %v11231_v39, %v11214_v51  ;;  %v1319_v1 = vor.u32 %v1318_v9, %v1317_v24  ;;  %v1397_v4 = vand.u32 2139095040, %v10512_v23  ;;  %v11287_v43 = vpop.eup %9367  ;;  %v8838_v8 = vmin.u32 %v1048_v31, %v11227_v52 }
 0x127   : > { %16945 = vst [vmem:[#allocation63_spill] sm:$0xff] %v11287_v43  ;;  %v1148_v32 = vshll.u32 %v11263_v5, 30  ;;  %v1298_v46 = vand.u32 8388607, %v16473_v60  ;;  %v1322_v57 = vor.u32 %v1321_v47, %v1320_v27  ;;  %v854_v41 = vshll.u32 %v853_v59, 23  ;;  %v16956_v60 = vld [vmem:[#allocation59_spill] sm:$0xff] }
 0x128   : > { %v955_v63 = vsub.s32 4294967266, %v11256_v22  ;;  %v1243_v30 = vmul.u32 %v11183_v61, %v1227_v54  ;;  %vm1326_vm14 = vcmp.lt.s32.totalorder %v11268_v49, 4  ;;  %v1247_v35 = vsel %vm1245_vm13, %v1246_v42, %v11215_v13 }
 0x129   : > { %v11296_v38 = vpop.eup %9369  ;;  %v11299_v28 = vor.u32 %v1309_v53, %v1308_v21  ;;  %v11301_v31 = vor.u32 %v1312_v62, %v1311_v19  ;;  %v1316_v24 = vor.u32 %v1315_v0, %v1314_v17  ;;  %vm1323_vm1 = vcmp.lt.s32.totalorder %v11268_v49, 1 }
 0x12a   : > { %16946 = vst [vmem:[#allocation64_spill] sm:$0xff] %v11296_v38  ;;  %v11303_v9 = vpop.eup %9371  ;;  %vm1325_vm2 = vcmp.lt.s32.totalorder %v11268_v49, 3  ;;  %v1332_v61 = vsel %vm1326_vm14, %v1319_v1, 920167782  ;;  %v1398_v59 = vshrl.u32 %v1397_v4, 23  ;;  %v1050_v54 = vclz %v8838_v8 }
 0x12b   : > { %16947 = vst [vmem:[#allocation65_spill] sm:$0xff] %v11303_v9  ;;  %v11310_v27 = vsub.s32 %v11209_v12, %v1148_v32  ;;  %v1299_v13 = vor.u32 8388608, %v1298_v46  ;;  %v1336_v42 = vsel %vm1326_vm14, %v1322_v57, 1326507024  ;;  %vm665_vm3 = vcmp.eq.s32.totalorder %v10915_v40, 0  ;;  %v16948_v46 = vld [vmem:[#allocation31_spill] sm:$0xff] }
 0x12c   : > { %vm668_vm4 = vcmp.eq.s32.totalorder %v10915_v40, 2  ;;  %v851_v21 = vor.u32 %v850_v26, %v849_v37  ;;  %v855_v19 = vor.u32 4788187, %v854_v41  ;;  %v935_v47 = vadd.s32 %v10856_v44, %v10866_v15 }
 0x12d   : > { %v11318_v53 = vadd.s32 %v1247_v35, %v1243_v30  ;;  %v951_v62 = vsub.s32 32, %v11256_v22  ;;  %vm1324_vm5 = vcmp.lt.s32.totalorder %v11268_v49, 2  ;;  %v1331_v12 = vsel %vm1323_vm1, %v11299_v28, %v11301_v31 }
 0x12e   : > { %v1333_v17 = vsel %vm1325_vm2, %v1316_v24, %v1332_v61  ;;  %v956_v0 = vadd.s32 127, %v955_v63  ;;  %v1335_v37 = vsel %vm1323_vm1, %v11301_v31, %v1316_v24  ;;  %v1337_v44 = vsel %vm1325_vm2, %v1319_v1, %v1336_v42  ;;  %v16949_v61 = vld [vmem:[#allocation10_spill] sm:$0xff] }
 0x12f   : > { %v8853_v15 = vadd.s32 4294967169, %v1398_v59  ;;  %vm768_vm6 = vcmp.eq.s32.totalorder %v11241_v16, 0  ;;  %v8839_v26 = vadd.s32 4294967294, %v1050_v54  ;;  %v1151_v4 = vsub.s32 0, %v11310_v27 }
 0x130   : > { %v11335_v8 = vshll.u32 %v1299_v13, 8  ;;  %v16471_v32 = vxor.u32 2147483648, %v11282_v6  ;;  %vm771_vm7 = vcmp.eq.s32.totalorder %v11241_v16, 2  ;;  %vm778_vm8 = vcmp.lt.s32.totalorder %v16948_v46, 0 }
 0x131   : > { %v1249_v57 = vadd.s32 536870912, %v11318_v53  ;;  %v1334_v41 = vsel %vm1324_vm5, %v1331_v12, %v1333_v17  ;;  %v16472_v1 = vxor.u32 2147483648, %v11287_v43  ;;  %v856_v63 = vand.u32 2147483647, %v855_v19 }
 0x132   : > { %v858_v30 = vcvt.s32.f32 %v851_v21  ;;  %v1338_v35 = vsel %vm1324_vm5, %v1335_v37, %v1337_v44  ;;  %vm16503_vm9 = vweird.f32 %v16949_v61  ;;  %vm664_vm10 = vcmp.lt.s32.totalorder %v10915_v40, 2 }
 0x133   : > { %v952_v59 = vshll.u32 %v11051_v25, %v11256_v22  ;;  %v953_v54 = vshrl.u32 %v935_v47, %v951_v62  ;;  %v957_v13 = vshll.u32 %v956_v0, 23  ;;  %v1404_v42 = vadd.s32 1, %v8853_v15  ;;  %v16953_v15 = vld [vmem:[#allocation57_spill] sm:$0xff] }
 0x134   : > { %vm8840_vm11 = vcmp.lt.s32.totalorder %v8839_v26, 0  ;;  %v8842_v12 = vmin.u32 %v1151_v4, %v11310_v27  ;;  %v11352_v17 = vmul.u32.u64.low %v11335_v8, %v1334_v41  ;;  %v11353_v19 = vmul.u32.u64.high %v11335_v8, %v1334_v41, %v11352_v17 }
 0x135   : > { %v16950_v21 = vand.u32 2147483647, %v16948_v46  ;;  %v11362_v44 = vshrl.u32 %v1249_v57, 30  ;;  %v1307_v25 = vshrl.u32 %v16807_v55, %v11233_v33  ;;  %v16480_v62 = vxor.u32 2147483648, %v11303_v9 }
 0x136   : > { %v11367_v22 = vmul.u32.u64.low %v11335_v8, %v1338_v35  ;;  %v11368_v47 = vmul.u32.u64.high %v11335_v8, %v1338_v35, %v11367_v22  ;;  %v16485_v0 = vxor.u32 2147483648, %v11296_v38  ;;  %v862_v4 = vsub.s32 4, %v16953_v15 }
 0x137   : > { %vm11358_vm0 = vcmp.le.f32.partialorder %v16950_v21, 0.7853982  ;;  %v1328_v41 = vsel %vm1326_vm14, %v1316_v24, 2102212464  ;;  %vm16502_vm15 = vweird.f32 %v16921_v11  ;;  %v859_v57 = vmul.f32 %v858_v30, %v856_v63  ;;  %v16954_v63 = vld [vmem:[#allocation32_spill] sm:$0xff] }
 0x138   : > { %v954_v21 = vor.u32 %v953_v54, %v952_v59  ;;  %v958_v33 = vor.u32 4788187, %v957_v13  ;;  %vm1405_vm12 = vcmp.gt.s32.totalorder %v1404_v42, 0  ;;  %v667_v35 = vsel %vm665_vm3, %v11282_v6, %v16472_v1 }
 0x139   : > { %v670_v24 = vsel %vm668_vm4, %v16471_v32, %v11287_v43  ;;  %vm767_vm14 = vcmp.lt.s32.totalorder %v11241_v16, 2  ;;  %v1053_v22 = vsel %vm8840_vm11, 0, %v8839_v26  ;;  %vm881_vm13 = vcmp.lt.s32.totalorder %v16954_v63, 0 }
 0x13a   : > { %v1153_v30 = vclz %v8842_v12  ;;  %v1251_v59 = vshll.u32 %v11362_v44, 30  ;;  %v1327_v54 = vsel %vm1323_vm1, %v1307_v25, %v11299_v28  ;;  %v1329_v13 = vsel %vm1325_vm2, %v11301_v31, %v1328_v41  ;;  %v16955_v41 = vld [vmem:[#allocation60_spill] sm:$0xff] }
 0x13b   : > { %v770_v32 = vsel %vm768_vm6, %v11296_v38, %v16480_v62  ;;  %v773_v26 = vsel %vm771_vm7, %v16485_v0, %v11303_v9  ;;  %v863_v28 = vsel %vm778_vm8, %v862_v4, %v16953_v15  ;;  %v1406_v12 = vsel %vm1405_vm12, %v1404_v42, 0  ;;  %v16959_v4 = vld [vmem:[#allocation58_spill] sm:$0xff] }
 0x13c   : > { %v860_v25 = vxor.u32 2147483648, %v859_v57  ;;  %v959_v1 = vand.u32 2147483647, %v958_v33  ;;  %v961_v31 = vcvt.s32.f32 %v954_v21  ;;  %v1038_v6 = vadd.s32 %v16956_v60, %v16955_v41 }
 0x13d   : > { %v1054_v43 = vsub.s32 32, %v1053_v22  ;;  %v1058_v20 = vsub.s32 4294967266, %v1053_v22  ;;  %v1330_v62 = vsel %vm1324_vm5, %v1327_v54, %v1329_v13  ;;  %v1349_v38 = vadd.s32 1, %v11353_v19 }
 0x13e   : > { %v8843_v36 = vadd.s32 4294967294, %v1153_v30  ;;  %v11416_v0 = vsub.s32 %v11318_v53, %v1251_v59  ;;  %vm1348_vm12 = vc.u32 %v11368_v47, %v11352_v17  ;;  %v1408_v42 = vand.u32 31, %v1406_v12 }
 0x13f   : > { %v11423_v15 = vsel %vm16503_vm9, nan, %v11238_v45  ;;  %v671_v60 = vsel %vm664_vm10, %v667_v35, %v670_v24  ;;  %v11429_v49 = vsel %vm11358_vm0, 0, %v863_v28  ;;  %v965_v21 = vsub.s32 4, %v16959_v4 }
 0x140   : > { %16957 = vst [vmem:[#allocation57_spill] sm:$0xff] %v11423_v15  ;;  %16958 = vst [vmem:[#allocation60_spill] sm:$0xff] %v11429_v49  ;;  %v774_v53 = vsel %vm767_vm14, %v770_v32, %v773_v26  ;;  %v861_v33 = vsel %vm778_vm8, %v860_v25, %v859_v57  ;;  %v11436_v30 = vmul.f32 %v961_v31, %v959_v1  ;;  %v1059_v35 = vadd.s32 127, %v1058_v20 }
 0x141   : > { %v1346_v45 = vmul.u32 %v11335_v8, %v1330_v62  ;;  %v1055_v59 = vshll.u32 %v11227_v52, %v1053_v22  ;;  %v1056_v40 = vshrl.u32 %v1038_v6, %v1054_v43  ;;  %v1350_v24 = vsel %vm1348_vm12, %v1349_v38, %v11353_v19  ;;  %v16963_v22 = vld [vmem:[#allocation38_spill] sm:$0xff] }
 0x142   : > { %vm8844_vm1 = vcmp.lt.s32.totalorder %v8843_v36, 0  ;;  %v1254_v54 = vsub.s32 0, %v11416_v0  ;;  %v16486_v13 = vand.u32 2147483647, %v10512_v23  ;;  %v11443_v16 = vsub.s32 32, %v1408_v42 }
 0x143   : > { %v11447_v32 = vsel %vm16502_vm15, nan, %v671_v60  ;;  %vm16961_vm2 = vweird.f32 %v16937_v34  ;;  %v11454_v52 = vand.u32 3, %v11429_v49  ;;  %v11459_v20 = vsel %vm881_vm13, %v965_v21, %v16959_v4 }
 0x144   : > { %16960 = vst [vmem:[#allocation59_spill] sm:$0xff] %v11447_v32  ;;  %v11451_v8 = vsel %vm16961_vm2, nan, %v774_v53  ;;  %v11464_v6 = vsel %vm11358_vm0, %v16948_v46, %v861_v33  ;;  %v1141_v38 = vadd.s32 %v11101_v29, %v11110_v58  ;;  %v11469_v1 = vadd.s32 %v1350_v24, %v1346_v45 }
 0x145   : > { %16962 = vst [vmem:[#allocation58_spill] sm:$0xff] %v11451_v8  ;;  %v11471_v19 = vor.u32 %v1056_v40, %v1055_v59  ;;  %v1060_v62 = vshll.u32 %v1059_v35, 23  ;;  %v11473_v57 = vsel %vm8844_vm1, 0, %v8843_v36  ;;  %v1500_v26 = vand.u32 2139095040, %v16963_v22  ;;  %v16965_v35 = vld [vmem:[#allocation13_spill] sm:$0xff] }
 0x146   : > { %v8846_v28 = vmin.u32 %v1254_v54, %v11416_v0  ;;  %v1401_v37 = vand.u32 8388607, %v16486_v13  ;;  %v1420_v25 = vshll.u32 %v16911_v10, %v1408_v42  ;;  %v1421_v31 = vshrl.u32 %v16912_v14, %v11443_v16 }
 0x147   : > { %v11482_v29 = vshrl.u32 %v1406_v12, 5  ;;  %v1411_v58 = vshll.u32 %v16807_v55, %v1408_v42  ;;  %v1412_v36 = vshrl.u32 %v16913_v2, %v11443_v16  ;;  %v1501_v41 = vshrl.u32 %v1500_v26, 23 }
 0x148   : > { %v1352_v60 = vadd.s32 536870912, %v11469_v1  ;;  %v1414_v4 = vshll.u32 %v16913_v2, %v1408_v42  ;;  %v1423_v21 = vshll.u32 %v16912_v14, %v1408_v42  ;;  %v1424_v53 = vshrl.u32 %v16915_v48, %v11443_v16 }
 0x149   : > { %v1415_v33 = vshrl.u32 %v16914_v7, %v11443_v16  ;;  %v1417_v12 = vshll.u32 %v16914_v7, %v1408_v42  ;;  %v1418_v45 = vshrl.u32 %v16911_v10, %v11443_v16  ;;  %v8857_v59 = vadd.s32 4294967169, %v1501_v41 }
 0x14a   : > { %v11497_v40 = vor.u32 4788187, %v1060_v62  ;;  %v1157_v24 = vsub.s32 32, %v11473_v57  ;;  %v1422_v54 = vor.u32 %v1421_v31, %v1420_v25  ;;  %v1161_v26 = vsub.s32 4294967266, %v11473_v57 }
 0x14b   : > { %v1402_v13 = vor.u32 8388608, %v1401_v37  ;;  %vm1429_vm3 = vcmp.lt.s32.totalorder %v11482_v29, 4  ;;  %v1507_v43 = vadd.s32 1, %v8857_v59  ;;  %v1256_v8 = vclz %v8846_v28 }
 0x14c   : > { %v11503_v32 = vshrl.u32 %v1352_v60, 30  ;;  %v11505_v42 = vor.u32 %v1412_v36, %v1411_v58  ;;  %v1425_v15 = vor.u32 %v1424_v53, %v1423_v21  ;;  %v11507_v41 = vor.u32 %v1415_v33, %v1414_v4 }
 0x14d   : > { %v1419_v62 = vor.u32 %v1418_v45, %v1417_v12  ;;  %vm1508_vm4 = vcmp.gt.s32.totalorder %v1507_v43, 0  ;;  %v1603_v34 = vand.u32 2139095040, %v16965_v35  ;;  %vm1426_vm5 = vcmp.lt.s32.totalorder %v11482_v29, 1 }
 0x14e   : > { %16964 = vst [vmem:[#allocation66_spill] sm:$0xff] %v11503_v32  ;;  %vm1428_vm6 = vcmp.lt.s32.totalorder %v11482_v29, 3  ;;  %v1435_v37 = vsel %vm1429_vm3, %v1422_v54, 920167782  ;;  %v1509_v25 = vsel %vm1508_vm4, %v1507_v43, 0  ;;  %v11517_v58 = vshrl.u32 %v1141_v38, %v1157_v24 }
 0x14f   : > { %v16489_v36 = vand.u32 2147483647, %v16963_v22  ;;  %v11520_v60 = vadd.s32 127, %v1161_v26  ;;  %v1439_v4 = vsel %vm1429_vm3, %v1425_v15, 1326507024  ;;  %v11524_v21 = vshll.u32 %v1402_v13, 8 }
 0x150   : > { %v1511_v53 = vand.u32 31, %v1509_v25  ;;  %vm1427_vm7 = vcmp.lt.s32.totalorder %v11482_v29, 2  ;;  %v1434_v43 = vsel %vm1426_vm5, %v11505_v42, %v11507_v41  ;;  %v1436_v38 = vsel %vm1428_vm6, %v1419_v62, %v1435_v37 }
 0x151   : > { %v1604_v33 = vshrl.u32 %v1603_v34, 23  ;;  %v8847_v12 = vadd.s32 4294967294, %v1256_v8  ;;  %v1354_v45 = vshll.u32 %v11503_v32, 30  ;;  %v1438_v15 = vsel %vm1426_vm5, %v11507_v41, %v1419_v62 }
 0x152   : > { %v1512_v13 = vsub.s32 32, %v1511_v53  ;;  %v1440_v59 = vsel %vm1428_vm6, %v1422_v54, %v1439_v4  ;;  %v1504_v24 = vand.u32 8388607, %v16489_v36  ;;  %v1514_v26 = vshll.u32 %v16807_v55, %v1511_v53 }
 0x153   : > { %v1517_v28 = vshll.u32 %v16913_v2, %v1511_v53  ;;  %v1437_v34 = vsel %vm1427_vm7, %v1434_v43, %v1436_v38  ;;  %v11545_v8 = vshrl.u32 %v1509_v25, 5  ;;  %v1520_v31 = vshll.u32 %v16914_v7, %v1511_v53 }
 0x154   : > { %v1515_v37 = vshrl.u32 %v16913_v2, %v1512_v13  ;;  %v1518_v11 = vshrl.u32 %v16914_v7, %v1512_v13  ;;  %v1521_v54 = vshrl.u32 %v16911_v10, %v1512_v13  ;;  %v1523_v4 = vshll.u32 %v16911_v10, %v1511_v53 }
 0x155   : > { %v8861_v36 = vadd.s32 4294967169, %v1604_v33  ;;  %v11553_v61 = vsub.s32 %v11469_v1, %v1354_v45  ;;  %v1410_v9 = vshrl.u32 %v16807_v55, %v11443_v16  ;;  %v1441_v25 = vsel %vm1427_vm7, %v1438_v15, %v1440_v59 }
 0x156   : > { %v1524_v43 = vshrl.u32 %v16912_v14, %v1512_v13  ;;  %v1505_v38 = vor.u32 8388608, %v1504_v24  ;;  %v1516_v49 = vor.u32 %v1515_v37, %v1514_v26  ;;  %v1519_v3 = vor.u32 %v1518_v11, %v1517_v28 }
 0x157   : > { %v1526_v22 = vshll.u32 %v16912_v14, %v1511_v53  ;;  %v11562_v23 = vmul.u32.u64.low %v11524_v21, %v1437_v34  ;;  %v11563_v32 = vmul.u32.u64.high %v11524_v21, %v1437_v34, %v11562_v23  ;;  %v1522_v1 = vor.u32 %v1521_v54, %v1520_v31 }
 0x158   : > { %vm1529_vm8 = vcmp.lt.s32.totalorder %v11545_v8, 1  ;;  %v1431_v16 = vsel %vm1429_vm3, %v1419_v62, 2102212464  ;;  %v1525_v33 = vor.u32 %v1524_v43, %v1523_v4  ;;  %v1527_v45 = vshrl.u32 %v16915_v48, %v1512_v13 }
 0x159   : > { %v1610_v15 = vadd.s32 1, %v8861_v36  ;;  %v11571_v59 = vmul.u32.u64.low %v11524_v21, %v1441_v25  ;;  %v11572_v11 = vmul.u32.u64.high %v11524_v21, %v1441_v25, %v11571_v59  ;;  %vm1531_vm10 = vcmp.lt.s32.totalorder %v11545_v8, 3 }
 0x15a   : > { %vm1532_vm11 = vcmp.lt.s32.totalorder %v11545_v8, 4  ;;  %v16966_v28 = vand.u32 2147483647, %v16954_v63  ;;  %v1528_v53 = vor.u32 %v1527_v45, %v1526_v22  ;;  %vm1530_vm14 = vcmp.lt.s32.totalorder %v11545_v8, 2 }
 0x15b   : > { %v1537_v62 = vsel %vm1529_vm8, %v1516_v49, %v1519_v3  ;;  %v11585_v36 = vshll.u32 %v1505_v38, 8  ;;  %v1163_v24 = vshll.u32 %v11520_v60, 23  ;;  %v1357_v26 = vsub.s32 0, %v11553_v61 }
 0x15c   : > { %vm11578_vm0 = vcmp.le.f32.partialorder %v16966_v28, 0.7853982  ;;  %v1538_v34 = vsel %vm1532_vm11, %v1525_v33, 920167782  ;;  %v1541_v37 = vsel %vm1529_vm8, %v1519_v3, %v1522_v1  ;;  %vm8848_vm12 = vcmp.lt.s32.totalorder %v8847_v12, 0 }
 0x15d   : > { %v1539_v22 = vsel %vm1531_vm10, %v1522_v1, %v1538_v34  ;;  %v1542_v54 = vsel %vm1532_vm11, %v1528_v53, 1326507024  ;;  %vm1611_vm1 = vcmp.gt.s32.totalorder %v1610_v15, 0  ;;  %v1430_v60 = vsel %vm1426_vm5, %v1410_v9, %v11505_v42 }
 0x15e   : > { %v1432_v4 = vsel %vm1428_vm6, %v11507_v41, %v1431_v16  ;;  %v1540_v25 = vsel %vm1530_vm14, %v1537_v62, %v1539_v22  ;;  %v1543_v43 = vsel %vm1531_vm10, %v1525_v33, %v1542_v54  ;;  %v1513_v38 = vshrl.u32 %v16807_v55, %v1512_v13 }
 0x15f   : > { %v1544_v45 = vsel %vm1530_vm14, %v1541_v37, %v1543_v43  ;;  %v11611_v59 = vmul.u32.u64.low %v11585_v36, %v1540_v25  ;;  %v11612_v28 = vmul.u32.u64.high %v11585_v36, %v1540_v25, %v11611_v59  ;;  %v11615_v9 = vsel %vm8848_vm12, 0, %v8847_v12 }
 0x160   : > { %v8850_v42 = vmin.u32 %v1357_v26, %v11553_v61  ;;  %v1534_v41 = vsel %vm1532_vm11, %v1522_v1, 2102212464  ;;  %v1612_v16 = vsel %vm1611_vm1, %v1610_v15, 0  ;;  %v1433_v33 = vsel %vm1427_vm7, %v1430_v60, %v1432_v4  ;;  %v16974_v60 = vld [vmem:[#allocation33_spill] sm:$0xff] }
 0x161   : > { %v1452_v13 = vadd.s32 1, %v11563_v32  ;;  %v11624_v53 = vmul.u32.u64.low %v11585_v36, %v1544_v45  ;;  %v11625_v62 = vmul.u32.u64.high %v11585_v36, %v1544_v45, %v11624_v53  ;;  %9373 = vcosq.f32 %v11464_v6 }
 0x162   : > { %v16969_v12 = vshll.u32 %v11310_v27, %v11473_v57  ;;  %vm1451_vm2 = vc.u32 %v11572_v11, %v11562_v23  ;;  %v1614_v1 = vand.u32 31, %v1612_v16  ;;  %v1164_v15 = vor.u32 4788187, %v1163_v24 }
 0x163   : > { %v1264_v29 = vsub.s32 4294967266, %v11615_v9  ;;  %v1533_v34 = vsel %vm1529_vm8, %v1513_v38, %v1516_v49  ;;  %v1535_v37 = vsel %vm1531_vm10, %v1519_v3, %v1534_v41  ;;  %9375 = vsinq.f32 %v11464_v6 }
 0x164   : > { %v1160_v26 = vor.u32 %v11517_v58, %v16969_v12  ;;  %v11643_v27 = vsel %vm11578_vm0, 0, %v11459_v20  ;;  %v1359_v57 = vclz %v8850_v42  ;;  %v1449_v58 = vmul.u32 %v11524_v21, %v1433_v33 }
 0x165   : > { %16970 = vst [vmem:[#allocation67_spill] sm:$0xff] %v11643_v27  ;;  %v16971_v24 = vxor.u32 2147483648, %v11436_v30  ;;  %v16972_v49 = vand.u32 2147483647, %v11497_v40  ;;  %v16973_v3 = vcvt.s32.f32 %v11471_v19  ;;  %v1244_v6 = vadd.s32 %v11214_v51, %v11231_v39 }
 0x166   : > { %v1453_v20 = vsel %vm1451_vm2, %v1452_v13, %v11563_v32  ;;  %vm984_vm3 = vcmp.lt.s32.totalorder %v16974_v60, 0  ;;  %v1167_v4 = vcvt.s32.f32 %v1160_v26  ;;  %v1536_v21 = vsel %vm1530_vm14, %v1533_v34, %v1535_v37 }
 0x167   : > { %v964_v22 = vsel %vm881_vm13, %v16971_v24, %v11436_v30  ;;  %v1065_v54 = vmul.f32 %v16973_v3, %v16972_v49  ;;  %v1555_v25 = vadd.s32 1, %v11612_v28  ;;  %v11662_v43 = vsub.s32 32, %v1614_v1 }
 0x168   : > { %v1165_v30 = vand.u32 2147483647, %v1164_v15  ;;  %v1260_v40 = vsub.s32 32, %v11615_v9  ;;  %v1265_v19 = vadd.s32 127, %v1264_v29  ;;  %vm1554_vm13 = vc.u32 %v11625_v62, %v11611_v59 }
 0x169   : > { %v8851_v51 = vadd.s32 4294967294, %v1359_v57  ;;  %v11667_v39 = vadd.s32 %v1453_v20, %v1449_v58  ;;  %v16500_v32 = vand.u32 2147483647, %v16965_v35  ;;  %v1626_v38 = vshll.u32 %v16911_v10, %v1614_v1 }
 0x16a   : > { %v1552_v8 = vmul.u32 %v11585_v36, %v1536_v21  ;;  %v11672_v45 = vshrl.u32 %v1612_v16, 5  ;;  %v1617_v42 = vshll.u32 %v16807_v55, %v1614_v1  ;;  %v1620_v41 = vshll.u32 %v16913_v2, %v1614_v1  ;;  %v16978_v16 = vld [vmem:[#allocation34_spill] sm:$0xff] }
 0x16b   : > { %v16975_v33 = vand.u32 2147483647, %v16974_v60  ;;  %v1556_v53 = vsel %vm1554_vm13, %v1555_v25, %v11612_v28  ;;  %v1623_v12 = vshll.u32 %v16914_v7, %v1614_v1  ;;  %v1627_v26 = vshrl.u32 %v16912_v14, %v11662_v43  ;;  %v11696_v37 = vpop.eup %9373 }
 0x16c   : > { %v1629_v36 = vshll.u32 %v16912_v14, %v1614_v1  ;;  %vm1087_vm5 = vcmp.lt.s32.totalorder %v16978_v16, 0  ;;  %v1618_v15 = vshrl.u32 %v16913_v2, %v11662_v43  ;;  %v1621_v29 = vshrl.u32 %v16914_v7, %v11662_v43  ;;  %16979 = vst [vmem:[#allocation68_spill] sm:$0xff] %v11696_v37 }
 0x16d   : > { %vm11678_vm4 = vcmp.le.f32.partialorder %v16975_v33, 0.7853982  ;;  %v1624_v34 = vshrl.u32 %v16911_v10, %v11662_v43  ;;  %v1630_v28 = vshrl.u32 %v16915_v48, %v11662_v43  ;;  %v1066_v57 = vxor.u32 2147483648, %v1065_v54  ;;  %v11704_v20 = vpop.eup %9375 }
 0x16e   : > { %vm8852_vm6 = vcmp.lt.s32.totalorder %v8851_v51, 0  ;;  %v1455_v1 = vadd.s32 536870912, %v11667_v39  ;;  %v1628_v58 = vor.u32 %v1627_v26, %v1626_v38  ;;  %v1168_v24 = vmul.f32 %v1167_v4, %v1165_v30  ;;  %16980 = vst [vmem:[#allocation69_spill] sm:$0xff] %v11704_v20 }
 0x16f   : > { %v11699_v49 = vadd.s32 %v1556_v53, %v1552_v8  ;;  %v1607_v3 = vand.u32 8388607, %v16500_v32  ;;  %vm1635_vm7 = vcmp.lt.s32.totalorder %v11672_v45, 4  ;;  %v16981_v21 = vand.u32 2147483647, %v16978_v16 }
 0x170   : > { %v1261_v33 = vshll.u32 %v11416_v0, %v11615_v9  ;;  %v1262_v38 = vshrl.u32 %v1244_v6, %v1260_v40  ;;  %v1266_v4 = vshll.u32 %v1265_v19, 23  ;;  %v1631_v30 = vor.u32 %v1630_v28, %v1629_v36 }
 0x171   : > { %vm11708_vm8 = vcmp.le.f32.partialorder %v16981_v21, 0.7853982  ;;  %v11714_v8 = vsel %vm8852_vm6, 0, %v8851_v51  ;;  %v11716_v53 = vor.u32 %v1618_v15, %v1617_v42  ;;  %v11718_v26 = vor.u32 %v1621_v29, %v1620_v41 }
 0x172   : > { %v1625_v32 = vor.u32 %v1624_v34, %v1623_v12  ;;  %v11720_v35 = vshrl.u32 %v1455_v1, 30  ;;  %vm1632_vm10 = vcmp.lt.s32.totalorder %v11672_v45, 1  ;;  %vm1634_vm11 = vcmp.lt.s32.totalorder %v11672_v45, 3 }
 0x173   : > { %v1641_v21 = vsel %vm1635_vm7, %v1628_v58, 920167782  ;;  %v967_v0 = vsel %vm11578_vm0, %v16954_v63, %v964_v22  ;;  %v1067_v9 = vsel %vm984_vm3, %v1066_v57, %v1065_v54  ;;  %v1558_v6 = vadd.s32 536870912, %v11699_v49 }
 0x174   : > { %v1608_v40 = vor.u32 8388608, %v1607_v3  ;;  %v1169_v19 = vxor.u32 2147483648, %v1168_v24  ;;  %v1263_v51 = vor.u32 %v1262_v38, %v1261_v33  ;;  %v1267_v42 = vor.u32 4788187, %v1266_v4 }
 0x175   : > { %v1645_v41 = vsel %vm1635_vm7, %v1631_v30, 1326507024  ;;  %v1367_v12 = vsub.s32 4294967266, %v11714_v8  ;;  %vm1633_vm14 = vcmp.lt.s32.totalorder %v11672_v45, 2  ;;  %v1640_v31 = vsel %vm1632_vm10, %v11716_v53, %v11718_v26 }
 0x176   : > { %v1642_v22 = vsel %vm1634_vm11, %v1625_v32, %v1641_v21  ;;  %9377 = vcosq.f32 %v967_v0  ;;  %v1457_v54 = vshll.u32 %v11720_v35, 30  ;;  %v1644_v36 = vsel %vm1632_vm10, %v11718_v26, %v1625_v32 }
 0x177   : > { %v1646_v15 = vsel %vm1634_vm11, %v1628_v58, %v1645_v41  ;;  %9379 = vsinq.f32 %v967_v0  ;;  %v1070_v29 = vsel %vm11678_vm4, %v16974_v60, %v1067_v9  ;;  %v11751_v34 = vshrl.u32 %v1558_v6, 30  ;;  %v16984_v0 = vld [vmem:[#allocation14_spill] sm:$0xff] }
 0x178   : > { %v11753_v28 = vshll.u32 %v1608_v40, 8  ;;  %v1170_v57 = vsel %vm1087_vm5, %v1169_v19, %v1168_v24  ;;  %v1268_v1 = vand.u32 2147483647, %v1267_v42  ;;  %v1270_v3 = vcvt.s32.f32 %v1263_v51 }
 0x179   : > { %v1643_v33 = vsel %vm1633_vm14, %v1640_v31, %v1642_v22  ;;  %v1347_v58 = vadd.s32 %v11352_v17, %v11368_v47  ;;  %v1363_v38 = vsub.s32 32, %v11714_v8  ;;  %v1368_v4 = vadd.s32 127, %v1367_v12 }
 0x17a   : > { %v1647_v30 = vsel %vm1633_vm14, %v1644_v36, %v1646_v15  ;;  %vm874_vm0 = vcmp.eq.s32.totalorder %v11454_v52, 2  ;;  %v1068_v21 = vsub.s32 4, %v11179_v18  ;;  %9381 = vcosq.f32 %v1070_v29 }
 0x17b   : > { %v11767_v24 = vsub.s32 %v11667_v39, %v1457_v54  ;;  %v1706_v9 = vand.u32 2139095040, %v16984_v0  ;;  %vm871_vm12 = vcmp.eq.s32.totalorder %v11454_v52, 0  ;;  %v1173_v17 = vsel %vm11708_vm8, %v16978_v16, %v1170_v57 }
 0x17c   : > { %v1560_v47 = vshll.u32 %v11751_v34, 30  ;;  %v11776_v6 = vmul.u32.u64.low %v11753_v28, %v1643_v33  ;;  %v11777_v40 = vmul.u32.u64.high %v11753_v28, %v1643_v33, %v11776_v6  ;;  %v1271_v19 = vmul.f32 %v1270_v3, %v1268_v1 }
 0x17d   : > { %v1616_v39 = vshrl.u32 %v16807_v55, %v11662_v43  ;;  %v11783_v51 = vmul.u32.u64.low %v11753_v28, %v1647_v30  ;;  %v11784_v42 = vmul.u32.u64.high %v11753_v28, %v1647_v30, %v11783_v51  ;;  %v1364_v41 = vshll.u32 %v11553_v61, %v11714_v8 }
 0x17e   : > { %v1365_v12 = vshrl.u32 %v1347_v58, %v1363_v38  ;;  %v1369_v31 = vshll.u32 %v1368_v4, 23  ;;  %v1637_v22 = vsel %vm1635_vm7, %v1625_v32, 2102212464  ;;  %vm870_vm1 = vcmp.lt.s32.totalorder %v11454_v52, 2 }
 0x17f   : > { %v11792_v54 = vand.u32 3, %v11643_v27  ;;  %9383 = vsinq.f32 %v1070_v29  ;;  %v1460_v43 = vsub.s32 0, %v11767_v24  ;;  %v1707_v36 = vshrl.u32 %v1706_v9, 23 }
 0x180   : > { %v16506_v15 = vxor.u32 2147483648, %v11696_v37  ;;  %v1171_v57 = vsub.s32 4, %v11263_v5  ;;  %vm1190_vm2 = vcmp.lt.s32.totalorder %v10504_v56, 0  ;;  %v11799_v61 = vsub.s32 %v11699_v49, %v1560_v47  ;;  %v11801_v8 = vpop.eup %9377 }
 0x181   : > { %16985 = vst [vmem:[#allocation70_spill] sm:$0xff] %v11801_v8  ;;  %9385 = vcosq.f32 %v1173_v17  ;;  %v1272_v32 = vxor.u32 2147483648, %v1271_v19  ;;  %v1636_v29 = vsel %vm1632_vm10, %v1616_v39, %v11716_v53  ;;  %v1638_v1 = vsel %vm1634_vm11, %v11718_v26, %v1637_v22  ;;  %v11809_v3 = vpop.eup %9379 }
 0x182   : > { %16986 = vst [vmem:[#allocation71_spill] sm:$0xff] %v11809_v3  ;;  %v1069_v33 = vsel %vm984_vm3, %v1068_v21, %v11179_v18  ;;  %9387 = vsinq.f32 %v1173_v17  ;;  %v1366_v49 = vor.u32 %v1365_v12, %v1364_v41  ;;  %v1370_v58 = vor.u32 4788187, %v1369_v31 }
 0x183   : > { %v16507_v38 = vxor.u32 2147483648, %v11704_v20  ;;  %vm974_vm13 = vcmp.eq.s32.totalorder %v11792_v54, 0  ;;  %v8854_v4 = vmin.u32 %v1460_v43, %v11767_v24  ;;  %v8865_v53 = vadd.s32 4294967169, %v1707_v36 }
 0x184   : > { %v16987_v30 = vand.u32 2147483647, %v10504_v56  ;;  %v1563_v9 = vsub.s32 0, %v11799_v61  ;;  %v1639_v18 = vsel %vm1633_vm14, %v1636_v29, %v1638_v1  ;;  %v1658_v21 = vadd.s32 1, %v11777_v40  ;;  %v11827_v17 = vpop.eup %9381 }
 0x185   : > { %16990 = vst [vmem:[#allocation72_spill] sm:$0xff] %v11827_v17  ;;  %v11831_v47 = vsel %vm11678_vm4, 0, %v1069_v33  ;;  %v1172_v39 = vsel %vm1087_vm5, %v1171_v57, %v11263_v5  ;;  %v1273_v51 = vsel %vm1190_vm2, %v1272_v32, %v1271_v19  ;;  %vm1657_vm3 = vc.u32 %v11784_v42, %v11776_v6 }
 0x186   : > { %vm11819_vm6 = vcmp.le.f32.partialorder %v16987_v30, 0.7853982  ;;  %16991 = vst [vmem:[#allocation73_spill] sm:$0xff] %v11831_v47  ;;  %v876_v45 = vsel %vm874_vm0, %v16506_v15, %v11704_v20  ;;  %vm973_vm7 = vcmp.lt.s32.totalorder %v11792_v54, 2  ;;  %v1075_v13 = vand.u32 3, %v11831_v47 }
 0x187   : > { %v1371_v41 = vand.u32 2147483647, %v1370_v58  ;;  %v1373_v12 = vcvt.s32.f32 %v1366_v49  ;;  %v873_v5 = vsel %vm871_vm12, %v11696_v37, %v16507_v38  ;;  %v1462_v19 = vclz %v8854_v4 }
 0x188   : > { %v1655_v31 = vmul.u32 %v11753_v28, %v1639_v18  ;;  %v1713_v22 = vadd.s32 1, %v8865_v53  ;;  %v11855_v43 = vsel %vm11708_vm8, 0, %v1172_v39  ;;  %v11860_v36 = vsel %vm11819_vm6, %v10504_v56, %v1273_v51 }
 0x189   : > { %16992 = vst [vmem:[#allocation74_spill] sm:$0xff] %v11855_v43  ;;  %v8858_v57 = vmin.u32 %v1563_v9, %v11799_v61  ;;  %v1659_v32 = vsel %vm1657_vm3, %v1658_v21, %v11777_v40  ;;  %v11864_v29 = vpop.eup %9383  ;;  %vm868_vm4 = vweird.f32 %v16948_v46  ;;  %vm16553_vm5 = vweird.f32 %v16954_v63 }
 0x18a   : > { %16993 = vst [vmem:[#allocation75_spill] sm:$0xff] %v11864_v29  ;;  %v16505_v28 = vxor.u32 2147483648, %v11809_v3  ;;  %vm977_vm8 = vcmp.eq.s32.totalorder %v11792_v54, 2  ;;  %v16504_v25 = vxor.u32 2147483648, %v11801_v8  ;;  %v1178_v1 = vand.u32 3, %v11855_v43 }
 0x18b   : > { %v877_v33 = vsel %vm870_vm1, %v873_v5, %v876_v45  ;;  %vm1076_vm10 = vcmp.lt.s32.totalorder %v1075_v13, 2  ;;  %vm1077_vm11 = vcmp.eq.s32.totalorder %v1075_v13, 0  ;;  %v1374_v40 = vmul.f32 %v1373_v12, %v1371_v41  ;;  %v11874_v49 = vpop.eup %9385 }
 0x18c   : > { %16994 = vst [vmem:[#allocation76_spill] sm:$0xff] %v11874_v49  ;;  %vm16552_vm14 = vweird.f32 %v16974_v60  ;;  %9389 = vcosq.f32 %v11860_v36  ;;  %v8855_v58 = vadd.s32 4294967294, %v1462_v19  ;;  %v11878_v4 = vadd.s32 %v1659_v32, %v1655_v31  ;;  %v11880_v53 = vpop.eup %9387 }
 0x18d   : > { %vm1714_vm0 = vcmp.gt.s32.totalorder %v1713_v22, 0  ;;  %16995 = vst [vmem:[#allocation77_spill] sm:$0xff] %v11880_v53  ;;  %v16508_v30 = vxor.u32 2147483648, %v11864_v29  ;;  %vm1080_vm12 = vcmp.eq.s32.totalorder %v1075_v13, 2  ;;  %v16509_v52 = vxor.u32 2147483648, %v11827_v17 }
 0x18e   : > { %v1565_v9 = vclz %v8858_v57  ;;  %v976_v18 = vsel %vm974_vm13, %v11801_v8, %v16505_v28  ;;  %v979_v21 = vsel %vm977_vm8, %v16504_v25, %v11809_v3  ;;  %vm1180_vm1 = vcmp.eq.s32.totalorder %v1178_v1, 0  ;;  %v16996_v57 = vld [vmem:[#allocation66_spill] sm:$0xff] }
 0x18f   : > { %vm1293_vm3 = vcmp.lt.s32.totalorder %v10508_v50, 0  ;;  %vm1183_vm15 = vcmp.eq.s32.totalorder %v1178_v1, 2  ;;  %v1274_v39 = vsub.s32 4, %v11362_v44  ;;  %v1375_v51 = vxor.u32 2147483648, %v1374_v40 }
 0x190   : > { %v1715_v45 = vsel %vm1714_vm0, %v1713_v22, 0  ;;  %v16512_v41 = vxor.u32 2147483648, %v11880_v53  ;;  %vm8856_vm9 = vcmp.lt.s32.totalorder %v8855_v58, 0  ;;  %v1661_v5 = vadd.s32 536870912, %v11878_v4 }
 0x191   : > { %v1079_v19 = vsel %vm1077_vm11, %v11827_v17, %v16508_v30  ;;  %v1082_v31 = vsel %vm1080_vm12, %v16509_v52, %v11864_v29  ;;  %v1377_v32 = vsub.s32 4, %v16996_v57  ;;  %v8859_v22 = vadd.s32 4294967294, %v1565_v9  ;;  %v17000_v9 = vld [vmem:[#allocation15_spill] sm:$0xff] }
 0x192   : > { %v980_v25 = vsel %vm973_vm7, %v976_v18, %v979_v21  ;;  %vm1179_vm13 = vcmp.lt.s32.totalorder %v1178_v1, 2  ;;  %v16997_v28 = vand.u32 2147483647, %v10508_v50  ;;  %v1717_v38 = vand.u32 31, %v1715_v45 }
 0x193   : > { %v1275_v30 = vsel %vm1190_vm2, %v1274_v39, %v11362_v44  ;;  %v1376_v52 = vsel %vm1293_vm3, %v1375_v51, %v1374_v40  ;;  %v11921_v12 = vsel %vm8856_vm9, 0, %v8855_v58  ;;  %v1809_v54 = vand.u32 2139095040, %v17000_v9 }
 0x194   : > { %vm11912_vm8 = vcmp.le.f32.partialorder %v16997_v28, 0.7853982  ;;  %v1083_v18 = vsel %vm1076_vm10, %v1079_v19, %v1082_v31  ;;  %v1182_v28 = vsel %vm1180_vm1, %v11874_v49, %v16512_v41  ;;  %v17001_v21 = vxor.u32 2147483648, %v11874_v49 }
 0x195   : > { %v11933_v44 = vshrl.u32 %v1661_v5, 30  ;;  %v11937_v40 = vsel %vm868_vm4, nan, %v877_v33  ;;  %v11941_v13 = vsel %vm16553_vm5, nan, %v980_v25  ;;  %v1378_v58 = vsel %vm1293_vm3, %v1377_v32, %v16996_v57 }
 0x196   : > { %v1185_v17 = vsel %vm1183_vm15, %v17001_v21, %v11880_v53  ;;  %17002 = vst [vmem:[#allocation66_spill] sm:$0xff] %v11937_v40  ;;  %17003 = vst [vmem:[#allocation78_spill] sm:$0xff] %v11941_v13  ;;  %vm8860_vm9 = vcmp.lt.s32.totalorder %v8859_v22, 0  ;;  %v11946_v39 = vpop.eup %9389  ;;  %v11950_v51 = vsel %vm11819_vm6, 0, %v1275_v30  ;;  %v1379_v33 = vsel %vm11912_vm8, %v10508_v50, %v1376_v52 }
 0x197   : > { %17004 = vst [vmem:[#allocation79_spill] sm:$0xff] %v11946_v39  ;;  %17005 = vst [vmem:[#allocation80_spill] sm:$0xff] %v11950_v51  ;;  %v1470_v5 = vsub.s32 4294967266, %v11921_v12  ;;  %v11956_v19 = vsub.s32 32, %v1717_v38  ;;  %v11960_v25 = vsel %vm16552_vm14, nan, %v1083_v18  ;;  %v11963_v31 = vsel %vm1179_vm13, %v1182_v28, %v1185_v17 }
 0x198   : > { %17006 = vst [vmem:[#allocation81_spill] sm:$0xff] %v11960_v25  ;;  %v11966_v57 = vand.u32 3, %v11950_v51  ;;  %v1810_v26 = vshrl.u32 %v1809_v54, 23  ;;  %9391 = vsinq.f32 %v11860_v36  ;;  %v11971_v30 = vsel %vm11912_vm8, 0, %v1378_v58 }
 0x199   : > { %17007 = vst [vmem:[#allocation82_spill] sm:$0xff] %v11971_v30  ;;  %v11973_v52 = vsel %vm8860_vm9, 0, %v8859_v22  ;;  %v1663_v32 = vshll.u32 %v11933_v44, 30  ;;  %9393 = vcosq.f32 %v1379_v33  ;;  %v1450_v17 = vadd.s32 %v11562_v23, %v11572_v11 }
 0x19a   : > { %v1466_v1 = vsub.s32 32, %v11921_v12  ;;  %v1471_v28 = vadd.s32 127, %v1470_v5  ;;  %v1729_v36 = vshll.u32 %v16911_v10, %v1717_v38  ;;  %v1730_v15 = vshrl.u32 %v16912_v14, %v11956_v19 }
 0x19b   : > { %v1573_v22 = vsub.s32 4294967266, %v11973_v52  ;;  %v11985_v21 = vshrl.u32 %v1715_v45, 5  ;;  %v1720_v58 = vshll.u32 %v16807_v55, %v1717_v38  ;;  %v8869_v41 = vadd.s32 4294967169, %v1810_v26 }
 0x19c   : > { %v11989_v18 = vsub.s32 %v11878_v4, %v1663_v32  ;;  %v1723_v23 = vshll.u32 %v16913_v2, %v1717_v38  ;;  %v1732_v11 = vshll.u32 %v16912_v14, %v1717_v38  ;;  %v1733_v5 = vshrl.u32 %v16915_v48, %v11956_v19 }
 0x19d   : > { %v1721_v54 = vshrl.u32 %v16913_v2, %v11956_v19  ;;  %v1724_v45 = vshrl.u32 %v16914_v7, %v11956_v19  ;;  %v1726_v25 = vshll.u32 %v16914_v7, %v1717_v38  ;;  %v1727_v26 = vshrl.u32 %v16911_v10, %v11956_v19 }
 0x19e   : > { %vm16551_vm15 = vweird.f32 %v16978_v16  ;;  %v1467_v4 = vshll.u32 %v11767_v24, %v11921_v12  ;;  %v1468_v32 = vshrl.u32 %v1450_v17, %v1466_v1  ;;  %v1472_v13 = vshll.u32 %v1471_v28, 23 }
 0x19f   : > { %v1731_v40 = vor.u32 %v1730_v15, %v1729_v36  ;;  %vm1283_vm2 = vcmp.eq.s32.totalorder %v11966_v57, 0  ;;  %vm1286_vm6 = vcmp.eq.s32.totalorder %v11966_v57, 2  ;;  %v1553_v60 = vadd.s32 %v11611_v59, %v11625_v62  ;;  %v17010_v59 = vld [vmem:[#allocation37_spill] sm:$0xff] }
 0x1a0   : > { %v17008_v38 = vand.u32 2147483647, %v16984_v0  ;;  %vm1738_vm7 = vcmp.lt.s32.totalorder %v11985_v21, 4  ;;  %v1816_v46 = vadd.s32 1, %v8869_v41  ;;  %v1569_v49 = vsub.s32 32, %v11973_v52 }
 0x1a1   : > { %v1574_v53 = vadd.s32 127, %v1573_v22  ;;  %v1666_v24 = vsub.s32 0, %v11989_v18  ;;  %v1734_v12 = vor.u32 %v1733_v5, %v1732_v11  ;;  %9395 = vsinq.f32 %v1379_v33 }
 0x1a2   : > { %v1710_v63 = vand.u32 8388607, %v17008_v38  ;;  %v12014_v17 = vor.u32 %v1721_v54, %v1720_v58  ;;  %v12016_v1 = vor.u32 %v1724_v45, %v1723_v23  ;;  %v1728_v28 = vor.u32 %v1727_v26, %v1726_v25  ;;  %v12018_v36 = vpop.eup %9391 }
 0x1a3   : > { %17009 = vst [vmem:[#allocation83_spill] sm:$0xff] %v12018_v36  ;;  %vm1396_vm10 = vcmp.lt.s32.totalorder %v17010_v59, 0  ;;  %v1469_v62 = vor.u32 %v1468_v32, %v1467_v4  ;;  %vm1735_vm11 = vcmp.lt.s32.totalorder %v11985_v21, 1  ;;  %vm1737_vm0 = vcmp.lt.s32.totalorder %v11985_v21, 3  ;;  %v12025_v15 = vpop.eup %9393 }
 0x1a4   : > { %v1744_v41 = vsel %vm1738_vm7, %v1731_v40, 920167782  ;;  %17011 = vst [vmem:[#allocation84_spill] sm:$0xff] %v12025_v15  ;;  %v1473_v33 = vor.u32 4788187, %v1472_v13  ;;  %v1570_v54 = vshll.u32 %v11799_v61, %v11973_v52  ;;  %v1711_v22 = vor.u32 8388608, %v1710_v63 }
 0x1a5   : > { %vm1817_vm12 = vcmp.gt.s32.totalorder %v1816_v46, 0  ;;  %v1571_v25 = vshrl.u32 %v1553_v60, %v1569_v49  ;;  %v1575_v58 = vshll.u32 %v1574_v53, 23  ;;  %v8862_v23 = vmin.u32 %v1666_v24, %v11989_v18  ;;  %v17015_v13 = vld [vmem:[#allocation16_spill] sm:$0xff] }
 0x1a6   : > { %v1748_v11 = vsel %vm1738_vm7, %v1734_v12, 1326507024  ;;  %v17012_v45 = vand.u32 2147483647, %v17010_v59  ;;  %vm1736_vm3 = vcmp.lt.s32.totalorder %v11985_v21, 2  ;;  %v1743_v63 = vsel %vm1735_vm11, %v12014_v17, %v12016_v1 }
 0x1a7   : > { %v1745_v60 = vsel %vm1737_vm0, %v1728_v28, %v1744_v41  ;;  %v1476_v61 = vcvt.s32.f32 %v1469_v62  ;;  %v1480_v49 = vsub.s32 4, %v11720_v35  ;;  %v1818_v53 = vsel %vm1817_vm12, %v1816_v46, 0 }
 0x1a8   : > { %vm12035_vm1 = vcmp.le.f32.partialorder %v17012_v45, 0.7853982  ;;  %v1912_v52 = vand.u32 2139095040, %v17015_v13  ;;  %v1474_v4 = vand.u32 2147483647, %v1473_v33  ;;  %v1747_v32 = vsel %vm1735_vm11, %v12016_v1, %v1728_v28 }
 0x1a9   : > { %v1749_v38 = vsel %vm1737_vm0, %v1731_v40, %v1748_v11  ;;  %v12053_v24 = vshll.u32 %v1711_v22, 8  ;;  %v1572_v12 = vor.u32 %v1571_v25, %v1570_v54  ;;  %v1576_v45 = vor.u32 4788187, %v1575_v58 }
 0x1aa   : > { %v1668_v5 = vclz %v8862_v23  ;;  %v1746_v62 = vsel %vm1736_vm3, %v1743_v63, %v1745_v60  ;;  %v12060_v46 = vsel %vm16551_vm15, nan, %v11963_v31  ;;  %vm1282_vm13 = vcmp.lt.s32.totalorder %v11966_v57, 2 }
 0x1ab   : > { %17016 = vst [vmem:[#allocation85_spill] sm:$0xff] %v12060_v46  ;;  %v12064_v41 = vand.u32 3, %v11971_v30  ;;  %v1820_v33 = vand.u32 31, %v1818_v53  ;;  %v17017_v40 = vxor.u32 2147483648, %v12018_v36  ;;  %v17018_v22 = vxor.u32 2147483648, %v11946_v39  ;;  %v12078_v23 = vpop.eup %9395 }
 0x1ac   : > { %v1750_v31 = vsel %vm1736_vm3, %v1747_v32, %v1749_v38  ;;  %v1913_v58 = vshrl.u32 %v1912_v52, 23  ;;  %17019 = vst [vmem:[#allocation86_spill] sm:$0xff] %v12078_v23  ;;  %v1477_v11 = vmul.f32 %v1476_v61, %v1474_v4  ;;  %v1481_v63 = vsel %vm1396_vm10, %v1480_v49, %v11720_v35 }
 0x1ad   : > { %v1285_v54 = vsel %vm1283_vm2, %v11946_v39, %v17017_v40  ;;  %v1288_v25 = vsel %vm1286_vm6, %v17018_v22, %v12018_v36  ;;  %v12084_v60 = vmul.u32.u64.low %v12053_v24, %v1746_v62  ;;  %v12085_v40 = vmul.u32.u64.high %v12053_v24, %v1746_v62, %v12084_v60 }
 0x1ae   : > { %v1577_v46 = vand.u32 2147483647, %v1576_v45  ;;  %v1579_v16 = vcvt.s32.f32 %v1572_v12  ;;  %v8863_v39 = vadd.s32 4294967294, %v1668_v5  ;;  %v1719_v22 = vshrl.u32 %v16807_v55, %v11956_v19  ;;  %v17021_v45 = vld [vmem:[#allocation38_spill] sm:$0xff] }
 0x1af   : > { %v1740_v52 = vsel %vm1738_vm7, %v1728_v28, 2102212464  ;;  %v12093_v61 = vmul.u32.u64.low %v12053_v24, %v1750_v31  ;;  %v12094_v4 = vmul.u32.u64.high %v12053_v24, %v1750_v31, %v12093_v61  ;;  %v12096_v32 = vsub.s32 32, %v1820_v33 }
 0x1b0   : > { %vm1386_vm8 = vcmp.eq.s32.totalorder %v12064_v41, 0  ;;  %vm1389_vm9 = vcmp.eq.s32.totalorder %v12064_v41, 2  ;;  %v12102_v35 = vsel %vm12035_vm1, 0, %v1481_v63  ;;  %v8873_v5 = vadd.s32 4294967169, %v1913_v58 }
 0x1b1   : > { %17020 = vst [vmem:[#allocation87_spill] sm:$0xff] %v12102_v35  ;;  %v12106_v19 = vsel %vm1282_vm13, %v1285_v54, %v1288_v25  ;;  %vm1385_vm2 = vcmp.lt.s32.totalorder %v12064_v41, 2  ;;  %v12112_v38 = vand.u32 3, %v12102_v35  ;;  %v1478_v12 = vxor.u32 2147483648, %v1477_v11 }
 0x1b2   : > { %vm1499_vm6 = vcmp.lt.s32.totalorder %v17021_v45, 0  ;;  %v1739_v62 = vsel %vm1735_vm11, %v1719_v22, %v12014_v17  ;;  %v1741_v57 = vsel %vm1737_vm0, %v12016_v1, %v1740_v52  ;;  %v1580_v25 = vmul.f32 %v1579_v16, %v1577_v46 }
 0x1b3   : > { %vm8864_vm7 = vcmp.lt.s32.totalorder %v8863_v39, 0  ;;  %v1832_v31 = vshll.u32 %v16911_v10, %v1820_v33  ;;  %v1833_v58 = vshrl.u32 %v16912_v14, %v12096_v32  ;;  %v12125_v63 = vshrl.u32 %v1818_v53, 5 }
 0x1b4   : > { %v1835_v61 = vshll.u32 %v16912_v14, %v1820_v33  ;;  %v1836_v17 = vshrl.u32 %v16915_v48, %v12096_v32  ;;  %v1919_v22 = vadd.s32 1, %v8873_v5  ;;  %v17022_v49 = vand.u32 2147483647, %v17021_v45 }
 0x1b5   : > { %v1742_v16 = vsel %vm1736_vm3, %v1739_v62, %v1741_v57  ;;  %v1761_v46 = vadd.s32 1, %v12085_v40  ;;  %v1823_v53 = vshll.u32 %v16807_v55, %v1820_v33  ;;  %v1824_v52 = vshrl.u32 %v16913_v2, %v12096_v32 }
 0x1b6   : > { %vm12132_vm11 = vcmp.le.f32.partialorder %v17022_v49, 0.7853982  ;;  %v1826_v54 = vshll.u32 %v16913_v2, %v1820_v33  ;;  %v1827_v5 = vshrl.u32 %v16914_v7, %v12096_v32  ;;  %v1829_v49 = vshll.u32 %v16914_v7, %v1820_v33 }
 0x1b7   : > { %v1830_v28 = vshrl.u32 %v16911_v10, %v12096_v32  ;;  %v17025_v21 = vxor.u32 2147483648, %v12078_v23  ;;  %v17026_v57 = vxor.u32 2147483648, %v12025_v15  ;;  %vm1760_vm0 = vc.u32 %v12094_v4, %v12084_v60 }
 0x1b8   : > { %v1834_v36 = vor.u32 %v1833_v58, %v1832_v31  ;;  %v17027_v33 = vand.u32 2147483647, %v17000_v9  ;;  %v1837_v29 = vor.u32 %v1836_v17, %v1835_v61  ;;  %vm1841_vm12 = vcmp.lt.s32.totalorder %v12125_v63, 4 }
 0x1b9   : > { %v1388_v62 = vsel %vm1386_vm8, %v12025_v15, %v17025_v21  ;;  %v1391_v35 = vsel %vm1389_vm9, %v17026_v57, %v12078_v23  ;;  %vm1920_vm3 = vcmp.gt.s32.totalorder %v1919_v22, 0  ;;  %v1479_v21 = vsel %vm1396_vm10, %v1478_v12, %v1477_v11 }
 0x1ba   : > { %v1813_v30 = vand.u32 8388607, %v17027_v33  ;;  %v1581_v51 = vxor.u32 2147483648, %v1580_v25  ;;  %v12166_v15 = vsel %vm8864_vm7, 0, %v8863_v39  ;;  %v1758_v57 = vmul.u32 %v12053_v24, %v1742_v16 }
 0x1bb   : > { %v1762_v23 = vsel %vm1760_vm0, %v1761_v46, %v12085_v40  ;;  %v1825_v43 = vor.u32 %v1824_v52, %v1823_v53  ;;  %v1828_v31 = vor.u32 %v1827_v5, %v1826_v54  ;;  %v1831_v58 = vor.u32 %v1830_v28, %v1829_v49 }
 0x1bc   : > { %vm1838_vm13 = vcmp.lt.s32.totalorder %v12125_v63, 1  ;;  %vm1840_vm8 = vcmp.lt.s32.totalorder %v12125_v63, 3  ;;  %v1847_v61 = vsel %vm1841_vm12, %v1834_v36, 920167782  ;;  %v1921_v17 = vsel %vm1920_vm3, %v1919_v22, 0  ;;  %v17028_v22 = vld [vmem:[#allocation17_spill] sm:$0xff] }
 0x1bd   : > { %v12176_v11 = vsel %vm1385_vm2, %v1388_v62, %v1391_v35  ;;  %v1482_v39 = vsel %vm12035_vm1, %v17010_v59, %v1479_v21  ;;  %v1814_v24 = vor.u32 8388608, %v1813_v30  ;;  %v1851_v40 = vsel %vm1841_vm12, %v1837_v29, 1326507024 }
 0x1be   : > { %v1582_v28 = vsel %vm1499_vm6, %v1581_v51, %v1580_v25  ;;  %v1676_v12 = vsub.s32 4294967266, %v12166_v15  ;;  %v12186_v54 = vadd.s32 %v1762_v23, %v1758_v57  ;;  %v2015_v16 = vand.u32 2139095040, %v17028_v22 }
 0x1bf   : > { %vm1839_vm10 = vcmp.lt.s32.totalorder %v12125_v63, 2  ;;  %v1846_v41 = vsel %vm1838_vm13, %v1825_v43, %v1828_v31  ;;  %v1848_v30 = vsel %vm1840_vm8, %v1831_v58, %v1847_v61  ;;  %v1923_v26 = vand.u32 31, %v1921_v17 }
 0x1c0   : > { %9397 = vcosq.f32 %v1482_v39  ;;  %v1583_v29 = vsub.s32 4, %v11751_v34  ;;  %v1850_v51 = vsel %vm1838_vm13, %v1828_v31, %v1831_v58  ;;  %v1852_v23 = vsel %vm1840_vm8, %v1834_v36, %v1851_v40 }
 0x1c1   : > { %v12202_v35 = vsel %vm12132_vm11, %v17021_v45, %v1582_v28  ;;  %v1656_v25 = vadd.s32 %v11776_v6, %v11784_v42  ;;  %v1672_v46 = vsub.s32 32, %v12166_v15  ;;  %v12207_v53 = vshll.u32 %v1814_v24, 8 }
 0x1c2   : > { %9399 = vsinq.f32 %v1482_v39  ;;  %v1677_v52 = vadd.s32 127, %v1676_v12  ;;  %v1849_v5 = vsel %vm1839_vm10, %v1846_v41, %v1848_v30  ;;  %v2016_v49 = vshrl.u32 %v2015_v16, 23 }
 0x1c3   : > { %v1764_v36 = vadd.s32 536870912, %v12186_v54  ;;  %v1822_v62 = vshrl.u32 %v16807_v55, %v12096_v32  ;;  %v1853_v33 = vsel %vm1839_vm10, %v1850_v51, %v1852_v23  ;;  %v12216_v21 = vsub.s32 32, %v1923_v26 }
 0x1c4   : > { %v12221_v6 = vsel %vm1499_vm6, %v1583_v29, %v11751_v34  ;;  %9401 = vcosq.f32 %v12202_v35  ;;  %v1673_v42 = vshll.u32 %v11989_v18, %v12166_v15  ;;  %v16539_v57 = vand.u32 2147483647, %v17015_v13 }
 0x1c5   : > { %v1674_v61 = vshrl.u32 %v1656_v25, %v1672_v46  ;;  %v1843_v32 = vsel %vm1841_vm12, %v1831_v58, 2102212464  ;;  %v12230_v39 = vmul.u32.u64.low %v12207_v53, %v1849_v5  ;;  %v12231_v24 = vmul.u32.u64.high %v12207_v53, %v1849_v5, %v12230_v39 }
 0x1c6   : > { %v1678_v40 = vshll.u32 %v1677_v52, 23  ;;  %v12235_v34 = vmul.u32.u64.low %v12207_v53, %v1853_v33  ;;  %v12236_v28 = vmul.u32.u64.high %v12207_v53, %v1853_v33, %v12235_v34  ;;  %v8877_v12 = vadd.s32 4294967169, %v2016_v49 }
 0x1c7   : > { %17029 = vst [vmem:[#allocation88_spill] sm:$0xff] %v12230_v39  ;;  %v12238_v16 = vshrl.u32 %v1764_v36, 30  ;;  %v1842_v18 = vsel %vm1838_vm13, %v1822_v62, %v1825_v43  ;;  %v1935_v15 = vshll.u32 %v16911_v10, %v1923_v26  ;;  %v1936_v58 = vshrl.u32 %v16912_v14, %v12216_v21 }
 0x1c8   : > { %v1844_v41 = vsel %vm1840_vm8, %v1828_v31, %v1843_v32  ;;  %v12247_v30 = vshrl.u32 %v1921_v17, 5  ;;  %v1926_v29 = vshll.u32 %v16807_v55, %v1923_v26  ;;  %v2022_v51 = vadd.s32 1, %v8877_v12 }
 0x1c9   : > { %v1927_v23 = vshrl.u32 %v16913_v2, %v12216_v21  ;;  %v1929_v25 = vshll.u32 %v16913_v2, %v1923_v26  ;;  %v1938_v43 = vshll.u32 %v16912_v14, %v1923_v26  ;;  %v1939_v46 = vshrl.u32 %v16915_v48, %v12216_v21 }
 0x1ca   : > { %v12256_v52 = vpop.eup %9397  ;;  %v1930_v31 = vshrl.u32 %v16914_v7, %v12216_v21  ;;  %v1932_v17 = vshll.u32 %v16914_v7, %v1923_v26  ;;  %v1933_v5 = vshrl.u32 %v16911_v10, %v12216_v21  ;;  %vm2023_vm1 = vcmp.gt.s32.totalorder %v2022_v51, 0 }
 0x1cb   : > { %17030 = vst [vmem:[#allocation89_spill] sm:$0xff] %v12256_v52  ;;  %v12263_v49 = vor.u32 %v1674_v61, %v1673_v42  ;;  %v1916_v36 = vand.u32 8388607, %v16539_v57  ;;  %v1937_v62 = vor.u32 %v1936_v58, %v1935_v15  ;;  %v2024_v33 = vsel %vm2023_vm1, %v2022_v51, 0 }
 0x1cc   : > { %v12267_v32 = vpop.eup %9399  ;;  %v12269_v34 = vor.u32 4788187, %v1678_v40  ;;  %v1766_v12 = vshll.u32 %v12238_v16, 30  ;;  %v1845_v26 = vsel %vm1839_vm10, %v1842_v18, %v1844_v41  ;;  %vm1944_vm9 = vcmp.lt.s32.totalorder %v12247_v30, 4 }
 0x1cd   : > { %17031 = vst [vmem:[#allocation90_spill] sm:$0xff] %v12267_v32  ;;  %v1864_v8 = vadd.s32 1, %v12231_v24  ;;  %v1940_v42 = vor.u32 %v1939_v46, %v1938_v43  ;;  %v16540_v61 = vand.u32 2147483647, %v17028_v22  ;;  %v2026_v3 = vand.u32 31, %v2024_v33 }
 0x1ce   : > { %v12277_v57 = vpop.eup %9401  ;;  %vm1863_vm2 = vc.u32 %v12236_v28, %v12230_v39  ;;  %v12281_v40 = vor.u32 %v1927_v23, %v1926_v29  ;;  %v12283_v15 = vor.u32 %v1930_v31, %v1929_v25  ;;  %v12285_v58 = vor.u32 %v1933_v5, %v1932_v17  ;;  %v17033_v31 = vld [vmem:[#allocation18_spill] sm:$0xff] }
 0x1cf   : > { %17032 = vst [vmem:[#allocation91_spill] sm:$0xff] %v12277_v57  ;;  %vm1941_vm6 = vcmp.lt.s32.totalorder %v12247_v30, 1  ;;  %vm1943_vm7 = vcmp.lt.s32.totalorder %v12247_v30, 3  ;;  %v1950_v63 = vsel %vm1944_vm9, %v1937_v62, 920167782  ;;  %v12291_v18 = vsub.s32 32, %v2026_v3 }
 0x1d0   : > { %v12295_v51 = vsub.s32 %v12186_v54, %v1766_v12  ;;  %v1861_v29 = vmul.u32 %v12207_v53, %v1845_v26  ;;  %v1917_v23 = vor.u32 8388608, %v1916_v36  ;;  %v1865_v25 = vsel %vm1863_vm2, %v1864_v8, %v12231_v24 }
 0x1d1   : > { %v1954_v43 = vsel %vm1944_vm9, %v1940_v42, 1326507024  ;;  %v2019_v46 = vand.u32 8388607, %v16540_v61  ;;  %v2118_v17 = vand.u32 2139095040, %v17033_v31  ;;  %vm1942_vm0 = vcmp.lt.s32.totalorder %v12247_v30, 2 }
 0x1d2   : > { %v1949_v54 = vsel %vm1941_vm6, %v12281_v40, %v12283_v15  ;;  %v1951_v53 = vsel %vm1943_vm7, %v12285_v58, %v1950_v63  ;;  %v1953_v8 = vsel %vm1941_vm6, %v12283_v15, %v12285_v58  ;;  %v2029_v24 = vshll.u32 %v16807_v55, %v2026_v3 }
 0x1d3   : > { %v2030_v5 = vshrl.u32 %v16913_v2, %v12291_v18  ;;  %v2032_v36 = vshll.u32 %v16913_v2, %v2026_v3  ;;  %v2033_v12 = vshrl.u32 %v16914_v7, %v12291_v18  ;;  %v1955_v26 = vsel %vm1943_vm7, %v1937_v62, %v1954_v43 }
 0x1d4   : > { %v12324_v42 = vshrl.u32 %v2024_v33, 5  ;;  %v2035_v63 = vshll.u32 %v16914_v7, %v2026_v3  ;;  %v2036_v61 = vshrl.u32 %v16911_v10, %v12291_v18  ;;  %v2038_v41 = vshll.u32 %v16911_v10, %v2026_v3 }
 0x1d5   : > { %v2039_v37 = vshrl.u32 %v16912_v14, %v12291_v18  ;;  %v2041_v20 = vshll.u32 %v16912_v14, %v2026_v3  ;;  %v2119_v47 = vshrl.u32 %v2118_v17, 23  ;;  %v1680_v27 = vand.u32 2147483647, %v12269_v34 }
 0x1d6   : > { %v1769_v22 = vsub.s32 0, %v12295_v51  ;;  %v12335_v62 = vadd.s32 %v1865_v25, %v1861_v29  ;;  %v2042_v33 = vshrl.u32 %v16915_v48, %v12291_v18  ;;  %v1952_v43 = vsel %vm1942_vm0, %v1949_v54, %v1951_v53 }
 0x1d7   : > { %v12341_v13 = vshll.u32 %v1917_v23, 8  ;;  %v12343_v9 = vor.u32 %v2030_v5, %v2029_v24  ;;  %v12345_v39 = vor.u32 %v2033_v12, %v2032_v36  ;;  %vm1492_vm12 = vcmp.eq.s32.totalorder %v12112_v38, 2 }
 0x1d8   : > { %v1956_v3 = vsel %vm1942_vm0, %v1953_v8, %v1955_v26  ;;  %v2037_v34 = vor.u32 %v2036_v61, %v2035_v63  ;;  %v2040_v29 = vor.u32 %v2039_v37, %v2038_v41  ;;  %vm2044_vm3 = vcmp.lt.s32.totalorder %v12324_v42, 1 }
 0x1d9   : > { %v2020_v25 = vor.u32 8388608, %v2019_v46  ;;  %v2043_v17 = vor.u32 %v2042_v33, %v2041_v20  ;;  %vm2047_vm13 = vcmp.lt.s32.totalorder %v12324_v42, 4  ;;  %v8881_v54 = vadd.s32 4294967169, %v2119_v47  ;;  %v17034_v47 = vld [vmem:[#allocation13_spill] sm:$0xff] }
 0x1da   : > { %vm1489_vm8 = vcmp.eq.s32.totalorder %v12112_v38, 0  ;;  %v8866_v23 = vmin.u32 %v1769_v22, %v12295_v51  ;;  %v1867_v53 = vadd.s32 536870912, %v12335_v62  ;;  %v1925_v24 = vshrl.u32 %v16807_v55, %v12216_v21 }
 0x1db   : > { %vm2046_vm10 = vcmp.lt.s32.totalorder %v12324_v42, 3  ;;  %vm1280_vm1 = vweird.f32 %v10504_v56  ;;  %v12360_v37 = vmul.u32.u64.low %v12341_v13, %v1952_v43  ;;  %v12361_v61 = vmul.u32.u64.high %v12341_v13, %v1952_v43, %v12360_v37 }
 0x1dc   : > { %vm2045_vm2 = vcmp.lt.s32.totalorder %v12324_v42, 2  ;;  %v2052_v20 = vsel %vm2044_vm3, %v12343_v9, %v12345_v39  ;;  %vm16781_vm15 = vweird.f32 %v10508_v50  ;;  %vm1602_vm14 = vcmp.lt.s32.totalorder %v17034_v47, 0 }
 0x1dd   : > { %v12372_v22 = vmul.u32.u64.low %v12341_v13, %v1956_v3  ;;  %v12373_v21 = vmul.u32.u64.high %v12341_v13, %v1956_v3, %v12372_v22  ;;  %v2053_v41 = vsel %vm2047_vm13, %v2040_v29, 920167782  ;;  %v2056_v46 = vsel %vm2044_vm3, %v12345_v39, %v2037_v34 }
 0x1de   : > { %vm1488_vm5 = vcmp.lt.s32.totalorder %v12112_v38, 2  ;;  %v2054_v8 = vsel %vm2046_vm10, %v2037_v34, %v2053_v41  ;;  %v2057_v5 = vsel %vm2047_vm13, %v2043_v17, 1326507024  ;;  %v12385_v36 = vshll.u32 %v2020_v25, 8 }
 0x1df   : > { %v2125_v12 = vadd.s32 1, %v8881_v54  ;;  %v12390_v26 = vsel %vm12132_vm11, 0, %v12221_v6  ;;  %v1946_v63 = vsel %vm1944_vm9, %v12285_v58, 2102212464  ;;  %v2055_v33 = vsel %vm2045_vm2, %v2052_v20, %v2054_v8 }
 0x1e0   : > { %17035 = vst [vmem:[#allocation92_spill] sm:$0xff] %v12390_v26  ;;  %v2058_v43 = vsel %vm2046_vm10, %v2040_v29, %v2057_v5  ;;  %v16554_v3 = vxor.u32 2147483648, %v12256_v52  ;;  %v17036_v25 = vcvt.s32.f32 %v12263_v49  ;;  %v16555_v6 = vxor.u32 2147483648, %v12267_v32 }
 0x1e1   : > { %v2059_v1 = vsel %vm2045_vm2, %v2056_v46, %v2058_v43  ;;  %vm2126_vm11 = vcmp.gt.s32.totalorder %v2125_v12, 0  ;;  %v1771_v54 = vclz %v8866_v23  ;;  %v12405_v22 = vshrl.u32 %v1867_v53, 30 }
 0x1e2   : > { %v1683_v17 = vmul.f32 %v17036_v25, %v1680_v27  ;;  %v2127_v58 = vsel %vm2126_vm11, %v2125_v12, 0  ;;  %v1945_v20 = vsel %vm1941_vm6, %v1925_v24, %v12281_v40  ;;  %v1947_v29 = vsel %vm1943_vm7, %v12283_v15, %v1946_v63 }
 0x1e3   : > { %v12414_v27 = vmul.u32.u64.low %v12385_v36, %v2055_v33  ;;  %v12415_v49 = vmul.u32.u64.high %v12385_v36, %v2055_v33, %v12414_v27  ;;  %v12419_v41 = vand.u32 3, %v12390_v26  ;;  %v2028_v23 = vshrl.u32 %v16807_v55, %v12291_v18 }
 0x1e4   : > { %v12424_v53 = vmul.u32.u64.low %v12385_v36, %v2059_v1  ;;  %v12425_v46 = vmul.u32.u64.high %v12385_v36, %v2059_v1, %v12424_v53  ;;  %v1494_v40 = vsel %vm1492_vm12, %v16554_v3, %v12267_v32  ;;  %v1684_v15 = vxor.u32 2147483648, %v1683_v17 }
 0x1e5   : > { %v2049_v24 = vsel %vm2047_vm13, %v2037_v34, 2102212464  ;;  %v2129_v8 = vand.u32 31, %v2127_v58  ;;  %9403 = vsinq.f32 %v12202_v35  ;;  %v8867_v5 = vadd.s32 4294967294, %v1771_v54 }
 0x1e6   : > { %v1948_v18 = vsel %vm1942_vm0, %v1945_v20, %v1947_v29  ;;  %v1967_v12 = vadd.s32 1, %v12361_v61  ;;  %v1491_v63 = vsel %vm1489_vm8, %v12256_v52, %v16555_v6  ;;  %v1686_v33 = vsub.s32 4, %v11933_v44 }
 0x1e7   : > { %v1869_v43 = vshll.u32 %v12405_v22, 30  ;;  %vm1966_vm9 = vc.u32 %v12373_v21, %v12360_v37  ;;  %v12450_v35 = vsel %vm1280_vm1, nan, %v12106_v19  ;;  %v17038_v30 = vand.u32 2147483647, %v17034_v47 }
 0x1e8   : > { %17037 = vst [vmem:[#allocation93_spill] sm:$0xff] %v12450_v35  ;;  %v2048_v25 = vsel %vm2044_vm3, %v2028_v23, %v12343_v9  ;;  %v2050_v1 = vsel %vm2046_vm10, %v12345_v39, %v2049_v24  ;;  %v12467_v54 = vsel %vm16781_vm15, nan, %v12176_v11  ;;  %v1685_v19 = vsel %vm1602_vm14, %v1684_v15, %v1683_v17 }
 0x1e9   : > { %vm12454_vm6 = vcmp.le.f32.partialorder %v17038_v30, 0.7853982  ;;  %17041 = vst [vmem:[#allocation94_spill] sm:$0xff] %v12467_v54  ;;  %v1964_v20 = vmul.u32 %v12341_v13, %v1948_v18  ;;  %v12472_v29 = vsub.s32 32, %v2129_v8  ;;  %v12476_v53 = vsel %vm1488_vm5, %v1491_v63, %v1494_v40 }
 0x1ea   : > { %vm1595_vm7 = vcmp.eq.s32.totalorder %v12419_v41, 2  ;;  %vm8868_vm0 = vcmp.lt.s32.totalorder %v8867_v5, 0  ;;  %v1968_v9 = vsel %vm1966_vm9, %v1967_v12, %v12361_v61  ;;  %v12483_v11 = vsel %vm1602_vm14, %v1686_v33, %v11933_v44 }
 0x1eb   : > { %v12486_v39 = vsub.s32 %v12335_v62, %v1869_v43  ;;  %v2051_v13 = vsel %vm2045_vm2, %v2048_v25, %v2050_v1  ;;  %v2070_v38 = vadd.s32 1, %v12415_v49  ;;  %vm1592_vm5 = vcmp.eq.s32.totalorder %v12419_v41, 0 }
 0x1ec   : > { %v16556_v17 = vxor.u32 2147483648, %v12277_v57  ;;  %v1688_v61 = vsel %vm12454_vm6, %v17034_v47, %v1685_v19  ;;  %vm2069_vm14 = vc.u32 %v12425_v46, %v12414_v27  ;;  %v16558_v44 = vand.u32 2147483647, %v17033_v31 }
 0x1ed   : > { %v12499_v62 = vsel %vm8868_vm0, 0, %v8867_v5  ;;  %v12501_v23 = vadd.s32 %v1968_v9, %v1964_v20  ;;  %v2141_v42 = vshll.u32 %v16911_v10, %v2129_v8  ;;  %v2142_v40 = vshrl.u32 %v16912_v14, %v12472_v29 }
 0x1ee   : > { %v2067_v15 = vmul.u32 %v12385_v36, %v2051_v13  ;;  %v12507_v24 = vshrl.u32 %v2127_v58, 5  ;;  %v2144_v18 = vshll.u32 %v16912_v14, %v2129_v8  ;;  %v2145_v12 = vshrl.u32 %v16915_v48, %v12472_v29 }
 0x1ef   : > { %v1872_v63 = vsub.s32 0, %v12486_v39  ;;  %v2071_v5 = vsel %vm2069_vm14, %v2070_v38, %v12415_v49  ;;  %v2132_v33 = vshll.u32 %v16807_v55, %v2129_v8  ;;  %v2135_v43 = vshll.u32 %v16913_v2, %v2129_v8  ;;  %v12516_v30 = vpop.eup %9403 }
 0x1f0   : > { %17042 = vst [vmem:[#allocation95_spill] sm:$0xff] %v12516_v30  ;;  %vm16733_vm12 = vweird.f32 %v17010_v59  ;;  %v2133_v36 = vshrl.u32 %v16913_v2, %v12472_v29  ;;  %v2136_v58 = vshrl.u32 %v16914_v7, %v12472_v29  ;;  %v2138_v25 = vshll.u32 %v16914_v7, %v2129_v8 }
 0x1f1   : > { %v2139_v1 = vshrl.u32 %v16911_v10, %v12472_v29  ;;  %v1759_v49 = vadd.s32 %v12084_v60, %v12094_v4  ;;  %v1779_v19 = vsub.s32 4294967266, %v12499_v62  ;;  %v2122_v20 = vand.u32 8388607, %v16558_v44 }
 0x1f2   : > { %v2143_v9 = vor.u32 %v2142_v40, %v2141_v42  ;;  %vm1591_vm3 = vcmp.lt.s32.totalorder %v12419_v41, 2  ;;  %v1970_v13 = vadd.s32 536870912, %v12501_v23  ;;  %v12533_v38 = vadd.s32 %v2071_v5, %v2067_v15  ;;  %v17050_v41 = vld [vmem:[#allocation20_spill] sm:$0xff] }
 0x1f3   : > { %v2146_v3 = vor.u32 %v2145_v12, %v2144_v18  ;;  %vm2150_vm13 = vcmp.lt.s32.totalorder %v12507_v24, 4  ;;  %v16557_v8 = vxor.u32 2147483648, %v12516_v30  ;;  %v1597_v60 = vsel %vm1595_vm7, %v16556_v17, %v12516_v30 }
 0x1f4   : > { %9405 = vcosq.f32 %v1688_v61  ;;  %v8870_v4 = vmin.u32 %v1872_v63, %v12486_v39  ;;  %v1775_v42 = vsub.s32 32, %v12499_v62  ;;  %v12544_v40 = vor.u32 %v2133_v36, %v2132_v33 }
 0x1f5   : > { %v12546_v15 = vor.u32 %v2136_v58, %v2135_v43  ;;  %v2140_v18 = vor.u32 %v2139_v1, %v2138_v25  ;;  %v1780_v12 = vadd.s32 127, %v1779_v19  ;;  %vm2147_vm8 = vcmp.lt.s32.totalorder %v12507_v24, 1  ;;  %v17043_v1 = vld [vmem:[#allocation19_spill] sm:$0xff] }
 0x1f6   : > { %vm2149_vm10 = vcmp.lt.s32.totalorder %v12507_v24, 3  ;;  %v2156_v5 = vsel %vm2150_vm13, %v2143_v9, 920167782  ;;  %v12552_v6 = vshrl.u32 %v1970_v13, 30  ;;  %v2073_v17 = vadd.s32 536870912, %v12533_v38 }
 0x1f7   : > { %v2123_v63 = vor.u32 8388608, %v2122_v20  ;;  %v2160_v33 = vsel %vm2150_vm13, %v2146_v3, 1326507024  ;;  %vm16591_vm2 = vweird.f32 %v17021_v45  ;;  %v1594_v43 = vsel %vm1592_vm5, %v12277_v57, %v16557_v8 }
 0x1f8   : > { %9407 = vsinq.f32 %v1688_v61  ;;  %v1776_v36 = vshll.u32 %v12295_v51, %v12499_v62  ;;  %v1874_v58 = vclz %v8870_v4  ;;  %vm2148_vm11 = vcmp.lt.s32.totalorder %v12507_v24, 2 }
 0x1f9   : > { %v2155_v3 = vsel %vm2147_vm8, %v12544_v40, %v12546_v15  ;;  %v2157_v25 = vsel %vm2149_vm10, %v2140_v18, %v2156_v5  ;;  %v2221_v19 = vand.u32 2139095040, %v17043_v1  ;;  %v1777_v20 = vshrl.u32 %v1759_v49, %v1775_v42 }
 0x1fa   : > { %v1781_v13 = vshll.u32 %v1780_v12, 23  ;;  %v2159_v61 = vsel %vm2147_vm8, %v12546_v15, %v2140_v18  ;;  %v2161_v51 = vsel %vm2149_vm10, %v2143_v9, %v2160_v33  ;;  %v1972_v62 = vshll.u32 %v12552_v6, 30 }
 0x1fb   : > { %v12579_v4 = vshrl.u32 %v2073_v17, 30  ;;  %v12581_v8 = vshll.u32 %v2123_v63, 8  ;;  %v2222_v44 = vshrl.u32 %v2221_v19, 23  ;;  %v12586_v5 = vsel %vm16733_vm12, nan, %v12476_v53 }
 0x1fc   : > { %17044 = vst [vmem:[#allocation96_spill] sm:$0xff] %v12586_v5  ;;  %v17045_v49 = vand.u32 2147483647, %v16984_v0  ;;  %vm1705_vm7 = vcmp.lt.s32.totalorder %v16984_v0, 0  ;;  %v2158_v17 = vsel %vm2148_vm11, %v2155_v3, %v2157_v25  ;;  %v12600_v9 = vsel %vm12454_vm6, 0, %v12483_v11 }
 0x1fd   : > { %17048 = vst [vmem:[#allocation97_spill] sm:$0xff] %v12600_v9  ;;  %v1789_v12 = vsub.s32 4, %v12238_v16  ;;  %v8871_v53 = vadd.s32 4294967294, %v1874_v58  ;;  %v2162_v63 = vsel %vm2148_vm11, %v2159_v61, %v2161_v51  ;;  %v1598_v19 = vsel %vm1591_vm3, %v1594_v43, %v1597_v60 }
 0x1fe   : > { %vm12590_vm9 = vcmp.le.f32.partialorder %v17045_v49, 0.7853982  ;;  %v12605_v33 = vpop.eup %9405  ;;  %v1778_v49 = vor.u32 %v1777_v20, %v1776_v36  ;;  %v1782_v5 = vor.u32 4788187, %v1781_v13  ;;  %v8885_v54 = vadd.s32 4294967169, %v2222_v44 }
 0x1ff   : > { %17049 = vst [vmem:[#allocation98_spill] sm:$0xff] %v12605_v33  ;;  %v12610_v3 = vsub.s32 %v12501_v23, %v1972_v62  ;;  %v2075_v34 = vshll.u32 %v12579_v4, 30  ;;  %v12614_v11 = vmul.u32.u64.low %v12581_v8, %v2158_v17  ;;  %v12615_v25 = vmul.u32.u64.high %v12581_v8, %v2158_v17, %v12614_v11 }
 0x200   : > { %v12619_v58 = vmul.u32.u64.low %v12581_v8, %v2162_v63  ;;  %v12620_v61 = vmul.u32.u64.high %v12581_v8, %v2162_v63, %v12619_v58  ;;  %v2228_v51 = vadd.s32 1, %v8885_v54  ;;  %v2324_v60 = vand.u32 2139095040, %v17050_v41 }
 0x201   : > { %v12624_v43 = vand.u32 3, %v12600_v9  ;;  %v1790_v44 = vsel %vm1705_vm7, %v1789_v12, %v12238_v16  ;;  %vm8872_vm6 = vcmp.lt.s32.totalorder %v8871_v53, 0  ;;  %v2131_v23 = vshrl.u32 %v16807_v55, %v12472_v29 }
 0x202   : > { %v12631_v36 = vpop.eup %9407  ;;  %v1783_v20 = vand.u32 2147483647, %v1782_v5  ;;  %v1785_v13 = vcvt.s32.f32 %v1778_v49  ;;  %v2152_v54 = vsel %vm2150_vm13, %v2140_v18, 2102212464  ;;  %vm2229_vm0 = vcmp.gt.s32.totalorder %v2228_v51, 0 }
 0x203   : > { %17051 = vst [vmem:[#allocation99_spill] sm:$0xff] %v12631_v36  ;;  %v12637_v62 = vsel %vm16591_vm2, nan, %v1598_v19  ;;  %v1975_v17 = vsub.s32 0, %v12610_v3  ;;  %v12641_v16 = vsub.s32 %v12533_v38, %v2075_v34  ;;  %v2230_v12 = vsel %vm2229_vm0, %v2228_v51, 0 }
 0x204   : > { %17052 = vst [vmem:[#allocation100_spill] sm:$0xff] %v12637_v62  ;;  %v12645_v29 = vsel %vm12590_vm9, 0, %v1790_v44  ;;  %v12647_v5 = vsel %vm8872_vm6, 0, %v8871_v53  ;;  %v2232_v63 = vand.u32 31, %v2230_v12  ;;  %v2325_v49 = vshrl.u32 %v2324_v60, 23  ;;  %v17054_v53 = vld [vmem:[#allocation88_spill] sm:$0xff] }
 0x205   : > { %17053 = vst [vmem:[#allocation101_spill] sm:$0xff] %v12645_v29  ;;  %v12651_v58 = vand.u32 3, %v12645_v29  ;;  %v2151_v19 = vsel %vm2147_vm8, %v2131_v23, %v12544_v40  ;;  %v2153_v38 = vsel %vm2149_vm10, %v12546_v15, %v2152_v54  ;;  %v1786_v51 = vmul.f32 %v1785_v13, %v1783_v20 }
 0x206   : > { %v1862_v44 = vadd.s32 %v17054_v53, %v12236_v28  ;;  %v12662_v60 = vsub.s32 32, %v2232_v63  ;;  %v1882_v18 = vsub.s32 4294967266, %v12647_v5  ;;  %v8874_v62 = vmin.u32 %v1975_v17, %v12610_v3 }
 0x207   : > { %v2078_v35 = vsub.s32 0, %v12641_v16  ;;  %v2154_v23 = vsel %vm2148_vm11, %v2151_v19, %v2153_v38  ;;  %vm2172_vm5 = vc.u32 %v12620_v61, %v12614_v11  ;;  %v2173_v15 = vadd.s32 1, %v12615_v25 }
 0x208   : > { %v8889_v20 = vadd.s32 4294967169, %v2325_v49  ;;  %vm1698_vm14 = vcmp.eq.s32.totalorder %v12624_v43, 2  ;;  %v2235_v28 = vshll.u32 %v16807_v55, %v2232_v63  ;;  %v2238_v13 = vshll.u32 %v16913_v2, %v2232_v63 }
 0x209   : > { %v2241_v54 = vshll.u32 %v16914_v7, %v2232_v63  ;;  %v2244_v17 = vshll.u32 %v16911_v10, %v2232_v63  ;;  %vm1695_vm3 = vcmp.eq.s32.totalorder %v12624_v43, 0  ;;  %v2236_v24 = vshrl.u32 %v16913_v2, %v12662_v60 }
 0x20a   : > { %v2239_v19 = vshrl.u32 %v16914_v7, %v12662_v60  ;;  %v2242_v49 = vshrl.u32 %v16911_v10, %v12662_v60  ;;  %v2245_v38 = vshrl.u32 %v16912_v14, %v12662_v60  ;;  %v1787_v53 = vxor.u32 2147483648, %v1786_v51 }
 0x20b   : > { %v1878_v34 = vsub.s32 32, %v12647_v5  ;;  %v12688_v40 = vshrl.u32 %v2230_v12, 5  ;;  %v2247_v45 = vshll.u32 %v16912_v14, %v2232_v63  ;;  %v1883_v59 = vadd.s32 127, %v1882_v18 }
 0x20c   : > { %v1977_v57 = vclz %v8874_v62  ;;  %v2170_v30 = vmul.u32 %v12581_v8, %v2154_v23  ;;  %v17055_v50 = vand.u32 2147483647, %v17043_v1  ;;  %v8878_v52 = vmin.u32 %v2078_v35, %v12641_v16 }
 0x20d   : > { %v2174_v32 = vsel %vm2172_vm5, %v2173_v15, %v12615_v25  ;;  %v2246_v56 = vor.u32 %v2245_v38, %v2244_v17  ;;  %v2248_v12 = vshrl.u32 %v16915_v48, %v12662_v60  ;;  %v2237_v9 = vor.u32 %v2236_v24, %v2235_v28 }
 0x20e   : > { %v2225_v29 = vand.u32 8388607, %v17055_v50  ;;  %v2240_v63 = vor.u32 %v2239_v19, %v2238_v13  ;;  %v2243_v18 = vor.u32 %v2242_v49, %v2241_v54  ;;  %v2331_v62 = vadd.s32 1, %v8889_v20 }
 0x20f   : > { %v2249_v26 = vor.u32 %v2248_v12, %v2247_v45  ;;  %vm2250_vm13 = vcmp.lt.s32.totalorder %v12688_v40, 1  ;;  %vm2252_vm8 = vcmp.lt.s32.totalorder %v12688_v40, 3  ;;  %vm2253_vm10 = vcmp.lt.s32.totalorder %v12688_v40, 4 }
 0x210   : > { %v8875_v50 = vadd.s32 4294967294, %v1977_v57  ;;  %v12704_v35 = vadd.s32 %v2174_v32, %v2170_v30  ;;  %v2226_v8 = vor.u32 8388608, %v2225_v29  ;;  %v2259_v25 = vsel %vm2253_vm10, %v2246_v56, 920167782 }
 0x211   : > { %v1788_v23 = vsel %vm1705_vm7, %v1787_v53, %v1786_v51  ;;  %v1879_v15 = vshll.u32 %v12486_v39, %v12647_v5  ;;  %v1880_v45 = vshrl.u32 %v1862_v44, %v1878_v34  ;;  %v2263_v20 = vsel %vm2253_vm10, %v2249_v26, 1326507024 }
 0x212   : > { %vm2251_vm11 = vcmp.lt.s32.totalorder %v12688_v40, 2  ;;  %v2258_v57 = vsel %vm2250_vm13, %v2237_v9, %v2240_v63  ;;  %v2260_v32 = vsel %vm2252_vm8, %v2243_v18, %v2259_v25  ;;  %vm2332_vm6 = vcmp.gt.s32.totalorder %v2331_v62, 0 }
 0x213   : > { %v1884_v30 = vshll.u32 %v1883_v59, 23  ;;  %v2080_v29 = vclz %v8878_v52  ;;  %v2262_v51 = vsel %vm2250_vm13, %v2240_v63, %v2243_v18  ;;  %v2264_v39 = vsel %vm2252_vm8, %v2246_v56, %v2263_v20 }
 0x214   : > { %v17056_v26 = vxor.u32 2147483648, %v12605_v33  ;;  %vm8876_vm7 = vcmp.lt.s32.totalorder %v8875_v50, 0  ;;  %v2176_v34 = vadd.s32 536870912, %v12704_v35  ;;  %v12731_v44 = vshll.u32 %v2226_v8, 8 }
 0x215   : > { %v17057_v59 = vxor.u32 2147483648, %v12631_v36  ;;  %v2261_v28 = vsel %vm2251_vm11, %v2258_v57, %v2260_v32  ;;  %v2333_v13 = vsel %vm2332_vm6, %v2331_v62, 0  ;;  %v1791_v54 = vsel %vm12590_vm9, %v16984_v0, %v1788_v23 }
 0x216   : > { %v12728_v5 = vsel %vm1698_vm14, %v17056_v26, %v12631_v36  ;;  %v12746_v17 = vor.u32 %v1880_v45, %v1879_v15  ;;  %v2265_v24 = vsel %vm2251_vm11, %v2262_v51, %v2264_v39  ;;  %v2335_v19 = vand.u32 31, %v2333_v13 }
 0x217   : > { %v12738_v52 = vsel %vm1695_vm3, %v12605_v33, %v17057_v59  ;;  %v12750_v49 = vor.u32 4788187, %v1884_v30  ;;  %v12752_v38 = vsel %vm8876_vm7, 0, %v8875_v50  ;;  %v8879_v53 = vadd.s32 4294967294, %v2080_v29 }
 0x218   : > { %v16574_v12 = vand.u32 2147483647, %v17050_v41  ;;  %v12755_v8 = vshrl.u32 %v2176_v34, 30  ;;  %v2234_v62 = vshrl.u32 %v16807_v55, %v12662_v60  ;;  %9409 = vcosq.f32 %v1791_v54 }
 0x219   : > { %v12760_v42 = vmul.u32.u64.low %v12731_v44, %v2261_v28  ;;  %v12761_v25 = vmul.u32.u64.high %v12731_v44, %v2261_v28, %v12760_v42  ;;  %v12765_v23 = vmul.u32.u64.low %v12731_v44, %v2265_v24  ;;  %v12766_v15 = vmul.u32.u64.high %v12731_v44, %v2265_v24, %v12765_v23 }
 0x21a   : > { %v12768_v50 = vsub.s32 32, %v2335_v19  ;;  %9411 = vsinq.f32 %v1791_v54  ;;  %v1965_v20 = vadd.s32 %v12360_v37, %v12373_v21  ;;  %v2255_v60 = vsel %vm2253_vm10, %v2243_v18, 2102212464 }
 0x21b   : > { %v1981_v32 = vsub.s32 32, %v12752_v38  ;;  %v1985_v29 = vsub.s32 4294967266, %v12752_v38  ;;  %vm8880_vm9 = vcmp.lt.s32.totalorder %v8879_v53, 0  ;;  %v2178_v51 = vshll.u32 %v12755_v8, 30 }
 0x21c   : > { %v2254_v39 = vsel %vm2250_vm13, %v2234_v62, %v2237_v9  ;;  %v2328_v37 = vand.u32 8388607, %v16574_v12  ;;  %v2256_v21 = vsel %vm2252_vm8, %v2240_v63, %v2255_v60  ;;  %v2338_v18 = vshll.u32 %v16807_v55, %v2335_v19 }
 0x21d   : > { %v2339_v26 = vshrl.u32 %v16913_v2, %v12768_v50  ;;  %v2341_v34 = vshll.u32 %v16913_v2, %v2335_v19  ;;  %v2342_v59 = vshrl.u32 %v16914_v7, %v12768_v50  ;;  %v2344_v28 = vshll.u32 %v16914_v7, %v2335_v19 }
 0x21e   : > { %v2345_v9 = vshrl.u32 %v16911_v10, %v12768_v50  ;;  %v2347_v54 = vshll.u32 %v16911_v10, %v2335_v19  ;;  %v12797_v24 = vshrl.u32 %v2333_v13, 5  ;;  %v2348_v63 = vshrl.u32 %v16912_v14, %v12768_v50 }
 0x21f   : > { %v2350_v62 = vshll.u32 %v16912_v14, %v2335_v19  ;;  %v2351_v23 = vshrl.u32 %v16915_v48, %v12768_v50  ;;  %v12805_v60 = vsel %vm8880_vm9, 0, %v8879_v53  ;;  %v12808_v12 = vsub.s32 %v12704_v35, %v2178_v51 }
 0x220   : > { %v2257_v56 = vsel %vm2251_vm11, %v2254_v39, %v2256_v21  ;;  %v2276_v13 = vadd.s32 1, %v12761_v25  ;;  %vm1694_vm0 = vcmp.lt.s32.totalorder %v12624_v43, 2  ;;  %v1986_v30 = vadd.s32 127, %v1985_v29  ;;  %v17060_v21 = vld [vmem:[#allocation21_spill] sm:$0xff] }
 0x221   : > { %vm2275_vm5 = vc.u32 %v12766_v15, %v12760_v42  ;;  %v2329_v19 = vor.u32 8388608, %v2328_v37  ;;  %v2340_v45 = vor.u32 %v2339_v26, %v2338_v18  ;;  %v2343_v57 = vor.u32 %v2342_v59, %v2341_v34 }
 0x222   : > { %v2346_v33 = vor.u32 %v2345_v9, %v2344_v28  ;;  %v2349_v53 = vor.u32 %v2348_v63, %v2347_v54  ;;  %v2352_v36 = vor.u32 %v2351_v23, %v2350_v62  ;;  %v12816_v41 = vpop.eup %9409  ;;  %v2088_v35 = vsub.s32 4294967266, %v12805_v60 }
 0x223   : > { %17058 = vst [vmem:[#allocation88_spill] sm:$0xff] %v12816_v41  ;;  %v2273_v40 = vmul.u32 %v12731_v44, %v2257_v56  ;;  %vm2353_vm14 = vcmp.lt.s32.totalorder %v12797_v24, 1  ;;  %vm2356_vm3 = vcmp.lt.s32.totalorder %v12797_v24, 4  ;;  %vm1798_vm13 = vcmp.eq.s32.totalorder %v12651_v58, 0  ;;  %v17061_v56 = vld [vmem:[#allocation15_spill] sm:$0xff] }
 0x224   : > { %v12822_v29 = vpop.eup %9411  ;;  %vm1801_vm8 = vcmp.eq.s32.totalorder %v12651_v58, 2  ;;  %v1983_v51 = vshrl.u32 %v1965_v20, %v1981_v32  ;;  %v2181_v39 = vsub.s32 0, %v12808_v12  ;;  %v2277_v37 = vsel %vm2275_vm5, %v2276_v13, %v12761_v25 }
 0x225   : > { %17059 = vst [vmem:[#allocation102_spill] sm:$0xff] %v12822_v29  ;;  %v2427_v44 = vand.u32 2139095040, %v17060_v21  ;;  %vm1808_vm10 = vcmp.lt.s32.totalorder %v17061_v56, 0  ;;  %v2068_v18 = vadd.s32 %v12414_v27, %v12425_v46  ;;  %vm2354_vm11 = vcmp.lt.s32.totalorder %v12797_v24, 2 }
 0x226   : > { %vm2355_vm6 = vcmp.lt.s32.totalorder %v12797_v24, 3  ;;  %v12837_v26 = vshll.u32 %v2329_v19, 8  ;;  %v2361_v20 = vsel %vm2353_vm14, %v2340_v45, %v2343_v57  ;;  %v2362_v32 = vsel %vm2356_vm3, %v2349_v53, 920167782  ;;  %v17073_v24 = vld [vmem:[#allocation24_spill] sm:$0xff] }
 0x227   : > { %v2365_v25 = vsel %vm2353_vm14, %v2343_v57, %v2346_v33  ;;  %v2366_v34 = vsel %vm2356_vm3, %v2352_v36, 1326507024  ;;  %v1987_v59 = vshll.u32 %v1986_v30, 23  ;;  %v2084_v27 = vsub.s32 32, %v12805_v60 }
 0x228   : > { %v2089_v46 = vadd.s32 127, %v2088_v35  ;;  %v12848_v28 = vadd.s32 %v2277_v37, %v2273_v40  ;;  %vm16590_vm7 = vweird.f32 %v17034_v47  ;;  %v8882_v9 = vmin.u32 %v2181_v39, %v12808_v12 }
 0x229   : > { %v2363_v54 = vsel %vm2355_vm6, %v2346_v33, %v2362_v32  ;;  %v2367_v63 = vsel %vm2355_vm6, %v2349_v53, %v2366_v34  ;;  %v2428_v62 = vshrl.u32 %v2427_v44, 23  ;;  %v2337_v36 = vshrl.u32 %v16807_v55, %v12768_v50 }
 0x22a   : > { %v2358_v30 = vsel %vm2356_vm3, %v2346_v33, 2102212464  ;;  %v2364_v23 = vsel %vm2354_vm11, %v2361_v20, %v2363_v54  ;;  %v2368_v13 = vsel %vm2354_vm11, %v2365_v25, %v2367_v63  ;;  %vm1797_vm9 = vcmp.lt.s32.totalorder %v12651_v58, 2  ;;  %v17067_v63 = vld [vmem:[#allocation16_spill] sm:$0xff] }
 0x22b   : > { %v17062_v19 = vand.u32 2147483647, %v17061_v56  ;;  %v12872_v53 = vmul.u32.u64.low %v12837_v26, %v2368_v13  ;;  %v12873_v50 = vmul.u32.u64.high %v12837_v26, %v2368_v13, %v12872_v53  ;;  %v16581_v39 = vxor.u32 2147483648, %v12822_v29 }
 0x22c   : > { %v12876_v33 = vmul.u32.u64.low %v12837_v26, %v2364_v23  ;;  %v12877_v40 = vmul.u32.u64.high %v12837_v26, %v2364_v23, %v12876_v33  ;;  %v16580_v37 = vxor.u32 2147483648, %v12816_v41  ;;  %v2279_v44 = vadd.s32 536870912, %v12848_v28 }
 0x22d   : > { %vm12867_vm5 = vcmp.le.f32.partialorder %v17062_v19, 0.7853982  ;;  %v8893_v20 = vadd.s32 4294967169, %v2428_v62  ;;  %v1701_v32 = vsel %vm1694_vm0, %v12738_v52, %v12728_v5  ;;  %v17065_v25 = vand.u32 2147483647, %v12750_v49 }
 0x22e   : > { %v17066_v34 = vcvt.s32.f32 %v12746_v17  ;;  %vm1911_vm3 = vcmp.lt.s32.totalorder %v17067_v63, 0  ;;  %v17068_v23 = vshll.u32 %v12610_v3, %v12752_v38  ;;  %v2183_v19 = vclz %v8882_v9 }
 0x22f   : > { %v1988_v53 = vor.u32 4788187, %v1987_v59  ;;  %v2357_v62 = vsel %vm2353_vm14, %v2337_v36, %v2340_v45  ;;  %v2359_v43 = vsel %vm2355_vm6, %v2343_v57, %v2358_v30  ;;  %v2434_v5 = vadd.s32 1, %v8893_v20 }
 0x230   : > { %v1889_v54 = vmul.f32 %v17066_v34, %v17065_v25  ;;  %v1984_v13 = vor.u32 %v1983_v51, %v17068_v23  ;;  %v17069_v52 = vsub.s32 4, %v12405_v22  ;;  %v2085_v49 = vshll.u32 %v12641_v16, %v12805_v60 }
 0x231   : > { %v2086_v3 = vshrl.u32 %v2068_v18, %v2084_v27  ;;  %v2090_v38 = vshll.u32 %v2089_v46, 23  ;;  %v1800_v45 = vsel %vm1798_vm13, %v12816_v41, %v16581_v39  ;;  %v1803_v57 = vsel %vm1801_vm8, %v16580_v37, %v12822_v29 }
 0x232   : > { %v1893_v17 = vsel %vm1808_vm10, %v17069_v52, %v12405_v22  ;;  %v1995_v51 = vsub.s32 4, %v12552_v6  ;;  %v12917_v22 = vshrl.u32 %v2279_v44, 30  ;;  %v8883_v59 = vadd.s32 4294967294, %v2183_v19 }
 0x233   : > { %v2360_v16 = vsel %vm2354_vm11, %v2357_v62, %v2359_v43  ;;  %v2379_v60 = vadd.s32 1, %v12877_v40  ;;  %vm2435_vm0 = vcmp.gt.s32.totalorder %v2434_v5, 0  ;;  %v1890_v18 = vxor.u32 2147483648, %v1889_v54 }
 0x234   : > { %v17070_v27 = vand.u32 2147483647, %v17067_v63  ;;  %v1989_v9 = vand.u32 2147483647, %v1988_v53  ;;  %v1991_v36 = vcvt.s32.f32 %v1984_v13  ;;  %vm2378_vm13 = vc.u32 %v12873_v50, %v12876_v33 }
 0x235   : > { %v2087_v30 = vor.u32 %v2086_v3, %v2085_v49  ;;  %v2091_v44 = vor.u32 4788187, %v2090_v38  ;;  %v2436_v20 = vsel %vm2435_vm0, %v2434_v5, 0  ;;  %v2530_v25 = vand.u32 2139095040, %v17073_v24 }
 0x236   : > { %vm12924_vm14 = vcmp.le.f32.partialorder %v17070_v27, 0.7853982  ;;  %v12933_v34 = vsel %vm16590_vm7, nan, %v1701_v32  ;;  %v12937_v23 = vsel %vm12867_vm5, 0, %v1893_v17  ;;  %v2281_v19 = vshll.u32 %v12917_v22, 30 }
 0x237   : > { %17074 = vst [vmem:[#allocation103_spill] sm:$0xff] %v12933_v34  ;;  %17075 = vst [vmem:[#allocation104_spill] sm:$0xff] %v12937_v23  ;;  %v2376_v13 = vmul.u32 %v12837_v26, %v2360_v16  ;;  %v12942_v53 = vand.u32 3, %v12937_v23  ;;  %vm8884_vm8 = vcmp.lt.s32.totalorder %v8883_v59, 0  ;;  %v2380_v62 = vsel %vm2378_vm13, %v2379_v60, %v12877_v40  ;;  %v17076_v60 = vld [vmem:[#allocation17_spill] sm:$0xff] }
 0x238   : > { %v2438_v43 = vand.u32 31, %v2436_v20  ;;  %v12947_v5 = vsel %vm1797_vm9, %v1800_v45, %v1803_v57  ;;  %v1891_v32 = vsel %vm1808_vm10, %v1890_v18, %v1889_v54  ;;  %v1992_v52 = vmul.f32 %v1991_v36, %v1989_v9 }
 0x239   : > { %v1996_v17 = vsel %vm1911_vm3, %v1995_v51, %v12552_v6  ;;  %v2092_v26 = vand.u32 2147483647, %v2091_v44  ;;  %v2094_v49 = vcvt.s32.f32 %v2087_v30  ;;  %v2531_v38 = vshrl.u32 %v2530_v25, 23 }
 0x23a   : > { %v12954_v3 = vsub.s32 32, %v2438_v43  ;;  %v12956_v16 = vsel %vm8884_vm8, 0, %v8883_v59  ;;  %v12959_v40 = vsub.s32 %v12848_v28, %v2281_v19  ;;  %v12961_v58 = vadd.s32 %v2380_v62, %v2376_v13 }
 0x23b   : > { %v16582_v45 = vand.u32 2147483647, %v17060_v21  ;;  %v2441_v54 = vshll.u32 %v16807_v55, %v2438_v43  ;;  %v2444_v57 = vshll.u32 %v16913_v2, %v2438_v43  ;;  %v2447_v6 = vshll.u32 %v16914_v7, %v2438_v43 }
 0x23c   : > { %v2450_v51 = vshll.u32 %v16911_v10, %v2438_v43  ;;  %vm2014_vm10 = vcmp.lt.s32.totalorder %v17076_v60, 0  ;;  %v2442_v59 = vshrl.u32 %v16913_v2, %v12954_v3  ;;  %v2445_v28 = vshrl.u32 %v16914_v7, %v12954_v3 }
 0x23d   : > { %v2448_v18 = vshrl.u32 %v16911_v10, %v12954_v3  ;;  %v2451_v27 = vshrl.u32 %v16912_v14, %v12954_v3  ;;  %v1894_v9 = vsel %vm12867_vm5, %v17061_v56, %v1891_v32  ;;  %v12982_v36 = vsel %vm12924_vm14, 0, %v1996_v17 }
 0x23e   : > { %17077 = vst [vmem:[#allocation105_spill] sm:$0xff] %v12982_v36  ;;  %v12984_v30 = vshrl.u32 %v2436_v20, 5  ;;  %v8897_v44 = vadd.s32 4294967169, %v2531_v38  ;;  %v1993_v25 = vxor.u32 2147483648, %v1992_v52  ;;  %v2095_v19 = vmul.f32 %v2094_v49, %v2092_v26 }
 0x23f   : > { %v2382_v13 = vadd.s32 536870912, %v12961_v58  ;;  %v2431_v62 = vand.u32 8388607, %v16582_v45  ;;  %v2191_v37 = vsub.s32 4294967266, %v12956_v16  ;;  %v2452_v39 = vor.u32 %v2451_v27, %v2450_v51 }
 0x240   : > { %v2453_v35 = vshll.u32 %v16912_v14, %v2438_v43  ;;  %v2454_v32 = vshrl.u32 %v16915_v48, %v12954_v3  ;;  %v2284_v17 = vsub.s32 0, %v12959_v40  ;;  %v2443_v20 = vor.u32 %v2442_v59, %v2441_v54 }
 0x241   : > { %v2446_v34 = vor.u32 %v2445_v28, %v2444_v57  ;;  %v2449_v38 = vor.u32 %v2448_v18, %v2447_v6  ;;  %v17078_v26 = vand.u32 2147483647, %v17076_v60  ;;  %vm2456_vm6 = vcmp.lt.s32.totalorder %v12984_v30, 1 }
 0x242   : > { %v2455_v45 = vor.u32 %v2454_v32, %v2453_v35  ;;  %vm2458_vm9 = vcmp.lt.s32.totalorder %v12984_v30, 3  ;;  %v2537_v43 = vadd.s32 1, %v8897_v44  ;;  %v1994_v51 = vsel %vm1911_vm3, %v1993_v25, %v1992_v52 }
 0x243   : > { %vm12996_vm11 = vcmp.le.f32.partialorder %v17078_v26, 0.7853982  ;;  %v13004_v27 = vshrl.u32 %v2382_v13, 30  ;;  %v2432_v54 = vor.u32 8388608, %v2431_v62  ;;  %vm2459_vm5 = vcmp.lt.s32.totalorder %v12984_v30, 4 }
 0x244   : > { %v2096_v57 = vxor.u32 2147483648, %v2095_v19  ;;  %v2171_v6 = vadd.s32 %v12614_v11, %v12620_v61  ;;  %v2187_v59 = vsub.s32 32, %v12956_v16  ;;  %v2465_v28 = vsel %vm2459_vm5, %v2452_v39, 920167782 }
 0x245   : > { %v2192_v18 = vadd.s32 127, %v2191_v37  ;;  %vm2457_vm0 = vcmp.lt.s32.totalorder %v12984_v30, 2  ;;  %v2464_v52 = vsel %vm2456_vm6, %v2443_v20, %v2446_v34  ;;  %v2466_v44 = vsel %vm2458_vm9, %v2449_v38, %v2465_v28 }
 0x246   : > { %v8886_v25 = vmin.u32 %v2284_v17, %v12959_v40  ;;  %v2468_v13 = vsel %vm2456_vm6, %v2446_v34, %v2449_v38  ;;  %v2469_v11 = vsel %vm2459_vm5, %v2455_v45, 1326507024  ;;  %vm2538_vm3 = vcmp.gt.s32.totalorder %v2537_v43, 0 }
 0x247   : > { %9413 = vcosq.f32 %v1894_v9  ;;  %v2384_v61 = vshll.u32 %v13004_v27, 30  ;;  %v2470_v37 = vsel %vm2458_vm9, %v2452_v39, %v2469_v11  ;;  %v13025_v62 = vshll.u32 %v2432_v54, 8 }
 0x248   : > { %v13030_v35 = vsel %vm12924_vm14, %v17067_v63, %v1994_v51  ;;  %v2097_v32 = vsel %vm2014_vm10, %v2096_v57, %v2095_v19  ;;  %v2467_v45 = vsel %vm2457_vm0, %v2464_v52, %v2466_v44  ;;  %v2539_v17 = vsel %vm2538_vm3, %v2537_v43, 0 }
 0x249   : > { %v2188_v26 = vshll.u32 %v12808_v12, %v12956_v16  ;;  %v2189_v28 = vshrl.u32 %v2171_v6, %v2187_v59  ;;  %v2193_v47 = vshll.u32 %v2192_v18, 23  ;;  %v2471_v39 = vsel %vm2457_vm0, %v2468_v13, %v2470_v37 }
 0x24a   : > { %v2286_v54 = vclz %v8886_v25  ;;  %v2440_v46 = vshrl.u32 %v16807_v55, %v12954_v3  ;;  %v16584_v51 = vand.u32 2147483647, %v17073_v24  ;;  %v2541_v11 = vand.u32 31, %v2539_v17 }
 0x24b   : > { %9415 = vsinq.f32 %v1894_v9  ;;  %v13044_v19 = vsub.s32 %v12961_v58, %v2384_v61  ;;  %v13047_v43 = vmul.u32.u64.low %v13025_v62, %v2467_v45  ;;  %v13048_v57 = vmul.u32.u64.high %v13025_v62, %v2467_v45, %v13047_v43 }
 0x24c   : > { %v2461_v12 = vsel %vm2459_vm5, %v2449_v38, 2102212464  ;;  %v13054_v16 = vmul.u32.u64.low %v13025_v62, %v2471_v39  ;;  %v13055_v6 = vmul.u32.u64.high %v13025_v62, %v2471_v39, %v13054_v16  ;;  %v13057_v3 = vsub.s32 32, %v2541_v11 }
 0x24d   : > { %9417 = vcosq.f32 %v13030_v35  ;;  %v13061_v9 = vand.u32 3, %v12982_v36  ;;  %v13066_v58 = vsel %vm12996_vm11, %v17076_v60, %v2097_v32  ;;  %v2190_v59 = vor.u32 %v2189_v28, %v2188_v26 }
 0x24e   : > { %v2194_v18 = vor.u32 4788187, %v2193_v47  ;;  %v8887_v52 = vadd.s32 4294967294, %v2286_v54  ;;  %v2460_v38 = vsel %vm2456_vm6, %v2440_v46, %v2443_v20  ;;  %v2534_v44 = vand.u32 8388607, %v16584_v51 }
 0x24f   : > { %v2462_v25 = vsel %vm2458_vm9, %v2446_v34, %v2461_v12  ;;  %v2544_v13 = vshll.u32 %v16807_v55, %v2541_v11  ;;  %v2547_v61 = vshll.u32 %v16913_v2, %v2541_v11  ;;  %v2553_v37 = vshll.u32 %v16911_v10, %v2541_v11 }
 0x250   : > { %v2387_v32 = vsub.s32 0, %v13044_v19  ;;  %v13078_v45 = vshrl.u32 %v2539_v17, 5  ;;  %v2545_v47 = vshrl.u32 %v16913_v2, %v13057_v3  ;;  %v2548_v20 = vshrl.u32 %v16914_v7, %v13057_v3 }
 0x251   : > { %v13084_v26 = vpop.eup %9413  ;;  %v2197_v28 = vcvt.s32.f32 %v2190_v59  ;;  %v2550_v34 = vshll.u32 %v16914_v7, %v2541_v11  ;;  %v2551_v39 = vshrl.u32 %v16911_v10, %v13057_v3  ;;  %v2554_v54 = vshrl.u32 %v16912_v14, %v13057_v3 }
 0x252   : > { %17081 = vst [vmem:[#allocation106_spill] sm:$0xff] %v13084_v26  ;;  %vm8888_vm14 = vcmp.lt.s32.totalorder %v8887_v52, 0  ;;  %v2463_v17 = vsel %vm2457_vm0, %v2460_v38, %v2462_v25  ;;  %v2535_v46 = vor.u32 8388608, %v2534_v44  ;;  %v2556_v12 = vshll.u32 %v16912_v14, %v2541_v11 }
 0x253   : > { %v2482_v16 = vadd.s32 1, %v13048_v57  ;;  %v2546_v51 = vor.u32 %v2545_v47, %v2544_v13  ;;  %v2549_v41 = vor.u32 %v2548_v20, %v2547_v61  ;;  %v2555_v59 = vor.u32 %v2554_v54, %v2553_v37 }
 0x254   : > { %v8890_v29 = vmin.u32 %v2387_v32, %v13044_v19  ;;  %vm2481_vm13 = vc.u32 %v13055_v6, %v13047_v43  ;;  %v2557_v36 = vshrl.u32 %v16915_v48, %v13057_v3  ;;  %vm2559_vm8 = vcmp.lt.s32.totalorder %v13078_v45, 1 }
 0x255   : > { %v13101_v30 = vpop.eup %9415  ;;  %vm1904_vm6 = vcmp.eq.s32.totalorder %v12942_v53, 2  ;;  %v2195_v11 = vand.u32 2147483647, %v2194_v18  ;;  %v13104_v38 = vsel %vm8888_vm14, 0, %v8887_v52  ;;  %v2552_v44 = vor.u32 %v2551_v39, %v2550_v34 }
 0x256   : > { %17082 = vst [vmem:[#allocation107_spill] sm:$0xff] %v13101_v30  ;;  %vm2562_vm9 = vcmp.lt.s32.totalorder %v13078_v45, 4  ;;  %vm2117_vm5 = vcmp.lt.s32.totalorder %v17033_v31, 0  ;;  %v2479_v25 = vmul.u32 %v13025_v62, %v2463_v17  ;;  %v2558_v13 = vor.u32 %v2557_v36, %v2556_v12 }
 0x257   : > { %vm2561_vm0 = vcmp.lt.s32.totalorder %v13078_v45, 3  ;;  %v13110_v61 = vshll.u32 %v2535_v46, 8  ;;  %v13112_v37 = vpop.eup %9417  ;;  %v2483_v32 = vsel %vm2481_vm13, %v2482_v16, %v13048_v57  ;;  %vm2560_vm3 = vcmp.lt.s32.totalorder %v13078_v45, 2 }
 0x258   : > { %17083 = vst [vmem:[#allocation108_spill] sm:$0xff] %v13112_v37  ;;  %v2567_v18 = vsel %vm2559_vm8, %v2546_v51, %v2549_v41  ;;  %v2568_v52 = vsel %vm2562_vm9, %v2555_v59, 920167782  ;;  %v16592_v47 = vxor.u32 2147483648, %v13084_v26  ;;  %9419 = vsinq.f32 %v13030_v35 }
 0x259   : > { %v2098_v36 = vsub.s32 4, %v12579_v4  ;;  %v2389_v62 = vclz %v8890_v29  ;;  %vm1901_vm14 = vcmp.eq.s32.totalorder %v12942_v53, 0  ;;  %9421 = vcosq.f32 %v13066_v58 }
 0x25a   : > { %v17084_v57 = vand.u32 2147483647, %v17033_v31  ;;  %v2198_v34 = vmul.f32 %v2197_v28, %v2195_v11  ;;  %v2569_v39 = vsel %vm2561_vm0, %v2552_v44, %v2568_v52  ;;  %v2572_v35 = vsel %vm2562_vm9, %v2558_v13, 1326507024  ;;  %v17087_v52 = vld [vmem:[#allocation25_spill] sm:$0xff] }
 0x25b   : > { %v2294_v54 = vsub.s32 4294967266, %v13104_v38  ;;  %v13136_v29 = vadd.s32 %v2483_v32, %v2479_v25  ;;  %v2570_v17 = vsel %vm2560_vm3, %v2567_v18, %v2569_v39  ;;  %v2571_v46 = vsel %vm2559_vm8, %v2549_v41, %v2552_v44 }
 0x25c   : > { %vm13127_vm13 = vcmp.le.f32.partialorder %v17084_v57, 0.7853982  ;;  %v2543_v12 = vshrl.u32 %v16807_v55, %v13057_v3  ;;  %v2573_v28 = vsel %vm2561_vm0, %v2555_v59, %v2572_v35  ;;  %vm1900_vm7 = vcmp.lt.s32.totalorder %v12942_v53, 2 }
 0x25d   : > { %v13147_v16 = vmul.u32.u64.low %v13110_v61, %v2570_v17  ;;  %v13148_v11 = vmul.u32.u64.high %v13110_v61, %v2570_v17, %v13147_v16  ;;  %v2099_v25 = vsel %vm2014_vm10, %v2098_v36, %v12579_v4  ;;  %9423 = vsinq.f32 %v13066_v58 }
 0x25e   : > { %v8891_v13 = vadd.s32 4294967294, %v2389_v62  ;;  %v2564_v3 = vsel %vm2562_vm9, %v2552_v44, 2102212464  ;;  %v2199_v32 = vxor.u32 2147483648, %v2198_v34  ;;  %v2274_v59 = vadd.s32 %v12760_v42, %v12766_v15 }
 0x25f   : > { %v2574_v18 = vsel %vm2560_vm3, %v2571_v46, %v2573_v28  ;;  %v2633_v57 = vand.u32 2139095040, %v17087_v52  ;;  %v2290_v39 = vsub.s32 32, %v13104_v38  ;;  %v2485_v35 = vadd.s32 536870912, %v13136_v29 }
 0x260   : > { %v13166_v4 = vmul.u32.u64.low %v13110_v61, %v2574_v18  ;;  %v13167_v58 = vmul.u32.u64.high %v13110_v61, %v2574_v18, %v13166_v4  ;;  %vm2004_vm10 = vcmp.eq.s32.totalorder %v13061_v9, 0  ;;  %v2295_v44 = vadd.s32 127, %v2294_v54 }
 0x261   : > { %v2563_v36 = vsel %vm2559_vm8, %v2543_v12, %v2546_v51  ;;  %v2565_v42 = vsel %vm2561_vm0, %v2549_v41, %v2564_v3  ;;  %v2634_v15 = vshrl.u32 %v2633_v57, 23  ;;  %v16593_v62 = vxor.u32 2147483648, %v13101_v30 }
 0x262   : > { %v1906_v17 = vsel %vm1904_vm6, %v16592_v47, %v13101_v30  ;;  %vm2007_vm9 = vcmp.eq.s32.totalorder %v13061_v9, 2  ;;  %vm8892_vm2 = vcmp.lt.s32.totalorder %v8891_v13, 0  ;;  %v13183_v54 = vsel %vm12996_vm11, 0, %v2099_v25  ;;  %v13189_v12 = vpop.eup %9419 }
 0x263   : > { %17088 = vst [vmem:[#allocation109_spill] sm:$0xff] %v13183_v54  ;;  %v2200_v51 = vsel %vm2117_vm5, %v2199_v32, %v2198_v34  ;;  %v2291_v41 = vshll.u32 %v12959_v40, %v13104_v38  ;;  %v8901_v46 = vadd.s32 4294967169, %v2634_v15  ;;  %17089 = vst [vmem:[#allocation110_spill] sm:$0xff] %v13189_v12  ;;  %vm16616_vm8 = vweird.f32 %v16984_v0  ;;  %v13198_v18 = vpop.eup %9421 }
 0x264   : > { %vm16615_vm6 = vweird.f32 %v17061_v56  ;;  %v2292_v28 = vshrl.u32 %v2274_v59, %v2290_v39  ;;  %v13193_v3 = vshrl.u32 %v2485_v35, 30  ;;  %v2566_v49 = vsel %vm2560_vm3, %v2563_v36, %v2565_v42  ;;  %17090 = vst [vmem:[#allocation111_spill] sm:$0xff] %v13198_v18 }
 0x265   : > { %v2585_v25 = vadd.s32 1, %v13148_v11  ;;  %vm2003_vm11 = vcmp.lt.s32.totalorder %v13061_v9, 2  ;;  %v2296_v40 = vshll.u32 %v2295_v44, 23  ;;  %v2392_v38 = vsel %vm8892_vm2, 0, %v8891_v13 }
 0x266   : > { %vm2584_vm0 = vc.u32 %v13167_v58, %v13147_v16  ;;  %v2640_v34 = vadd.s32 1, %v8901_v46  ;;  %v1903_v45 = vsel %vm1901_vm14, %v13084_v26, %v16593_v62  ;;  %v16594_v32 = vxor.u32 2147483648, %v13112_v37  ;;  %v17102_v26 = vld [vmem:[#allocation20_spill] sm:$0xff] }
 0x267   : > { %v13211_v59 = vand.u32 3, %v13183_v54  ;;  %v2203_v57 = vsel %vm13127_vm13, %v17033_v31, %v2200_v51  ;;  %v16597_v13 = vxor.u32 2147483648, %v13189_v12  ;;  %v2201_v39 = vsub.s32 4, %v12755_v8  ;;  %v13219_v4 = vpop.eup %9423 }
 0x268   : > { %v2582_v35 = vmul.u32 %v13110_v61, %v2566_v49  ;;  %vm2641_vm2 = vcmp.gt.s32.totalorder %v2640_v34, 0  ;;  %17091 = vst [vmem:[#allocation112_spill] sm:$0xff] %v13219_v4  ;;  %v2397_v44 = vsub.s32 4294967266, %v2392_v38  ;;  %v2487_v36 = vshll.u32 %v13193_v3, 30 }
 0x269   : > { %v2586_v42 = vsel %vm2584_vm0, %v2585_v25, %v13148_v11  ;;  %v2642_v15 = vsel %vm2641_vm2, %v2640_v34, 0  ;;  %v1907_v46 = vsel %vm1900_vm7, %v1903_v45, %v1906_v17  ;;  %9425 = vcosq.f32 %v2203_v57 }
 0x26a   : > { %v2293_v51 = vor.u32 %v2292_v28, %v2291_v41  ;;  %v2297_v47 = vor.u32 4788187, %v2296_v40  ;;  %vm2107_vm3 = vcmp.eq.s32.totalorder %v13211_v59, 0  ;;  %v2377_v61 = vadd.s32 %v12876_v33, %v12873_v50 }
 0x26b   : > { %v2393_v49 = vsub.s32 32, %v2392_v38  ;;  %v2644_v62 = vand.u32 31, %v2642_v15  ;;  %v2009_v11 = vsel %vm2007_vm9, %v16594_v32, %v13189_v12  ;;  %vm2110_vm14 = vcmp.eq.s32.totalorder %v13211_v59, 2 }
 0x26c   : > { %9427 = vsinq.f32 %v2203_v57  ;;  %v13234_v53 = vadd.s32 %v2586_v42, %v2582_v35  ;;  %v2006_v17 = vsel %vm2004_vm10, %v13112_v37, %v16597_v13  ;;  %v2202_v50 = vsel %vm2117_vm5, %v2201_v39, %v12755_v8  ;;  %v17092_v42 = vld [vmem:[#allocation39_spill] sm:$0xff] }
 0x26d   : > { %v2398_v33 = vadd.s32 127, %v2397_v44  ;;  %v13245_v41 = vsub.s32 %v13136_v29, %v2487_v36  ;;  %v16596_v28 = vxor.u32 2147483648, %v13219_v4  ;;  %v16595_v25 = vxor.u32 2147483648, %v13198_v18 }
 0x26e   : > { %v2298_v40 = vand.u32 2147483647, %v2297_v47  ;;  %v2300_v34 = vcvt.s32.f32 %v2293_v51  ;;  %v2394_v45 = vshll.u32 %v13044_v19, %v2392_v38  ;;  %v2395_v57 = vshrl.u32 %v2377_v61, %v2393_v49 }
 0x26f   : > { %v13250_v35 = vsub.s32 32, %v2644_v62  ;;  %v2736_v32 = vand.u32 2139095040, %v17092_v42  ;;  %v13256_v8 = vsel %vm16616_vm8, nan, %v12947_v5  ;;  %v13260_v29 = vsel %vm16615_vm6, nan, %v1907_v46 }
 0x270   : > { %17093 = vst [vmem:[#allocation113_spill] sm:$0xff] %v13256_v8  ;;  %17094 = vst [vmem:[#allocation114_spill] sm:$0xff] %v13260_v29  ;;  %v13264_v47 = vsel %vm13127_vm13, 0, %v2202_v50  ;;  %v2588_v19 = vadd.s32 536870912, %v13234_v53  ;;  %v13269_v38 = vsel %vm2003_vm11, %v2006_v17, %v2009_v11  ;;  %v2399_v44 = vshll.u32 %v2398_v33, 23 }
 0x271   : > { %17095 = vst [vmem:[#allocation115_spill] sm:$0xff] %v13264_v47  ;;  %v13272_v39 = vand.u32 3, %v13264_v47  ;;  %v2490_v5 = vsub.s32 0, %v13245_v41  ;;  %v13280_v20 = vsel %vm2107_vm3, %v13198_v18, %v16596_v28  ;;  %v13287_v9 = vsel %vm2110_vm14, %v16595_v25, %v13219_v4 }
 0x272   : > { %vm2220_vm7 = vcmp.lt.s32.totalorder %v17043_v1, 0  ;;  %v2301_v36 = vmul.f32 %v2300_v34, %v2298_v40  ;;  %v2396_v51 = vor.u32 %v2395_v57, %v2394_v45  ;;  %v2656_v61 = vshll.u32 %v16911_v10, %v2644_v62 }
 0x273   : > { %v2657_v49 = vshrl.u32 %v16912_v14, %v13250_v35  ;;  %v2737_v11 = vshrl.u32 %v2736_v32, 23  ;;  %v13294_v17 = vpop.eup %9425  ;;  %v13296_v50 = vshrl.u32 %v2588_v19, 30  ;;  %v13298_v33 = vshrl.u32 %v2642_v15, 5 }
 0x274   : > { %17096 = vst [vmem:[#allocation116_spill] sm:$0xff] %v13294_v17  ;;  %v2659_v25 = vshll.u32 %v16912_v14, %v2644_v62  ;;  %v2660_v40 = vshrl.u32 %v16915_v48, %v13250_v35  ;;  %vm16649_vm5 = vweird.f32 %v17067_v63  ;;  %v17097_v34 = vand.u32 2147483647, %v17043_v1 }
 0x275   : > { %v2400_v32 = vor.u32 4788187, %v2399_v44  ;;  %v8894_v57 = vmin.u32 %v2490_v5, %v13245_v41  ;;  %v2647_v19 = vshll.u32 %v16807_v55, %v2644_v62  ;;  %v2650_v15 = vshll.u32 %v16913_v2, %v2644_v62 }
 0x276   : > { %vm13306_vm13 = vcmp.le.f32.partialorder %v17097_v34, 0.7853982  ;;  %v13313_v28 = vpop.eup %9427  ;;  %vm2106_vm10 = vcmp.lt.s32.totalorder %v13211_v59, 2  ;;  %vm2213_vm9 = vcmp.eq.s32.totalorder %v13272_v39, 2  ;;  %v2648_v13 = vshrl.u32 %v16913_v2, %v13250_v35 }
 0x277   : > { %17100 = vst [vmem:[#allocation117_spill] sm:$0xff] %v13313_v28  ;;  %v2651_v34 = vshrl.u32 %v16914_v7, %v13250_v35  ;;  %v2653_v44 = vshll.u32 %v16914_v7, %v2644_v62  ;;  %v2654_v5 = vshrl.u32 %v16911_v10, %v13250_v35  ;;  %vm2210_vm11 = vcmp.eq.s32.totalorder %v13272_v39, 0 }
 0x278   : > { %v2304_v29 = vsub.s32 4, %v12917_v22  ;;  %v2658_v8 = vor.u32 %v2657_v49, %v2656_v61  ;;  %v8905_v56 = vadd.s32 4294967169, %v2737_v11  ;;  %v2590_v0 = vshll.u32 %v13296_v50, 30 }
 0x279   : > { %v17101_v18 = vand.u32 2147483647, %v17087_v52  ;;  %v2661_v37 = vor.u32 %v2660_v40, %v2659_v25  ;;  %vm2665_vm0 = vcmp.lt.s32.totalorder %v13298_v33, 4  ;;  %v16617_v62 = vxor.u32 2147483648, %v13313_v28 }
 0x27a   : > { %v2302_v12 = vxor.u32 2147483648, %v2301_v36  ;;  %vm2323_vm2 = vcmp.lt.s32.totalorder %v17102_v26, 0  ;;  %v2401_v30 = vand.u32 2147483647, %v2400_v32  ;;  %v2403_v47 = vcvt.s32.f32 %v2396_v51 }
 0x27b   : > { %v2637_v4 = vand.u32 8388607, %v17101_v18  ;;  %v2492_v46 = vclz %v8894_v57  ;;  %v2649_v54 = vor.u32 %v2648_v13, %v2647_v19  ;;  %v13333_v23 = vor.u32 %v2651_v34, %v2650_v15 }
 0x27c   : > { %v2655_v61 = vor.u32 %v2654_v5, %v2653_v44  ;;  %vm2662_vm3 = vcmp.lt.s32.totalorder %v13298_v33, 1  ;;  %vm2664_vm14 = vcmp.lt.s32.totalorder %v13298_v33, 3  ;;  %v2671_v18 = vsel %vm2665_vm0, %v2658_v8, 920167782 }
 0x27d   : > { %v2743_v25 = vadd.s32 1, %v8905_v56  ;;  %v2407_v49 = vsub.s32 4, %v13004_v27  ;;  %v13341_v11 = vsub.s32 %v13234_v53, %v2590_v0  ;;  %v2638_v40 = vor.u32 8388608, %v2637_v4 }
 0x27e   : > { %v2675_v13 = vsel %vm2665_vm0, %v2661_v37, 1326507024  ;;  %v2303_v51 = vsel %vm2220_vm7, %v2302_v12, %v2301_v36  ;;  %v13347_v32 = vmul.f32 %v2403_v47, %v2401_v30  ;;  %v16618_v57 = vand.u32 2147483647, %v17092_v42 }
 0x27f   : > { %vm2744_vm6 = vcmp.gt.s32.totalorder %v2743_v25, 0  ;;  %vm2663_vm8 = vcmp.lt.s32.totalorder %v13298_v33, 2  ;;  %v2670_v56 = vsel %vm2662_vm3, %v2649_v54, %v13333_v23  ;;  %v2672_v0 = vsel %vm2664_vm14, %v2655_v61, %v2671_v18 }
 0x280   : > { %v2745_v4 = vsel %vm2744_vm6, %v2743_v25, 0  ;;  %v8895_v53 = vadd.s32 4294967294, %v2492_v46  ;;  %v2674_v37 = vsel %vm2662_vm3, %v13333_v23, %v2655_v61  ;;  %v2676_v30 = vsel %vm2664_vm14, %v2658_v8, %v2675_v13 }
 0x281   : > { %v2747_v12 = vand.u32 31, %v2745_v4  ;;  %v13364_v47 = vsel %vm16649_vm5, nan, %v13269_v38  ;;  %v13369_v36 = vsel %vm13306_vm13, %v17043_v1, %v2303_v51  ;;  %v2593_v46 = vsub.s32 0, %v13341_v11 }
 0x282   : > { %17103 = vst [vmem:[#allocation118_spill] sm:$0xff] %v13364_v47  ;;  %v13372_v19 = vshll.u32 %v2638_v40, 8  ;;  %v13378_v8 = vsel %vm2106_vm10, %v13280_v20, %v13287_v9  ;;  %v17104_v15 = vxor.u32 2147483648, %v13294_v17  ;;  %v13390_v34 = vsel %vm2220_vm7, %v2304_v29, %v12917_v22 }
 0x283   : > { %v2673_v44 = vsel %vm2663_vm8, %v2670_v56, %v2672_v0  ;;  %v13399_v59 = vsel %vm2210_vm11, %v13294_v17, %v16617_v62  ;;  %v13404_v20 = vsel %vm2323_vm2, %v2407_v49, %v13004_v27  ;;  %v2677_v9 = vsel %vm2663_vm8, %v2674_v37, %v2676_v30 }
 0x284   : > { %v13385_v38 = vsel %vm2213_vm9, %v17104_v15, %v13313_v28  ;;  %v13408_v22 = vsub.s32 32, %v2747_v12  ;;  %9429 = vcosq.f32 %v13369_v36  ;;  %v2405_v29 = vxor.u32 2147483648, %v13347_v32 }
 0x285   : > { %vm8896_vm6 = vcmp.lt.s32.totalorder %v8895_v53, 0  ;;  %v2740_v5 = vand.u32 8388607, %v16618_v57  ;;  %v8898_v18 = vmin.u32 %v2593_v46, %v13341_v11  ;;  %v2646_v25 = vshrl.u32 %v16807_v55, %v13250_v35 }
 0x286   : > { %v13418_v27 = vmul.u32.u64.low %v13372_v19, %v2673_v44  ;;  %v13419_v49 = vmul.u32.u64.high %v13372_v19, %v2673_v44, %v13418_v27  ;;  %v2667_v40 = vsel %vm2665_vm0, %v2655_v61, 2102212464  ;;  %v13428_v56 = vshrl.u32 %v2745_v4, 5 }
 0x287   : > { %v13425_v13 = vmul.u32.u64.low %v13372_v19, %v2677_v9  ;;  %v13426_v51 = vmul.u32.u64.high %v13372_v19, %v2677_v9, %v13425_v13  ;;  %v2750_v0 = vshll.u32 %v16807_v55, %v2747_v12  ;;  %v2751_v37 = vshrl.u32 %v16913_v2, %v13408_v22 }
 0x288   : > { %v2753_v35 = vshll.u32 %v16913_v2, %v2747_v12  ;;  %v2754_v30 = vshrl.u32 %v16914_v7, %v13408_v22  ;;  %v2756_v46 = vshll.u32 %v16914_v7, %v2747_v12  ;;  %v2757_v61 = vshrl.u32 %v16911_v10, %v13408_v22 }
 0x289   : > { %v2759_v15 = vshll.u32 %v16911_v10, %v2747_v12  ;;  %v2760_v4 = vshrl.u32 %v16912_v14, %v13408_v22  ;;  %v13443_v44 = vsel %vm8896_vm6, 0, %v8895_v53  ;;  %v2595_v9 = vclz %v8898_v18 }
 0x28a   : > { %v2762_v13 = vshll.u32 %v16912_v14, %v2747_v12  ;;  %v2763_v62 = vshrl.u32 %v16915_v48, %v13408_v22  ;;  %vm16648_vm7 = vweird.f32 %v17076_v60  ;;  %v2480_v57 = vadd.s32 %v13047_v43, %v13055_v6 }
 0x28b   : > { %v2496_v47 = vsub.s32 32, %v13443_v44  ;;  %v2666_v63 = vsel %vm2662_vm3, %v2646_v25, %v2649_v54  ;;  %v2741_v17 = vor.u32 8388608, %v2740_v5  ;;  %vm2209_vm10 = vcmp.lt.s32.totalorder %v13272_v39, 2  ;;  %v17108_v25 = vld [vmem:[#allocation40_spill] sm:$0xff] }
 0x28c   : > { %v2668_v53 = vsel %vm2664_vm14, %v13333_v23, %v2667_v40  ;;  %v2752_v12 = vor.u32 %v2751_v37, %v2750_v0  ;;  %v2755_v18 = vor.u32 %v2754_v30, %v2753_v35  ;;  %v2761_v28 = vor.u32 %v2760_v4, %v2759_v15 }
 0x28d   : > { %v17105_v42 = vand.u32 2147483647, %v17102_v26  ;;  %v2500_v43 = vsub.s32 4294967266, %v13443_v44  ;;  %v2758_v6 = vor.u32 %v2757_v61, %v2756_v46  ;;  %vm2765_vm11 = vcmp.lt.s32.totalorder %v13428_v56, 1 }
 0x28e   : > { %vm2768_vm0 = vcmp.lt.s32.totalorder %v13428_v56, 4  ;;  %v2406_v23 = vsel %vm2323_vm2, %v2405_v29, %v13347_v32  ;;  %v8899_v54 = vadd.s32 4294967294, %v2595_v9  ;;  %v2764_v5 = vor.u32 %v2763_v62, %v2762_v13  ;;  %v13471_v0 = vpop.eup %9429 }
 0x28f   : > { %vm13460_vm9 = vcmp.le.f32.partialorder %v17105_v42, 0.7853982  ;;  %v2839_v40 = vand.u32 2139095040, %v17108_v25  ;;  %17109 = vst [vmem:[#allocation119_spill] sm:$0xff] %v13471_v0  ;;  %v2669_v42 = vsel %vm2663_vm8, %v2666_v63, %v2668_v53  ;;  %v2688_v37 = vadd.s32 1, %v13419_v49 }
 0x290   : > { %vm2767_vm3 = vcmp.lt.s32.totalorder %v13428_v56, 3  ;;  %v13477_v35 = vshll.u32 %v2741_v17, 8  ;;  %vm16626_vm14 = vweird.f32 %v17033_v31  ;;  %vm2687_vm2 = vc.u32 %v13426_v51, %v13418_v27 }
 0x291   : > { %vm2766_vm6 = vcmp.lt.s32.totalorder %v13428_v56, 2  ;;  %v2773_v62 = vsel %vm2765_vm11, %v2752_v12, %v2755_v18  ;;  %v2774_v33 = vsel %vm2768_vm0, %v2761_v28, 920167782  ;;  %v2497_v63 = vshll.u32 %v13245_v41, %v13443_v44 }
 0x292   : > { %v2498_v32 = vshrl.u32 %v2480_v57, %v2496_v47  ;;  %v2501_v29 = vadd.s32 127, %v2500_v43  ;;  %v2777_v17 = vsel %vm2765_vm11, %v2755_v18, %v2758_v6  ;;  %v2685_v30 = vmul.u32 %v13372_v19, %v2669_v42 }
 0x293   : > { %v2775_v46 = vsel %vm2767_vm3, %v2758_v6, %v2774_v33  ;;  %v2778_v61 = vsel %vm2768_vm0, %v2764_v5, 1326507024  ;;  %v2840_v15 = vshrl.u32 %v2839_v40, 23  ;;  %vm8900_vm8 = vcmp.lt.s32.totalorder %v8899_v54, 0 }
 0x294   : > { %v2689_v4 = vsel %vm2687_vm2, %v2688_v37, %v13419_v49  ;;  %v2776_v41 = vsel %vm2766_vm6, %v2773_v62, %v2775_v46  ;;  %v2779_v57 = vsel %vm2767_vm3, %v2761_v28, %v2778_v61  ;;  %v2502_v13 = vshll.u32 %v2501_v29, 23 }
 0x295   : > { %v2780_v47 = vsel %vm2766_vm6, %v2777_v17, %v2779_v57  ;;  %v13504_v19 = vmul.u32.u64.low %v13477_v35, %v2776_v41  ;;  %v13505_v44 = vmul.u32.u64.high %v13477_v35, %v2776_v41, %v13504_v19  ;;  %v8909_v9 = vadd.s32 4294967169, %v2840_v15 }
 0x296   : > { %v2749_v53 = vshrl.u32 %v16807_v55, %v13408_v22  ;;  %v13511_v49 = vmul.u32.u64.low %v13477_v35, %v2780_v47  ;;  %v13512_v43 = vmul.u32.u64.high %v13477_v35, %v2780_v47, %v13511_v49  ;;  %v13517_v28 = vsel %vm16648_vm7, nan, %v13378_v8 }
 0x297   : > { %17110 = vst [vmem:[#allocation120_spill] sm:$0xff] %v13517_v28  ;;  %v13522_v5 = vsel %vm13306_vm13, 0, %v13390_v34  ;;  %v2770_v40 = vsel %vm2768_vm0, %v2758_v6, 2102212464  ;;  %v2846_v42 = vadd.s32 1, %v8909_v9  ;;  %v2216_v22 = vsel %vm2209_vm10, %v13399_v59, %v13385_v38 }
 0x298   : > { %v13531_v37 = vand.u32 3, %v13522_v5  ;;  %v2598_v8 = vsel %vm8900_vm8, 0, %v8899_v54  ;;  %v13534_v62 = vadd.s32 %v2689_v4, %v2685_v30  ;;  %v2409_v45 = vsel %vm13460_vm9, %v17102_v26, %v2406_v23 }
 0x299   : > { %v13542_v34 = vsel %vm13460_vm9, 0, %v13404_v20  ;;  %v2583_v39 = vadd.s32 %v13147_v16, %v13167_v58  ;;  %vm2847_vm13 = vcmp.gt.s32.totalorder %v2846_v42, 0  ;;  %v2499_v38 = vor.u32 %v2498_v32, %v2497_v63 }
 0x29a   : > { %v2503_v59 = vor.u32 4788187, %v2502_v13  ;;  %v2769_v6 = vsel %vm2765_vm11, %v2749_v53, %v2752_v12  ;;  %v2771_v54 = vsel %vm2767_vm3, %v2755_v18, %v2770_v40  ;;  %v2599_v33 = vsub.s32 32, %v2598_v8 }
 0x29b   : > { %v2603_v29 = vsub.s32 4294967266, %v2598_v8  ;;  %v16632_v23 = vand.u32 2147483647, %v17108_v25  ;;  %v2848_v17 = vsel %vm2847_vm13, %v2846_v42, 0  ;;  %v13553_v52 = vsel %vm16626_vm14, nan, %v2216_v22 }
 0x29c   : > { %17111 = vst [vmem:[#allocation121_spill] sm:$0xff] %v13553_v52  ;;  %v13556_v16 = vand.u32 3, %v13542_v34  ;;  %v2691_v58 = vadd.s32 536870912, %v13534_v62  ;;  %v2791_v20 = vadd.s32 1, %v13505_v44  ;;  %9431 = vsinq.f32 %v13369_v36 }
 0x29d   : > { %v2772_v12 = vsel %vm2766_vm6, %v2769_v6, %v2771_v54  ;;  %vm2790_vm10 = vc.u32 %v13512_v43, %v13504_v19  ;;  %v2850_v18 = vand.u32 31, %v2848_v17  ;;  %9433 = vcosq.f32 %v2409_v45 }
 0x29e   : > { %v2504_v63 = vand.u32 2147483647, %v2503_v59  ;;  %v2506_v32 = vcvt.s32.f32 %v2499_v38  ;;  %v2600_v30 = vshll.u32 %v13341_v11, %v2598_v8  ;;  %v2601_v46 = vshrl.u32 %v2583_v39, %v2599_v33 }
 0x29f   : > { %v2604_v61 = vadd.s32 127, %v2603_v29  ;;  %v2843_v15 = vand.u32 8388607, %v16632_v23  ;;  %v2851_v4 = vsub.s32 32, %v2850_v18  ;;  %v13568_v41 = vshrl.u32 %v2691_v58, 30 }
 0x2a0   : > { %v2788_v36 = vmul.u32 %v13477_v35, %v2772_v12  ;;  %v2792_v56 = vsel %vm2790_vm10, %v2791_v20, %v13505_v44  ;;  %v13572_v57 = vshrl.u32 %v2848_v17, 5  ;;  %v2853_v47 = vshll.u32 %v16807_v55, %v2850_v18 }
 0x2a1   : > { %v2854_v9 = vshrl.u32 %v16913_v2, %v2851_v4  ;;  %v2856_v11 = vshll.u32 %v16913_v2, %v2850_v18  ;;  %v2857_v13 = vshrl.u32 %v16914_v7, %v2851_v4  ;;  %v2859_v53 = vshll.u32 %v16914_v7, %v2850_v18 }
 0x2a2   : > { %v2860_v49 = vshrl.u32 %v16911_v10, %v2851_v4  ;;  %v2862_v40 = vshll.u32 %v16911_v10, %v2850_v18  ;;  %v2863_v35 = vshrl.u32 %v16912_v14, %v2851_v4  ;;  %v16627_v44 = vxor.u32 2147483648, %v13471_v0 }
 0x2a3   : > { %9435 = vsinq.f32 %v2409_v45  ;;  %v2507_v42 = vmul.f32 %v2506_v32, %v2504_v63  ;;  %v2605_v22 = vshll.u32 %v2604_v61, 23  ;;  %v2602_v8 = vor.u32 %v2601_v46, %v2600_v30  ;;  %v17112_v45 = vld [vmem:[#allocation23_spill] sm:$0xff] }
 0x2a4   : > { %v2693_v39 = vshll.u32 %v13568_v41, 30  ;;  %v2844_v38 = vor.u32 8388608, %v2843_v15  ;;  %v2865_v59 = vshll.u32 %v16912_v14, %v2850_v18  ;;  %vm2426_vm9 = vcmp.lt.s32.totalorder %v17060_v21, 0 }
 0x2a5   : > { %v13586_v6 = vadd.s32 %v2792_v56, %v2788_v36  ;;  %v2855_v54 = vor.u32 %v2854_v9, %v2853_v47  ;;  %v2858_v33 = vor.u32 %v2857_v13, %v2856_v11  ;;  %v2866_v29 = vshrl.u32 %v16915_v48, %v2851_v4 }
 0x2a6   : > { %v2861_v17 = vor.u32 %v2860_v49, %v2859_v53  ;;  %v2864_v58 = vor.u32 %v2863_v35, %v2862_v40  ;;  %vm2868_vm11 = vcmp.lt.s32.totalorder %v13572_v57, 1  ;;  %v2942_v20 = vand.u32 2139095040, %v17112_v45  ;;  %v13591_v12 = vpop.eup %9431 }
 0x2a7   : > { %17113 = vst [vmem:[#allocation122_spill] sm:$0xff] %v13591_v12  ;;  %vm2313_vm0 = vcmp.eq.s32.totalorder %v13531_v37, 0  ;;  %vm2316_vm3 = vcmp.eq.s32.totalorder %v13531_v37, 2  ;;  %v2510_v18 = vsub.s32 4, %v13193_v3  ;;  %v2606_v63 = vor.u32 4788187, %v2605_v22  ;;  %v13598_v30 = vpop.eup %9433 }
 0x2a8   : > { %v2852_v32 = vshrl.u32 %v16807_v55, %v2851_v4  ;;  %vm2871_vm2 = vcmp.lt.s32.totalorder %v13572_v57, 4  ;;  %17114 = vst [vmem:[#allocation123_spill] sm:$0xff] %v13598_v30  ;;  %v13601_v46 = vsub.s32 %v13534_v62, %v2693_v39  ;;  %v2867_v61 = vor.u32 %v2866_v29, %v2865_v59 }
 0x2a9   : > { %vm2870_vm6 = vcmp.lt.s32.totalorder %v13572_v57, 3  ;;  %v2873_v15 = vsel %vm2871_vm2, %v2861_v17, 2102212464  ;;  %v17115_v36 = vand.u32 2147483647, %v17060_v21  ;;  %v2794_v4 = vadd.s32 536870912, %v13586_v6 }
 0x2aa   : > { %vm2869_vm13 = vcmp.lt.s32.totalorder %v13572_v57, 2  ;;  %v2876_v62 = vsel %vm2868_vm11, %v2855_v54, %v2858_v33  ;;  %v2884_v47 = vshll.u32 %v2844_v38, 8  ;;  %v2508_v9 = vxor.u32 2147483648, %v2507_v42 }
 0x2ab   : > { %vm13608_vm8 = vcmp.le.f32.partialorder %v17115_v36, 0.7853982  ;;  %v2609_v11 = vcvt.s32.f32 %v2602_v8  ;;  %v2877_v13 = vsel %vm2871_vm2, %v2864_v58, 920167782  ;;  %v2943_v53 = vshrl.u32 %v2942_v20, 23 }
 0x2ac   : > { %vm2312_vm10 = vcmp.lt.s32.totalorder %v13531_v37, 2  ;;  %v2607_v49 = vand.u32 2147483647, %v2606_v63  ;;  %v2872_v40 = vsel %vm2868_vm11, %v2852_v32, %v2855_v54  ;;  %v2874_v35 = vsel %vm2870_vm6, %v2858_v33, %v2873_v15 }
 0x2ad   : > { %v2878_v22 = vsel %vm2870_vm6, %v2861_v17, %v2877_v13  ;;  %vm2529_vm14 = vcmp.lt.s32.totalorder %v17073_v24, 0  ;;  %v2696_v8 = vsub.s32 0, %v13601_v46  ;;  %v2880_v38 = vsel %vm2868_vm11, %v2858_v33, %v2861_v17  ;;  %v13633_v54 = vpop.eup %9435 }
 0x2ae   : > { %v2879_v39 = vsel %vm2869_vm13, %v2876_v62, %v2878_v22  ;;  %v2881_v59 = vsel %vm2871_vm2, %v2867_v61, 1326507024  ;;  %17118 = vst [vmem:[#allocation124_spill] sm:$0xff] %v13633_v54  ;;  %v13635_v29 = vshrl.u32 %v2794_v4, 30  ;;  %v16630_v15 = vxor.u32 2147483648, %v13591_v12 }
 0x2af   : > { %v2882_v20 = vsel %vm2870_vm6, %v2864_v58, %v2881_v59  ;;  %v13639_v63 = vmul.u32.u64.low %v2884_v47, %v2879_v39  ;;  %v13640_v32 = vmul.u32.u64.high %v2884_v47, %v2879_v39, %v13639_v63  ;;  %v2875_v36 = vsel %vm2869_vm13, %v2872_v40, %v2874_v35 }
 0x2b0   : > { %v2883_v33 = vsel %vm2869_vm13, %v2880_v38, %v2882_v20  ;;  %v8913_v17 = vadd.s32 4294967169, %v2943_v53  ;;  %v2511_v61 = vsel %vm2426_vm9, %v2510_v18, %v13193_v3  ;;  %v17119_v4 = vand.u32 2147483647, %v17073_v24 }
 0x2b1   : > { %v2610_v62 = vmul.f32 %v2609_v11, %v2607_v49  ;;  %v13657_v13 = vmul.u32.u64.low %v2884_v47, %v2883_v33  ;;  %v13658_v22 = vmul.u32.u64.high %v2884_v47, %v2883_v33, %v13657_v13  ;;  %vm2416_vm2 = vcmp.eq.s32.totalorder %v13556_v16, 0 }
 0x2b2   : > { %vm13653_vm11 = vcmp.le.f32.partialorder %v17119_v4, 0.7853982  ;;  %vm2419_vm6 = vcmp.eq.s32.totalorder %v13556_v16, 2  ;;  %v2509_v57 = vsel %vm2426_vm9, %v2508_v9, %v2507_v42  ;;  %v2949_v53 = vadd.s32 1, %v8913_v17 }
 0x2b3   : > { %v8902_v3 = vmin.u32 %v2696_v8, %v13601_v46  ;;  %v2796_v18 = vshll.u32 %v13635_v29, 30  ;;  %v2891_v40 = vmul.u32 %v2884_v47, %v2875_v36  ;;  %v2894_v35 = vadd.s32 1, %v13640_v32 }
 0x2b4   : > { %v2315_v11 = vsel %vm2313_vm0, %v13471_v0, %v16630_v15  ;;  %v2318_v42 = vsel %vm2316_vm3, %v16627_v44, %v13591_v12  ;;  %v13679_v9 = vsel %vm13608_vm8, 0, %v2511_v61  ;;  %vm2950_vm9 = vcmp.gt.s32.totalorder %v2949_v53, 0 }
 0x2b5   : > { %17122 = vst [vmem:[#allocation125_spill] sm:$0xff] %v13679_v9  ;;  %v16629_v47 = vxor.u32 2147483648, %v13633_v54  ;;  %v16628_v49 = vxor.u32 2147483648, %v13598_v30  ;;  %v2611_v8 = vxor.u32 2147483648, %v2610_v62  ;;  %vm2893_vm13 = vc.u32 %v13658_v22, %v13639_v63 }
 0x2b6   : > { %v2512_v39 = vsel %vm13608_vm8, %v17060_v21, %v2509_v57  ;;  %v2613_v38 = vsub.s32 4, %v13296_v50  ;;  %v2895_v59 = vsel %vm2893_vm13, %v2894_v35, %v13640_v32  ;;  %v2951_v20 = vsel %vm2950_vm9, %v2949_v53, 0  ;;  %v17123_v57 = vld [vmem:[#allocation26_spill] sm:$0xff] }
 0x2b7   : > { %v2698_v36 = vclz %v8902_v3  ;;  %v13691_v33 = vsub.s32 %v13586_v6, %v2796_v18  ;;  %v2896_v17 = vadd.s32 %v2895_v59, %v2891_v40  ;;  %v16631_v61 = vand.u32 2147483647, %v17112_v45 }
 0x2b8   : > { %v13696_v4 = vsel %vm2312_vm10, %v2315_v11, %v2318_v42  ;;  %v13699_v13 = vand.u32 3, %v13679_v9  ;;  %v2953_v56 = vand.u32 31, %v2951_v20  ;;  %v3045_v44 = vand.u32 2139095040, %v17123_v57 }
 0x2b9   : > { %v13707_v6 = vsel %vm2419_vm6, %v16628_v49, %v13633_v54  ;;  %9437 = vcosq.f32 %v2512_v39  ;;  %v2612_v32 = vsel %vm2529_vm14, %v2611_v8, %v2610_v62  ;;  %v2897_v37 = vadd.s32 536870912, %v2896_v17 }
 0x2ba   : > { %v13716_v53 = vsel %vm2416_vm2, %v13598_v30, %v16629_v47  ;;  %9439 = vsinq.f32 %v2512_v39  ;;  %v13721_v3 = vsel %vm2529_vm14, %v2613_v38, %v13296_v50  ;;  %v2954_v18 = vsub.s32 32, %v2953_v56 }
 0x2bb   : > { %v8903_v40 = vadd.s32 4294967294, %v2698_v36  ;;  %v2799_v35 = vsub.s32 0, %v13691_v33  ;;  %v13724_v11 = vshrl.u32 %v2897_v37, 30  ;;  %v2946_v62 = vand.u32 8388607, %v16631_v61 }
 0x2bc   : > { %v2615_v42 = vsel %vm13653_vm11, %v17073_v24, %v2612_v32  ;;  %v2952_v8 = vshrl.u32 %v2951_v20, 5  ;;  %v2956_v39 = vshll.u32 %v16807_v55, %v2953_v56  ;;  %v3046_v59 = vshrl.u32 %v3045_v44, 23 }
 0x2bd   : > { %v2899_v50 = vshll.u32 %v13724_v11, 30  ;;  %v2957_v38 = vshrl.u32 %v16913_v2, %v2954_v18  ;;  %v2959_v36 = vshll.u32 %v16913_v2, %v2953_v56  ;;  %v2960_v37 = vshrl.u32 %v16914_v7, %v2954_v18 }
 0x2be   : > { %v2962_v49 = vshll.u32 %v16914_v7, %v2953_v56  ;;  %v2963_v47 = vshrl.u32 %v16911_v10, %v2954_v18  ;;  %v2965_v15 = vshll.u32 %v16911_v10, %v2953_v56  ;;  %v2966_v32 = vshrl.u32 %v16912_v14, %v2954_v18 }
 0x2bf   : > { %vm16646_vm14 = vweird.f32 %v17043_v1  ;;  %vm2415_vm0 = vcmp.lt.s32.totalorder %v13556_v16, 2  ;;  %9441 = vcosq.f32 %v2615_v42  ;;  %vm8904_vm3 = vcmp.lt.s32.totalorder %v8903_v40, 0 }
 0x2c0   : > { %v8906_v44 = vmin.u32 %v2799_v35, %v13691_v33  ;;  %v2947_v20 = vor.u32 8388608, %v2946_v62  ;;  %v13743_v61 = vsub.s32 %v2896_v17, %v2899_v50  ;;  %v2968_v23 = vshll.u32 %v16912_v14, %v2953_v56 }
 0x2c1   : > { %v2969_v52 = vshrl.u32 %v16915_v48, %v2954_v18  ;;  %v8917_v28 = vadd.s32 4294967169, %v3046_v59  ;;  %v2955_v31 = vshrl.u32 %v16807_v55, %v2954_v18  ;;  %v2958_v30 = vor.u32 %v2957_v38, %v2956_v39 }
 0x2c2   : > { %v2961_v54 = vor.u32 %v2960_v37, %v2959_v36  ;;  %v2967_v0 = vor.u32 %v2966_v32, %v2965_v15  ;;  %9443 = vsinq.f32 %v2615_v42  ;;  %v2964_v12 = vor.u32 %v2963_v47, %v2962_v49 }
 0x2c3   : > { %v2970_v9 = vor.u32 %v2969_v52, %v2968_v23  ;;  %vm2971_vm8 = vcmp.lt.s32.totalorder %v2952_v8, 1  ;;  %v13748_v60 = vpop.eup %9437  ;;  %v13751_v35 = vsel %vm8904_vm3, 0, %v8903_v40  ;;  %v2801_v17 = vclz %v8906_v44 }
 0x2c4   : > { %17124 = vst [vmem:[#allocation126_spill] sm:$0xff] %v13748_v60  ;;  %vm2973_vm10 = vcmp.lt.s32.totalorder %v2952_v8, 3  ;;  %v2987_v56 = vshll.u32 %v2947_v20, 8  ;;  %v13753_v62 = vpop.eup %9439  ;;  %v2902_v59 = vsub.s32 0, %v13743_v61  ;;  %vm2972_vm2 = vcmp.lt.s32.totalorder %v2952_v8, 2 }
 0x2c5   : > { %17125 = vst [vmem:[#allocation127_spill] sm:$0xff] %v13753_v62  ;;  %vm2974_vm6 = vcmp.lt.s32.totalorder %v2952_v8, 4  ;;  %v3052_v18 = vadd.s32 1, %v8917_v28  ;;  %v2975_v15 = vsel %vm2971_vm8, %v2955_v31, %v2958_v30  ;;  %v2979_v23 = vsel %vm2971_vm8, %v2958_v30, %v2961_v54 }
 0x2c6   : > { %v2976_v47 = vsel %vm2974_vm6, %v2964_v12, 2102212464  ;;  %v2980_v52 = vsel %vm2974_vm6, %v2967_v0, 920167782  ;;  %v2983_v42 = vsel %vm2971_vm8, %v2961_v54, %v2964_v12  ;;  %v2984_v39 = vsel %vm2974_vm6, %v2970_v9, 1326507024 }
 0x2c7   : > { %v2977_v49 = vsel %vm2973_vm10, %v2961_v54, %v2976_v47  ;;  %v2981_v40 = vsel %vm2973_vm10, %v2964_v12, %v2980_v52  ;;  %v2706_v50 = vsub.s32 4294967266, %v13751_v35  ;;  %v8907_v38 = vadd.s32 4294967294, %v2801_v17 }
 0x2c8   : > { %v2982_v36 = vsel %vm2972_vm2, %v2979_v23, %v2981_v40  ;;  %v2985_v28 = vsel %vm2973_vm10, %v2967_v0, %v2984_v39  ;;  %v2978_v31 = vsel %vm2972_vm2, %v2975_v15, %v2977_v49  ;;  %v8910_v12 = vmin.u32 %v2902_v59, %v13743_v61 }
 0x2c9   : > { %v2986_v37 = vsel %vm2972_vm2, %v2983_v42, %v2985_v28  ;;  %v13766_v30 = vmul.u32.u64.low %v2987_v56, %v2982_v36  ;;  %v13767_v32 = vmul.u32.u64.high %v2987_v56, %v2982_v36, %v13766_v30  ;;  %v13770_v44 = vpop.eup %9441  ;;  %vm3053_vm9 = vcmp.gt.s32.totalorder %v3052_v18, 0 }
 0x2ca   : > { %17126 = vst [vmem:[#allocation128_spill] sm:$0xff] %v13770_v44  ;;  %v13773_v54 = vmul.u32.u64.low %v2987_v56, %v2986_v37  ;;  %v13774_v9 = vmul.u32.u64.high %v2987_v56, %v2986_v37, %v13773_v54  ;;  %v13779_v0 = vsel %vm16646_vm14, nan, %v13696_v4  ;;  %v13785_v8 = vsel %vm2415_vm0, %v13716_v53, %v13707_v6 }
 0x2cb   : > { %17127 = vst [vmem:[#allocation129_spill] sm:$0xff] %v13779_v0  ;;  %vm2522_vm13 = vcmp.eq.s32.totalorder %v13699_v13, 2  ;;  %v3054_v20 = vsel %vm3053_vm9, %v3052_v18, 0  ;;  %v16644_v17 = vxor.u32 2147483648, %v13748_v60  ;;  %v13792_v59 = vsel %vm13653_vm11, 0, %v13721_v3 }
 0x2cc   : > { %v2686_v4 = vadd.s32 %v13418_v27, %v13426_v51  ;;  %v2994_v15 = vmul.u32 %v2987_v56, %v2978_v31  ;;  %v13796_v47 = vpop.eup %9443  ;;  %v2702_v16 = vsub.s32 32, %v13751_v35  ;;  %v2707_v6 = vadd.s32 127, %v2706_v50 }
 0x2cd   : > { %17128 = vst [vmem:[#allocation130_spill] sm:$0xff] %v13796_v47  ;;  %v2997_v53 = vadd.s32 1, %v13767_v32  ;;  %v3056_v23 = vand.u32 31, %v3054_v20  ;;  %vm8908_vm0 = vcmp.lt.s32.totalorder %v8907_v38, 0  ;;  %v2904_v18 = vclz %v8910_v12 }
 0x2ce   : > { %vm2996_vm3 = vc.u32 %v13774_v9, %v13766_v30  ;;  %v16645_v58 = vand.u32 2147483647, %v17123_v57  ;;  %v13805_v27 = vand.u32 3, %v13792_v59  ;;  %v13813_v52 = vsel %vm2522_vm13, %v16644_v17, %v13753_v62 }
 0x2cf   : > { %v2998_v51 = vsel %vm2996_vm3, %v2997_v53, %v13767_v32  ;;  %v3057_v56 = vsub.s32 32, %v3056_v23  ;;  %v2703_v40 = vshll.u32 %v13601_v46, %v13751_v35  ;;  %v2704_v50 = vshrl.u32 %v2686_v4, %v2702_v16 }
 0x2d0   : > { %v2999_v42 = vadd.s32 %v2998_v51, %v2994_v15  ;;  %v2708_v36 = vshll.u32 %v2707_v6, 23  ;;  %v13819_v28 = vsel %vm8908_vm0, 0, %v8907_v38  ;;  %v2789_v31 = vadd.s32 %v13504_v19, %v13512_v43 }
 0x2d1   : > { %v8911_v37 = vadd.s32 4294967294, %v2904_v18  ;;  %v3049_v12 = vand.u32 8388607, %v16645_v58  ;;  %v3059_v54 = vshll.u32 %v16807_v55, %v3056_v23  ;;  %v3060_v53 = vshrl.u32 %v16913_v2, %v3057_v56 }
 0x2d2   : > { %v3000_v32 = vadd.s32 536870912, %v2999_v42  ;;  %v3062_v46 = vshll.u32 %v16913_v2, %v3056_v23  ;;  %v3063_v35 = vshrl.u32 %v16914_v7, %v3057_v56  ;;  %v2809_v4 = vsub.s32 4294967266, %v13819_v28 }
 0x2d3   : > { %v3055_v38 = vshrl.u32 %v3054_v20, 5  ;;  %v3065_v15 = vshll.u32 %v16914_v7, %v3056_v23  ;;  %v3066_v19 = vshrl.u32 %v16911_v10, %v3057_v56  ;;  %v13832_v43 = vor.u32 %v2704_v50, %v2703_v40 }
 0x2d4   : > { %v13834_v16 = vor.u32 4788187, %v2708_v36  ;;  %v3068_v6 = vshll.u32 %v16911_v10, %v3056_v23  ;;  %v3069_v18 = vshrl.u32 %v16912_v14, %v3057_v56  ;;  %vm8912_vm11 = vcmp.lt.s32.totalorder %v8911_v37, 0 }
 0x2d5   : > { %v13838_v51 = vshrl.u32 %v3000_v32, 30  ;;  %v3050_v17 = vor.u32 8388608, %v3049_v12  ;;  %v3071_v58 = vshll.u32 %v16912_v14, %v3056_v23  ;;  %vm2519_vm8 = vcmp.eq.s32.totalorder %v13699_v13, 0 }
 0x2d6   : > { %v3061_v20 = vor.u32 %v3060_v53, %v3059_v54  ;;  %v3064_v39 = vor.u32 %v3063_v35, %v3062_v46  ;;  %v3070_v49 = vor.u32 %v3069_v18, %v3068_v6  ;;  %v3072_v40 = vshrl.u32 %v16915_v48, %v3057_v56 }
 0x2d7   : > { %vm2625_vm10 = vcmp.eq.s32.totalorder %v13805_v27, 2  ;;  %v2805_v50 = vsub.s32 32, %v13819_v28  ;;  %v2810_v36 = vadd.s32 127, %v2809_v4  ;;  %v3067_v3 = vor.u32 %v3066_v19, %v3065_v15 }
 0x2d8   : > { %vm3074_vm2 = vcmp.lt.s32.totalorder %v3055_v38, 1  ;;  %vm2622_vm6 = vcmp.eq.s32.totalorder %v13805_v27, 0  ;;  %v2712_v32 = vcvt.s32.f32 %v13832_v43  ;;  %v13848_v23 = vsel %vm8912_vm11, 0, %v8911_v37 }
 0x2d9   : > { %v3058_v12 = vshrl.u32 %v16807_v55, %v3057_v56  ;;  %vm3077_vm9 = vcmp.lt.s32.totalorder %v3055_v38, 4  ;;  %v3002_v54 = vshll.u32 %v13838_v51, 30  ;;  %v3073_v53 = vor.u32 %v3072_v40, %v3071_v58 }
 0x2da   : > { %vm3076_vm13 = vcmp.lt.s32.totalorder %v3055_v38, 3  ;;  %v3079_v46 = vsel %vm3077_vm9, %v3067_v3, 2102212464  ;;  %vm3075_vm0 = vcmp.lt.s32.totalorder %v3055_v38, 2  ;;  %v3082_v35 = vsel %vm3074_vm2, %v3061_v20, %v3064_v39 }
 0x2db   : > { %v3083_v4 = vsel %vm3077_vm9, %v3070_v49, 920167782  ;;  %v3090_v15 = vshll.u32 %v3050_v17, 8  ;;  %vm2518_vm3 = vcmp.lt.s32.totalorder %v13699_v13, 2  ;;  %vm2621_vm11 = vcmp.lt.s32.totalorder %v13805_v27, 2  ;;  %v17129_v17 = vld [vmem:[#allocation25_spill] sm:$0xff] }
 0x2dc   : > { %v2710_v37 = vand.u32 2147483647, %v13834_v16  ;;  %v2806_v56 = vshll.u32 %v13691_v33, %v13819_v28  ;;  %v2807_v19 = vshrl.u32 %v2789_v31, %v2805_v50  ;;  %v2811_v58 = vshll.u32 %v2810_v36, 23 }
 0x2dd   : > { %v2912_v43 = vsub.s32 4294967266, %v13848_v23  ;;  %v3078_v6 = vsel %vm3074_vm2, %v3058_v12, %v3061_v20  ;;  %v3080_v18 = vsel %vm3076_vm13, %v3064_v39, %v3079_v46  ;;  %v3084_v40 = vsel %vm3076_vm13, %v3067_v3, %v3083_v4 }
 0x2de   : > { %vm2632_vm14 = vcmp.lt.s32.totalorder %v17129_v17, 0  ;;  %v13865_v0 = vsub.s32 %v2999_v42, %v3002_v54  ;;  %v3085_v1 = vsel %vm3075_vm0, %v3082_v35, %v3084_v40  ;;  %v3086_v16 = vsel %vm3074_vm2, %v3064_v39, %v3067_v3  ;;  %v17130_v39 = vld [vmem:[#allocation27_spill] sm:$0xff] }
 0x2df   : > { %v3087_v33 = vsel %vm3077_vm9, %v3073_v53, 1326507024  ;;  %vm16688_vm7 = vweird.f32 %v17102_v26  ;;  %v2892_v28 = vadd.s32 %v13639_v63, %v13658_v22  ;;  %vm16687_vm5 = vweird.f32 %v17060_v21  ;;  %v17159_v26 = vld [vmem:[#allocation30_spill] sm:$0xff] }
 0x2e0   : > { %v3088_v31 = vsel %vm3076_vm13, %v3070_v49, %v3087_v33  ;;  %v13874_v20 = vmul.u32.u64.low %v3090_v15, %v3085_v1  ;;  %v13875_v50 = vmul.u32.u64.high %v3090_v15, %v3085_v1, %v13874_v20  ;;  %v2808_v42 = vor.u32 %v2807_v19, %v2806_v56 }
 0x2e1   : > { %v3081_v36 = vsel %vm3075_vm0, %v3078_v6, %v3080_v18  ;;  %v3089_v3 = vsel %vm3075_vm0, %v3086_v16, %v3088_v31  ;;  %v3148_v12 = vand.u32 2139095040, %v17130_v39  ;;  %vm16656_vm2 = vweird.f32 %v17073_v24  ;;  %v17136_v18 = vld [vmem:[#allocation39_spill] sm:$0xff] }
 0x2e2   : > { %v17131_v54 = vand.u32 2147483647, %v17129_v17  ;;  %v2812_v1 = vor.u32 4788187, %v2811_v58  ;;  %v2908_v22 = vsub.s32 32, %v13848_v23  ;;  %v17134_v46 = vxor.u32 2147483648, %v13753_v62 }
 0x2e3   : > { %v13890_v49 = vmul.u32.u64.low %v3090_v15, %v3089_v3  ;;  %v13891_v53 = vmul.u32.u64.high %v3090_v15, %v3089_v3, %v13890_v49  ;;  %v2913_v35 = vadd.s32 127, %v2912_v43  ;;  %v3005_v4 = vsub.s32 0, %v13865_v0 }
 0x2e4   : > { %vm13885_vm9 = vcmp.le.f32.partialorder %v17131_v54, 0.7853982  ;;  %v2521_v38 = vsel %vm2519_vm8, %v13748_v60, %v17134_v46  ;;  %v3149_v56 = vshrl.u32 %v3148_v12, 23  ;;  %v17135_v19 = vxor.u32 2147483648, %v13770_v44 }
 0x2e5   : > { %v2716_v6 = vsub.s32 4, %v13568_v41  ;;  %vm2735_vm13 = vcmp.lt.s32.totalorder %v17136_v18, 0  ;;  %v3097_v40 = vmul.u32 %v3090_v15, %v3081_v36  ;;  %v3100_v16 = vadd.s32 1, %v13875_v50 }
 0x2e6   : > { %v2627_v58 = vsel %vm2625_vm10, %v17135_v19, %v13796_v47  ;;  %v17137_v33 = vxor.u32 2147483648, %v13796_v47  ;;  %v2713_v31 = vmul.f32 %v2712_v32, %v2710_v37  ;;  %v2815_v3 = vcvt.s32.f32 %v2808_v42 }
 0x2e7   : > { %v8921_v12 = vadd.s32 4294967169, %v3149_v56  ;;  %v2813_v54 = vand.u32 2147483647, %v2812_v1  ;;  %v2909_v49 = vshll.u32 %v13743_v61, %v13848_v23  ;;  %v2910_v46 = vshrl.u32 %v2892_v28, %v2908_v22  ;;  %v17138_v1 = vld [vmem:[#allocation28_spill] sm:$0xff] }
 0x2e8   : > { %v2624_v43 = vsel %vm2622_vm6, %v13770_v44, %v17137_v33  ;;  %vm3099_vm8 = vc.u32 %v13891_v53, %v13874_v20  ;;  %v2914_v15 = vshll.u32 %v2913_v35, 23  ;;  %v8914_v36 = vmin.u32 %v3005_v4, %v13865_v0 }
 0x2e9   : > { %v3101_v19 = vsel %vm3099_vm8, %v3100_v16, %v13875_v50  ;;  %v3155_v47 = vadd.s32 1, %v8921_v12  ;;  %v2525_v32 = vsel %vm2518_vm3, %v2521_v38, %v13813_v52  ;;  %v2628_v37 = vsel %vm2621_vm11, %v2624_v43, %v2627_v58 }
 0x2ea   : > { %v2717_v61 = vsel %vm2632_vm14, %v2716_v6, %v13568_v41  ;;  %v13926_v23 = vadd.s32 %v3101_v19, %v3097_v40  ;;  %v2714_v28 = vxor.u32 2147483648, %v2713_v31  ;;  %v2819_v42 = vsub.s32 4, %v13635_v29 }
 0x2eb   : > { %vm3156_vm10 = vcmp.gt.s32.totalorder %v3155_v47, 0  ;;  %v3251_v50 = vand.u32 2139095040, %v17138_v1  ;;  %v2816_v22 = vmul.f32 %v2815_v3, %v2813_v54  ;;  %v2911_v35 = vor.u32 %v2910_v46, %v2909_v49 }
 0x2ec   : > { %v16652_v13 = vand.u32 2147483647, %v17130_v39  ;;  %v3157_v52 = vsel %vm3156_vm10, %v3155_v47, 0  ;;  %v13934_v27 = vsel %vm16688_vm7, nan, %v13785_v8  ;;  %v13938_v41 = vsel %vm13885_vm9, 0, %v2717_v61 }
 0x2ed   : > { %17139 = vst [vmem:[#allocation131_spill] sm:$0xff] %v13934_v27  ;;  %v2915_v38 = vor.u32 4788187, %v2914_v15  ;;  %v3007_v4 = vclz %v8914_v36  ;;  %v13942_v56 = vsel %vm16687_vm5, nan, %v2525_v32  ;;  %v13945_v58 = vand.u32 3, %v13938_v41 }
 0x2ee   : > { %17140 = vst [vmem:[#allocation132_spill] sm:$0xff] %v13942_v56  ;;  %v3103_v47 = vadd.s32 536870912, %v13926_v23  ;;  %v3159_v6 = vand.u32 31, %v3157_v52  ;;  %v13950_v8 = vsel %vm16656_vm2, nan, %v2628_v37  ;;  %v2715_v40 = vsel %vm2632_vm14, %v2714_v28, %v2713_v31 }
 0x2ef   : > { %17141 = vst [vmem:[#allocation133_spill] sm:$0xff] %v13950_v8  ;;  %v13957_v16 = vsel %vm2735_vm13, %v2819_v42, %v13635_v29  ;;  %v3252_v33 = vshrl.u32 %v3251_v50, 23  ;;  %v2817_v43 = vxor.u32 2147483648, %v2816_v22  ;;  %v2918_v3 = vcvt.s32.f32 %v2911_v35 }
 0x2f0   : > { %v3152_v12 = vand.u32 8388607, %v16652_v13  ;;  %v3160_v54 = vsub.s32 32, %v3159_v6  ;;  %v17142_v49 = vand.u32 2147483647, %v17136_v18  ;;  %v8915_v31 = vadd.s32 4294967294, %v3007_v4 }
 0x2f1   : > { %v2916_v15 = vand.u32 2147483647, %v2915_v38  ;;  %v3162_v36 = vshll.u32 %v16807_v55, %v3159_v6  ;;  %v3165_v29 = vshll.u32 %v16913_v2, %v3159_v6  ;;  %v13969_v19 = vshrl.u32 %v3103_v47, 30 }
 0x2f2   : > { %vm13963_vm6 = vcmp.le.f32.partialorder %v17142_v49, 0.7853982  ;;  %v3158_v32 = vshrl.u32 %v3157_v52, 5  ;;  %v3163_v37 = vshrl.u32 %v16913_v2, %v3160_v54  ;;  %v3168_v61 = vshll.u32 %v16914_v7, %v3159_v6 }
 0x2f3   : > { %v3166_v28 = vshrl.u32 %v16914_v7, %v3160_v54  ;;  %v3169_v42 = vshrl.u32 %v16911_v10, %v3160_v54  ;;  %v3171_v50 = vshll.u32 %v16911_v10, %v3159_v6  ;;  %v8925_v35 = vadd.s32 4294967169, %v3252_v33 }
 0x2f4   : > { %v2718_v38 = vsel %vm13885_vm9, %v17129_v17, %v2715_v40  ;;  %v2818_v4 = vsel %vm2735_vm13, %v2817_v43, %v2816_v22  ;;  %v3153_v47 = vor.u32 8388608, %v3152_v12  ;;  %v3172_v52 = vshrl.u32 %v16912_v14, %v3160_v54 }
 0x2f5   : > { %vm8916_vm14 = vcmp.lt.s32.totalorder %v8915_v31, 0  ;;  %v3164_v49 = vor.u32 %v3163_v37, %v3162_v36  ;;  %v3167_v13 = vor.u32 %v3166_v28, %v3165_v29  ;;  %v3174_v8 = vshll.u32 %v16912_v14, %v3159_v6 }
 0x2f6   : > { %v3105_v56 = vshll.u32 %v13969_v19, 30  ;;  %v3161_v27 = vshrl.u32 %v16807_v55, %v3160_v54  ;;  %v3170_v33 = vor.u32 %v3169_v42, %v3168_v61  ;;  %vm3177_vm0 = vcmp.lt.s32.totalorder %v3158_v32, 1 }
 0x2f7   : > { %vm2838_vm3 = vcmp.lt.s32.totalorder %v17108_v25, 0  ;;  %v2919_v63 = vmul.f32 %v2918_v3, %v2916_v15  ;;  %v3173_v40 = vor.u32 %v3172_v52, %v3171_v50  ;;  %v3175_v22 = vshrl.u32 %v16915_v48, %v3160_v54 }
 0x2f8   : > { %v3258_v43 = vadd.s32 1, %v8925_v35  ;;  %v13987_v12 = vsel %vm8916_vm14, 0, %v8915_v31  ;;  %vm3179_vm11 = vcmp.lt.s32.totalorder %v3158_v32, 3  ;;  %vm3180_vm9 = vcmp.lt.s32.totalorder %v3158_v32, 4 }
 0x2f9   : > { %v3193_v36 = vshll.u32 %v3153_v47, 8  ;;  %v3176_v29 = vor.u32 %v3175_v22, %v3174_v8  ;;  %vm3178_vm13 = vcmp.lt.s32.totalorder %v3158_v32, 2  ;;  %v3182_v6 = vsel %vm3180_vm9, %v3170_v33, 2102212464 }
 0x2fa   : > { %v3185_v37 = vsel %vm3177_vm0, %v3164_v49, %v3167_v13  ;;  %v13991_v61 = vsub.s32 %v13926_v23, %v3105_v56  ;;  %v3181_v28 = vsel %vm3177_vm0, %v3161_v27, %v3164_v49  ;;  %v3186_v3 = vsel %vm3180_vm9, %v3173_v40, 920167782 }
 0x2fb   : > { %v3189_v15 = vsel %vm3177_vm0, %v3167_v13, %v3170_v33  ;;  %v3183_v54 = vsel %vm3179_vm11, %v3167_v13, %v3182_v6  ;;  %v3187_v31 = vsel %vm3179_vm11, %v3170_v33, %v3186_v3  ;;  %v3190_v42 = vsel %vm3180_vm9, %v3176_v29, 1326507024 }
 0x2fc   : > { %vm3259_vm8 = vcmp.gt.s32.totalorder %v3258_v43, 0  ;;  %9445 = vcosq.f32 %v2718_v38  ;;  %v2821_v8 = vsel %vm13963_vm6, %v17136_v18, %v2818_v4  ;;  %v17145_v50 = vand.u32 2147483647, %v17108_v25 }
 0x2fd   : > { %v3188_v27 = vsel %vm3178_vm13, %v3185_v37, %v3187_v31  ;;  %v3191_v56 = vsel %vm3179_vm11, %v3173_v40, %v3190_v42  ;;  %v2920_v13 = vxor.u32 2147483648, %v2919_v63  ;;  %v3015_v49 = vsub.s32 4294967266, %v13987_v12 }
 0x2fe   : > { %vm14002_vm10 = vcmp.le.f32.partialorder %v17145_v50, 0.7853982  ;;  %v3192_v35 = vsel %vm3178_vm13, %v3189_v15, %v3191_v56  ;;  %v14009_v47 = vmul.u32.u64.low %v3193_v36, %v3188_v27  ;;  %v14010_v52 = vmul.u32.u64.high %v3193_v36, %v3188_v27, %v14009_v47 }
 0x2ff   : > { %v3184_v4 = vsel %vm3178_vm13, %v3181_v28, %v3183_v54  ;;  %v16653_v33 = vand.u32 2147483647, %v17138_v1  ;;  %v3260_v22 = vsel %vm3259_vm8, %v3258_v43, 0  ;;  %v3108_v29 = vsub.s32 0, %v13991_v61 }
 0x300   : > { %v14017_v6 = vmul.u32.u64.low %v3193_v36, %v3192_v35  ;;  %v14018_v37 = vmul.u32.u64.high %v3193_v36, %v3192_v35, %v14017_v6  ;;  %v3262_v40 = vand.u32 31, %v3260_v22  ;;  %9447 = vsinq.f32 %v2718_v38 }
 0x301   : > { %v14023_v3 = vsel %vm13963_vm6, 0, %v13957_v16  ;;  %v2995_v15 = vadd.s32 %v13766_v30, %v13774_v9  ;;  %v3011_v32 = vsub.s32 32, %v13987_v12  ;;  %9449 = vcosq.f32 %v2821_v8 }
 0x302   : > { %v3200_v28 = vmul.u32 %v3193_v36, %v3184_v4  ;;  %v3203_v43 = vadd.s32 1, %v14010_v52  ;;  %v3263_v54 = vsub.s32 32, %v3262_v40  ;;  %9451 = vsinq.f32 %v2821_v8 }
 0x303   : > { %v2921_v31 = vsel %vm2838_vm3, %v2920_v13, %v2919_v63  ;;  %v2922_v38 = vsub.s32 4, %v13724_v11  ;;  %v3016_v42 = vadd.s32 127, %v3015_v49  ;;  %v3012_v16 = vshll.u32 %v13865_v0, %v13987_v12 }
 0x304   : > { %v8918_v46 = vmin.u32 %v3108_v29, %v13991_v61  ;;  %vm3202_vm6 = vc.u32 %v14018_v37, %v14009_v47  ;;  %v3255_v30 = vand.u32 8388607, %v16653_v33  ;;  %v3013_v9 = vshrl.u32 %v2995_v15, %v3011_v32 }
 0x305   : > { %v3204_v36 = vsel %vm3202_vm6, %v3203_v43, %v14010_v52  ;;  %v3265_v8 = vshll.u32 %v16807_v55, %v3262_v40  ;;  %v3268_v63 = vshll.u32 %v16913_v2, %v3262_v40  ;;  %v14042_v27 = vshrl.u32 %v3260_v22, 5 }
 0x306   : > { %v3205_v50 = vadd.s32 %v3204_v36, %v3200_v28  ;;  %v3266_v0 = vshrl.u32 %v16913_v2, %v3263_v54  ;;  %v3269_v12 = vshrl.u32 %v16914_v7, %v3263_v54  ;;  %v14046_v56 = vpop.eup %9445  ;;  %v3017_v13 = vshll.u32 %v3016_v42, 23 }
 0x307   : > { %17148 = vst [vmem:[#allocation134_spill] sm:$0xff] %v14046_v56  ;;  %v3271_v35 = vshll.u32 %v16914_v7, %v3262_v40  ;;  %v3272_v49 = vshrl.u32 %v16911_v10, %v3263_v54  ;;  %v3274_v52 = vshll.u32 %v16911_v10, %v3262_v40  ;;  %v2924_v4 = vsel %vm14002_vm10, %v17108_v25, %v2921_v31 }
 0x308   : > { %v3110_v29 = vclz %v8918_v46  ;;  %v3206_v22 = vadd.s32 536870912, %v3205_v50  ;;  %v3256_v6 = vor.u32 8388608, %v3255_v30  ;;  %v3267_v15 = vor.u32 %v3266_v0, %v3265_v8 }
 0x309   : > { %v3270_v32 = vor.u32 %v3269_v12, %v3268_v63  ;;  %v3275_v28 = vshrl.u32 %v16912_v14, %v3263_v54  ;;  %v3277_v43 = vshll.u32 %v16912_v14, %v3262_v40  ;;  %v3014_v42 = vor.u32 %v3013_v9, %v3012_v16 }
 0x30a   : > { %v14056_v36 = vshrl.u32 %v3206_v22, 30  ;;  %v3278_v33 = vshrl.u32 %v16915_v48, %v3263_v54  ;;  %vm3280_vm14 = vcmp.lt.s32.totalorder %v14042_v27, 1  ;;  %v14060_v24 = vpop.eup %9447  ;;  %v3018_v21 = vor.u32 4788187, %v3017_v13 }
 0x30b   : > { %17149 = vst [vmem:[#allocation135_spill] sm:$0xff] %v14060_v24  ;;  %v3273_v31 = vor.u32 %v3272_v49, %v3271_v35  ;;  %v3276_v46 = vor.u32 %v3275_v28, %v3274_v52  ;;  %vm3283_vm0 = vcmp.lt.s32.totalorder %v14042_v27, 4  ;;  %v14063_v30 = vpop.eup %9449  ;;  %vm2725_vm11 = vcmp.eq.s32.totalorder %v13945_v58, 0 }
 0x30c   : > { %17150 = vst [vmem:[#allocation136_spill] sm:$0xff] %v14063_v30  ;;  %vm2728_vm9 = vcmp.eq.s32.totalorder %v13945_v58, 2  ;;  %v8919_v40 = vadd.s32 4294967294, %v3110_v29  ;;  %v3208_v16 = vshll.u32 %v14056_v36, 30  ;;  %vm3282_vm13 = vcmp.lt.s32.totalorder %v14042_v27, 3  ;;  %v14071_v8 = vpop.eup %9451 }
 0x30d   : > { %v14069_v9 = vshll.u32 %v3256_v6, 8  ;;  %17151 = vst [vmem:[#allocation137_spill] sm:$0xff] %v14071_v8  ;;  %v3279_v63 = vor.u32 %v3278_v33, %v3277_v43  ;;  %vm3281_vm8 = vcmp.lt.s32.totalorder %v14042_v27, 2  ;;  %v3288_v0 = vsel %vm3280_vm14, %v3267_v15, %v3270_v32 }
 0x30e   : > { %v3289_v12 = vsel %vm3283_vm0, %v3276_v46, 920167782  ;;  %v14079_v13 = vand.u32 3, %v14023_v3  ;;  %v2923_v35 = vsel %vm2838_vm3, %v2922_v38, %v13724_v11  ;;  %9453 = vcosq.f32 %v2924_v4 }
 0x30f   : > { %v3264_v49 = vshrl.u32 %v16807_v55, %v3263_v54  ;;  %9455 = vsinq.f32 %v2924_v4  ;;  %v3021_v33 = vcvt.s32.f32 %v3014_v42  ;;  %v3285_v52 = vsel %vm3283_vm0, %v3273_v31, 2102212464 }
 0x310   : > { %v3290_v29 = vsel %vm3282_vm13, %v3273_v31, %v3289_v12  ;;  %v3019_v22 = vand.u32 2147483647, %v3018_v21  ;;  %vm8920_vm6 = vcmp.lt.s32.totalorder %v8919_v40, 0  ;;  %v14089_v6 = vsub.s32 %v3205_v50, %v3208_v16  ;;  %v17153_v12 = vld [vmem:[#allocation29_spill] sm:$0xff] }
 0x311   : > { %v3291_v28 = vsel %vm3281_vm8, %v3288_v0, %v3290_v29  ;;  %v3292_v11 = vsel %vm3280_vm14, %v3270_v32, %v3273_v31  ;;  %v3293_v54 = vsel %vm3283_vm0, %v3279_v63, 1326507024  ;;  %v16657_v43 = vxor.u32 2147483648, %v14046_v56 }
 0x312   : > { %v14098_v38 = vmul.u32.u64.low %v14069_v9, %v3291_v28  ;;  %v14099_v4 = vmul.u32.u64.high %v14069_v9, %v3291_v28, %v14098_v38  ;;  %vm2828_vm3 = vcmp.eq.s32.totalorder %v14079_v13, 0  ;;  %vm2941_vm2 = vcmp.lt.s32.totalorder %v17112_v45, 0 }
 0x313   : > { %v3284_v21 = vsel %vm3280_vm14, %v3264_v49, %v3267_v15  ;;  %v3286_v50 = vsel %vm3282_vm13, %v3270_v32, %v3285_v52  ;;  %v16658_v42 = vxor.u32 2147483648, %v14060_v24  ;;  %v14112_v31 = vsel %vm14002_vm10, 0, %v2923_v35 }
 0x314   : > { %17152 = vst [vmem:[#allocation138_spill] sm:$0xff] %v14112_v31  ;;  %v14114_v16 = vsel %vm8920_vm6, 0, %v8919_v40  ;;  %v3294_v63 = vsel %vm3282_vm13, %v3276_v46, %v3293_v54  ;;  %vm2724_vm0 = vcmp.lt.s32.totalorder %v13945_v58, 2  ;;  %v14120_v0 = vand.u32 3, %v14112_v31 }
 0x315   : > { %v3211_v15 = vsub.s32 0, %v14089_v6  ;;  %v3295_v32 = vsel %vm3281_vm8, %v3292_v11, %v3294_v63  ;;  %v3354_v49 = vand.u32 2139095040, %v17153_v12  ;;  %vm2827_vm10 = vcmp.lt.s32.totalorder %v14079_v13, 2 }
 0x316   : > { %v17154_v23 = vand.u32 2147483647, %v17112_v45  ;;  %v3022_v46 = vmul.f32 %v3021_v33, %v3019_v22  ;;  %v3287_v35 = vsel %vm3281_vm8, %v3284_v21, %v3286_v50  ;;  %vm2831_vm13 = vcmp.eq.s32.totalorder %v14079_v13, 2 }
 0x317   : > { %v14136_v52 = vmul.u32.u64.low %v14069_v9, %v3295_v32  ;;  %v14137_v29 = vmul.u32.u64.high %v14069_v9, %v3295_v32, %v14136_v52  ;;  %v16667_v28 = vxor.u32 2147483648, %v14063_v30  ;;  %v3118_v11 = vsub.s32 4294967266, %v14114_v16 }
 0x318   : > { %vm14129_vm14 = vcmp.le.f32.partialorder %v17154_v23, 0.7853982  ;;  %v3355_v54 = vshrl.u32 %v3354_v49, 23  ;;  %v2727_v33 = vsel %vm2725_vm11, %v14046_v56, %v16658_v42  ;;  %v2730_v27 = vsel %vm2728_vm9, %v16657_v43, %v14060_v24  ;;  %v14154_v50 = vpop.eup %9453 }
 0x319   : > { %v16670_v22 = vxor.u32 2147483648, %v14071_v8  ;;  %v3306_v21 = vadd.s32 1, %v14099_v4  ;;  %17157 = vst [vmem:[#allocation139_spill] sm:$0xff] %v14154_v50  ;;  %v3025_v63 = vsub.s32 4, %v13838_v51  ;;  %v8922_v32 = vmin.u32 %v3211_v15, %v14089_v6  ;;  %v14159_v52 = vpop.eup %9455 }
 0x31a   : > { %v3303_v49 = vmul.u32 %v14069_v9, %v3287_v35  ;;  %v8929_v23 = vadd.s32 4294967169, %v3355_v54  ;;  %17158 = vst [vmem:[#allocation140_spill] sm:$0xff] %v14159_v52  ;;  %vm2931_vm11 = vcmp.eq.s32.totalorder %v14120_v0, 0  ;;  %vm2934_vm8 = vcmp.eq.s32.totalorder %v14120_v0, 2 }
 0x31b   : > { %v3023_v43 = vxor.u32 2147483648, %v3022_v46  ;;  %vm3044_vm9 = vcmp.lt.s32.totalorder %v17123_v57, 0  ;;  %vm3305_vm6 = vc.u32 %v14137_v29, %v14098_v38  ;;  %v2833_v15 = vsel %vm2831_vm13, %v16667_v28, %v14071_v8 }
 0x31c   : > { %v3098_v9 = vadd.s32 %v13874_v20, %v13891_v53  ;;  %v3114_v35 = vsub.s32 32, %v14114_v16  ;;  %v3119_v54 = vadd.s32 127, %v3118_v11  ;;  %v2830_v42 = vsel %vm2828_vm3, %v14063_v30, %v16670_v22 }
 0x31d   : > { %v3307_v56 = vsel %vm3305_vm6, %v3306_v21, %v14099_v4  ;;  %v3361_v24 = vadd.s32 1, %v8929_v23  ;;  %v3457_v44 = vand.u32 2139095040, %v17159_v26  ;;  %v3026_v20 = vsel %vm2941_vm2, %v3025_v63, %v13838_v51 }
 0x31e   : > { %v3213_v53 = vclz %v8922_v32  ;;  %v3308_v28 = vadd.s32 %v3307_v56, %v3303_v49  ;;  %v16671_v11 = vxor.u32 2147483648, %v14159_v52  ;;  %v3024_v8 = vsel %vm2941_vm2, %v3023_v43, %v3022_v46 }
 0x31f   : > { %v3128_v22 = vsub.s32 4, %v13969_v19  ;;  %vm3362_vm3 = vcmp.gt.s32.totalorder %v3361_v24, 0  ;;  %v3115_v4 = vshll.u32 %v13991_v61, %v14114_v16  ;;  %v3116_v21 = vshrl.u32 %v3098_v9, %v3114_v35 }
 0x320   : > { %v3120_v23 = vshll.u32 %v3119_v54, 23  ;;  %v16672_v31 = vand.u32 2147483647, %v17153_v12  ;;  %v14194_v51 = vsel %vm2724_vm0, %v2727_v33, %v2730_v27  ;;  %v3309_v56 = vadd.s32 536870912, %v3308_v28 }
 0x321   : > { %v3363_v63 = vsel %vm3362_vm3, %v3361_v24, 0  ;;  %v3458_v32 = vshrl.u32 %v3457_v44, 23  ;;  %v14198_v43 = vsel %vm2827_vm10, %v2830_v42, %v2833_v15  ;;  %v3027_v46 = vsel %vm14129_vm14, %v17112_v45, %v3024_v8 }
 0x322   : > { %v14205_v61 = vsel %vm14129_vm14, 0, %v3026_v20  ;;  %v8923_v16 = vadd.s32 4294967294, %v3213_v53  ;;  %v14212_v24 = vsel %vm2931_vm11, %v14154_v50, %v16671_v11  ;;  %v17161_v44 = vxor.u32 2147483648, %v14154_v50 }
 0x323   : > { %17160 = vst [vmem:[#allocation141_spill] sm:$0xff] %v14205_v61  ;;  %v14222_v8 = vand.u32 3, %v14205_v61  ;;  %v3365_v13 = vand.u32 31, %v3363_v63  ;;  %v3117_v42 = vor.u32 %v3116_v21, %v3115_v4  ;;  %v3121_v40 = vor.u32 4788187, %v3120_v23 }
 0x324   : > { %v14219_v58 = vsel %vm2934_vm8, %v17161_v44, %v14159_v52  ;;  %v14227_v33 = vsel %vm3044_vm9, %v3128_v22, %v13969_v19  ;;  %v3358_v27 = vand.u32 8388607, %v16672_v31  ;;  %9457 = vcosq.f32 %v3027_v46 }
 0x325   : > { %v14231_v49 = vshrl.u32 %v3309_v56, 30  ;;  %v3366_v15 = vsub.s32 32, %v3365_v13  ;;  %v8933_v9 = vadd.s32 4294967169, %v3458_v32  ;;  %vm8924_vm2 = vcmp.lt.s32.totalorder %v8923_v16, 0 }
 0x326   : > { %v3364_v35 = vshrl.u32 %v3363_v63, 5  ;;  %v3368_v54 = vshll.u32 %v16807_v55, %v3365_v13  ;;  %v3371_v20 = vshll.u32 %v16913_v2, %v3365_v13  ;;  %v3374_v19 = vshll.u32 %v16914_v7, %v3365_v13 }
 0x327   : > { %v3369_v53 = vshrl.u32 %v16913_v2, %v3366_v15  ;;  %v3372_v4 = vshrl.u32 %v16914_v7, %v3366_v15  ;;  %v3377_v22 = vshll.u32 %v16911_v10, %v3365_v13  ;;  %v3122_v21 = vand.u32 2147483647, %v3121_v40 }
 0x328   : > { %v3124_v23 = vcvt.s32.f32 %v3117_v42  ;;  %v3359_v56 = vor.u32 8388608, %v3358_v27  ;;  %v3375_v44 = vshrl.u32 %v16911_v10, %v3366_v15  ;;  %v14240_v32 = vsel %vm8924_vm2, 0, %v8923_v16 }
 0x329   : > { %v3311_v63 = vshll.u32 %v14231_v49, 30  ;;  %v3378_v11 = vshrl.u32 %v16912_v14, %v3366_v15  ;;  %v3464_v31 = vadd.s32 1, %v8933_v9  ;;  %vm16686_vm0 = vweird.f32 %v17129_v17 }
 0x32a   : > { %vm16685_vm10 = vweird.f32 %v17136_v18  ;;  %9459 = vsinq.f32 %v3027_v46  ;;  %v3370_v50 = vor.u32 %v3369_v53, %v3368_v54  ;;  %v3373_v52 = vor.u32 %v3372_v4, %v3371_v20 }
 0x32b   : > { %v3380_v40 = vshll.u32 %v16912_v14, %v3365_v13  ;;  %vm2930_vm14 = vcmp.lt.s32.totalorder %v14120_v0, 2  ;;  %v3367_v42 = vshrl.u32 %v16807_v55, %v3366_v15  ;;  %v3376_v16 = vor.u32 %v3375_v44, %v3374_v19 }
 0x32c   : > { %v3379_v27 = vor.u32 %v3378_v11, %v3377_v22  ;;  %vm3383_vm13 = vcmp.lt.s32.totalorder %v3364_v35, 1  ;;  %v3125_v30 = vmul.f32 %v3124_v23, %v3122_v21  ;;  %v3221_v61 = vsub.s32 4294967266, %v14240_v32 }
 0x32d   : > { %v3381_v9 = vshrl.u32 %v16915_v48, %v3366_v15  ;;  %v3399_v60 = vshll.u32 %v3359_v56, 8  ;;  %v14251_v62 = vsub.s32 %v3308_v28, %v3311_v63  ;;  %vm3385_vm11 = vcmp.lt.s32.totalorder %v3364_v35, 3 }
 0x32e   : > { %vm3386_vm8 = vcmp.lt.s32.totalorder %v3364_v35, 4  ;;  %vm3465_vm6 = vcmp.gt.s32.totalorder %v3464_v31, 0  ;;  %vm3384_vm3 = vcmp.lt.s32.totalorder %v3364_v35, 2  ;;  %v3391_v54 = vsel %vm3383_vm13, %v3370_v50, %v3373_v52  ;;  %v14254_v20 = vpop.eup %9457 }
 0x32f   : > { %v3382_v46 = vor.u32 %v3381_v9, %v3380_v40  ;;  %v3388_v13 = vsel %vm3386_vm8, %v3376_v16, 2102212464  ;;  %17162 = vst [vmem:[#allocation142_spill] sm:$0xff] %v14254_v20  ;;  %v3387_v11 = vsel %vm3383_vm13, %v3367_v42, %v3370_v50  ;;  %v3392_v4 = vsel %vm3386_vm8, %v3379_v27, 920167782 }
 0x330   : > { %v3389_v53 = vsel %vm3385_vm11, %v3373_v52, %v3388_v13  ;;  %v3395_v15 = vsel %vm3383_vm13, %v3373_v52, %v3376_v16  ;;  %v3201_v28 = vadd.s32 %v14009_v47, %v14018_v37  ;;  %v3217_v19 = vsub.s32 32, %v14240_v32 }
 0x331   : > { %v3393_v22 = vsel %vm3385_vm11, %v3376_v16, %v3392_v4  ;;  %v3396_v21 = vsel %vm3386_vm8, %v3382_v46, 1326507024  ;;  %v3222_v23 = vadd.s32 127, %v3221_v61  ;;  %v3466_v50 = vsel %vm3465_vm6, %v3464_v31, 0 }
 0x332   : > { %v3394_v56 = vsel %vm3384_vm3, %v3391_v54, %v3393_v22  ;;  %v3397_v44 = vsel %vm3385_vm11, %v3379_v27, %v3396_v21  ;;  %v3126_v63 = vxor.u32 2147483648, %v3125_v30  ;;  %v3314_v40 = vsub.s32 0, %v14251_v62 }
 0x333   : > { %v3390_v52 = vsel %vm3384_vm3, %v3387_v11, %v3389_v53  ;;  %v3398_v42 = vsel %vm3384_vm3, %v3395_v15, %v3397_v44  ;;  %v14272_v9 = vmul.u32.u64.low %v3399_v60, %v3394_v56  ;;  %v14273_v16 = vmul.u32.u64.high %v3399_v60, %v3394_v56, %v14272_v9 }
 0x334   : > { %v14269_v47 = vmul.u32.u64.low %v3399_v60, %v3398_v42  ;;  %v14270_v37 = vmul.u32.u64.high %v3399_v60, %v3398_v42, %v14269_v47  ;;  %v14276_v61 = vpop.eup %9459  ;;  %v3218_v27 = vshll.u32 %v14089_v6, %v14240_v32  ;;  %v3219_v31 = vshrl.u32 %v3201_v28, %v3217_v19 }
 0x335   : > { %17163 = vst [vmem:[#allocation143_spill] sm:$0xff] %v14276_v61  ;;  %v16684_v46 = vand.u32 2147483647, %v17159_v26  ;;  %v3468_v13 = vand.u32 31, %v3466_v50  ;;  %v14284_v35 = vsel %vm16686_vm0, nan, %v14194_v51  ;;  %v14289_v54 = vsel %vm16685_vm10, nan, %v14198_v43 }
 0x336   : > { %17164 = vst [vmem:[#allocation144_spill] sm:$0xff] %v14284_v35  ;;  %17165 = vst [vmem:[#allocation145_spill] sm:$0xff] %v14289_v54  ;;  %v17166_v11 = vand.u32 2147483647, %v17123_v57  ;;  %v3223_v6 = vshll.u32 %v3222_v23, 23  ;;  %v14301_v32 = vsel %vm2930_vm14, %v14212_v24, %v14219_v58  ;;  %v3127_v51 = vsel %vm3044_vm9, %v3126_v63, %v3125_v30 }
 0x337   : > { %v3406_v4 = vmul.u32 %v3399_v60, %v3390_v52  ;;  %v3469_v15 = vsub.s32 32, %v3468_v13  ;;  %v8926_v28 = vmin.u32 %v3314_v40, %v14251_v62  ;;  %vm3408_vm13 = vc.u32 %v14270_v37, %v14272_v9 }
 0x338   : > { %vm14293_vm2 = vcmp.le.f32.partialorder %v17166_v11, 0.7853982  ;;  %v3409_v19 = vadd.s32 1, %v14273_v16  ;;  %v16690_v0 = vxor.u32 2147483648, %v14276_v61  ;;  %vm3037_vm14 = vcmp.eq.s32.totalorder %v14222_v8, 2 }
 0x339   : > { %v14308_v43 = vsel %vm14293_vm2, 0, %v14227_v33  ;;  %v16689_v30 = vxor.u32 2147483648, %v14254_v20  ;;  %v3220_v60 = vor.u32 %v3219_v31, %v3218_v27  ;;  %v3461_v24 = vand.u32 8388607, %v16684_v46 }
 0x33a   : > { %v3130_v58 = vsel %vm14293_vm2, %v17123_v57, %v3127_v51  ;;  %v3224_v33 = vor.u32 4788187, %v3223_v6  ;;  %v3410_v22 = vsel %vm3408_vm13, %v3409_v19, %v14273_v16  ;;  %v3471_v21 = vshll.u32 %v16807_v55, %v3468_v13 }
 0x33b   : > { %v3411_v23 = vadd.s32 %v3410_v22, %v3406_v4  ;;  %v3472_v56 = vshrl.u32 %v16913_v2, %v3469_v15  ;;  %v3474_v44 = vshll.u32 %v16913_v2, %v3468_v13  ;;  %v3475_v63 = vshrl.u32 %v16914_v7, %v3469_v15 }
 0x33c   : > { %vm3034_vm9 = vcmp.eq.s32.totalorder %v14222_v8, 0  ;;  %v3316_v40 = vclz %v8926_v28  ;;  %v3467_v52 = vshrl.u32 %v3466_v50, 5  ;;  %v3477_v42 = vshll.u32 %v16914_v7, %v3468_v13 }
 0x33d   : > { %v3478_v47 = vshrl.u32 %v16911_v10, %v3469_v15  ;;  %9461 = vcosq.f32 %v3130_v58  ;;  %v3227_v27 = vcvt.s32.f32 %v3220_v60  ;;  %v3412_v16 = vadd.s32 536870912, %v3411_v23 }
 0x33e   : > { %v3462_v31 = vor.u32 8388608, %v3461_v24  ;;  %vm16732_vm11 = vweird.f32 %v17108_v25  ;;  %v3225_v11 = vand.u32 2147483647, %v3224_v33  ;;  %v3480_v53 = vshll.u32 %v16911_v10, %v3468_v13  ;;  %v17177_v25 = vld [vmem:[#allocation42_spill] sm:$0xff] }
 0x33f   : > { %v3481_v6 = vshrl.u32 %v16912_v14, %v3469_v15  ;;  %v3483_v51 = vshll.u32 %v16912_v14, %v3468_v13  ;;  %v14334_v4 = vshrl.u32 %v3412_v16, 30  ;;  %v3473_v50 = vor.u32 %v3472_v56, %v3471_v21  ;;  %v17169_v56 = vld [vmem:[#allocation41_spill] sm:$0xff] }
 0x340   : > { %v3476_v28 = vor.u32 %v3475_v63, %v3474_v44  ;;  %v3484_v19 = vshrl.u32 %v16915_v48, %v3469_v15  ;;  %vm3033_vm8 = vcmp.lt.s32.totalorder %v14222_v8, 2  ;;  %v8927_v60 = vadd.s32 4294967294, %v3316_v40 }
 0x341   : > { %v3479_v22 = vor.u32 %v3478_v47, %v3477_v42  ;;  %v3482_v24 = vor.u32 %v3481_v6, %v3480_v53  ;;  %vm3486_vm6 = vcmp.lt.s32.totalorder %v3467_v52, 1  ;;  %9463 = vsinq.f32 %v3130_v58 }
 0x342   : > { %vm3147_vm3 = vcmp.lt.s32.totalorder %v17130_v39, 0  ;;  %v3414_v33 = vshll.u32 %v14334_v4, 30  ;;  %v3470_v46 = vshrl.u32 %v16807_v55, %v3469_v15  ;;  %vm3489_vm2 = vcmp.lt.s32.totalorder %v3467_v52, 4 }
 0x343   : > { %v3485_v13 = vor.u32 %v3484_v19, %v3483_v51  ;;  %vm3488_vm13 = vcmp.lt.s32.totalorder %v3467_v52, 3  ;;  %v3491_v21 = vsel %vm3489_vm2, %v3479_v22, 2102212464  ;;  %v3560_v44 = vand.u32 2139095040, %v17169_v56 }
 0x344   : > { %v3228_v63 = vmul.f32 %v3227_v27, %v3225_v11  ;;  %v14343_v16 = vsub.s32 %v3411_v23, %v3414_v33  ;;  %vm3487_vm10 = vcmp.lt.s32.totalorder %v3467_v52, 2  ;;  %v3494_v40 = vsel %vm3486_vm6, %v3473_v50, %v3476_v28 }
 0x345   : > { %vm16707_vm0 = vweird.f32 %v17112_v45  ;;  %v3039_v15 = vsel %vm3037_vm14, %v16689_v30, %v14276_v61  ;;  %v17170_v58 = vand.u32 2147483647, %v17130_v39  ;;  %vm8928_vm7 = vcmp.lt.s32.totalorder %v8927_v60, 0 }
 0x346   : > { %v3495_v23 = vsel %vm3489_vm2, %v3482_v24, 920167782  ;;  %v3502_v47 = vshll.u32 %v3462_v31, 8  ;;  %v3417_v27 = vsub.s32 0, %v14343_v16  ;;  %v3490_v11 = vsel %vm3486_vm6, %v3470_v46, %v3473_v50 }
 0x347   : > { %vm14354_vm5 = vcmp.le.f32.partialorder %v17170_v58, 0.7853982  ;;  %v3492_v53 = vsel %vm3488_vm13, %v3476_v28, %v3491_v21  ;;  %v3496_v6 = vsel %vm3488_vm13, %v3479_v22, %v3495_v23  ;;  %v3498_v19 = vsel %vm3486_vm6, %v3476_v28, %v3479_v22  ;;  %v14366_v30 = vpop.eup %9461 }
 0x348   : > { %v3497_v51 = vsel %vm3487_vm10, %v3494_v40, %v3496_v6  ;;  %v3499_v33 = vsel %vm3489_vm2, %v3485_v13, 1326507024  ;;  %v3561_v58 = vshrl.u32 %v3560_v44, 23  ;;  %17173 = vst [vmem:[#allocation146_spill] sm:$0xff] %v14366_v30  ;;  %v3036_v31 = vsel %vm3034_vm9, %v14254_v20, %v16690_v0 }
 0x349   : > { %v3229_v46 = vxor.u32 2147483648, %v3228_v63  ;;  %v3319_v50 = vsel %vm8928_vm7, 0, %v8927_v60  ;;  %v8930_v21 = vmin.u32 %v3417_v27, %v14343_v16  ;;  %v3500_v23 = vsel %vm3488_vm13, %v3482_v24, %v3499_v33 }
 0x34a   : > { %v14375_v40 = vmul.u32.u64.low %v3502_v47, %v3497_v51  ;;  %v14376_v6 = vmul.u32.u64.high %v3502_v47, %v3497_v51, %v14375_v40  ;;  %v8937_v28 = vadd.s32 4294967169, %v3561_v58  ;;  %v14382_v22 = vsel %vm16732_vm11, nan, %v14301_v32 }
 0x34b   : > { %17174 = vst [vmem:[#allocation147_spill] sm:$0xff] %v14382_v22  ;;  %v14385_v13 = vand.u32 3, %v14308_v43  ;;  %v3493_v44 = vsel %vm3487_vm10, %v3490_v11, %v3492_v53  ;;  %v3501_v60 = vsel %vm3487_vm10, %v3498_v19, %v3500_v23  ;;  %v3419_v27 = vclz %v8930_v21  ;;  %v14392_v33 = vpop.eup %9463 }
 0x34c   : > { %v14389_v0 = vmul.u32.u64.low %v3502_v47, %v3501_v60  ;;  %v14390_v24 = vmul.u32.u64.high %v3502_v47, %v3501_v60, %v14389_v0  ;;  %v3567_v51 = vadd.s32 1, %v8937_v28  ;;  %17175 = vst [vmem:[#allocation148_spill] sm:$0xff] %v14392_v33  ;;  %v3040_v58 = vsel %vm3033_vm8, %v3036_v31, %v3039_v15 }
 0x34d   : > { %v3231_v32 = vsub.s32 4, %v14056_v36  ;;  %v3304_v22 = vadd.s32 %v14098_v38, %v14137_v29  ;;  %v3324_v54 = vsub.s32 4294967266, %v3319_v50  ;;  %v3230_v52 = vsel %vm3147_vm3, %v3229_v46, %v3228_v63 }
 0x34e   : > { %v3320_v11 = vsub.s32 32, %v3319_v50  ;;  %v3512_v53 = vadd.s32 1, %v14376_v6  ;;  %vm3568_vm7 = vcmp.gt.s32.totalorder %v3567_v51, 0  ;;  %v16691_v0 = vxor.u32 2147483648, %v14366_v30 }
 0x34f   : > { %v3509_v19 = vmul.u32 %v3502_v47, %v3493_v44  ;;  %v16693_v21 = vand.u32 2147483647, %v17169_v56  ;;  %v3569_v8 = vsel %vm3568_vm7, %v3567_v51, 0  ;;  %v16692_v15 = vxor.u32 2147483648, %v14392_v33 }
 0x350   : > { %vm3140_vm10 = vcmp.eq.s32.totalorder %v14385_v13, 2  ;;  %v8931_v31 = vadd.s32 4294967294, %v3419_v27  ;;  %vm3511_vm14 = vc.u32 %v14390_v24, %v14375_v40  ;;  %v14410_v38 = vsel %vm16707_vm0, nan, %v3040_v58 }
 0x351   : > { %17176 = vst [vmem:[#allocation149_spill] sm:$0xff] %v14410_v38  ;;  %vm3137_vm9 = vcmp.eq.s32.totalorder %v14385_v13, 0  ;;  %v3233_v29 = vsel %vm14354_vm5, %v17130_v39, %v3230_v52  ;;  %v3325_v63 = vadd.s32 127, %v3324_v54  ;;  %v3321_v47 = vshll.u32 %v14251_v62, %v3319_v50 }
 0x352   : > { %v3322_v46 = vshrl.u32 %v3304_v22, %v3320_v11  ;;  %v3513_v23 = vsel %vm3511_vm14, %v3512_v53, %v14376_v6  ;;  %v3571_v28 = vand.u32 31, %v3569_v8  ;;  %v14421_v44 = vsel %vm3140_vm10, %v16691_v0, %v14392_v33 }
 0x353   : > { %v14426_v60 = vsel %vm3147_vm3, %v3231_v32, %v14056_v36  ;;  %v3514_v27 = vadd.s32 %v3513_v23, %v3509_v19  ;;  %v3564_v54 = vand.u32 8388607, %v16693_v21  ;;  %v14433_v62 = vsel %vm3137_vm9, %v14366_v30, %v16692_v15 }
 0x354   : > { %9465 = vcosq.f32 %v3233_v29  ;;  %vm8932_vm8 = vcmp.lt.s32.totalorder %v8931_v31, 0  ;;  %v3572_v50 = vsub.s32 32, %v3571_v28  ;;  %v3326_v6 = vshll.u32 %v3325_v63, 23 }
 0x355   : > { %9467 = vsinq.f32 %v3233_v29  ;;  %v3515_v22 = vadd.s32 536870912, %v3514_v27  ;;  %v3574_v51 = vshll.u32 %v16807_v55, %v3571_v28  ;;  %v3323_v58 = vor.u32 %v3322_v46, %v3321_v47 }
 0x356   : > { %v3575_v36 = vshrl.u32 %v16913_v2, %v3572_v50  ;;  %v3577_v32 = vshll.u32 %v16913_v2, %v3571_v28  ;;  %v3578_v52 = vshrl.u32 %v16914_v7, %v3572_v50  ;;  %v14439_v11 = vsel %vm8932_vm8, 0, %v8931_v31 }
 0x357   : > { %v14441_v53 = vshrl.u32 %v3515_v22, 30  ;;  %v3565_v19 = vor.u32 8388608, %v3564_v54  ;;  %v3570_v23 = vshrl.u32 %v3569_v8, 5  ;;  %v3580_v0 = vshll.u32 %v16914_v7, %v3571_v28 }
 0x358   : > { %v3581_v29 = vshrl.u32 %v16911_v10, %v3572_v50  ;;  %v3583_v63 = vshll.u32 %v16911_v10, %v3571_v28  ;;  %v3584_v47 = vshrl.u32 %v16912_v14, %v3572_v50  ;;  %v3327_v46 = vor.u32 4788187, %v3326_v6 }
 0x359   : > { %v3407_v15 = vadd.s32 %v14272_v9, %v14270_v37  ;;  %v3517_v21 = vshll.u32 %v14441_v53, 30  ;;  %v3576_v31 = vor.u32 %v3575_v36, %v3574_v51  ;;  %v3579_v38 = vor.u32 %v3578_v52, %v3577_v32 }
 0x35a   : > { %v3585_v22 = vor.u32 %v3584_v47, %v3583_v63  ;;  %v3586_v54 = vshll.u32 %v16912_v14, %v3571_v28  ;;  %v3587_v8 = vshrl.u32 %v16915_v48, %v3572_v50  ;;  %v3427_v35 = vsub.s32 4294967266, %v14439_v11 }
 0x35b   : > { %v14453_v45 = vsub.s32 %v3514_v27, %v3517_v21  ;;  %vm3589_vm6 = vcmp.lt.s32.totalorder %v3570_v23, 1  ;;  %v3663_v18 = vand.u32 2139095040, %v17177_v25  ;;  %v3573_v6 = vshrl.u32 %v16807_v55, %v3572_v50 }
 0x35c   : > { %v3582_v30 = vor.u32 %v3581_v29, %v3580_v0  ;;  %vm3592_vm3 = vcmp.lt.s32.totalorder %v3570_v23, 4  ;;  %v14457_v37 = vshll.u32 %v3565_v19, 8  ;;  %vm3136_vm2 = vcmp.lt.s32.totalorder %v14385_v13, 2 }
 0x35d   : > { %v3423_v9 = vsub.s32 32, %v14439_v11  ;;  %v3520_v28 = vsub.s32 0, %v14453_v45  ;;  %vm3590_vm13 = vcmp.lt.s32.totalorder %v3570_v23, 2  ;;  %vm3591_vm7 = vcmp.lt.s32.totalorder %v3570_v23, 3 }
 0x35e   : > { %v14462_v51 = vpop.eup %9465  ;;  %v3588_v21 = vor.u32 %v3587_v8, %v3586_v54  ;;  %v3594_v27 = vsel %vm3592_vm3, %v3582_v30, 2102212464  ;;  %v3597_v36 = vsel %vm3589_vm6, %v3576_v31, %v3579_v38  ;;  %v3598_v0 = vsel %vm3592_vm3, %v3585_v22, 920167782 }
 0x35f   : > { %17178 = vst [vmem:[#allocation150_spill] sm:$0xff] %v14462_v51  ;;  %v14467_v50 = vpop.eup %9467  ;;  %vm3250_vm10 = vcmp.lt.s32.totalorder %v17138_v1, 0  ;;  %v3330_v32 = vcvt.s32.f32 %v3323_v58  ;;  %v3428_v52 = vadd.s32 127, %v3427_v35  ;;  %v8934_v19 = vmin.u32 %v3520_v28, %v14453_v45 }
 0x360   : > { %17179 = vst [vmem:[#allocation151_spill] sm:$0xff] %v14467_v50  ;;  %v3664_v29 = vshrl.u32 %v3663_v18, 23  ;;  %v3328_v63 = vand.u32 2147483647, %v3327_v46  ;;  %v3424_v47 = vshll.u32 %v14343_v16, %v14439_v11  ;;  %v3593_v54 = vsel %vm3589_vm6, %v3573_v6, %v3576_v31 }
 0x361   : > { %v3599_v8 = vsel %vm3591_vm7, %v3582_v30, %v3598_v0  ;;  %vm16706_vm14 = vweird.f32 %v17123_v57  ;;  %v3522_v33 = vclz %v8934_v19  ;;  %v3595_v17 = vsel %vm3591_vm7, %v3579_v38, %v3594_v27 }
 0x362   : > { %v3600_v20 = vsel %vm3590_vm13, %v3597_v36, %v3599_v8  ;;  %v3601_v35 = vsel %vm3589_vm6, %v3579_v38, %v3582_v30  ;;  %v3425_v58 = vshrl.u32 %v3407_v15, %v3423_v9  ;;  %v3602_v18 = vsel %vm3592_vm3, %v3588_v21, 1326507024 }
 0x363   : > { %v14481_v46 = vmul.u32.u64.low %v14457_v37, %v3600_v20  ;;  %v14482_v28 = vmul.u32.u64.high %v14457_v37, %v3600_v20, %v14481_v46  ;;  %v17180_v16 = vand.u32 2147483647, %v17138_v1  ;;  %v3429_v31 = vshll.u32 %v3428_v52, 23 }
 0x364   : > { %v8935_v6 = vadd.s32 4294967294, %v3522_v33  ;;  %v3603_v27 = vsel %vm3591_vm7, %v3585_v22, %v3602_v18  ;;  %v8941_v36 = vadd.s32 4294967169, %v3664_v29  ;;  %v3331_v30 = vmul.f32 %v3330_v32, %v3328_v63 }
 0x365   : > { %vm14487_vm9 = vcmp.le.f32.partialorder %v17180_v16, 0.7853982  ;;  %v3334_v15 = vsub.s32 4, %v14231_v49  ;;  %v3596_v38 = vsel %vm3590_vm13, %v3593_v54, %v3595_v17  ;;  %v3604_v20 = vsel %vm3590_vm13, %v3601_v35, %v3603_v27  ;;  %v17183_v16 = vld [vmem:[#allocation43_spill] sm:$0xff] }
 0x366   : > { %vm8936_vm8 = vcmp.lt.s32.totalorder %v8935_v6, 0  ;;  %v14496_v9 = vmul.u32.u64.low %v14457_v37, %v3604_v20  ;;  %v14497_v21 = vmul.u32.u64.high %v14457_v37, %v3604_v20, %v14496_v9  ;;  %v3670_v0 = vadd.s32 1, %v8941_v36 }
 0x367   : > { %v14502_v33 = vsel %vm14354_vm5, 0, %v14426_v60  ;;  %v3426_v22 = vor.u32 %v3425_v58, %v3424_v47  ;;  %v3525_v52 = vsel %vm8936_vm8, 0, %v8935_v6  ;;  %v3615_v32 = vadd.s32 1, %v14482_v28 }
 0x368   : > { %v3430_v19 = vor.u32 4788187, %v3429_v31  ;;  %v3530_v29 = vsub.s32 4294967266, %v3525_v52  ;;  %v3612_v17 = vmul.u32 %v14457_v37, %v3596_v38  ;;  %vm3671_vm6 = vcmp.gt.s32.totalorder %v3670_v0, 0 }
 0x369   : > { %v3143_v23 = vsel %vm3136_vm2, %v14433_v62, %v14421_v44  ;;  %v14511_v63 = vand.u32 3, %v14502_v33  ;;  %v3335_v42 = vsel %vm3250_vm10, %v3334_v15, %v14231_v49  ;;  %v3672_v60 = vsel %vm3671_vm6, %v3670_v0, 0 }
 0x36a   : > { %v3332_v47 = vxor.u32 2147483648, %v3331_v30  ;;  %v3510_v54 = vadd.s32 %v14375_v40, %v14390_v24  ;;  %v3526_v8 = vsub.s32 32, %v3525_v52  ;;  %vm3614_vm5 = vc.u32 %v14497_v21, %v14481_v46 }
 0x36b   : > { %v3531_v37 = vadd.s32 127, %v3530_v29  ;;  %v3616_v13 = vsel %vm3614_vm5, %v3615_v32, %v14482_v28  ;;  %v16704_v44 = vand.u32 2147483647, %v17177_v25  ;;  %v3674_v62 = vand.u32 31, %v3672_v60 }
 0x36c   : > { %v3431_v35 = vand.u32 2147483647, %v3430_v19  ;;  %v3433_v58 = vcvt.s32.f32 %v3426_v22  ;;  %v3617_v18 = vadd.s32 %v3616_v13, %v3612_v17  ;;  %v3766_v49 = vand.u32 2139095040, %v17183_v16 }
 0x36d   : > { %v14525_v31 = vsel %vm16706_vm14, nan, %v3143_v23  ;;  %v14530_v24 = vsel %vm14487_vm9, 0, %v3335_v42  ;;  %vm3353_vm3 = vcmp.lt.s32.totalorder %v17153_v12, 0  ;;  %v3675_v28 = vsub.s32 32, %v3674_v62 }
 0x36e   : > { %17184 = vst [vmem:[#allocation152_spill] sm:$0xff] %v14525_v31  ;;  %v3527_v27 = vshll.u32 %v14453_v45, %v3525_v52  ;;  %v3528_v36 = vshrl.u32 %v3510_v54, %v3526_v8  ;;  %v3618_v15 = vadd.s32 536870912, %v3617_v18  ;;  %v14537_v38 = vsel %vm3250_vm10, %v3332_v47, %v3331_v30 }
 0x36f   : > { %v3532_v9 = vshll.u32 %v3531_v37, 23  ;;  %v3667_v0 = vand.u32 8388607, %v16704_v44  ;;  %v3434_v22 = vmul.f32 %v3433_v58, %v3431_v35  ;;  %v3673_v19 = vshrl.u32 %v3672_v60, 5 }
 0x370   : > { %v14542_v32 = vshrl.u32 %v3618_v15, 30  ;;  %v3767_v29 = vshrl.u32 %v3766_v49, 23  ;;  %v3677_v17 = vshll.u32 %v16807_v55, %v3674_v62  ;;  %v3678_v45 = vshrl.u32 %v16913_v2, %v3675_v28 }
 0x371   : > { %v3680_v52 = vshll.u32 %v16913_v2, %v3674_v62  ;;  %v3681_v30 = vshrl.u32 %v16914_v7, %v3675_v28  ;;  %v3529_v23 = vor.u32 %v3528_v36, %v3527_v27  ;;  %v3683_v47 = vshll.u32 %v16914_v7, %v3674_v62 }
 0x372   : > { %v3620_v42 = vshll.u32 %v14542_v32, 30  ;;  %v3684_v54 = vshrl.u32 %v16911_v10, %v3675_v28  ;;  %v3533_v8 = vor.u32 4788187, %v3532_v9  ;;  %v3686_v37 = vshll.u32 %v16911_v10, %v3674_v62 }
 0x373   : > { %v3687_v60 = vshrl.u32 %v16912_v14, %v3675_v28  ;;  %v3689_v13 = vshll.u32 %v16912_v14, %v3674_v62  ;;  %vm3240_vm2 = vcmp.eq.s32.totalorder %v14511_v63, 0  ;;  %vm3243_vm13 = vcmp.eq.s32.totalorder %v14511_v63, 2 }
 0x374   : > { %v3435_v35 = vxor.u32 2147483648, %v3434_v22  ;;  %v14556_v58 = vsub.s32 %v3617_v18, %v3620_v42  ;;  %v3668_v49 = vor.u32 8388608, %v3667_v0  ;;  %v3690_v27 = vshrl.u32 %v16915_v48, %v3675_v28 }
 0x375   : > { %v17185_v36 = vand.u32 2147483647, %v17153_v12  ;;  %v3676_v9 = vshrl.u32 %v16807_v55, %v3675_v28  ;;  %v3679_v44 = vor.u32 %v3678_v45, %v3677_v17  ;;  %v3682_v62 = vor.u32 %v3681_v30, %v3680_v52 }
 0x376   : > { %v8945_v20 = vadd.s32 4294967169, %v3767_v29  ;;  %v3623_v40 = vsub.s32 0, %v14556_v58  ;;  %v3685_v6 = vor.u32 %v3684_v54, %v3683_v47  ;;  %v3688_v31 = vor.u32 %v3687_v60, %v3686_v37 }
 0x377   : > { %vm14561_vm7 = vcmp.le.f32.partialorder %v17185_v36, 0.7853982  ;;  %vm3692_vm10 = vcmp.lt.s32.totalorder %v3673_v19, 1  ;;  %v3534_v18 = vand.u32 2147483647, %v3533_v8  ;;  %v3536_v0 = vcvt.s32.f32 %v3529_v23 }
 0x378   : > { %v3691_v42 = vor.u32 %v3690_v27, %v3689_v13  ;;  %vm3695_vm8 = vcmp.lt.s32.totalorder %v3673_v19, 4  ;;  %vm3239_vm6 = vcmp.lt.s32.totalorder %v14511_v63, 2  ;;  %v3436_v36 = vsel %vm3353_vm3, %v3435_v35, %v3434_v22 }
 0x379   : > { %v8938_v57 = vmin.u32 %v3623_v40, %v14556_v58  ;;  %vm3694_vm5 = vcmp.lt.s32.totalorder %v3673_v19, 3  ;;  %v3708_v28 = vshll.u32 %v3668_v49, 8  ;;  %vm3693_vm14 = vcmp.lt.s32.totalorder %v3673_v19, 2 }
 0x37a   : > { %v3696_v29 = vsel %vm3692_vm10, %v3676_v9, %v3679_v44  ;;  %v3697_v17 = vsel %vm3695_vm8, %v3685_v6, 2102212464  ;;  %v3700_v45 = vsel %vm3692_vm10, %v3679_v44, %v3682_v62  ;;  %vm3456_vm0 = vcmp.lt.s32.totalorder %v17159_v26, 0 }
 0x37b   : > { %v3625_v52 = vclz %v8938_v57  ;;  %v3698_v30 = vsel %vm3694_vm5, %v3682_v62, %v3697_v17  ;;  %v3701_v23 = vsel %vm3695_vm8, %v3688_v31, 920167782  ;;  %v3704_v22 = vsel %vm3692_vm10, %v3682_v62, %v3685_v6 }
 0x37c   : > { %v3537_v47 = vmul.f32 %v3536_v0, %v3534_v18  ;;  %v3702_v40 = vsel %vm3694_vm5, %v3685_v6, %v3701_v23  ;;  %v3705_v54 = vsel %vm3695_vm8, %v3691_v42, 1326507024  ;;  %v3773_v8 = vadd.s32 1, %v8945_v20 }
 0x37d   : > { %v8939_v37 = vadd.s32 4294967294, %v3625_v52  ;;  %v3699_v60 = vsel %vm3693_vm14, %v3696_v29, %v3698_v30  ;;  %v3703_v44 = vsel %vm3693_vm14, %v3700_v45, %v3702_v40  ;;  %v3706_v13 = vsel %vm3694_vm5, %v3688_v31, %v3705_v54 }
 0x37e   : > { %v3707_v57 = vsel %vm3693_vm14, %v3704_v22, %v3706_v13  ;;  %v14584_v35 = vmul.u32.u64.low %v3708_v28, %v3703_v44  ;;  %v14585_v49 = vmul.u32.u64.high %v3708_v28, %v3703_v44, %v14584_v35  ;;  %vm3774_vm10 = vcmp.gt.s32.totalorder %v3773_v8, 0 }
 0x37f   : > { %v3336_v6 = vsel %vm14487_vm9, %v17138_v1, %v14537_v38  ;;  %v17188_v20 = vand.u32 2147483647, %v17159_v26  ;;  %v14598_v9 = vmul.u32.u64.low %v3708_v28, %v3707_v57  ;;  %v14599_v31 = vmul.u32.u64.high %v3708_v28, %v3707_v57, %v14598_v9 }
 0x380   : > { %v3775_v19 = vsel %vm3774_vm10, %v3773_v8, 0  ;;  %v17191_v62 = vxor.u32 2147483648, %v14467_v50  ;;  %v17192_v11 = vxor.u32 2147483648, %v14462_v51  ;;  %vm8940_vm14 = vcmp.lt.s32.totalorder %v8939_v37, 0 }
 0x381   : > { %vm14594_vm8 = vcmp.le.f32.partialorder %v17188_v20, 0.7853982  ;;  %v3777_v0 = vand.u32 31, %v3775_v19  ;;  %v17193_v42 = vsub.s32 4, %v14334_v4  ;;  %v3439_v17 = vsel %vm14561_vm7, %v17153_v12, %v3436_v36 }
 0x382   : > { %v3242_v18 = vsel %vm3240_vm2, %v14462_v51, %v17191_v62  ;;  %v3245_v38 = vsel %vm3243_vm13, %v17192_v11, %v14467_v50  ;;  %v3715_v45 = vmul.u32 %v3708_v28, %v3699_v60  ;;  %v16708_v52 = vand.u32 2147483647, %v17183_v16 }
 0x383   : > { %v3438_v29 = vsel %vm3353_vm3, %v17193_v42, %v14334_v4  ;;  %9469 = vcosq.f32 %v3336_v6  ;;  %v14621_v30 = vand.u32 3, %v14530_v24  ;;  %v3538_v23 = vxor.u32 2147483648, %v3537_v47 }
 0x384   : > { %v3718_v22 = vadd.s32 1, %v14585_v49  ;;  %9471 = vsinq.f32 %v3336_v6  ;;  %v14624_v40 = vsel %vm8940_vm14, 0, %v8939_v37  ;;  %vm3717_vm9 = vc.u32 %v14599_v31, %v14584_v35 }
 0x385   : > { %v3778_v4 = vsub.s32 32, %v3777_v0  ;;  %v14630_v36 = vsel %vm3239_vm6, %v3242_v18, %v3245_v38  ;;  %v14634_v28 = vsel %vm14561_vm7, 0, %v3438_v29  ;;  %9473 = vcosq.f32 %v3439_v17 }
 0x386   : > { %17194 = vst [vmem:[#allocation153_spill] sm:$0xff] %v14634_v28  ;;  %v3719_v54 = vsel %vm3717_vm9, %v3718_v22, %v14585_v49  ;;  %9475 = vsinq.f32 %v3439_v17  ;;  %v14638_v8 = vand.u32 3, %v14634_v28  ;;  %v3770_v60 = vand.u32 8388607, %v16708_v52 }
 0x387   : > { %v3720_v37 = vadd.s32 %v3719_v54, %v3715_v45  ;;  %v3539_v63 = vsel %vm3456_vm0, %v3538_v23, %v3537_v47  ;;  %v3613_v44 = vadd.s32 %v14481_v46, %v14497_v21  ;;  %v3633_v15 = vsub.s32 4294967266, %v14624_v40 }
 0x388   : > { %v3780_v13 = vshll.u32 %v16807_v55, %v3777_v0  ;;  %v3781_v49 = vshrl.u32 %v16913_v2, %v3778_v4  ;;  %v3783_v6 = vshll.u32 %v16913_v2, %v3777_v0  ;;  %v3784_v20 = vshrl.u32 %v16914_v7, %v3778_v4 }
 0x389   : > { %v3721_v57 = vadd.s32 536870912, %v3720_v37  ;;  %v3776_v9 = vshrl.u32 %v3775_v19, 5  ;;  %v3786_v62 = vshll.u32 %v16914_v7, %v3777_v0  ;;  %v3787_v18 = vshrl.u32 %v16911_v10, %v3778_v4 }
 0x38a   : > { %v3789_v47 = vshll.u32 %v16911_v10, %v3777_v0  ;;  %v3629_v46 = vsub.s32 32, %v14624_v40  ;;  %v3771_v11 = vor.u32 8388608, %v3770_v60  ;;  %v3790_v38 = vshrl.u32 %v16912_v14, %v3778_v4 }
 0x38b   : > { %v14655_v21 = vshrl.u32 %v3721_v57, 30  ;;  %v3542_v42 = vsel %vm14594_vm8, %v17159_v26, %v3539_v63  ;;  %v3634_v29 = vadd.s32 127, %v3633_v15  ;;  %v3792_v19 = vshll.u32 %v16912_v14, %v3777_v0 }
 0x38c   : > { %v3793_v17 = vshrl.u32 %v16915_v48, %v3778_v4  ;;  %vm16731_vm3 = vweird.f32 %v17130_v39  ;;  %v3782_v23 = vor.u32 %v3781_v49, %v3780_v13  ;;  %v3785_v22 = vor.u32 %v3784_v20, %v3783_v6 }
 0x38d   : > { %v3723_v45 = vshll.u32 %v14655_v21, 30  ;;  %v3791_v54 = vor.u32 %v3790_v38, %v3789_v47  ;;  %v14665_v57 = vpop.eup %9469  ;;  %v3630_v60 = vshll.u32 %v14556_v58, %v14624_v40  ;;  %v3788_v52 = vor.u32 %v3787_v18, %v3786_v62 }
 0x38e   : > { %17195 = vst [vmem:[#allocation154_spill] sm:$0xff] %v14665_v57  ;;  %vm3795_vm2 = vcmp.lt.s32.totalorder %v3776_v9, 1  ;;  %vm3798_vm13 = vcmp.lt.s32.totalorder %v3776_v9, 4  ;;  %v14669_v63 = vpop.eup %9471  ;;  %vm3343_vm7 = vcmp.eq.s32.totalorder %v14621_v30, 0  ;;  %vm3346_vm6 = vcmp.eq.s32.totalorder %v14621_v30, 2 }
 0x38f   : > { %17196 = vst [vmem:[#allocation155_spill] sm:$0xff] %v14669_v63  ;;  %v3631_v0 = vshrl.u32 %v3613_v44, %v3629_v46  ;;  %v14673_v15 = vsub.s32 %v3720_v37, %v3723_v45  ;;  %v3779_v13 = vshrl.u32 %v16807_v55, %v3778_v4  ;;  %vm3797_vm5 = vcmp.lt.s32.totalorder %v3776_v9, 3  ;;  %v14676_v49 = vpop.eup %9473 }
 0x390   : > { %17197 = vst [vmem:[#allocation156_spill] sm:$0xff] %v14676_v49  ;;  %v3635_v6 = vshll.u32 %v3634_v29, 23  ;;  %v3794_v20 = vor.u32 %v3793_v17, %v3792_v19  ;;  %v3800_v58 = vsel %vm3798_vm13, %v3788_v52, 2102212464  ;;  %v3804_v40 = vsel %vm3798_vm13, %v3791_v54, 920167782  ;;  %v14680_v62 = vpop.eup %9475 }
 0x391   : > { %17198 = vst [vmem:[#allocation157_spill] sm:$0xff] %v14680_v62  ;;  %v3726_v18 = vsub.s32 0, %v14673_v15  ;;  %vm3796_vm10 = vcmp.lt.s32.totalorder %v3776_v9, 2  ;;  %v3803_v44 = vsel %vm3795_vm2, %v3782_v23, %v3785_v22  ;;  %v3811_v37 = vshll.u32 %v3771_v11, 8 }
 0x392   : > { %9477 = vcosq.f32 %v3542_v42  ;;  %v3805_v46 = vsel %vm3797_vm5, %v3788_v52, %v3804_v40  ;;  %vm3342_vm14 = vcmp.lt.s32.totalorder %v14621_v30, 2  ;;  %v3799_v29 = vsel %vm3795_vm2, %v3779_v13, %v3782_v23  ;;  %v17199_v13 = vld [vmem:[#allocation44_spill] sm:$0xff] }
 0x393   : > { %v8942_v38 = vmin.u32 %v3726_v18, %v14673_v15  ;;  %v3801_v19 = vsel %vm3797_vm5, %v3785_v22, %v3800_v58  ;;  %v3807_v17 = vsel %vm3795_vm2, %v3785_v22, %v3788_v52  ;;  %v3632_v45 = vor.u32 %v3631_v0, %v3630_v60 }
 0x394   : > { %v3636_v51 = vor.u32 4788187, %v3635_v6  ;;  %v3806_v11 = vsel %vm3796_vm10, %v3803_v44, %v3805_v46  ;;  %v3808_v47 = vsel %vm3798_vm13, %v3794_v20, 1326507024  ;;  %v3540_v18 = vsub.s32 4, %v14441_v53 }
 0x395   : > { %v3728_v4 = vclz %v8942_v38  ;;  %v3809_v50 = vsel %vm3797_vm5, %v3791_v54, %v3808_v47  ;;  %v14695_v40 = vmul.u32.u64.low %v3811_v37, %v3806_v11  ;;  %v14696_v28 = vmul.u32.u64.high %v3811_v37, %v3806_v11, %v14695_v40  ;;  %v17204_v11 = vld [vmem:[#allocation45_spill] sm:$0xff] }
 0x396   : > { %9479 = vsinq.f32 %v3542_v42  ;;  %v3802_v23 = vsel %vm3796_vm10, %v3799_v29, %v3801_v19  ;;  %v3810_v52 = vsel %vm3796_vm10, %v3807_v17, %v3809_v50  ;;  %vm16730_vm9 = vweird.f32 %v17138_v1 }
 0x397   : > { %v8943_v22 = vadd.s32 4294967294, %v3728_v4  ;;  %v14703_v60 = vmul.u32.u64.low %v3811_v37, %v3810_v52  ;;  %v14704_v0 = vmul.u32.u64.high %v3811_v37, %v3810_v52, %v14703_v60  ;;  %v3869_v6 = vand.u32 2139095040, %v17199_v13 }
 0x398   : > { %v14710_v54 = vsel %vm16731_vm3, nan, %v14630_v36  ;;  %vm3446_vm2 = vcmp.eq.s32.totalorder %v14638_v8, 0  ;;  %v3637_v42 = vand.u32 2147483647, %v3636_v51  ;;  %v3639_v20 = vcvt.s32.f32 %v3632_v45 }
 0x399   : > { %17200 = vst [vmem:[#allocation44_spill] sm:$0xff] %v14710_v54  ;;  %v3716_v50 = vadd.s32 %v14584_v35, %v14599_v31  ;;  %vm8944_vm13 = vcmp.lt.s32.totalorder %v8943_v22, 0  ;;  %v3821_v9 = vadd.s32 1, %v14696_v28  ;;  %v3870_v58 = vshrl.u32 %v3869_v6, 23 }
 0x39a   : > { %v17201_v44 = vxor.u32 2147483648, %v14669_v63  ;;  %v17202_v36 = vxor.u32 2147483648, %v14665_v57  ;;  %vm3559_vm5 = vcmp.lt.s32.totalorder %v17169_v56, 0  ;;  %v3731_v4 = vsel %vm8944_vm13, 0, %v8943_v22 }
 0x39b   : > { %v3818_v35 = vmul.u32 %v3811_v37, %v3802_v23  ;;  %v3541_v31 = vsel %vm3456_vm0, %v3540_v18, %v14441_v53  ;;  %v3732_v46 = vsub.s32 32, %v3731_v4  ;;  %v3736_v38 = vsub.s32 4294967266, %v3731_v4 }
 0x39c   : > { %v3345_v47 = vsel %vm3343_vm7, %v14665_v57, %v17201_v44  ;;  %v3348_v51 = vsel %vm3346_vm6, %v17202_v36, %v14669_v63  ;;  %v16716_v29 = vand.u32 2147483647, %v17199_v13  ;;  %v14731_v19 = vpop.eup %9477  ;;  %v3640_v17 = vmul.f32 %v3639_v20, %v3637_v42 }
 0x39d   : > { %17203 = vst [vmem:[#allocation158_spill] sm:$0xff] %v14731_v19  ;;  %vm3820_vm7 = vc.u32 %v14704_v0, %v14695_v40  ;;  %v8949_v45 = vadd.s32 4294967169, %v3870_v58  ;;  %v3972_v52 = vand.u32 2139095040, %v17204_v11  ;;  %v3733_v22 = vshll.u32 %v14673_v15, %v3731_v4 }
 0x39e   : > { %v3734_v37 = vshrl.u32 %v3716_v50, %v3732_v46  ;;  %v3737_v23 = vadd.s32 127, %v3736_v38  ;;  %v3822_v60 = vsel %vm3820_vm7, %v3821_v9, %v14696_v28  ;;  %v3349_v53 = vsel %vm3342_vm14, %v3345_v47, %v3348_v51 }
 0x39f   : > { %vm3449_vm0 = vcmp.eq.s32.totalorder %v14638_v8, 2  ;;  %v17205_v18 = vand.u32 2147483647, %v17169_v56  ;;  %v3823_v42 = vadd.s32 %v3822_v60, %v3818_v35  ;;  %v3876_v20 = vadd.s32 1, %v8949_v45 }
 0x3a0   : > { %v16714_v58 = vxor.u32 2147483648, %v14680_v62  ;;  %v16715_v15 = vxor.u32 2147483648, %v14676_v49  ;;  %v14751_v28 = vsel %vm14594_vm8, 0, %v3541_v31  ;;  %v3643_v30 = vsub.s32 4, %v14542_v32  ;;  %v14754_v50 = vpop.eup %9479 }
 0x3a1   : > { %vm14743_vm6 = vcmp.le.f32.partialorder %v17205_v18, 0.7853982  ;;  %17208 = vst [vmem:[#allocation45_spill] sm:$0xff] %v14751_v28  ;;  %v3641_v9 = vxor.u32 2147483648, %v3640_v17  ;;  %v3738_v44 = vshll.u32 %v3737_v23, 23  ;;  %v3824_v47 = vadd.s32 536870912, %v3823_v42 }
 0x3a2   : > { %vm3877_vm10 = vcmp.gt.s32.totalorder %v3876_v20, 0  ;;  %v3735_v36 = vor.u32 %v3734_v37, %v3733_v22  ;;  %v3873_v51 = vand.u32 8388607, %v16716_v29  ;;  %v3973_v35 = vshrl.u32 %v3972_v52, 23 }
 0x3a3   : > { %v3878_v4 = vsel %vm3877_vm10, %v3876_v20, 0  ;;  %v14760_v46 = vsel %vm16730_vm9, nan, %v3349_v53  ;;  %v14763_v27 = vand.u32 3, %v14751_v28  ;;  %v14765_v31 = vshrl.u32 %v3824_v47, 30 }
 0x3a4   : > { %17209 = vst [vmem:[#allocation159_spill] sm:$0xff] %v14760_v46  ;;  %v3880_v38 = vand.u32 31, %v3878_v4  ;;  %v14772_v45 = vsel %vm3446_vm2, %v14676_v49, %v16714_v58  ;;  %v14779_v52 = vsel %vm3449_vm0, %v16715_v15, %v14680_v62  ;;  %v14785_v37 = vsel %vm3559_vm5, %v3643_v30, %v14542_v32 }
 0x3a5   : > { %v3739_v60 = vor.u32 4788187, %v3738_v44  ;;  %v3826_v53 = vshll.u32 %v14765_v31, 30  ;;  %v3642_v20 = vsel %vm3559_vm5, %v3641_v9, %v3640_v17  ;;  %v3742_v47 = vcvt.s32.f32 %v3735_v36 }
 0x3a6   : > { %v3881_v18 = vsub.s32 32, %v3880_v38  ;;  %v3874_v58 = vor.u32 8388608, %v3873_v51  ;;  %v8953_v15 = vadd.s32 4294967169, %v3973_v35  ;;  %v3883_v22 = vshll.u32 %v16807_v55, %v3880_v38 }
 0x3a7   : > { %v14791_v29 = vsub.s32 %v3823_v42, %v3826_v53  ;;  %v3886_v32 = vshll.u32 %v16913_v2, %v3880_v38  ;;  %vm3445_vm8 = vcmp.lt.s32.totalorder %v14638_v8, 2  ;;  %v3889_v44 = vshll.u32 %v16914_v7, %v3880_v38 }
 0x3a8   : > { %v3884_v46 = vshrl.u32 %v16913_v2, %v3881_v18  ;;  %v3887_v30 = vshrl.u32 %v16914_v7, %v3881_v18  ;;  %v3890_v23 = vshrl.u32 %v16911_v10, %v3881_v18  ;;  %v3892_v17 = vshll.u32 %v16911_v10, %v3880_v38 }
 0x3a9   : > { %v3740_v9 = vand.u32 2147483647, %v3739_v60  ;;  %v3829_v42 = vsub.s32 0, %v14791_v29  ;;  %v3879_v36 = vshrl.u32 %v3878_v4, 5  ;;  %v3893_v51 = vshrl.u32 %v16912_v14, %v3881_v18 }
 0x3aa   : > { %vm3549_vm14 = vcmp.eq.s32.totalorder %v14763_v27, 0  ;;  %vm3552_vm2 = vcmp.eq.s32.totalorder %v14763_v27, 2  ;;  %v14808_v35 = vsel %vm14743_vm6, %v17169_v56, %v3642_v20  ;;  %v3746_v53 = vsub.s32 4, %v14655_v21 }
 0x3ab   : > { %v3882_v54 = vshrl.u32 %v16807_v55, %v3881_v18  ;;  %v3895_v60 = vshll.u32 %v16912_v14, %v3880_v38  ;;  %v8946_v1 = vmin.u32 %v3829_v42, %v14791_v29  ;;  %v3885_v4 = vor.u32 %v3884_v46, %v3883_v22 }
 0x3ac   : > { %v3888_v39 = vor.u32 %v3887_v30, %v3886_v32  ;;  %v14814_v49 = vshll.u32 %v3874_v58, 8  ;;  %vm3662_vm13 = vcmp.lt.s32.totalorder %v17177_v25, 0  ;;  %v3891_v62 = vor.u32 %v3890_v23, %v3889_v44 }
 0x3ad   : > { %v3894_v57 = vor.u32 %v3893_v51, %v3892_v17  ;;  %v3896_v63 = vshrl.u32 %v16915_v48, %v3881_v18  ;;  %v3979_v20 = vadd.s32 1, %v8953_v15  ;;  %vm16773_vm5 = vweird.f32 %v17153_v12  ;;  %v17217_v12 = vld [vmem:[#allocation46_spill] sm:$0xff] }
 0x3ae   : > { %v3743_v28 = vmul.f32 %v3742_v47, %v3740_v9  ;;  %v3831_v61 = vclz %v8946_v1  ;;  %vm3898_vm7 = vcmp.lt.s32.totalorder %v3879_v36, 1  ;;  %vm3899_vm0 = vcmp.lt.s32.totalorder %v3879_v36, 2 }
 0x3af   : > { %v3897_v38 = vor.u32 %v3896_v63, %v3895_v60  ;;  %vm3900_vm10 = vcmp.lt.s32.totalorder %v3879_v36, 3  ;;  %vm3901_vm9 = vcmp.lt.s32.totalorder %v3879_v36, 4  ;;  %v3902_v46 = vsel %vm3898_vm7, %v3882_v54, %v3885_v4 }
 0x3b0   : > { %v17210_v58 = vand.u32 2147483647, %v17177_v25  ;;  %v8947_v23 = vadd.s32 4294967294, %v3831_v61  ;;  %v3903_v32 = vsel %vm3901_vm9, %v3891_v62, 2102212464  ;;  %v3906_v18 = vsel %vm3898_vm7, %v3885_v4, %v3888_v39 }
 0x3b1   : > { %v3907_v15 = vsel %vm3901_vm9, %v3894_v57, 920167782  ;;  %v3904_v30 = vsel %vm3900_vm10, %v3888_v39, %v3903_v32  ;;  %v3910_v47 = vsel %vm3898_vm7, %v3888_v39, %v3891_v62  ;;  %v3911_v1 = vsel %vm3901_vm9, %v3897_v38, 1326507024 }
 0x3b2   : > { %vm14821_vm3 = vcmp.le.f32.partialorder %v17210_v58, 0.7853982  ;;  %v3908_v44 = vsel %vm3900_vm10, %v3891_v62, %v3907_v15  ;;  %vm8948_vm11 = vcmp.lt.s32.totalorder %v8947_v23, 0  ;;  %v3912_v17 = vsel %vm3900_vm10, %v3894_v57, %v3911_v1 }
 0x3b3   : > { %v3909_v63 = vsel %vm3899_vm0, %v3906_v18, %v3908_v44  ;;  %vm3980_vm12 = vcmp.gt.s32.totalorder %v3979_v20, 0  ;;  %9481 = vcosq.f32 %v14808_v35  ;;  %v3913_v54 = vsel %vm3899_vm0, %v3910_v47, %v3912_v17 }
 0x3b4   : > { %v14829_v9 = vmul.u32.u64.low %v14814_v49, %v3909_v63  ;;  %v14830_v42 = vmul.u32.u64.high %v14814_v49, %v3909_v63, %v14829_v9  ;;  %v3452_v39 = vsel %vm3445_vm8, %v14772_v45, %v14779_v52  ;;  %vm3548_vm9 = vcmp.lt.s32.totalorder %v14763_v27, 2 }
 0x3b5   : > { %v3744_v61 = vxor.u32 2147483648, %v3743_v28  ;;  %v3905_v57 = vsel %vm3899_vm0, %v3902_v46, %v3904_v30  ;;  %v3834_v62 = vsel %vm8948_vm11, 0, %v8947_v23  ;;  %v3981_v4 = vsel %vm3980_vm12, %v3979_v20, 0 }
 0x3b6   : > { %v14840_v51 = vmul.u32.u64.low %v14814_v49, %v3913_v54  ;;  %v14841_v60 = vmul.u32.u64.high %v14814_v49, %v3913_v54, %v14840_v51  ;;  %v17213_v38 = vxor.u32 2147483648, %v14754_v50  ;;  %v17214_v8 = vxor.u32 2147483648, %v14731_v19 }
 0x3b7   : > { %v14856_v52 = vsel %vm14743_vm6, 0, %v14785_v37  ;;  %v3983_v36 = vand.u32 31, %v3981_v4  ;;  %v3747_v20 = vsel %vm3662_vm13, %v3746_v53, %v14655_v21  ;;  %v3921_v46 = vmul.u32 %v14814_v49, %v3905_v57 }
 0x3b8   : > { %v3551_v58 = vsel %vm3549_vm14, %v14731_v19, %v17213_v38  ;;  %v3554_v45 = vsel %vm3552_vm2, %v17214_v8, %v14754_v50  ;;  %v3924_v23 = vadd.s32 1, %v14830_v42  ;;  %v16734_v32 = vand.u32 2147483647, %v17204_v11 }
 0x3b9   : > { %v3745_v18 = vsel %vm3662_vm13, %v3744_v61, %v3743_v28  ;;  %v3819_v15 = vadd.s32 %v14695_v40, %v14704_v0  ;;  %v3835_v6 = vsub.s32 32, %v3834_v62  ;;  %v3839_v37 = vsub.s32 4294967266, %v3834_v62 }
 0x3ba   : > { %v14870_v30 = vsel %vm16773_vm5, nan, %v3452_v39  ;;  %v14873_v21 = vand.u32 3, %v14856_v52  ;;  %vm3923_vm12 = vc.u32 %v14841_v60, %v14829_v9  ;;  %v3984_v49 = vsub.s32 32, %v3983_v36 }
 0x3bb   : > { %17215 = vst [vmem:[#allocation160_spill] sm:$0xff] %v14870_v30  ;;  %v14879_v53 = vsel %vm3548_vm9, %v3551_v58, %v3554_v45  ;;  %9483 = vsinq.f32 %v14808_v35  ;;  %v14884_v40 = vsel %vm14821_vm3, 0, %v3747_v20  ;;  %v3925_v0 = vsel %vm3923_vm12, %v3924_v23, %v14830_v42 }
 0x3bc   : > { %v3748_v28 = vsel %vm14821_vm3, %v17177_v25, %v3745_v18  ;;  %v14891_v44 = vand.u32 3, %v14884_v40  ;;  %v3926_v47 = vadd.s32 %v3925_v0, %v3921_v46  ;;  %v3976_v27 = vand.u32 8388607, %v16734_v32 }
 0x3bd   : > { %v3836_v1 = vshll.u32 %v14791_v29, %v3834_v62  ;;  %v3837_v35 = vshrl.u32 %v3819_v15, %v3835_v6  ;;  %v3840_v63 = vadd.s32 127, %v3839_v37  ;;  %v3982_v17 = vshrl.u32 %v3981_v4, 5  ;;  %v14896_v54 = vpop.eup %9481 }
 0x3be   : > { %17216 = vst [vmem:[#allocation161_spill] sm:$0xff] %v14896_v54  ;;  %v3927_v39 = vadd.s32 536870912, %v3926_v47  ;;  %v3986_v42 = vshll.u32 %v16807_v55, %v3983_v36  ;;  %v3987_v22 = vshrl.u32 %v16913_v2, %v3984_v49  ;;  %v3992_v61 = vshll.u32 %v16914_v7, %v3983_v36 }
 0x3bf   : > { %v3989_v57 = vshll.u32 %v16913_v2, %v3983_v36  ;;  %v3990_v51 = vshrl.u32 %v16914_v7, %v3984_v49  ;;  %v3993_v38 = vshrl.u32 %v16911_v10, %v3984_v49  ;;  %v3995_v29 = vshll.u32 %v16911_v10, %v3983_v36 }
 0x3c0   : > { %v14905_v62 = vshrl.u32 %v3927_v39, 30  ;;  %v3996_v4 = vshrl.u32 %v16912_v14, %v3984_v49  ;;  %v3998_v58 = vshll.u32 %v16912_v14, %v3983_v36  ;;  %v3999_v8 = vshrl.u32 %v16915_v48, %v3984_v49 }
 0x3c1   : > { %vm16746_vm11 = vweird.f32 %v17159_v26  ;;  %9485 = vcosq.f32 %v3748_v28  ;;  %v3841_v20 = vshll.u32 %v3840_v63, 23  ;;  %v3977_v46 = vor.u32 8388608, %v3976_v27 }
 0x3c2   : > { %vm3652_vm3 = vcmp.eq.s32.totalorder %v14873_v21, 0  ;;  %vm3655_vm6 = vcmp.eq.s32.totalorder %v14873_v21, 2  ;;  %v3929_v23 = vshll.u32 %v14905_v62, 30  ;;  %v3985_v18 = vshrl.u32 %v16807_v55, %v3984_v49 }
 0x3c3   : > { %v3988_v15 = vor.u32 %v3987_v22, %v3986_v42  ;;  %v3994_v6 = vor.u32 %v3993_v38, %v3992_v61  ;;  %v3991_v36 = vor.u32 %v3990_v51, %v3989_v57  ;;  %v3997_v37 = vor.u32 %v3996_v4, %v3995_v29 }
 0x3c4   : > { %v4000_v0 = vor.u32 %v3999_v8, %v3998_v58  ;;  %vm4004_vm8 = vcmp.lt.s32.totalorder %v3982_v17, 4  ;;  %v3838_v39 = vor.u32 %v3837_v35, %v3836_v1  ;;  %v14916_v32 = vsub.s32 %v3926_v47, %v3929_v23 }
 0x3c5   : > { %vm4001_vm14 = vcmp.lt.s32.totalorder %v3982_v17, 1  ;;  %v4006_v27 = vsel %vm4004_vm8, %v3994_v6, 2102212464  ;;  %v14919_v63 = vpop.eup %9483  ;;  %v3842_v45 = vor.u32 4788187, %v3841_v20  ;;  %vm4003_vm2 = vcmp.lt.s32.totalorder %v3982_v17, 3 }
 0x3c6   : > { %v4017_v30 = vshll.u32 %v3977_v46, 8  ;;  %v4075_v19 = vand.u32 2139095040, %v17217_v12  ;;  %v3932_v49 = vsub.s32 0, %v14916_v32  ;;  %vm4002_vm13 = vcmp.lt.s32.totalorder %v3982_v17, 2 }
 0x3c7   : > { %v4005_v42 = vsel %vm4001_vm14, %v3985_v18, %v3988_v15  ;;  %v4007_v22 = vsel %vm4003_vm2, %v3991_v36, %v4006_v27  ;;  %v4009_v61 = vsel %vm4001_vm14, %v3988_v15, %v3991_v36  ;;  %v4010_v47 = vsel %vm4004_vm8, %v3997_v37, 920167782 }
 0x3c8   : > { %v4013_v1 = vsel %vm4001_vm14, %v3991_v36, %v3994_v6  ;;  %v4014_v35 = vsel %vm4004_vm8, %v4000_v0, 1326507024  ;;  %vm16745_vm7 = vweird.f32 %v17169_v56  ;;  %v16739_v57 = vxor.u32 2147483648, %v14919_v63 }
 0x3c9   : > { %9487 = vsinq.f32 %v3748_v28  ;;  %vm3765_vm0 = vcmp.lt.s32.totalorder %v17183_v16, 0  ;;  %v3845_v51 = vcvt.s32.f32 %v3838_v39  ;;  %v8950_v38 = vmin.u32 %v3932_v49, %v14916_v32 }
 0x3ca   : > { %v3843_v29 = vand.u32 2147483647, %v3842_v45  ;;  %v4011_v4 = vsel %vm4003_vm2, %v3994_v6, %v4010_v47  ;;  %v4015_v58 = vsel %vm4003_vm2, %v3997_v37, %v4014_v35  ;;  %v4076_v8 = vshrl.u32 %v4075_v19, 23 }
 0x3cb   : > { %v3934_v20 = vclz %v8950_v38  ;;  %v4008_v46 = vsel %vm4002_vm13, %v4005_v42, %v4007_v22  ;;  %v4012_v23 = vsel %vm4002_vm13, %v4009_v61, %v4011_v4  ;;  %v4016_v18 = vsel %vm4002_vm13, %v4013_v1, %v4015_v58  ;;  %v14935_v15 = vpop.eup %9485 }
 0x3cc   : > { %17218 = vst [vmem:[#allocation162_spill] sm:$0xff] %v14935_v15  ;;  %v17219_v28 = vand.u32 2147483647, %v17183_v16  ;;  %v14943_v45 = vmul.u32.u64.low %v4017_v30, %v4016_v18  ;;  %v14944_v6 = vmul.u32.u64.high %v4017_v30, %v4016_v18, %v14943_v45  ;;  %v14953_v17 = vsel %vm16746_vm11, nan, %v14879_v53 }
 0x3cd   : > { %v14946_v37 = vmul.u32.u64.low %v4017_v30, %v4012_v23  ;;  %v14947_v19 = vmul.u32.u64.high %v4017_v30, %v4012_v23, %v14946_v37  ;;  %17222 = vst [vmem:[#allocation163_spill] sm:$0xff] %v14953_v17  ;;  %vm3651_vm9 = vcmp.lt.s32.totalorder %v14873_v21, 2  ;;  %v8951_v0 = vadd.s32 4294967294, %v3934_v20  ;;  %v17226_v45 = vld [vmem:[#allocation47_spill] sm:$0xff] }
 0x3ce   : > { %vm14939_vm10 = vcmp.le.f32.partialorder %v17219_v28, 0.7853982  ;;  %v8957_v39 = vadd.s32 4294967169, %v4076_v8  ;;  %v3654_v27 = vsel %vm3652_vm3, %v14896_v54, %v16739_v57  ;;  %v17223_v49 = vxor.u32 2147483648, %v14896_v54 }
 0x3cf   : > { %v3849_v22 = vsub.s32 4, %v14765_v31  ;;  %v3922_v53 = vadd.s32 %v14829_v9, %v14841_v60  ;;  %v3846_v61 = vmul.f32 %v3845_v51, %v3843_v29  ;;  %vm8952_vm12 = vcmp.lt.s32.totalorder %v8951_v0, 0 }
 0x3d0   : > { %v3657_v42 = vsel %vm3655_vm6, %v17223_v49, %v14919_v63  ;;  %v4024_v47 = vmul.u32 %v4017_v30, %v4008_v46  ;;  %v4082_v1 = vadd.s32 1, %v8957_v39  ;;  %vm3758_vm8 = vcmp.eq.s32.totalorder %v14891_v44, 2 }
 0x3d1   : > { %v3937_v35 = vsel %vm8952_vm12, 0, %v8951_v0  ;;  %vm4026_vm3 = vc.u32 %v14944_v6, %v14946_v37  ;;  %v4027_v38 = vadd.s32 1, %v14947_v19  ;;  %v3658_v4 = vsel %vm3651_vm9, %v3654_v27, %v3657_v42 }
 0x3d2   : > { %v3938_v58 = vsub.s32 32, %v3937_v35  ;;  %v3939_v8 = vshll.u32 %v14916_v32, %v3937_v35  ;;  %v3942_v20 = vsub.s32 4294967266, %v3937_v35  ;;  %v16738_v9 = vxor.u32 2147483648, %v14935_v15 }
 0x3d3   : > { %v3850_v60 = vsel %vm3765_vm0, %v3849_v22, %v14765_v31  ;;  %v4028_v30 = vsel %vm4026_vm3, %v4027_v38, %v14947_v19  ;;  %vm4083_vm6 = vcmp.gt.s32.totalorder %v4082_v1, 0  ;;  %v14981_v51 = vpop.eup %9487  ;;  %v3847_v29 = vxor.u32 2147483648, %v3846_v61 }
 0x3d4   : > { %17224 = vst [vmem:[#allocation164_spill] sm:$0xff] %v14981_v51  ;;  %vm3868_vm14 = vcmp.lt.s32.totalorder %v17199_v13, 0  ;;  %v3940_v21 = vshrl.u32 %v3922_v53, %v3938_v58  ;;  %v3943_v46 = vadd.s32 127, %v3942_v20  ;;  %v4029_v23 = vadd.s32 %v4028_v30, %v4024_v47 }
 0x3d5   : > { %v14986_v32 = vsel %vm16745_vm7, nan, %v3658_v4  ;;  %v16740_v18 = vand.u32 2147483647, %v17217_v12  ;;  %v4084_v28 = vsel %vm4083_vm6, %v4082_v1, 0  ;;  %v4178_v31 = vand.u32 2139095040, %v17226_v45 }
 0x3d6   : > { %17225 = vst [vmem:[#allocation165_spill] sm:$0xff] %v14986_v32  ;;  %v14992_v19 = vsel %vm14939_vm10, 0, %v3850_v60  ;;  %v3941_v0 = vor.u32 %v3940_v21, %v3939_v8  ;;  %v3944_v39 = vshll.u32 %v3943_v46, 23  ;;  %v4030_v27 = vadd.s32 536870912, %v4029_v23 }
 0x3d7   : > { %v15000_v42 = vsel %vm3758_vm8, %v16738_v9, %v14981_v51  ;;  %v15003_v22 = vand.u32 3, %v14992_v19  ;;  %v4086_v53 = vand.u32 31, %v4084_v28  ;;  %v3848_v47 = vsel %vm3765_vm0, %v3847_v29, %v3846_v61 }
 0x3d8   : > { %v3945_v1 = vor.u32 4788187, %v3944_v39  ;;  %v3952_v35 = vsub.s32 4, %v14905_v62  ;;  %v15008_v38 = vshrl.u32 %v4030_v27, 30  ;;  %v4079_v4 = vand.u32 8388607, %v16740_v18 }
 0x3d9   : > { %v15012_v58 = vshrl.u32 %v4084_v28, 5  ;;  %v4087_v8 = vsub.s32 32, %v4086_v53  ;;  %v4179_v20 = vshrl.u32 %v4178_v31, 23  ;;  %v3948_v30 = vcvt.s32.f32 %v3941_v0 }
 0x3da   : > { %v3946_v60 = vand.u32 2147483647, %v3945_v1  ;;  %v4032_v21 = vshll.u32 %v15008_v38, 30  ;;  %v4089_v46 = vshll.u32 %v16807_v55, %v4086_v53  ;;  %v4092_v29 = vshll.u32 %v16913_v2, %v4086_v53 }
 0x3db   : > { %v4090_v61 = vshrl.u32 %v16913_v2, %v4087_v8  ;;  %v4093_v39 = vshrl.u32 %v16914_v7, %v4087_v8  ;;  %v4098_v27 = vshll.u32 %v16911_v10, %v4086_v53  ;;  %v4095_v28 = vshll.u32 %v16914_v7, %v4086_v53 }
 0x3dc   : > { %v15020_v9 = vsub.s32 %v4029_v23, %v4032_v21  ;;  %v4096_v31 = vshrl.u32 %v16911_v10, %v4087_v8  ;;  %v4099_v0 = vshrl.u32 %v16912_v14, %v4087_v8  ;;  %v3851_v1 = vsel %vm14939_vm10, %v17183_v16, %v3848_v47 }
 0x3dd   : > { %v3953_v57 = vsel %vm3868_vm14, %v3952_v35, %v14905_v62  ;;  %v4080_v18 = vor.u32 8388608, %v4079_v4  ;;  %v8961_v49 = vadd.s32 4294967169, %v4179_v20  ;;  %v3949_v32 = vmul.f32 %v3948_v30, %v3946_v60 }
 0x3de   : > { %v4035_v23 = vsub.s32 0, %v15020_v9  ;;  %v4091_v21 = vor.u32 %v4090_v61, %v4089_v46  ;;  %v16749_v17 = vand.u32 2147483647, %v17226_v45  ;;  %v17227_v56 = vand.u32 2147483647, %v17199_v13 }
 0x3df   : > { %v4094_v36 = vor.u32 %v4093_v39, %v4092_v29  ;;  %v4100_v47 = vor.u32 %v4099_v0, %v4098_v27  ;;  %v4101_v54 = vshll.u32 %v16912_v14, %v4086_v53  ;;  %v4102_v62 = vshrl.u32 %v16915_v48, %v4087_v8 }
 0x3e0   : > { %vm15035_vm2 = vcmp.le.f32.partialorder %v17227_v56, 0.7853982  ;;  %vm3755_vm13 = vcmp.eq.s32.totalorder %v14891_v44, 0  ;;  %v8954_v35 = vmin.u32 %v4035_v23, %v15020_v9  ;;  %v4088_v4 = vshrl.u32 %v16807_v55, %v4087_v8 }
 0x3e1   : > { %v4097_v20 = vor.u32 %v4096_v31, %v4095_v28  ;;  %vm4104_vm0 = vcmp.lt.s32.totalorder %v15012_v58, 1  ;;  %v4103_v60 = vor.u32 %v4102_v62, %v4101_v54  ;;  %vm4106_vm10 = vcmp.lt.s32.totalorder %v15012_v58, 3 }
 0x3e2   : > { %v4120_v56 = vshll.u32 %v4080_v18, 8  ;;  %v4185_v30 = vadd.s32 1, %v8961_v49  ;;  %v4025_v46 = vadd.s32 %v14946_v37, %v14944_v6  ;;  %v4037_v53 = vclz %v8954_v35 }
 0x3e3   : > { %vm4105_vm9 = vcmp.lt.s32.totalorder %v15012_v58, 2  ;;  %vm4107_vm12 = vcmp.lt.s32.totalorder %v15012_v58, 4  ;;  %v3950_v61 = vxor.u32 2147483648, %v3949_v32  ;;  %v4112_v8 = vsel %vm4104_vm0, %v4091_v21, %v4094_v36 }
 0x3e4   : > { %v4109_v29 = vsel %vm4107_vm12, %v4097_v20, 2102212464  ;;  %v4113_v39 = vsel %vm4107_vm12, %v4100_v47, 920167782  ;;  %v8955_v27 = vadd.s32 4294967294, %v4037_v53  ;;  %v4108_v54 = vsel %vm4104_vm0, %v4088_v4, %v4091_v21 }
 0x3e5   : > { %v4114_v18 = vsel %vm4106_vm10, %v4097_v20, %v4113_v39  ;;  %v4116_v6 = vsel %vm4104_vm0, %v4094_v36, %v4097_v20  ;;  %v4110_v37 = vsel %vm4106_vm10, %v4094_v36, %v4109_v29  ;;  %v4117_v28 = vsel %vm4107_vm12, %v4103_v60, 1326507024 }
 0x3e6   : > { %v4115_v49 = vsel %vm4105_vm9, %v4112_v8, %v4114_v18  ;;  %vm4186_vm8 = vcmp.gt.s32.totalorder %v4185_v30, 0  ;;  %vm8956_vm3 = vcmp.lt.s32.totalorder %v8955_v27, 0  ;;  %v4118_v31 = vsel %vm4106_vm10, %v4100_v47, %v4117_v28 }
 0x3e7   : > { %v15064_v0 = vmul.u32.u64.low %v4120_v56, %v4115_v49  ;;  %v15065_v23 = vmul.u32.u64.high %v4120_v56, %v4115_v49, %v15064_v0  ;;  %v3951_v21 = vsel %vm3868_vm14, %v3950_v61, %v3949_v32  ;;  %v4040_v62 = vsel %vm8956_vm3, 0, %v8955_v27 }
 0x3e8   : > { %v4119_v36 = vsel %vm4105_vm9, %v4116_v6, %v4118_v31  ;;  %v4187_v35 = vsel %vm4186_vm8, %v4185_v30, 0  ;;  %v4041_v4 = vsub.s32 32, %v4040_v62  ;;  %v4042_v20 = vshll.u32 %v15020_v9, %v4040_v62 }
 0x3e9   : > { %v4045_v60 = vsub.s32 4294967266, %v4040_v62  ;;  %v4111_v53 = vsel %vm4105_vm9, %v4108_v54, %v4110_v37  ;;  %vm3754_vm6 = vcmp.lt.s32.totalorder %v14891_v44, 2  ;;  %9489 = vcosq.f32 %v3851_v1 }
 0x3ea   : > { %v15076_v47 = vmul.u32.u64.low %v4120_v56, %v4119_v36  ;;  %v15077_v29 = vmul.u32.u64.high %v4120_v56, %v4119_v36, %v15076_v47  ;;  %v4189_v8 = vand.u32 31, %v4187_v35  ;;  %v3954_v32 = vsel %vm15035_vm2, %v17199_v13, %v3951_v21 }
 0x3eb   : > { %v4043_v61 = vshrl.u32 %v4025_v46, %v4041_v4  ;;  %v4046_v30 = vadd.s32 127, %v4045_v60  ;;  %v4130_v39 = vadd.s32 1, %v15065_v23  ;;  %v17230_v9 = vxor.u32 2147483648, %v14981_v51 }
 0x3ec   : > { %9491 = vsinq.f32 %v3851_v1  ;;  %v4127_v27 = vmul.u32 %v4120_v56, %v4111_v53  ;;  %v4190_v54 = vsub.s32 32, %v4189_v8  ;;  %v15090_v18 = vsel %vm15035_vm2, 0, %v3953_v57 }
 0x3ed   : > { %v3757_v58 = vsel %vm3755_vm13, %v14935_v15, %v17230_v9  ;;  %v4044_v6 = vor.u32 %v4043_v61, %v4042_v20  ;;  %v4047_v37 = vshll.u32 %v4046_v30, 23  ;;  %v4182_v46 = vand.u32 8388607, %v16749_v17 }
 0x3ee   : > { %9493 = vcosq.f32 %v3954_v32  ;;  %vm4129_vm14 = vc.u32 %v15077_v29, %v15064_v0  ;;  %v4192_v49 = vshll.u32 %v16807_v55, %v4189_v8  ;;  %v4195_v28 = vshll.u32 %v16913_v2, %v4189_v8 }
 0x3ef   : > { %vm3971_vm13 = vcmp.lt.s32.totalorder %v17204_v11, 0  ;;  %v4048_v1 = vor.u32 4788187, %v4047_v37  ;;  %v4051_v56 = vcvt.s32.f32 %v4044_v6  ;;  %v4131_v26 = vsel %vm4129_vm14, %v4130_v39, %v15065_v23 }
 0x3f0   : > { %v4201_v57 = vshll.u32 %v16911_v10, %v4189_v8  ;;  %v4132_v31 = vadd.s32 %v4131_v26, %v4127_v27  ;;  %v15101_v21 = vshrl.u32 %v4187_v35, 5  ;;  %v4193_v62 = vshrl.u32 %v16913_v2, %v4190_v54 }
 0x3f1   : > { %v4196_v36 = vshrl.u32 %v16914_v7, %v4190_v54  ;;  %vm3861_vm2 = vcmp.eq.s32.totalorder %v15003_v22, 2  ;;  %v4049_v4 = vand.u32 2147483647, %v4048_v1  ;;  %v4198_v20 = vshll.u32 %v16914_v7, %v4189_v8 }
 0x3f2   : > { %v4199_v60 = vshrl.u32 %v16911_v10, %v4190_v54  ;;  %v4202_v53 = vshrl.u32 %v16912_v14, %v4190_v54  ;;  %vm3858_vm0 = vcmp.eq.s32.totalorder %v15003_v22, 0  ;;  %9495 = vsinq.f32 %v3954_v32 }
 0x3f3   : > { %v17231_v23 = vand.u32 2147483647, %v17204_v11  ;;  %v4133_v47 = vadd.s32 536870912, %v4132_v31  ;;  %v4183_v61 = vor.u32 8388608, %v4182_v46  ;;  %v4204_v30 = vshll.u32 %v16912_v14, %v4189_v8  ;;  %v15117_v37 = vpop.eup %9489 }
 0x3f4   : > { %v4052_v39 = vmul.f32 %v4051_v56, %v4049_v4  ;;  %v4194_v9 = vor.u32 %v4193_v62, %v4192_v49  ;;  %v4197_v27 = vor.u32 %v4196_v36, %v4195_v28  ;;  %v4203_v6 = vor.u32 %v4202_v53, %v4201_v57  ;;  %17234 = vst [vmem:[#allocation47_spill] sm:$0xff] %v15117_v37 }
 0x3f5   : > { %vm15112_vm10 = vcmp.le.f32.partialorder %v17231_v23, 0.7853982  ;;  %v15120_v1 = vand.u32 3, %v15090_v18  ;;  %v15122_v32 = vshrl.u32 %v4133_v47, 30  ;;  %v4205_v26 = vshrl.u32 %v16915_v48, %v4190_v54 }
 0x3f6   : > { %vm4207_vm9 = vcmp.lt.s32.totalorder %v15101_v21, 1  ;;  %v15129_v46 = vsel %vm3754_vm6, %v3757_v58, %v15000_v42  ;;  %vm3857_vm12 = vcmp.lt.s32.totalorder %v15003_v22, 2  ;;  %v4191_v8 = vshrl.u32 %v16807_v55, %v4190_v54  ;;  %v15134_v28 = vpop.eup %9491 }
 0x3f7   : > { %v4200_v49 = vor.u32 %v4199_v60, %v4198_v20  ;;  %vm4210_vm8 = vcmp.lt.s32.totalorder %v15101_v21, 4  ;;  %17235 = vst [vmem:[#allocation166_spill] sm:$0xff] %v15134_v28  ;;  %v4053_v56 = vxor.u32 2147483648, %v4052_v39  ;;  %v4135_v57 = vshll.u32 %v15122_v32, 30 }
 0x3f8   : > { %v4206_v62 = vor.u32 %v4205_v26, %v4204_v30  ;;  %vm4209_vm3 = vcmp.lt.s32.totalorder %v15101_v21, 3  ;;  %vm4208_vm14 = vcmp.lt.s32.totalorder %v15101_v21, 2  ;;  %v4215_v44 = vsel %vm4207_vm9, %v4194_v9, %v4197_v27  ;;  %v15145_v54 = vpop.eup %9493 }
 0x3f9   : > { %v4216_v42 = vsel %vm4210_vm8, %v4203_v6, 920167782  ;;  %v15143_v58 = vshll.u32 %v4183_v61, 8  ;;  %17236 = vst [vmem:[#allocation167_spill] sm:$0xff] %v15145_v54  ;;  %v16747_v36 = vxor.u32 2147483648, %v15117_v37  ;;  %vm3964_vm6 = vcmp.eq.s32.totalorder %v15120_v1, 2 }
 0x3fa   : > { %v4055_v4 = vsub.s32 4, %v15008_v38  ;;  %v15150_v20 = vsub.s32 %v4132_v31, %v4135_v57  ;;  %v4212_v60 = vsel %vm4210_vm8, %v4200_v49, 2102212464  ;;  %v16748_v53 = vxor.u32 2147483648, %v15134_v28 }
 0x3fb   : > { %vm3961_vm7 = vcmp.eq.s32.totalorder %v15120_v1, 0  ;;  %v4211_v23 = vsel %vm4207_vm9, %v4191_v8, %v4194_v9  ;;  %v4217_v47 = vsel %vm4209_vm3, %v4200_v49, %v4216_v42  ;;  %v4220_v61 = vsel %vm4210_vm8, %v4206_v62, 1326507024 }
 0x3fc   : > { %v4054_v31 = vsel %vm3971_vm13, %v4053_v56, %v4052_v39  ;;  %v4138_v30 = vsub.s32 0, %v15150_v20  ;;  %v4218_v26 = vsel %vm4208_vm14, %v4215_v44, %v4217_v47  ;;  %v4219_v57 = vsel %vm4207_vm9, %v4197_v27, %v4200_v49  ;;  %v15178_v39 = vpop.eup %9495  ;;  %v17238_v56 = vld [vmem:[#allocation48_spill] sm:$0xff] }
 0x3fd   : > { %v4213_v9 = vsel %vm4209_vm3, %v4197_v27, %v4212_v60  ;;  %v4221_v8 = vsel %vm4209_vm3, %v4203_v6, %v4220_v61  ;;  %v15174_v42 = vmul.u32.u64.low %v15143_v58, %v4218_v26  ;;  %v15175_v62 = vmul.u32.u64.high %v15143_v58, %v4218_v26, %v15174_v42  ;;  %17237 = vst [vmem:[#allocation168_spill] sm:$0xff] %v15178_v39 }
 0x3fe   : > { %vm16772_vm8 = vweird.f32 %v17177_v25  ;;  %vm16768_vm11 = vweird.f32 %v17183_v16  ;;  %v3863_v27 = vsel %vm3861_vm2, %v16747_v36, %v15134_v28  ;;  %v4056_v6 = vsel %vm3971_vm13, %v4055_v4, %v15008_v38 }
 0x3ff   : > { %vm4074_vm9 = vcmp.lt.s32.totalorder %v17217_v12, 0  ;;  %v8958_v49 = vmin.u32 %v4138_v30, %v15150_v20  ;;  %v16753_v44 = vand.u32 2147483647, %v17238_v56  ;;  %v3860_v60 = vsel %vm3858_vm0, %v15117_v37, %v16748_v53 }
 0x400   : > { %vm3960_vm3 = vcmp.lt.s32.totalorder %v15120_v1, 2  ;;  %v4057_v47 = vsel %vm15112_vm10, %v17204_v11, %v4054_v31  ;;  %v4222_v38 = vsel %vm4208_vm14, %v4219_v57, %v4221_v8  ;;  %v4281_v4 = vand.u32 2139095040, %v17238_v56 }
 0x401   : > { %v4140_v61 = vclz %v8958_v49  ;;  %v4214_v30 = vsel %vm4208_vm14, %v4211_v23, %v4213_v9  ;;  %v15208_v26 = vmul.u32.u64.low %v15143_v58, %v4222_v38  ;;  %v15209_v36 = vmul.u32.u64.high %v15143_v58, %v4222_v38, %v15208_v26 }
 0x402   : > { %v16750_v53 = vxor.u32 2147483648, %v15145_v54  ;;  %v15214_v17 = vsel %vm15112_vm10, 0, %v4056_v6  ;;  %v17239_v31 = vand.u32 2147483647, %v17217_v12  ;;  %v4233_v8 = vadd.s32 1, %v15175_v62 }
 0x403   : > { %v4282_v21 = vshrl.u32 %v4281_v4, 23  ;;  %v3864_v23 = vsel %vm3857_vm12, %v3860_v60, %v3863_v27  ;;  %v16751_v9 = vxor.u32 2147483648, %v15178_v39  ;;  %v15227_v49 = vand.u32 3, %v15214_v17 }
 0x404   : > { %vm15218_vm13 = vcmp.le.f32.partialorder %v17239_v31, 0.7853982  ;;  %v8959_v35 = vadd.s32 4294967294, %v4140_v61  ;;  %9497 = vcosq.f32 %v4057_v47  ;;  %v4158_v6 = vsub.s32 4, %v15122_v32 }
 0x405   : > { %v4230_v38 = vmul.u32 %v15143_v58, %v4214_v30  ;;  %v8965_v26 = vadd.s32 4294967169, %v4282_v21  ;;  %9499 = vsinq.f32 %v4057_v47  ;;  %v4128_v31 = vadd.s32 %v15064_v0, %v15077_v29 }
 0x406   : > { %vm8960_vm2 = vcmp.lt.s32.totalorder %v8959_v35, 0  ;;  %vm4232_vm0 = vc.u32 %v15209_v36, %v15174_v42  ;;  %v3966_v22 = vsel %vm3964_vm6, %v16750_v53, %v15178_v39  ;;  %v3963_v0 = vsel %vm3961_vm7, %v15145_v54, %v16751_v9 }
 0x407   : > { %v4143_v27 = vsel %vm8960_vm2, 0, %v8959_v35  ;;  %v4234_v60 = vsel %vm4232_vm0, %v4233_v8, %v15175_v62  ;;  %v4288_v4 = vadd.s32 1, %v8965_v26  ;;  %v4159_v61 = vsel %vm4074_vm9, %v4158_v6, %v15122_v32  ;;  %v17242_v26 = vld [vmem:[#allocation49_spill] sm:$0xff] }
 0x408   : > { %v4144_v29 = vsub.s32 32, %v4143_v27  ;;  %v4145_v58 = vshll.u32 %v15150_v20, %v4143_v27  ;;  %v4148_v47 = vsub.s32 4294967266, %v4143_v27  ;;  %v4235_v30 = vadd.s32 %v4234_v60, %v4230_v38 }
 0x409   : > { %v4285_v21 = vand.u32 8388607, %v16753_v44  ;;  %vm4289_vm10 = vcmp.gt.s32.totalorder %v4288_v4, 0  ;;  %v16752_v53 = vand.u32 2147483647, %v17242_v26  ;;  %v15256_v9 = vsel %vm16772_vm8, nan, %v15129_v46 }
 0x40a   : > { %v4146_v62 = vshrl.u32 %v4128_v31, %v4144_v29  ;;  %v4149_v8 = vadd.s32 127, %v4148_v47  ;;  %v4290_v35 = vsel %vm4289_vm10, %v4288_v4, 0  ;;  %17243 = vst [vmem:[#allocation48_spill] sm:$0xff] %v15256_v9  ;;  %v15260_v20 = vsel %vm16768_vm11, nan, %v3864_v23 }
 0x40b   : > { %17244 = vst [vmem:[#allocation49_spill] sm:$0xff] %v15260_v20  ;;  %v4236_v32 = vadd.s32 536870912, %v4235_v30  ;;  %v4292_v6 = vand.u32 31, %v4290_v35  ;;  %v15264_v38 = vsel %vm3960_vm3, %v3963_v0, %v3966_v22  ;;  %vm4067_vm7 = vcmp.eq.s32.totalorder %v15227_v49, 2 }
 0x40c   : > { %v4147_v31 = vor.u32 %v4146_v62, %v4145_v58  ;;  %v4150_v27 = vshll.u32 %v4149_v8, 23  ;;  %v15269_v60 = vsel %vm15218_vm13, 0, %v4159_v61  ;;  %vm4064_vm12 = vcmp.eq.s32.totalorder %v15227_v49, 0 }
 0x40d   : > { %v15272_v46 = vshrl.u32 %v4236_v32, 30  ;;  %v4286_v23 = vor.u32 8388608, %v4285_v21  ;;  %v4293_v4 = vsub.s32 32, %v4292_v6  ;;  %v4384_v29 = vand.u32 2139095040, %v17242_v26 }
 0x40e   : > { %v4151_v47 = vor.u32 4788187, %v4150_v27  ;;  %v4154_v1 = vcvt.s32.f32 %v4147_v31  ;;  %v15277_v22 = vadd.s32 %v15174_v42, %v15209_v36  ;;  %v15281_v0 = vand.u32 8388607, %v16752_v53  ;;  %v15283_v58 = vpop.eup %9497 }
 0x40f   : > { %v4238_v61 = vshll.u32 %v15272_v46, 30  ;;  %v15286_v62 = vshrl.u32 %v4290_v35, 5  ;;  %v4295_v21 = vshll.u32 %v16807_v55, %v4292_v6  ;;  %v4298_v8 = vshll.u32 %v16913_v2, %v4292_v6  ;;  %v15290_v32 = vpop.eup %9499 }
 0x410   : > { %v4152_v31 = vand.u32 2147483647, %v4151_v47  ;;  %v4296_v36 = vshrl.u32 %v16913_v2, %v4293_v4  ;;  %v4299_v42 = vshrl.u32 %v16914_v7, %v4293_v4  ;;  %v4304_v27 = vshll.u32 %v16911_v10, %v4292_v6 }
 0x411   : > { %v15295_v53 = vsub.s32 %v4235_v30, %v4238_v61  ;;  %v4301_v44 = vshll.u32 %v16914_v7, %v4292_v6  ;;  %v4302_v35 = vshrl.u32 %v16911_v10, %v4293_v4  ;;  %v4305_v20 = vshrl.u32 %v16912_v14, %v4293_v4 }
 0x412   : > { %v4155_v16 = vmul.f32 %v4154_v1, %v4152_v31  ;;  %v15301_v25 = vshll.u32 %v4286_v23, 8  ;;  %v4385_v47 = vshrl.u32 %v4384_v29, 23  ;;  %vm4063_vm14 = vcmp.lt.s32.totalorder %v15227_v49, 2 }
 0x413   : > { %v16769_v54 = vxor.u32 2147483648, %v15290_v32  ;;  %v4241_v39 = vsub.s32 0, %v15295_v53  ;;  %v4294_v30 = vshrl.u32 %v16807_v55, %v4293_v4  ;;  %v4307_v61 = vshll.u32 %v16912_v14, %v4292_v6 }
 0x414   : > { %v4297_v37 = vor.u32 %v4296_v36, %v4295_v21  ;;  %v4300_v28 = vor.u32 %v4299_v42, %v4298_v8  ;;  %v4306_v15 = vor.u32 %v4305_v20, %v4304_v27  ;;  %v4308_v51 = vshrl.u32 %v16915_v48, %v4293_v4 }
 0x415   : > { %v4156_v9 = vxor.u32 2147483648, %v4155_v16  ;;  %v8962_v23 = vmin.u32 %v4241_v39, %v15295_v53  ;;  %v4303_v1 = vor.u32 %v4302_v35, %v4301_v44  ;;  %vm4310_vm6 = vcmp.lt.s32.totalorder %v15286_v62, 1 }
 0x416   : > { %v4309_v29 = vor.u32 %v4308_v51, %v4307_v61  ;;  %vm4312_vm3 = vcmp.lt.s32.totalorder %v15286_v62, 3  ;;  %vm4313_vm2 = vcmp.lt.s32.totalorder %v15286_v62, 4  ;;  %v8969_v31 = vadd.s32 4294967169, %v4385_v47 }
 0x417   : > { %vm16771_vm0 = vweird.f32 %v17199_v13  ;;  %v17245_v6 = vxor.u32 2147483648, %v15283_v58  ;;  %vm4177_vm10 = vcmp.lt.s32.totalorder %v17226_v45, 0  ;;  %v4243_v39 = vclz %v8962_v23 }
 0x418   : > { %vm4311_vm11 = vcmp.lt.s32.totalorder %v15286_v62, 2  ;;  %v4315_v51 = vsel %vm4313_vm2, %v4303_v1, 2102212464  ;;  %v4066_v44 = vsel %vm4064_vm12, %v15283_v58, %v16769_v54  ;;  %v4261_v4 = vsub.s32 4, %v15272_v46 }
 0x419   : > { %v4069_v20 = vsel %vm4067_vm7, %v17245_v6, %v15290_v32  ;;  %v4318_v21 = vsel %vm4310_vm6, %v4297_v37, %v4300_v28  ;;  %v4319_v8 = vsel %vm4313_vm2, %v4306_v15, 920167782  ;;  %vm16770_vm7 = vweird.f32 %v17204_v11 }
 0x41a   : > { %v4157_v36 = vsel %vm4074_vm9, %v4156_v9, %v4155_v16  ;;  %v8963_v42 = vadd.s32 4294967294, %v4243_v39  ;;  %v4314_v27 = vsel %vm4310_vm6, %v4294_v30, %v4297_v37  ;;  %v4320_v35 = vsel %vm4312_vm3, %v4303_v1, %v4319_v8 }
 0x41b   : > { %v17246_v47 = vand.u32 2147483647, %v17226_v45  ;;  %v4316_v23 = vsel %vm4312_vm3, %v4300_v28, %v4315_v51  ;;  %v4321_v6 = vsel %vm4311_vm11, %v4318_v21, %v4320_v35  ;;  %v4322_v16 = vsel %vm4310_vm6, %v4300_v28, %v4303_v1 }
 0x41c   : > { %v4323_v37 = vsel %vm4313_vm2, %v4309_v29, 1326507024  ;;  %vm8964_vm9 = vcmp.lt.s32.totalorder %v8963_v42, 0  ;;  %v15357_v30 = vmul.u32.u64.low %v15301_v25, %v4321_v6  ;;  %v15358_v39 = vmul.u32.u64.high %v15301_v25, %v4321_v6, %v15357_v30 }
 0x41d   : > { %vm15342_vm12 = vcmp.le.f32.partialorder %v17246_v47, 0.7853982  ;;  %v4324_v9 = vsel %vm4312_vm3, %v4306_v15, %v4323_v37  ;;  %v4160_v51 = vsel %vm15218_vm13, %v17217_v12, %v4157_v36  ;;  %v4246_v21 = vsel %vm8964_vm9, 0, %v8963_v42 }
 0x41e   : > { %v4325_v28 = vsel %vm4311_vm11, %v4322_v16, %v4324_v9  ;;  %v4391_v1 = vadd.s32 1, %v8969_v31  ;;  %v4247_v8 = vsub.s32 32, %v4246_v21  ;;  %v4248_v29 = vshll.u32 %v15295_v53, %v4246_v21 }
 0x41f   : > { %v4251_v35 = vsub.s32 4294967266, %v4246_v21  ;;  %v4317_v15 = vsel %vm4311_vm11, %v4314_v27, %v4316_v23  ;;  %v4070_v47 = vsel %vm4063_vm14, %v4066_v44, %v4069_v20  ;;  %v4336_v31 = vadd.s32 1, %v15358_v39  ;;  %v17251_v21 = vld [vmem:[#allocation50_spill] sm:$0xff] }
 0x420   : > { %v15372_v6 = vmul.u32.u64.low %v15301_v25, %v4325_v28  ;;  %v15373_v37 = vmul.u32.u64.high %v15301_v25, %v4325_v28, %v15372_v6  ;;  %vm4392_vm13 = vcmp.gt.s32.totalorder %v4391_v1, 0  ;;  %v4249_v57 = vshrl.u32 %v15277_v22, %v4247_v8 }
 0x421   : > { %v4252_v36 = vadd.s32 127, %v4251_v35  ;;  %v4393_v42 = vsel %vm4392_vm13, %v4391_v1, 0  ;;  %9501 = vcosq.f32 %v4160_v51  ;;  %v4262_v53 = vsel %vm4177_vm10, %v4261_v4, %v15272_v46  ;;  %v17252_v35 = vld [vmem:[#allocation52_spill] sm:$0xff] }
 0x422   : > { %v4333_v62 = vmul.u32 %v15301_v25, %v4317_v15  ;;  %v4395_v49 = vand.u32 31, %v4393_v42  ;;  %9503 = vsinq.f32 %v4160_v51  ;;  %v4250_v20 = vor.u32 %v4249_v57, %v4248_v29 }
 0x423   : > { %v4253_v44 = vshll.u32 %v4252_v36, 23  ;;  %v4389_v27 = vor.u32 8388608, %v15281_v0  ;;  %v15385_v22 = vsel %vm16771_vm0, nan, %v15264_v38  ;;  %v15388_v23 = vand.u32 3, %v15269_v60 }
 0x424   : > { %17249 = vst [vmem:[#allocation169_spill] sm:$0xff] %v15385_v22  ;;  %vm4335_vm11 = vc.u32 %v15373_v37, %v15357_v30  ;;  %v4396_v46 = vsub.s32 32, %v4395_v49  ;;  %v4257_v25 = vcvt.s32.f32 %v4250_v20  ;;  %v15394_v16 = vsel %vm15342_vm12, 0, %v4262_v53 }
 0x425   : > { %v4254_v4 = vor.u32 4788187, %v4253_v44  ;;  %v4337_v0 = vsel %vm4335_vm11, %v4336_v31, %v15358_v39  ;;  %v15399_v9 = vsel %vm16770_vm7, nan, %v4070_v47  ;;  %v15402_v38 = vand.u32 3, %v15394_v16 }
 0x426   : > { %17250 = vst [vmem:[#allocation170_spill] sm:$0xff] %v15399_v9  ;;  %v4338_v51 = vadd.s32 %v4337_v0, %v4333_v62  ;;  %v4577_v28 = vadd.s32 3, %v17251_v21  ;;  %v15405_v8 = vshrl.u32 %v4393_v42, 5  ;;  %v15407_v29 = vshll.u32 %v4389_v27, 8 }
 0x427   : > { %v4255_v1 = vand.u32 2147483647, %v4254_v4  ;;  %v4681_v15 = vadd.s32 3, %v17252_v35  ;;  %vm4170_vm14 = vcmp.eq.s32.totalorder %v15388_v23, 2  ;;  %v4398_v6 = vshll.u32 %v16807_v55, %v4395_v49 }
 0x428   : > { %v4339_v39 = vadd.s32 536870912, %v4338_v51  ;;  %v4399_v47 = vshrl.u32 %v16913_v2, %v4396_v46  ;;  %v4401_v57 = vshll.u32 %v16913_v2, %v4395_v49  ;;  %vm4167_vm6 = vcmp.eq.s32.totalorder %v15388_v23, 0 }
 0x429   : > { %v4258_v36 = vmul.f32 %v4257_v25, %v4255_v1  ;;  %v4402_v31 = vshrl.u32 %v16914_v7, %v4396_v46  ;;  %v4404_v42 = vshll.u32 %v16914_v7, %v4395_v49  ;;  %v4405_v53 = vshrl.u32 %v16911_v10, %v4396_v46 }
 0x42a   : > { %v4340_v62 = vshrl.u32 %v4339_v39, 30  ;;  %v4407_v20 = vshll.u32 %v16911_v10, %v4395_v49  ;;  %v4408_v44 = vshrl.u32 %v16912_v14, %v4396_v46  ;;  %v15420_v27 = vand.u32 3, %v4577_v28  ;;  %v17253_v10 = vld [vmem:[#allocation54_spill] sm:$0xff] }
 0x42b   : > { %v4259_v4 = vxor.u32 2147483648, %v4258_v36  ;;  %v4410_v0 = vshll.u32 %v16912_v14, %v4395_v49  ;;  %v4411_v2 = vshrl.u32 %v16915_v48, %v4396_v46  ;;  %v15424_v21 = vand.u32 3, %v4681_v15  ;;  %v15426_v25 = vpop.eup %9501 }
 0x42c   : > { %vm4166_vm3 = vcmp.lt.s32.totalorder %v15388_v23, 2  ;;  %v4341_v7 = vshll.u32 %v4340_v62, 30  ;;  %v4397_v1 = vshrl.u32 %v16807_v55, %v4396_v46  ;;  %v4400_v35 = vor.u32 %v4399_v47, %v4398_v6  ;;  %v15433_v28 = vpop.eup %9503 }
 0x42d   : > { %v15431_v39 = vadd.s32 3, %v17253_v10  ;;  %v4260_v14 = vsel %vm4177_vm10, %v4259_v4, %v4258_v36  ;;  %v4403_v49 = vor.u32 %v4402_v31, %v4401_v57  ;;  %v4406_v48 = vor.u32 %v4405_v53, %v4404_v42  ;;  %v17254_v36 = vld [vmem:[#allocation61_spill] sm:$0xff] }
 0x42e   : > { %v4409_v15 = vor.u32 %v4408_v44, %v4407_v20  ;;  %v4263_v54 = vsel %vm15342_vm12, %v17226_v45, %v4260_v14  ;;  %vm4280_vm2 = vcmp.lt.s32.totalorder %v17238_v56, 0  ;;  %v15441_v9 = vsub.s32 %v4338_v51, %v4341_v7 }
 0x42f   : > { %vm4413_vm9 = vcmp.lt.s32.totalorder %v15405_v8, 1  ;;  %vm4416_vm13 = vcmp.lt.s32.totalorder %v15405_v8, 4  ;;  %v16774_v55 = vxor.u32 2147483648, %v15426_v25  ;;  %9505 = vcosq.f32 %v4263_v54 }
 0x430   : > { %v4412_v46 = vor.u32 %v4411_v2, %v4410_v0  ;;  %v4418_v6 = vsel %vm4416_vm13, %v4406_v48, 2102212464  ;;  %v16775_v47 = vxor.u32 2147483648, %v15433_v28  ;;  %9507 = vsinq.f32 %v4263_v54 }
 0x431   : > { %v4344_v61 = vsub.s32 0, %v15441_v9  ;;  %vm4415_vm10 = vcmp.lt.s32.totalorder %v15405_v8, 3  ;;  %vm4414_vm12 = vcmp.lt.s32.totalorder %v15405_v8, 2  ;;  %v4421_v51 = vsel %vm4413_vm9, %v4400_v35, %v4403_v49 }
 0x432   : > { %v4422_v57 = vsel %vm4416_vm13, %v4409_v15, 920167782  ;;  %v4889_v31 = vadd.s32 3, %v17254_v36  ;;  %v4417_v53 = vsel %vm4413_vm9, %v4397_v1, %v4400_v35  ;;  %v4419_v54 = vsel %vm4415_vm10, %v4403_v49, %v4418_v6 }
 0x433   : > { %v8966_v42 = vmin.u32 %v4344_v61, %v15441_v9  ;;  %v4425_v20 = vsel %vm4413_vm9, %v4403_v49, %v4406_v48  ;;  %vm16780_vm11 = vweird.f32 %v17217_v12  ;;  %v4172_v44 = vsel %vm4170_vm14, %v16774_v55, %v15433_v28  ;;  %v17291_v49 = vld [vmem:[#allocation69_spill] sm:$0xff] }
 0x434   : > { %v4364_v4 = vsub.s32 4, %v4340_v62  ;;  %v4423_v0 = vsel %vm4415_vm10, %v4406_v48, %v4422_v57  ;;  %v4426_v2 = vsel %vm4416_vm13, %v4412_v46, 1326507024  ;;  %v4169_v7 = vsel %vm4167_vm6, %v15426_v25, %v16775_v47 }
 0x435   : > { %v4346_v1 = vclz %v8966_v42  ;;  %v4424_v35 = vsel %vm4414_vm12, %v4421_v51, %v4423_v0  ;;  %v4427_v10 = vsel %vm4415_vm10, %v4409_v15, %v4426_v2  ;;  %vm4273_vm14 = vcmp.eq.s32.totalorder %v15402_v38, 2 }
 0x436   : > { %v17255_v14 = vand.u32 2147483647, %v17238_v56  ;;  %v4420_v48 = vsel %vm4414_vm12, %v4417_v53, %v4419_v54  ;;  %v4428_v46 = vsel %vm4414_vm12, %v4425_v20, %v4427_v10  ;;  %vm4270_vm6 = vcmp.eq.s32.totalorder %v15402_v38, 0 }
 0x437   : > { %v15495_v6 = vmul.u32.u64.low %v15407_v29, %v4424_v35  ;;  %v15496_v61 = vmul.u32.u64.high %v15407_v29, %v4424_v35, %v15495_v6  ;;  %v8967_v15 = vadd.s32 4294967294, %v4346_v1  ;;  %vm4580_vm13 = vcmp.eq.s32.totalorder %v15420_v27, 0  ;;  %v17262_v35 = vld [vmem:[#allocation56_spill] sm:$0xff] }
 0x438   : > { %vm15486_vm9 = vcmp.le.f32.partialorder %v17255_v14, 0.7853982  ;;  %v15501_v51 = vmul.u32.u64.low %v15407_v29, %v4428_v46  ;;  %v15502_v57 = vmul.u32.u64.high %v15407_v29, %v4428_v46, %v15501_v51  ;;  %v4173_v36 = vsel %vm4166_vm3, %v4169_v7, %v4172_v44  ;;  %v17260_v44 = vld [vmem:[#allocation12_spill] sm:$0xff]  ;;  %v17264_v14 = vld [vmem:[#allocation53_spill] sm:$0xff] }
 0x439   : > { %v4334_v8 = vadd.s32 %v15357_v30, %v15373_v37  ;;  %v4365_v42 = vsel %vm4280_vm2, %v4364_v4, %v4340_v62  ;;  %vm4583_vm10 = vcmp.eq.s32.totalorder %v15420_v27, 2  ;;  %vm8968_vm12 = vcmp.lt.s32.totalorder %v8967_v15, 0  ;;  %v15515_v54 = vpop.eup %9505  ;;  %v17258_v30 = vld [vmem:[#allocation51_spill] sm:$0xff] }
 0x43a   : > { %v4436_v53 = vmul.u32 %v15407_v29, %v4420_v48  ;;  %vm4684_vm7 = vcmp.eq.s32.totalorder %v15424_v21, 0  ;;  %vm4687_vm0 = vcmp.eq.s32.totalorder %v15424_v21, 2  ;;  %v4349_v20 = vsel %vm8968_vm12, 0, %v8967_v15  ;;  %v15522_v4 = vpop.eup %9507 }
 0x43b   : > { %v4439_v23 = vadd.s32 1, %v15496_v61  ;;  %vm4579_vm3 = vcmp.lt.s32.totalorder %v15420_v27, 2  ;;  %v17259_v37 = vxor.u32 2147483648, %v17258_v30  ;;  %v4350_v0 = vsub.s32 32, %v4349_v20 }
 0x43c   : > { %v4351_v29 = vshll.u32 %v15441_v9, %v4349_v20  ;;  %v4354_v2 = vsub.s32 4294967266, %v4349_v20  ;;  %v17261_v7 = vxor.u32 2147483648, %v17260_v44  ;;  %vm4269_vm12 = vcmp.lt.s32.totalorder %v15402_v38, 2 }
 0x43d   : > { %v4582_v62 = vsel %vm4580_vm13, %v17260_v44, %v17259_v37  ;;  %vm4438_vm8 = vc.u32 %v15502_v57, %v15495_v6  ;;  %vm4683_vm5 = vcmp.lt.s32.totalorder %v15424_v21, 2  ;;  %v17263_v10 = vxor.u32 2147483648, %v17262_v35  ;;  %v17267_v21 = vld [vmem:[#allocation60_spill] sm:$0xff] }
 0x43e   : > { %v4585_v1 = vsel %vm4583_vm10, %v17261_v7, %v17258_v30  ;;  %v17265_v46 = vxor.u32 2147483648, %v17264_v14  ;;  %v16776_v15 = vxor.u32 2147483648, %v15515_v54  ;;  %v4352_v51 = vshrl.u32 %v4334_v8, %v4350_v0 }
 0x43f   : > { %v4686_v48 = vsel %vm4684_vm7, %v17264_v14, %v17263_v10  ;;  %v4355_v20 = vadd.s32 127, %v4354_v2  ;;  %v4440_v30 = vsel %vm4438_vm8, %v4439_v23, %v15496_v61  ;;  %v16777_v37 = vxor.u32 2147483648, %v15522_v4 }
 0x440   : > { %v4689_v9 = vsel %vm4687_vm0, %v17265_v46, %v17262_v35  ;;  %v4441_v44 = vadd.s32 %v4440_v30, %v4436_v53  ;;  %v4786_v7 = vand.u32 3, %v15431_v39  ;;  %v4890_v55 = vand.u32 3, %v4889_v31  ;;  %v17275_v30 = vld [vmem:[#allocation65_spill] sm:$0xff] }
 0x441   : > { %v15544_v47 = vsel %vm16780_vm11, nan, %v4173_v36  ;;  %vm16779_vm7 = vweird.f32 %v17226_v45  ;;  %v4353_v10 = vor.u32 %v4352_v51, %v4351_v29  ;;  %v4356_v35 = vshll.u32 %v4355_v20, 23 }
 0x442   : > { %17266 = vst [vmem:[#allocation50_spill] sm:$0xff] %v15544_v47  ;;  %v15549_v8 = vsel %vm15486_vm9, 0, %v4365_v42  ;;  %vm4383_vm8 = vcmp.lt.s32.totalorder %v17242_v26, 0  ;;  %v4442_v61 = vadd.s32 536870912, %v4441_v44  ;;  %v4586_v53 = vsel %vm4579_vm3, %v4582_v62, %v4585_v1  ;;  %v17271_v1 = vld [vmem:[#allocation63_spill] sm:$0xff] }
 0x443   : > { %v4690_v39 = vsel %vm4683_vm5, %v4686_v48, %v4689_v9  ;;  %vm4788_vm0 = vcmp.eq.s32.totalorder %v4786_v7, 0  ;;  %v4275_v31 = vsel %vm4273_vm14, %v16776_v15, %v15522_v4  ;;  %v4357_v36 = vor.u32 4788187, %v4356_v35  ;;  %v17273_v48 = vld [vmem:[#allocation62_spill] sm:$0xff]  ;;  %v17277_v35 = vld [vmem:[#allocation64_spill] sm:$0xff] }
 0x444   : > { %v4360_v23 = vcvt.s32.f32 %v4353_v10  ;;  %vm4791_vm13 = vcmp.eq.s32.totalorder %v4786_v7, 2  ;;  %v4272_v27 = vsel %vm4270_vm6, %v15515_v54, %v16777_v37  ;;  %v4443_v42 = vshrl.u32 %v4442_v61, 30  ;;  %v17279_v37 = vld [vmem:[#allocation67_spill] sm:$0xff] }
 0x445   : > { %vm4892_vm10 = vcmp.eq.s32.totalorder %v4890_v55, 0  ;;  %v4993_v62 = vadd.s32 3, %v17267_v21  ;;  %v4358_v0 = vand.u32 2147483647, %v4357_v36  ;;  %v17268_v29 = vand.u32 2147483647, %v17242_v26 }
 0x446   : > { %vm4787_vm14 = vcmp.lt.s32.totalorder %v4786_v7, 2  ;;  %v17272_v14 = vxor.u32 2147483648, %v17271_v1  ;;  %vm4895_vm3 = vcmp.eq.s32.totalorder %v4890_v55, 2  ;;  %v4444_v9 = vshll.u32 %v4443_v42, 30 }
 0x447   : > { %vm15569_vm5 = vcmp.le.f32.partialorder %v17268_v29, 0.7853982  ;;  %v17274_v51 = vxor.u32 2147483648, %v17273_v48  ;;  %vm4891_vm6 = vcmp.lt.s32.totalorder %v4890_v55, 2  ;;  %v17276_v10 = vxor.u32 2147483648, %v17275_v30  ;;  %v17286_v55 = vld [vmem:[#allocation22_spill] sm:$0xff] }
 0x448   : > { %v4790_v46 = vsel %vm4788_vm0, %v17273_v48, %v17272_v14  ;;  %v4361_v36 = vmul.f32 %v4360_v23, %v4358_v0  ;;  %v4467_v21 = vsub.s32 4, %v4443_v42  ;;  %v17278_v29 = vxor.u32 2147483648, %v17277_v35  ;;  %v17281_v0 = vld [vmem:[#allocation9_spill] sm:$0xff] }
 0x449   : > { %v4793_v20 = vsel %vm4791_vm13, %v17274_v51, %v17271_v1  ;;  %v4894_v61 = vsel %vm4892_vm10, %v17277_v35, %v17276_v10  ;;  %v5097_v47 = vadd.s32 3, %v17279_v37  ;;  %v15587_v14 = vand.u32 3, %v15549_v8  ;;  %v17280_v1 = vld [vmem:[#allocation73_spill] sm:$0xff]  ;;  %v17283_v35 = vld [vmem:[#allocation10_spill] sm:$0xff] }
 0x44a   : > { %v4897_v15 = vsel %vm4895_vm3, %v17278_v29, %v17275_v30  ;;  %v15589_v22 = vsub.s32 %v4441_v44, %v4444_v9  ;;  %v4994_v48 = vand.u32 3, %v4993_v62  ;;  %v5201_v51 = vadd.s32 3, %v17280_v1  ;;  %v17295_v1 = vld [vmem:[#allocation71_spill] sm:$0xff] }
 0x44b   : > { %v4276_v12 = vsel %vm4269_vm12, %v4272_v27, %v4275_v31  ;;  %v4362_v10 = vxor.u32 2147483648, %v4361_v36  ;;  %v4437_v23 = vadd.s32 %v15495_v6, %v15502_v57  ;;  %vm17282_vm0 = vweird.f32 %v17281_v0  ;;  %v17288_v27 = vld [vmem:[#allocation11_spill] sm:$0xff] }
 0x44c   : > { %v15598_v30 = vsel %vm17282_vm0, nan, %v4586_v53  ;;  %v4447_v37 = vsub.s32 0, %v15589_v22  ;;  %vm17284_vm13 = vweird.f32 %v17283_v35  ;;  %v4794_v62 = vsel %vm4787_vm14, %v4790_v46, %v4793_v20  ;;  %v17293_v20 = vld [vmem:[#allocation68_spill] sm:$0xff] }
 0x44d   : > { %v15603_v44 = vsel %vm17284_vm13, nan, %v4690_v39  ;;  %v4898_v9 = vsel %vm4891_vm6, %v4894_v61, %v4897_v15  ;;  %v4363_v38 = vsel %vm4280_vm2, %v4362_v10, %v4361_v36  ;;  %v4468_v6 = vsel %vm4383_vm8, %v4467_v21, %v4443_v42  ;;  %v17297_v10 = vld [vmem:[#allocation70_spill] sm:$0xff] }
 0x44e   : > { %v5098_v57 = vand.u32 3, %v5097_v47  ;;  %v5202_v31 = vand.u32 3, %v5201_v51  ;;  %v15613_v53 = vsel %vm16779_vm7, nan, %v4276_v12  ;;  %v4366_v39 = vsel %vm15486_vm9, %v17238_v56, %v4363_v38 }
 0x44f   : > { %17285 = vst [vmem:[#allocation52_spill] sm:$0xff] %v15613_v53  ;;  %v8970_v7 = vmin.u32 %v4447_v37, %v15589_v22  ;;  %vm4996_vm12 = vcmp.eq.s32.totalorder %v4994_v48, 0  ;;  %9509 = vcosq.f32 %v4366_v39  ;;  %vm17287_vm10 = vweird.f32 %v17286_v55  ;;  %v17298_v37 = vld [vmem:[#allocation74_spill] sm:$0xff]  ;;  %v17303_v55 = vld [vmem:[#allocation72_spill] sm:$0xff] }
 0x450   : > { %v15621_v15 = vsel %vm17287_vm10, nan, %v4794_v62  ;;  %vm17289_vm2 = vweird.f32 %v17288_v27  ;;  %vm4999_vm14 = vcmp.eq.s32.totalorder %v4994_v48, 2  ;;  %9511 = vsinq.f32 %v4366_v39  ;;  %v17299_v62 = vld [vmem:[#allocation80_spill] sm:$0xff]  ;;  %v17301_v39 = vld [vmem:[#allocation75_spill] sm:$0xff] }
 0x451   : > { %v15625_v47 = vsel %vm17289_vm2, nan, %v4898_v9  ;;  %v4449_v12 = vclz %v8970_v7  ;;  %v15629_v42 = vsel %vm15569_vm5, 0, %v4468_v6  ;;  %vm5100_vm9 = vcmp.eq.s32.totalorder %v5098_v57, 0 }
 0x452   : > { %17290 = vst [vmem:[#allocation54_spill] sm:$0xff] %v15625_v47  ;;  %vm4995_vm3 = vcmp.lt.s32.totalorder %v4994_v48, 2  ;;  %v17292_v46 = vxor.u32 2147483648, %v17291_v49  ;;  %vm5103_vm6 = vcmp.eq.s32.totalorder %v5098_v57, 2  ;;  %vm5204_vm0 = vcmp.eq.s32.totalorder %v5202_v31, 0 }
 0x453   : > { %v8971_v36 = vadd.s32 4294967294, %v4449_v12  ;;  %v17294_v21 = vxor.u32 2147483648, %v17293_v20  ;;  %vm5099_vm13 = vcmp.lt.s32.totalorder %v5098_v57, 2  ;;  %vm5207_vm10 = vcmp.eq.s32.totalorder %v5202_v31, 2  ;;  %v17304_v12 = vld [vmem:[#allocation82_spill] sm:$0xff] }
 0x454   : > { %v4998_v61 = vsel %vm4996_vm12, %v17293_v20, %v17292_v46  ;;  %v17296_v51 = vxor.u32 2147483648, %v17295_v1  ;;  %vm5203_vm2 = vcmp.lt.s32.totalorder %v5202_v31, 2  ;;  %v5305_v35 = vadd.s32 3, %v17298_v37 }
 0x455   : > { %v5001_v29 = vsel %vm4999_vm14, %v17294_v21, %v17291_v49  ;;  %v5409_v9 = vadd.s32 3, %v17299_v62  ;;  %vm4373_vm12 = vcmp.eq.s32.totalorder %v15587_v14, 0  ;;  %vm4376_vm7 = vcmp.eq.s32.totalorder %v15587_v14, 2 }
 0x456   : > { %v5102_v0 = vsel %vm5100_vm9, %v17297_v10, %v17296_v51  ;;  %vm8972_vm11 = vcmp.lt.s32.totalorder %v8971_v36, 0  ;;  %v17300_v38 = vxor.u32 2147483648, %v17297_v10  ;;  %v17302_v7 = vxor.u32 2147483648, %v17301_v39 }
 0x457   : > { %v5513_v49 = vadd.s32 3, %v17304_v12  ;;  %v4452_v46 = vsel %vm8972_vm11, 0, %v8971_v36  ;;  %v17305_v20 = vxor.u32 2147483648, %v17303_v55  ;;  %v5306_v51 = vand.u32 3, %v5305_v35 }
 0x458   : > { %v5105_v6 = vsel %vm5103_vm6, %v17300_v38, %v17295_v1  ;;  %v5206_v27 = vsel %vm5204_vm0, %v17303_v55, %v17302_v7  ;;  %v5410_v37 = vand.u32 3, %v5409_v9  ;;  %v4453_v62 = vsub.s32 32, %v4452_v46 }
 0x459   : > { %v5209_v21 = vsel %vm5207_vm10, %v17305_v20, %v17301_v39  ;;  %v4454_v53 = vshll.u32 %v15589_v22, %v4452_v46  ;;  %v4457_v47 = vsub.s32 4294967266, %v4452_v46  ;;  %v15656_v10 = vand.u32 3, %v15629_v42  ;;  %v15662_v39 = vpop.eup %9509 }
 0x45a   : > { %v5002_v1 = vsel %vm4995_vm3, %v4998_v61, %v5001_v29  ;;  %v5106_v38 = vsel %vm5099_vm13, %v5102_v0, %v5105_v6  ;;  %vm5308_vm14 = vcmp.eq.s32.totalorder %v5306_v51, 0  ;;  %vm5311_vm9 = vcmp.eq.s32.totalorder %v5306_v51, 2  ;;  %v15664_v22 = vpop.eup %9511  ;;  %v17306_v61 = vld [vmem:[#allocation77_spill] sm:$0xff]  ;;  %v17308_v0 = vld [vmem:[#allocation76_spill] sm:$0xff] }
 0x45b   : > { %vm4372_vm11 = vcmp.lt.s32.totalorder %v15587_v14, 2  ;;  %v4455_v36 = vshrl.u32 %v4437_v23, %v4453_v62  ;;  %v4458_v7 = vadd.s32 127, %v4457_v47  ;;  %v5210_v35 = vsel %vm5203_vm2, %v5206_v27, %v5209_v21  ;;  %v17310_v27 = vld [vmem:[#allocation83_spill] sm:$0xff] }
 0x45c   : > { %v5514_v9 = vand.u32 3, %v5513_v49  ;;  %vm5307_vm6 = vcmp.lt.s32.totalorder %v5306_v51, 2  ;;  %vm5411_vm0 = vcmp.lt.s32.totalorder %v5410_v37, 2  ;;  %vm5412_vm10 = vcmp.eq.s32.totalorder %v5410_v37, 0  ;;  %v17312_v49 = vld [vmem:[#allocation79_spill] sm:$0xff] }
 0x45d   : > { %vm5415_vm15 = vcmp.eq.s32.totalorder %v5410_v37, 2  ;;  %v4456_v48 = vor.u32 %v4455_v36, %v4454_v53  ;;  %v4459_v57 = vshll.u32 %v4458_v7, 23  ;;  %v17307_v29 = vxor.u32 2147483648, %v17306_v61 }
 0x45e   : > { %v17309_v23 = vxor.u32 2147483648, %v17308_v0  ;;  %vm4370_vm3 = vweird.f32 %v17238_v56  ;;  %v16782_v47 = vxor.u32 2147483648, %v15664_v22  ;;  %v16783_v55 = vxor.u32 2147483648, %v15662_v39  ;;  %v17517_v56 = vld [vmem:[#allocation59_spill] sm:$0xff] }
 0x45f   : > { %v5310_v6 = vsel %vm5308_vm14, %v17308_v0, %v17307_v29  ;;  %v17311_v12 = vxor.u32 2147483648, %v17310_v27  ;;  %v17313_v53 = vxor.u32 2147483648, %v17312_v49  ;;  %v4460_v21 = vor.u32 4788187, %v4459_v57  ;;  %v17319_v0 = vld [vmem:[#allocation33_spill] sm:$0xff] }
 0x460   : > { %v5313_v31 = vsel %vm5311_vm9, %v17309_v23, %v17306_v61  ;;  %v4463_v62 = vcvt.s32.f32 %v4456_v48  ;;  %v15683_v7 = vsel %vm868_vm4, nan, %v5002_v1  ;;  %v17316_v61 = vld [vmem:[#allocation32_spill] sm:$0xff]  ;;  %vm17320_vm2 = vweird.f32 %v17319_v0  ;;  %v17322_v48 = vld [vmem:[#allocation87_spill] sm:$0xff] }
 0x461   : > { %v5414_v46 = vsel %vm5412_vm10, %v17312_v49, %v17311_v12  ;;  %v5417_v20 = vsel %vm5415_vm15, %v17313_v53, %v17310_v27  ;;  %17315 = vst [vmem:[#allocation61_spill] sm:$0xff] %v15683_v7  ;;  %vm17317_vm13 = vweird.f32 %v17316_v61  ;;  %v15691_v23 = vsel %vm17320_vm2, nan, %v5210_v35 }
 0x462   : > { %v15687_v29 = vsel %vm17317_vm13, nan, %v5106_v38  ;;  %17321 = vst [vmem:[#allocation12_spill] sm:$0xff] %v15691_v23  ;;  %v5314_v12 = vsel %vm5307_vm6, %v5310_v6, %v5313_v31  ;;  %vm5516_vm14 = vcmp.eq.s32.totalorder %v5514_v9, 0  ;;  %vm5519_vm9 = vcmp.eq.s32.totalorder %v5514_v9, 2  ;;  %v17323_v38 = vld [vmem:[#allocation92_spill] sm:$0xff]  ;;  %v17324_v6 = vld [vmem:[#allocation97_spill] sm:$0xff] }
 0x463   : > { %17318 = vst [vmem:[#allocation51_spill] sm:$0xff] %v15687_v29  ;;  %v4461_v49 = vand.u32 2147483647, %v4460_v21  ;;  %v5418_v57 = vsel %vm5411_vm0, %v5414_v46, %v5417_v20  ;;  %vm5515_vm15 = vcmp.lt.s32.totalorder %v5514_v9, 2  ;;  %v5617_v27 = vadd.s32 3, %v17322_v48  ;;  %v17325_v46 = vld [vmem:[#allocation86_spill] sm:$0xff] }
 0x464   : > { %v4375_v1 = vsel %vm4373_vm12, %v15662_v39, %v16782_v47  ;;  %v4378_v51 = vsel %vm4376_vm7, %v16783_v55, %v15664_v22  ;;  %v5721_v35 = vadd.s32 3, %v17323_v38  ;;  %v5825_v37 = vadd.s32 3, %v17324_v6  ;;  %v17327_v20 = vld [vmem:[#allocation84_spill] sm:$0xff]  ;;  %v17329_v48 = vld [vmem:[#allocation34_spill] sm:$0xff] }
 0x465   : > { %v4464_v31 = vmul.f32 %v4463_v62, %v4461_v49  ;;  %v17326_v53 = vxor.u32 2147483648, %v17325_v46  ;;  %v17328_v36 = vxor.u32 2147483648, %v17327_v20  ;;  %v5618_v0 = vand.u32 3, %v5617_v27  ;;  %v17334_v27 = vld [vmem:[#allocation90_spill] sm:$0xff] }
 0x466   : > { %vm17330_vm4 = vweird.f32 %v17329_v48  ;;  %v15720_v55 = vsel %vm1280_vm1, nan, %v5418_v57  ;;  %v5722_v38 = vand.u32 3, %v5721_v35  ;;  %v5826_v6 = vand.u32 3, %v5825_v37  ;;  %v17338_v37 = vld [vmem:[#allocation101_spill] sm:$0xff] }
 0x467   : > { %v5518_v21 = vsel %vm5516_vm14, %v17327_v20, %v17326_v53  ;;  %v5521_v61 = vsel %vm5519_vm9, %v17328_v36, %v17325_v46  ;;  %v15716_v47 = vsel %vm17330_vm4, nan, %v5314_v12  ;;  %17333 = vst [vmem:[#allocation53_spill] sm:$0xff] %v15720_v55  ;;  %v4465_v62 = vxor.u32 2147483648, %v4464_v31  ;;  %v17336_v20 = vld [vmem:[#allocation89_spill] sm:$0xff]  ;;  %v17366_v55 = vld [vmem:[#allocation110_spill] sm:$0xff] }
 0x468   : > { %17331 = vst [vmem:[#allocation56_spill] sm:$0xff] %v15716_v47  ;;  %vm5619_vm7 = vcmp.lt.s32.totalorder %v5618_v0, 2  ;;  %vm5620_vm12 = vcmp.eq.s32.totalorder %v5618_v0, 0  ;;  %vm5623_vm6 = vcmp.eq.s32.totalorder %v5618_v0, 2  ;;  %v4379_v49 = vsel %vm4372_vm11, %v4375_v1, %v4378_v51  ;;  %v17339_v0 = vld [vmem:[#allocation104_spill] sm:$0xff]  ;;  %v17340_v1 = vld [vmem:[#allocation105_spill] sm:$0xff] }
 0x469   : > { %v5522_v46 = vsel %vm5515_vm15, %v5518_v21, %v5521_v61  ;;  %v17335_v53 = vxor.u32 2147483648, %v17334_v27  ;;  %v17337_v23 = vxor.u32 2147483648, %v17336_v20  ;;  %v4466_v35 = vsel %vm4383_vm8, %v4465_v62, %v4464_v31  ;;  %v17342_v31 = vld [vmem:[#allocation36_spill] sm:$0xff]  ;;  %v17345_v62 = vld [vmem:[#allocation95_spill] sm:$0xff] }
 0x46a   : > { %vm5724_vm1 = vcmp.eq.s32.totalorder %v5722_v38, 0  ;;  %v5929_v36 = vadd.s32 3, %v17338_v37  ;;  %v6033_v48 = vadd.s32 3, %v17339_v0  ;;  %v4469_v14 = vsel %vm15569_vm5, %v17242_v26, %v4466_v35  ;;  %v17352_v37 = vld [vmem:[#allocation99_spill] sm:$0xff] }
 0x46b   : > { %v5622_v12 = vsel %vm5620_vm12, %v17336_v20, %v17335_v53  ;;  %v5625_v57 = vsel %vm5623_vm6, %v17337_v23, %v17334_v27  ;;  %vm5727_vm11 = vcmp.eq.s32.totalorder %v5722_v38, 2  ;;  %v6137_v51 = vadd.s32 3, %v17340_v1  ;;  %v17347_v27 = vld [vmem:[#allocation91_spill] sm:$0xff]  ;;  %v17348_v20 = vld [vmem:[#allocation37_spill] sm:$0xff] }
 0x46c   : > { %v5626_v9 = vsel %vm5619_vm7, %v5622_v12, %v5625_v57  ;;  %v15741_v21 = vsel %vm4370_vm3, nan, %v4379_v49  ;;  %9513 = vcosq.f32 %v4469_v14  ;;  %vm5828_vm0 = vcmp.eq.s32.totalorder %v5826_v6, 0 }
 0x46d   : > { %17341 = vst [vmem:[#allocation60_spill] sm:$0xff] %v15741_v21  ;;  %vm5831_vm8 = vcmp.eq.s32.totalorder %v5826_v6, 2  ;;  %9515 = vsinq.f32 %v4469_v14  ;;  %vm17343_vm10 = vweird.f32 %v17342_v31  ;;  %vm5723_vm13 = vcmp.lt.s32.totalorder %v5722_v38, 2  ;;  %v17364_v21 = vld [vmem:[#allocation106_spill] sm:$0xff] }
 0x46e   : > { %v15745_v61 = vsel %vm17343_vm10, nan, %v5522_v46  ;;  %v17346_v2 = vxor.u32 2147483648, %v17345_v62  ;;  %vm17349_vm5 = vweird.f32 %v17348_v20  ;;  %v17351_v49 = vxor.u32 2147483648, %v17347_v27  ;;  %v17354_v46 = vld [vmem:[#allocation98_spill] sm:$0xff] }
 0x46f   : > { %17344 = vst [vmem:[#allocation63_spill] sm:$0xff] %v15745_v61  ;;  %v15752_v12 = vsel %vm17349_vm5, nan, %v5626_v9  ;;  %v5930_v57 = vand.u32 3, %v5929_v36  ;;  %v6034_v35 = vand.u32 3, %v6033_v48  ;;  %vm5827_vm2 = vcmp.lt.s32.totalorder %v5826_v6, 2  ;;  %v17356_v9 = vld [vmem:[#allocation109_spill] sm:$0xff] }
 0x470   : > { %v5726_v53 = vsel %vm5724_vm1, %v17347_v27, %v17346_v2  ;;  %17350 = vst [vmem:[#allocation62_spill] sm:$0xff] %v15752_v12  ;;  %v5729_v23 = vsel %vm5727_vm11, %v17351_v49, %v17345_v62  ;;  %v17353_v0 = vxor.u32 2147483648, %v17352_v37  ;;  %v17355_v1 = vxor.u32 2147483648, %v17354_v46  ;;  %v17357_v36 = vld [vmem:[#allocation115_spill] sm:$0xff]  ;;  %v17358_v27 = vld [vmem:[#allocation102_spill] sm:$0xff]  ;;  %v17360_v49 = vld [vmem:[#allocation88_spill] sm:$0xff] }
 0x471   : > { %v6138_v2 = vand.u32 3, %v6137_v51  ;;  %vm4476_vm14 = vcmp.eq.s32.totalorder %v15656_v10, 0  ;;  %vm4479_vm9 = vcmp.eq.s32.totalorder %v15656_v10, 2  ;;  %vm5932_vm15 = vcmp.eq.s32.totalorder %v5930_v57, 0 }
 0x472   : > { %v5830_v14 = vsel %vm5828_vm0, %v17354_v46, %v17353_v0  ;;  %v5833_v31 = vsel %vm5831_vm8, %v17355_v1, %v17352_v37  ;;  %vm5935_vm4 = vcmp.eq.s32.totalorder %v5930_v57, 2  ;;  %v6241_v62 = vadd.s32 3, %v17356_v9  ;;  %v17362_v46 = vld [vmem:[#allocation107_spill] sm:$0xff] }
 0x473   : > { %v6345_v48 = vadd.s32 3, %v17357_v36  ;;  %vm5931_vm7 = vcmp.lt.s32.totalorder %v5930_v57, 2  ;;  %vm6035_vm12 = vcmp.lt.s32.totalorder %v6034_v35, 2  ;;  %vm6036_vm6 = vcmp.eq.s32.totalorder %v6034_v35, 0 }
 0x474   : > { %vm6039_vm1 = vcmp.eq.s32.totalorder %v6034_v35, 2  ;;  %v17359_v20 = vxor.u32 2147483648, %v17358_v27  ;;  %v17361_v51 = vxor.u32 2147483648, %v17360_v49  ;;  %v17363_v1 = vxor.u32 2147483648, %v17362_v46 }
 0x475   : > { %v17365_v9 = vxor.u32 2147483648, %v17364_v21  ;;  %vm4475_vm11 = vcmp.lt.s32.totalorder %v15656_v10, 2  ;;  %vm6139_vm0 = vcmp.lt.s32.totalorder %v6138_v2, 2  ;;  %vm6140_vm8 = vcmp.eq.s32.totalorder %v6138_v2, 0 }
 0x476   : > { %v5934_v0 = vsel %vm5932_vm15, %v17360_v49, %v17359_v20  ;;  %v5937_v37 = vsel %vm5935_vm4, %v17361_v51, %v17358_v27  ;;  %v6038_v12 = vsel %vm6036_vm6, %v17364_v21, %v17363_v1  ;;  %vm6143_vm10 = vcmp.eq.s32.totalorder %v6138_v2, 2  ;;  %v17368_v27 = vld [vmem:[#allocation108_spill] sm:$0xff]  ;;  %v15791_v7 = vpop.eup %9513 }
 0x477   : > { %v6041_v36 = vsel %vm6039_vm1, %v17365_v9, %v17362_v46  ;;  %v6449_v61 = vadd.s32 3, %v13522_v5  ;;  %v5730_v20 = vsel %vm5723_vm13, %v5726_v53, %v5729_v23  ;;  %v17367_v49 = vxor.u32 2147483648, %v17366_v55  ;;  %v15793_v38 = vpop.eup %9515  ;;  %v17370_v23 = vld [vmem:[#allocation112_spill] sm:$0xff] }
 0x478   : > { %v17369_v1 = vxor.u32 2147483648, %v17368_v27  ;;  %v6242_v29 = vand.u32 3, %v6241_v62  ;;  %v5834_v21 = vsel %vm5827_vm2, %v5830_v14, %v5833_v31  ;;  %v5938_v46 = vsel %vm5931_vm7, %v5934_v0, %v5937_v37  ;;  %v17372_v62 = vld [vmem:[#allocation111_spill] sm:$0xff]  ;;  %v17374_v31 = vld [vmem:[#allocation38_spill] sm:$0xff]  ;;  %v17376_v0 = vld [vmem:[#allocation13_spill] sm:$0xff] }
 0x479   : > { %v6142_v51 = vsel %vm6140_vm8, %v17368_v27, %v17367_v49  ;;  %v6042_v9 = vsel %vm6035_vm12, %v6038_v12, %v6041_v36  ;;  %v6346_v2 = vand.u32 3, %v6345_v48  ;;  %v16784_v53 = vxor.u32 2147483648, %v15791_v7  ;;  %v17378_v36 = vld [vmem:[#allocation14_spill] sm:$0xff]  ;;  %v17380_v27 = vld [vmem:[#allocation15_spill] sm:$0xff] }
 0x47a   : > { %v6145_v47 = vsel %vm6143_vm10, %v17369_v1, %v17366_v55  ;;  %vm6243_vm13 = vcmp.lt.s32.totalorder %v6242_v29, 2  ;;  %vm6244_vm5 = vcmp.eq.s32.totalorder %v6242_v29, 0  ;;  %vm6247_vm15 = vcmp.eq.s32.totalorder %v6242_v29, 2 }
 0x47b   : > { %v6146_v5 = vsel %vm6139_vm0, %v6142_v51, %v6145_v47  ;;  %v17371_v55 = vxor.u32 2147483648, %v17370_v23  ;;  %v17373_v57 = vxor.u32 2147483648, %v17372_v62  ;;  %v6450_v12 = vand.u32 3, %v6449_v61 }
 0x47c   : > { %v16785_v14 = vxor.u32 2147483648, %v15793_v38  ;;  %vm6348_vm2 = vcmp.eq.s32.totalorder %v6346_v2, 0  ;;  %vm6351_vm4 = vcmp.eq.s32.totalorder %v6346_v2, 2  ;;  %v6553_v47 = vadd.s32 3, %v13542_v34  ;;  %v17382_v34 = vld [vmem:[#allocation117_spill] sm:$0xff] }
 0x47d   : > { %v6246_v6 = vsel %vm6244_vm5, %v17372_v62, %v17371_v55  ;;  %v6249_v35 = vsel %vm6247_vm15, %v17373_v57, %v17370_v23  ;;  %vm4473_vm7 = vweird.f32 %v17242_v26  ;;  %vm17375_vm12 = vweird.f32 %v17374_v31  ;;  %v17384_v23 = vld [vmem:[#allocation116_spill] sm:$0xff]  ;;  %v17388_v62 = vld [vmem:[#allocation17_spill] sm:$0xff]  ;;  %v17518_v26 = vld [vmem:[#allocation54_spill] sm:$0xff] }
 0x47e   : > { %v15807_v48 = vsel %vm17375_vm12, nan, %v5730_v20  ;;  %vm17377_vm6 = vweird.f32 %v17376_v0  ;;  %vm17379_vm1 = vweird.f32 %v17378_v36  ;;  %v6250_v61 = vsel %vm6243_vm13, %v6246_v6, %v6249_v35  ;;  %v17390_v35 = vld [vmem:[#allocation125_spill] sm:$0xff] }
 0x47f   : > { %v15811_v37 = vsel %vm17377_vm6, nan, %v5834_v21  ;;  %v15815_v49 = vsel %vm17379_vm1, nan, %v5938_v46  ;;  %vm17381_vm0 = vweird.f32 %v17380_v27  ;;  %vm6347_vm8 = vcmp.lt.s32.totalorder %v6346_v2, 2 }
 0x480   : > { %v15820_v51 = vsel %vm17381_vm0, nan, %v6042_v9  ;;  %v17383_v1 = vxor.u32 2147483648, %v17382_v34  ;;  %v17385_v55 = vxor.u32 2147483648, %v17384_v23  ;;  %v4478_v29 = vsel %vm4476_vm14, %v15791_v7, %v16785_v14  ;;  %v17386_v9 = vld [vmem:[#allocation16_spill] sm:$0xff]  ;;  %v17430_v14 = vld [vmem:[#allocation143_spill] sm:$0xff] }
 0x481   : > { %v4481_v46 = vsel %vm4479_vm9, %v16784_v53, %v15793_v38  ;;  %vm17387_vm10 = vweird.f32 %v17386_v9  ;;  %vm6452_vm13 = vcmp.eq.s32.totalorder %v6450_v12, 0  ;;  %vm17389_vm5 = vweird.f32 %v17388_v62  ;;  %v17397_v62 = vld [vmem:[#allocation123_spill] sm:$0xff] }
 0x482   : > { %v6350_v20 = vsel %vm6348_vm2, %v17384_v23, %v17383_v1  ;;  %v6353_v21 = vsel %vm6351_vm4, %v17385_v55, %v17382_v34  ;;  %v15840_v2 = vsel %vm17387_vm10, nan, %v6146_v5  ;;  %v15844_v6 = vsel %vm17389_vm5, nan, %v6250_v61  ;;  %v17391_v5 = vld [vmem:[#allocation122_spill] sm:$0xff]  ;;  %v17393_v23 = vld [vmem:[#allocation119_spill] sm:$0xff] }
 0x483   : > { %vm6455_vm15 = vcmp.eq.s32.totalorder %v6450_v12, 2  ;;  %v6554_v57 = vand.u32 3, %v6553_v47  ;;  %v6657_v31 = vadd.s32 3, %v17390_v35  ;;  %v6354_v0 = vsel %vm6347_vm8, %v6350_v20, %v6353_v21 }
 0x484   : > { %vm6451_vm14 = vcmp.lt.s32.totalorder %v6450_v12, 2  ;;  %v6761_v36 = vadd.s32 3, %v13792_v59  ;;  %v6865_v27 = vadd.s32 3, %v13938_v41  ;;  %v4482_v34 = vsel %vm4475_vm11, %v4478_v29, %v4481_v46  ;;  %v17395_v59 = vld [vmem:[#allocation124_spill] sm:$0xff] }
 0x485   : > { %v17392_v1 = vxor.u32 2147483648, %v17391_v5  ;;  %vm6556_vm9 = vcmp.eq.s32.totalorder %v6554_v57, 0  ;;  %vm6559_vm2 = vcmp.eq.s32.totalorder %v6554_v57, 2  ;;  %v17394_v47 = vxor.u32 2147483648, %v17393_v23 }
 0x486   : > { %v6658_v9 = vand.u32 3, %v6657_v31  ;;  %v6762_v20 = vand.u32 3, %v6761_v36  ;;  %v6969_v21 = vadd.s32 3, %v14023_v3  ;;  %vm6555_vm4 = vcmp.lt.s32.totalorder %v6554_v57, 2  ;;  %v17401_v3 = vld [vmem:[#allocation127_spill] sm:$0xff]  ;;  %v17403_v36 = vld [vmem:[#allocation126_spill] sm:$0xff] }
 0x487   : > { %v6454_v55 = vsel %vm6452_vm13, %v17393_v23, %v17392_v1  ;;  %v6457_v61 = vsel %vm6455_vm15, %v17394_v47, %v17391_v5  ;;  %v17396_v41 = vxor.u32 2147483648, %v17395_v59  ;;  %v17398_v29 = vxor.u32 2147483648, %v17397_v62  ;;  %v17399_v1 = vld [vmem:[#allocation18_spill] sm:$0xff] }
 0x488   : > { %v6866_v35 = vand.u32 3, %v6865_v27  ;;  %vm17400_vm11 = vweird.f32 %v17399_v1  ;;  %vm6659_vm12 = vcmp.lt.s32.totalorder %v6658_v9, 2  ;;  %vm6660_vm6 = vcmp.eq.s32.totalorder %v6658_v9, 0  ;;  %v17411_v1 = vld [vmem:[#allocation128_spill] sm:$0xff] }
 0x489   : > { %v6558_v10 = vsel %vm6556_vm9, %v17397_v62, %v17396_v41  ;;  %v6561_v46 = vsel %vm6559_vm2, %v17398_v29, %v17395_v59  ;;  %v15866_v53 = vsel %vm17400_vm11, nan, %v6354_v0  ;;  %vm6663_vm1 = vcmp.eq.s32.totalorder %v6658_v9, 2  ;;  %v17405_v41 = vld [vmem:[#allocation138_spill] sm:$0xff] }
 0x48a   : > { %v6458_v31 = vsel %vm6451_vm14, %v6454_v55, %v6457_v61  ;;  %v17402_v57 = vxor.u32 2147483648, %v17401_v3  ;;  %v17404_v23 = vxor.u32 2147483648, %v17403_v36  ;;  %vm6764_vm0 = vcmp.eq.s32.totalorder %v6762_v20, 0  ;;  %v17407_v55 = vld [vmem:[#allocation19_spill] sm:$0xff]  ;;  %v17409_v9 = vld [vmem:[#allocation130_spill] sm:$0xff] }
 0x48b   : > { %v6562_v59 = vsel %vm6555_vm4, %v6558_v10, %v6561_v46  ;;  %vm6767_vm8 = vcmp.eq.s32.totalorder %v6762_v20, 2  ;;  %v6970_v27 = vand.u32 3, %v6969_v21  ;;  %v7073_v0 = vadd.s32 3, %v17405_v41 }
 0x48c   : > { %v6662_v5 = vsel %vm6660_vm6, %v17403_v36, %v17402_v57  ;;  %v6665_v47 = vsel %vm6663_vm1, %v17404_v23, %v17401_v3  ;;  %v15878_v62 = vsel %vm4473_vm7, nan, %v4482_v34  ;;  %vm6868_vm10 = vcmp.eq.s32.totalorder %v6866_v35, 0  ;;  %v17413_v3 = vld [vmem:[#allocation20_spill] sm:$0xff]  ;;  %v17415_v57 = vld [vmem:[#allocation135_spill] sm:$0xff] }
 0x48d   : > { %17406 = vst [vmem:[#allocation65_spill] sm:$0xff] %v15878_v62  ;;  %v6666_v12 = vsel %vm6659_vm12, %v6662_v5, %v6665_v47  ;;  %vm6871_vm13 = vcmp.eq.s32.totalorder %v6866_v35, 2  ;;  %vm17408_vm5 = vweird.f32 %v17407_v55  ;;  %vm6763_vm15 = vcmp.lt.s32.totalorder %v6762_v20, 2  ;;  %v17417_v5 = vld [vmem:[#allocation134_spill] sm:$0xff]  ;;  %v17419_v47 = vld [vmem:[#allocation21_spill] sm:$0xff]  ;;  %v17435_v62 = vld [vmem:[#allocation24_spill] sm:$0xff] }
 0x48e   : > { %v15882_v61 = vsel %vm17408_vm5, nan, %v6458_v31  ;;  %v17410_v29 = vxor.u32 2147483648, %v17409_v9  ;;  %v17412_v21 = vxor.u32 2147483648, %v17411_v1  ;;  %vm17414_vm14 = vweird.f32 %v17413_v3  ;;  %v17422_v3 = vld [vmem:[#allocation137_spill] sm:$0xff] }
 0x48f   : > { %v15892_v34 = vsel %vm17414_vm14, nan, %v6562_v59  ;;  %vm6867_vm9 = vcmp.lt.s32.totalorder %v6866_v35, 2  ;;  %v17416_v36 = vxor.u32 2147483648, %v17415_v57  ;;  %v17418_v20 = vxor.u32 2147483648, %v17417_v5 }
 0x490   : > { %v6766_v10 = vsel %vm6764_vm0, %v17411_v1, %v17410_v29  ;;  %v6769_v46 = vsel %vm6767_vm8, %v17412_v21, %v17409_v9  ;;  %vm17420_vm2 = vweird.f32 %v17419_v47  ;;  %vm6972_vm4 = vcmp.eq.s32.totalorder %v6970_v27, 0  ;;  %v17421_v29 = vld [vmem:[#allocation141_spill] sm:$0xff] }
 0x491   : > { %v6870_v23 = vsel %vm6868_vm10, %v17417_v5, %v17416_v36  ;;  %v6873_v31 = vsel %vm6871_vm13, %v17418_v20, %v17415_v57  ;;  %v15902_v41 = vsel %vm17420_vm2, nan, %v6666_v12  ;;  %vm6975_vm11 = vcmp.eq.s32.totalorder %v6970_v27, 2  ;;  %v17424_v36 = vld [vmem:[#allocation136_spill] sm:$0xff] }
 0x492   : > { %v7074_v55 = vand.u32 3, %v7073_v0  ;;  %v6770_v9 = vsel %vm6763_vm15, %v6766_v10, %v6769_v46  ;;  %v7177_v59 = vadd.s32 3, %v17421_v29  ;;  %v7281_v35 = vadd.s32 3, %v14308_v43  ;;  %v17426_v46 = vld [vmem:[#allocation140_spill] sm:$0xff]  ;;  %v17428_v43 = vld [vmem:[#allocation139_spill] sm:$0xff] }
 0x493   : > { %v7385_v1 = vadd.s32 3, %v14502_v33  ;;  %v6874_v21 = vsel %vm6867_vm9, %v6870_v23, %v6873_v31  ;;  %vm6971_vm12 = vcmp.lt.s32.totalorder %v6970_v27, 2  ;;  %v17423_v57 = vxor.u32 2147483648, %v17422_v3 }
 0x494   : > { %vm7076_vm6 = vcmp.eq.s32.totalorder %v7074_v55, 0  ;;  %vm7079_vm1 = vcmp.eq.s32.totalorder %v7074_v55, 2  ;;  %v17425_v12 = vxor.u32 2147483648, %v17424_v36  ;;  %v7178_v0 = vand.u32 3, %v7177_v59 }
 0x495   : > { %v6974_v5 = vsel %vm6972_vm4, %v17424_v36, %v17423_v57  ;;  %v7282_v10 = vand.u32 3, %v7281_v35  ;;  %vm7075_vm0 = vcmp.lt.s32.totalorder %v7074_v55, 2  ;;  %v17427_v47 = vxor.u32 2147483648, %v17426_v46 }
 0x496   : > { %v6977_v20 = vsel %vm6975_vm11, %v17425_v12, %v17422_v3  ;;  %v17429_v33 = vxor.u32 2147483648, %v17428_v43  ;;  %v7386_v31 = vand.u32 3, %v7385_v1  ;;  %vm7179_vm8 = vcmp.lt.s32.totalorder %v7178_v0, 2  ;;  %v17432_v3 = vld [vmem:[#allocation142_spill] sm:$0xff]  ;;  %v17434_v12 = vld [vmem:[#allocation153_spill] sm:$0xff] }
 0x497   : > { %v7078_v29 = vsel %vm7076_vm6, %v17428_v43, %v17427_v47  ;;  %vm7180_vm10 = vcmp.eq.s32.totalorder %v7178_v0, 0  ;;  %vm7183_vm13 = vcmp.eq.s32.totalorder %v7178_v0, 2  ;;  %v7489_v57 = vadd.s32 3, %v14530_v24  ;;  %v17437_v24 = vld [vmem:[#allocation25_spill] sm:$0xff] }
 0x498   : > { %v7081_v23 = vsel %vm7079_vm1, %v17429_v33, %v17426_v46  ;;  %v17431_v36 = vxor.u32 2147483648, %v17430_v14  ;;  %v17433_v55 = vxor.u32 2147483648, %v17432_v3  ;;  %vm7284_vm5 = vcmp.eq.s32.totalorder %v7282_v10, 0 }
 0x499   : > { %v7593_v47 = vadd.s32 3, %v17434_v12  ;;  %vm17436_vm15 = vweird.f32 %v17435_v62  ;;  %v6978_v1 = vsel %vm6971_vm12, %v6974_v5, %v6977_v20  ;;  %v7082_v0 = vsel %vm7075_vm0, %v7078_v29, %v7081_v23  ;;  %v17446_v20 = vld [vmem:[#allocation40_spill] sm:$0xff]  ;;  %v17449_v29 = vld [vmem:[#allocation45_spill] sm:$0xff] }
 0x49a   : > { %v7182_v59 = vsel %vm7180_vm10, %v17432_v3, %v17431_v36  ;;  %v7185_v35 = vsel %vm7183_vm13, %v17433_v55, %v17430_v14  ;;  %v15929_v46 = vsel %vm17436_vm15, nan, %v6770_v9  ;;  %vm7287_vm14 = vcmp.eq.s32.totalorder %v7282_v10, 2  ;;  %v17439_v36 = vld [vmem:[#allocation148_spill] sm:$0xff]  ;;  %v17441_v14 = vld [vmem:[#allocation146_spill] sm:$0xff]  ;;  %v17443_v9 = vld [vmem:[#allocation39_spill] sm:$0xff] }
 0x49b   : > { %vm17438_vm9 = vweird.f32 %v17437_v24  ;;  %v7186_v33 = vsel %vm7179_vm8, %v7182_v59, %v7185_v35  ;;  %vm7283_vm2 = vcmp.lt.s32.totalorder %v7282_v10, 2  ;;  %v17440_v3 = vxor.u32 2147483648, %v17439_v36  ;;  %v17450_v59 = vld [vmem:[#allocation23_spill] sm:$0xff] }
 0x49c   : > { %v15934_v43 = vsel %vm17438_vm9, nan, %v6874_v21  ;;  %v17442_v12 = vxor.u32 2147483648, %v17441_v14  ;;  %vm7388_vm4 = vcmp.eq.s32.totalorder %v7386_v31, 0  ;;  %vm7391_vm11 = vcmp.eq.s32.totalorder %v7386_v31, 2 }
 0x49d   : > { %v7286_v55 = vsel %vm7284_vm5, %v17441_v14, %v17440_v3  ;;  %v7490_v27 = vand.u32 3, %v7489_v57  ;;  %vm17444_vm12 = vweird.f32 %v17443_v9  ;;  %vm17447_vm6 = vweird.f32 %v17446_v20  ;;  %v17453_v57 = vld [vmem:[#allocation151_spill] sm:$0xff]  ;;  %v17455_v3 = vld [vmem:[#allocation150_spill] sm:$0xff] }
 0x49e   : > { %v7289_v62 = vsel %vm7287_vm14, %v17442_v12, %v17439_v36  ;;  %v15944_v5 = vsel %vm17444_vm12, nan, %v6978_v1  ;;  %v15948_v21 = vsel %vm17447_vm6, nan, %v7082_v0  ;;  %v7594_v10 = vand.u32 3, %v7593_v47  ;;  %v17457_v47 = vld [vmem:[#allocation155_spill] sm:$0xff]  ;;  %v17459_v9 = vld [vmem:[#allocation154_spill] sm:$0xff] }
 0x49f   : > { %17445 = vst [vmem:[#allocation64_spill] sm:$0xff] %v15944_v5  ;;  %17448 = vst [vmem:[#allocation67_spill] sm:$0xff] %v15948_v21  ;;  %v7697_v23 = vadd.s32 3, %v17449_v29  ;;  %vm17451_vm1 = vweird.f32 %v17450_v59  ;;  %vm7387_vm0 = vcmp.lt.s32.totalorder %v7386_v31, 2  ;;  %vm7492_vm8 = vcmp.eq.s32.totalorder %v7490_v27, 0  ;;  %v17473_v31 = vld [vmem:[#allocation27_spill] sm:$0xff] }
 0x4a0   : > { %v15953_v35 = vsel %vm17451_vm1, nan, %v7186_v33  ;;  %vm7495_vm10 = vcmp.eq.s32.totalorder %v7490_v27, 2  ;;  %v7290_v24 = vsel %vm7283_vm2, %v7286_v55, %v7289_v62  ;;  %v17454_v36 = vxor.u32 2147483648, %v17453_v57 }
 0x4a1   : > { %17452 = vst [vmem:[#allocation73_spill] sm:$0xff] %v15953_v35  ;;  %v17456_v14 = vxor.u32 2147483648, %v17455_v3  ;;  %vm7596_vm13 = vcmp.eq.s32.totalorder %v7594_v10, 0  ;;  %vm7491_vm5 = vcmp.lt.s32.totalorder %v7490_v27, 2  ;;  %v17458_v12 = vxor.u32 2147483648, %v17457_v47 }
 0x4a2   : > { %v7390_v1 = vsel %vm7388_vm4, %v17455_v3, %v17454_v36  ;;  %vm7599_vm15 = vcmp.eq.s32.totalorder %v7594_v10, 2  ;;  %v7698_v33 = vand.u32 3, %v7697_v23  ;;  %v17460_v29 = vxor.u32 2147483648, %v17459_v9  ;;  %v17461_v36 = vld [vmem:[#allocation157_spill] sm:$0xff] }
 0x4a3   : > { %v7393_v0 = vsel %vm7391_vm11, %v17456_v14, %v17453_v57  ;;  %v7494_v20 = vsel %vm7492_vm8, %v17459_v9, %v17458_v12  ;;  %vm7595_vm14 = vcmp.lt.s32.totalorder %v7594_v10, 2  ;;  %v7801_v62 = vadd.s32 3, %v14856_v52  ;;  %v17463_v57 = vld [vmem:[#allocation156_spill] sm:$0xff]  ;;  %v17466_v12 = vld [vmem:[#allocation158_spill] sm:$0xff] }
 0x4a4   : > { %v7497_v55 = vsel %vm7495_vm10, %v17460_v29, %v17457_v47  ;;  %v7905_v59 = vadd.s32 3, %v14884_v40  ;;  %v17462_v3 = vxor.u32 2147483648, %v17461_v36  ;;  %v17464_v35 = vxor.u32 2147483648, %v17463_v57  ;;  %v17468_v29 = vld [vmem:[#allocation26_spill] sm:$0xff] }
 0x4a5   : > { %vm7700_vm9 = vcmp.eq.s32.totalorder %v7698_v33, 0  ;;  %vm7703_vm2 = vcmp.eq.s32.totalorder %v7698_v33, 2  ;;  %vm7699_vm4 = vcmp.lt.s32.totalorder %v7698_v33, 2  ;;  %v17465_v23 = vxor.u32 2147483648, %v14754_v50 }
 0x4a6   : > { %v7598_v14 = vsel %vm7596_vm13, %v17463_v57, %v17462_v3  ;;  %v7601_v21 = vsel %vm7599_vm15, %v17464_v35, %v17461_v36  ;;  %v17467_v52 = vxor.u32 2147483648, %v17466_v12  ;;  %v7802_v40 = vand.u32 3, %v7801_v62  ;;  %v17471_v62 = vld [vmem:[#allocation161_spill] sm:$0xff] }
 0x4a7   : > { %v7702_v47 = vsel %vm7700_vm9, %v17466_v12, %v17465_v23  ;;  %vm17469_vm11 = vweird.f32 %v17468_v29  ;;  %v7906_v3 = vand.u32 3, %v7905_v59  ;;  %v8009_v57 = vadd.s32 3, %v14992_v19  ;;  %v17483_v29 = vld [vmem:[#allocation162_spill] sm:$0xff] }
 0x4a8   : > { %v7705_v9 = vsel %vm7703_vm2, %v17467_v52, %v14754_v50  ;;  %v15983_v5 = vsel %vm17469_vm11, nan, %v7290_v24  ;;  %v8113_v35 = vadd.s32 3, %v15090_v18  ;;  %v7394_v33 = vsel %vm7387_vm0, %v7390_v1, %v7393_v0  ;;  %v17475_v1 = vld [vmem:[#allocation28_spill] sm:$0xff] }
 0x4a9   : > { %v7498_v36 = vsel %vm7491_vm5, %v7494_v20, %v7497_v55  ;;  %vm7804_vm12 = vcmp.eq.s32.totalorder %v7802_v40, 0  ;;  %vm7807_vm6 = vcmp.eq.s32.totalorder %v7802_v40, 2  ;;  %v7602_v23 = vsel %vm7595_vm14, %v7598_v14, %v7601_v21  ;;  %v16005_v20 = vld [vmem:[#allocation2 + $0x1] sm:$0x1]  ;;  %v17477_v55 = vld [vmem:[#allocation29_spill] sm:$0xff] }
 0x4aa   : > { %v7706_v12 = vsel %vm7699_vm4, %v7702_v47, %v7705_v9  ;;  %vm7803_vm1 = vcmp.lt.s32.totalorder %v7802_v40, 2  ;;  %v17470_v50 = vxor.u32 2147483648, %v14919_v63  ;;  %v17472_v59 = vxor.u32 2147483648, %v17471_v62  ;;  %v17481_v9 = vld [vmem:[#allocation164_spill] sm:$0xff] }
 0x4ab   : > { %vm7908_vm8 = vcmp.eq.s32.totalorder %v7906_v3, 0  ;;  %vm7911_vm10 = vcmp.eq.s32.totalorder %v7906_v3, 2  ;;  %v8010_v18 = vand.u32 3, %v8009_v57  ;;  %vm17474_vm0 = vweird.f32 %v17473_v31 }
 0x4ac   : > { %v7806_v24 = vsel %vm7804_vm12, %v17471_v62, %v17470_v50  ;;  %v7809_v19 = vsel %vm7807_vm6, %v17472_v59, %v14919_v63  ;;  %v15998_v27 = vsel %vm17474_vm0, nan, %v7394_v33  ;;  %vm17476_vm13 = vweird.f32 %v17475_v1  ;;  %v17479_v63 = vld [vmem:[#allocation30_spill] sm:$0xff]  ;;  %v17491_v1 = vld [vmem:[#allocation167_spill] sm:$0xff] }
 0x4ad   : > { %v16002_v21 = vsel %vm17476_vm13, nan, %v7498_v36  ;;  %v8114_v10 = vand.u32 3, %v8113_v35  ;;  %v8217_v0 = vadd.s32 3, %v15214_v17  ;;  %vm17478_vm5 = vweird.f32 %v17477_v55  ;;  %v17485_v36 = vld [vmem:[#allocation166_spill] sm:$0xff] }
 0x4ae   : > { %v16009_v14 = vsel %vm17478_vm5, nan, %v7602_v23  ;;  %vm17480_vm15 = vweird.f32 %v17479_v63  ;;  %vm8012_vm14 = vcmp.eq.s32.totalorder %v8010_v18, 0  ;;  %vm8015_vm9 = vcmp.eq.s32.totalorder %v8010_v18, 2 }
 0x4af   : > { %v16013_v47 = vsel %vm17480_vm15, nan, %v7706_v12  ;;  %v7810_v52 = vsel %vm7803_vm1, %v7806_v24, %v7809_v19  ;;  %vm7907_vm2 = vcmp.lt.s32.totalorder %v7906_v3, 2  ;;  %v17482_v40 = vxor.u32 2147483648, %v17481_v9  ;;  %v17487_v12 = vld [vmem:[#allocation47_spill] sm:$0xff]  ;;  %v17489_v19 = vld [vmem:[#allocation168_spill] sm:$0xff] }
 0x4b0   : > { %v17484_v17 = vxor.u32 2147483648, %v17483_v29  ;;  %vm8011_vm4 = vcmp.lt.s32.totalorder %v8010_v18, 2  ;;  %vm8116_vm11 = vcmp.eq.s32.totalorder %v8114_v10, 0  ;;  %vm8119_vm12 = vcmp.eq.s32.totalorder %v8114_v10, 2  ;;  %v17497_v18 = vld [vmem:[#allocation8_spill] sm:$0xff] }
 0x4b1   : > { %v7910_v57 = vsel %vm7908_vm8, %v17483_v29, %v17482_v40  ;;  %v8218_v33 = vand.u32 3, %v8217_v0  ;;  %vm111_vm6 = vcmp.gt.f32.partialorder %v16005_v20, 0.5  ;;  %v17486_v23 = vxor.u32 2147483648, %v17485_v36  ;;  %v17512_v20 = vld [vmem:[#allocation46_spill] sm:$0xff] }
 0x4b2   : > { %v7913_v35 = vsel %vm7911_vm10, %v17484_v17, %v17481_v9  ;;  %v17488_v62 = vxor.u32 2147483648, %v17487_v12  ;;  %vm8115_vm1 = vcmp.lt.s32.totalorder %v8114_v10, 2  ;;  %v8321_v59 = vadd.s32 3, %v15269_v60 }
 0x4b3   : > { %v8014_v50 = vsel %vm8012_vm14, %v17487_v12, %v17486_v23  ;;  %v17490_v31 = vxor.u32 2147483648, %v17489_v19  ;;  %v17492_v0 = vxor.u32 2147483648, %v17491_v1  ;;  %vm8220_vm8 = vcmp.eq.s32.totalorder %v8218_v33, 0 }
 0x4b4   : > { %v8017_v24 = vsel %vm8015_vm9, %v17488_v62, %v17485_v36  ;;  %vm8223_vm10 = vcmp.eq.s32.totalorder %v8218_v33, 2  ;;  %vm8219_vm0 = vcmp.lt.s32.totalorder %v8218_v33, 2  ;;  %v17493_v9 = vxor.u32 2147483648, %v15290_v32 }
 0x4b5   : > { %v8118_v55 = vsel %vm8116_vm11, %v17491_v1, %v17490_v31  ;;  %v8121_v63 = vsel %vm8119_vm12, %v17492_v0, %v17489_v19  ;;  %v17494_v10 = vxor.u32 2147483648, %v15283_v58  ;;  %v8322_v29 = vand.u32 3, %v8321_v59 }
 0x4b6   : > { %v8222_v40 = vsel %vm8220_vm8, %v15283_v58, %v17493_v9  ;;  %v7914_v17 = vsel %vm7907_vm2, %v7910_v57, %v7913_v35  ;;  %v8425_v36 = vadd.s32 3, %v15394_v16  ;;  %v8529_v23 = vadd.s32 3, %v15549_v8 }
 0x4b7   : > { %v8225_v60 = vsel %vm8223_vm10, %v17494_v10, %v15290_v32  ;;  %v8633_v12 = vadd.s32 3, %v15629_v42  ;;  %v8018_v33 = vsel %vm8011_vm4, %v8014_v50, %v8017_v24  ;;  %v8122_v62 = vsel %vm8115_vm1, %v8118_v55, %v8121_v63 }
 0x4b8   : > { %vm8324_vm13 = vcmp.eq.s32.totalorder %v8322_v29, 0  ;;  %vm8327_vm5 = vcmp.eq.s32.totalorder %v8322_v29, 2  ;;  %v8226_v19 = vsel %vm8219_vm0, %v8222_v40, %v8225_v60  ;;  %vm8323_vm15 = vcmp.lt.s32.totalorder %v8322_v29, 2 }
 0x4b9   : > { %v8426_v31 = vand.u32 3, %v8425_v36  ;;  %v8530_v58 = vand.u32 3, %v8529_v23  ;;  %v17495_v32 = vxor.u32 2147483648, %v15433_v28  ;;  %v17496_v16 = vxor.u32 2147483648, %v15426_v25  ;;  %v17504_v36 = vld [vmem:[#allocation41_spill] sm:$0xff] }
 0x4ba   : > { %v8634_v42 = vand.u32 3, %v8633_v12  ;;  %v8647_v57 = vsub.s32 0, %v17497_v18  ;;  %v17498_v35 = vxor.u32 2147483648, %v15522_v4  ;;  %v17499_v24 = vxor.u32 2147483648, %v15515_v54  ;;  %v17521_v18 = vld [vmem:[#allocation66_spill] sm:$0xff] }
 0x4bb   : > { %v8326_v3 = vsel %vm8324_vm13, %v15426_v25, %v17495_v32  ;;  %v8329_v8 = vsel %vm8327_vm5, %v17496_v16, %v15433_v28  ;;  %vm8427_vm14 = vcmp.lt.s32.totalorder %v8426_v31, 2  ;;  %vm8428_vm9 = vcmp.eq.s32.totalorder %v8426_v31, 0  ;;  %v17519_v16 = vld [vmem:[#allocation58_spill] sm:$0xff] }
 0x4bc   : > { %vm8431_vm2 = vcmp.eq.s32.totalorder %v8426_v31, 2  ;;  %v8430_v50 = vsel %vm8428_vm9, %v15515_v54, %v17498_v35  ;;  %vm8531_vm4 = vcmp.lt.s32.totalorder %v8530_v58, 2  ;;  %vm8532_vm11 = vcmp.eq.s32.totalorder %v8530_v58, 0  ;;  %v17523_v35 = vld [vmem:[#allocation78_spill] sm:$0xff] }
 0x4bd   : > { %v8433_v59 = vsel %vm8431_vm2, %v17499_v24, %v15522_v4  ;;  %v8330_v25 = vsel %vm8323_vm15, %v8326_v3, %v8329_v8  ;;  %v17500_v28 = vxor.u32 2147483648, %v15664_v22  ;;  %vm8535_vm12 = vcmp.eq.s32.totalorder %v8530_v58, 2  ;;  %v17508_v58 = vld [vmem:[#allocation43_spill] sm:$0xff]  ;;  %v17525_v24 = vld [vmem:[#allocation81_spill] sm:$0xff] }
 0x4be   : > { %vm8635_vm1 = vcmp.lt.s32.totalorder %v8634_v42, 2  ;;  %v8434_v55 = vsel %vm8427_vm14, %v8430_v50, %v8433_v59  ;;  %v17501_v0 = vxor.u32 2147483648, %v15662_v39  ;;  %vm8636_vm8 = vcmp.eq.s32.totalorder %v8634_v42, 0  ;;  %v17524_v50 = vld [vmem:[#allocation12_spill] sm:$0xff] }
 0x4bf   : > { %v8534_v1 = vsel %vm8532_vm11, %v15662_v39, %v17500_v28  ;;  %vm8639_vm10 = vcmp.eq.s32.totalorder %v8634_v42, 2  ;;  %v17502_v4 = vxor.u32 2147483648, %v15793_v38  ;;  %v17503_v40 = vxor.u32 2147483648, %v15791_v7  ;;  %v17506_v39 = vld [vmem:[#allocation42_spill] sm:$0xff]  ;;  %v17520_v42 = vld [vmem:[#allocation61_spill] sm:$0xff]  ;;  %v17526_v59 = vld [vmem:[#allocation56_spill] sm:$0xff] }
 0x4c0   : > { %v8537_v63 = vsel %vm8535_vm12, %v17501_v0, %v15664_v22  ;;  %v9621_v60 = vmov 0   ;;  %vm17505_vm0 = vweird.f32 %v17504_v36  ;;  %vm17507_vm13 = vweird.f32 %v17506_v39  ;;  %v17535_v36 = vld [vmem:[#allocation103_spill] sm:$0xff] }
 0x4c1   : > { %v8538_v54 = vsel %vm8531_vm4, %v8534_v1, %v8537_v63  ;;  %v8638_v9 = vsel %vm8636_vm8, %v15791_v7, %v17502_v4  ;;  %v8641_v10 = vsel %vm8639_vm10, %v17503_v40, %v15793_v38  ;;  %v8644_v29 = vsel %vm111_vm6, 1, %v9621_v60  ;;  %v17528_v1 = vld [vmem:[#allocation53_spill] sm:$0xff]  ;;  %v17530_v63 = vld [vmem:[#allocation63_spill] sm:$0xff]  ;;  %v17533_v40 = vld [vmem:[#allocation96_spill] sm:$0xff] }
 0x4c2   : > { %v16081_v23 = vsel %vm17505_vm0, nan, %v7810_v52  ;;  %v16085_v22 = vsel %vm17507_vm13, nan, %v7914_v17  ;;  %v8642_v12 = vsel %vm8635_vm1, %v8638_v9, %v8641_v10  ;;  %v16087_v31 = vrot.slane %v8644_v29, %v8647_v57  ;;  %v17522_v57 = vld [vmem:[#allocation51_spill] sm:$0xff]  ;;  %v17532_v9 = vld [vmem:[#allocation62_spill] sm:$0xff]  ;;  %v17534_v60 = vld [vmem:[#allocation100_spill] sm:$0xff] }
 0x4c3   : > { %vm17509_vm5 = vweird.f32 %v17508_v58  ;;  %vm17510_vm15 = vweird.f32 %v17199_v13  ;;  %vm17511_vm6 = vweird.f32 %v17204_v11  ;;  %vm17513_vm14 = vweird.f32 %v17512_v20  ;;  %v17515_v11 = vld [vmem:[#allocation55_spill] sm:$0xff] }
 0x4c4   : > { %v16091_v32 = vsel %vm17509_vm5, nan, %v8018_v33  ;;  %v16095_v7 = vsel %vm17510_vm15, nan, %v8122_v62  ;;  %v16099_v38 = vsel %vm17511_vm6, nan, %v8226_v19  ;;  %v16103_v52 = vsel %vm17513_vm14, nan, %v8330_v25  ;;  %v17516_v19 = vld [vmem:[#allocation57_spill] sm:$0xff] }
 0x4c5   : > { %vm17514_vm9 = vweird.f32 %v17226_v45  ;;  %v16111_v33 = vsel %vm4370_vm3, nan, %v8538_v54  ;;  %v16115_v13 = vsel %vm4473_vm7, nan, %v8642_v12  ;;  %vm8649_vm2 = vcmp.eq.s32.totalorder %v16087_v31, 1  ;;  %v17527_v25 = vld [vmem:[#allocation85_spill] sm:$0xff]  ;;  %v17531_v54 = vld [vmem:[#allocation94_spill] sm:$0xff] }
 0x4c6   : > { %v16107_v17 = vsel %vm17514_vm9, nan, %v8434_v55  ;;  %v8650_v62 = vsel %vm8649_vm2, %v17515_v11, %v15598_v30  ;;  %v8651_v45 = vsel %vm8649_vm2, %v17516_v19, %v15603_v44  ;;  %v8652_v3 = vsel %vm8649_vm2, %v17517_v56, %v15621_v15  ;;  %v17529_v55 = vld [vmem:[#allocation93_spill] sm:$0xff]  ;;  %v17538_v11 = vld [vmem:[#allocation118_spill] sm:$0xff]  ;;  %v17542_v56 = vld [vmem:[#allocation131_spill] sm:$0xff] }
 0x4c7   : > { %v8653_v8 = vsel %vm8649_vm2, %v17519_v16, %v17518_v26  ;;  %v8654_v30 = vsel %vm8649_vm2, %v17521_v18, %v17520_v42  ;;  %v8655_v44 = vsel %vm8649_vm2, %v17523_v35, %v17522_v57  ;;  %v8656_v15 = vsel %vm8649_vm2, %v17525_v24, %v17524_v50  ;;  %8690 = vst [vmem:[%s16151_s11] sm:$0xff] %v8650_v62  ;;  %v17536_v12 = vld [vmem:[#allocation113_spill] sm:$0xff]  ;;  %v17553_v24 = vld [vmem:[#allocation44_spill] sm:$0xff] }
 0x4c8   : > { %v8657_v28 = vsel %vm8649_vm2, %v17527_v25, %v17526_v59  ;;  %8691 = vst [vmem:[%s16151_s11 + $0x8] sm:$0xff] %v8651_v45  ;;  %8692 = vst [vmem:[%s16151_s11 + $0x10] sm:$0xff] %v8652_v3  ;;  %v8658_v0 = vsel %vm8649_vm2, %v17529_v55, %v17528_v1  ;;  %v8659_v4 = vsel %vm8649_vm2, %v17531_v54, %v17530_v63  ;;  %v17547_v42 = vld [vmem:[#allocation145_spill] sm:$0xff]  ;;  %v17554_v59 = vld [vmem:[#allocation159_spill] sm:$0xff] }
 0x4c9   : > { %8693 = vst [vmem:[%s16151_s11 + $0x18] sm:$0xff] %v8653_v8  ;;  %v8660_v10 = vsel %vm8649_vm2, %v17533_v40, %v17532_v9  ;;  %v8661_v29 = vsel %vm8649_vm2, %v17534_v60, %v15807_v48  ;;  %8694 = vst [vmem:[%s16151_s11 + $0x20] sm:$0xff] %v8654_v30  ;;  %v8662_v39 = vsel %vm8649_vm2, %v17535_v36, %v15811_v37  ;;  %v17537_v48 = vld [vmem:[#allocation114_spill] sm:$0xff]  ;;  %v17539_v37 = vld [vmem:[#allocation120_spill] sm:$0xff] }
 0x4ca   : > { %8695 = vst [vmem:[%s16151_s11 + $0x28] sm:$0xff] %v8655_v44  ;;  %8696 = vst [vmem:[%s16151_s11 + $0x30] sm:$0xff] %v8656_v15  ;;  %v8663_v58 = vsel %vm8649_vm2, %v17536_v12, %v15815_v49  ;;  %v8664_v20 = vsel %vm8649_vm2, %v17537_v48, %v15820_v51  ;;  %v8665_v62 = vsel %vm8649_vm2, %v17538_v11, %v15840_v2  ;;  %v17540_v51 = vld [vmem:[#allocation121_spill] sm:$0xff]  ;;  %v17546_v8 = vld [vmem:[#allocation64_spill] sm:$0xff] }
 0x4cb   : > { %8697 = vst [vmem:[%s16151_s11 + $0x38] sm:$0xff] %v8657_v28  ;;  %8698 = vst [vmem:[%s16151_s11 + $0x40] sm:$0xff] %v8658_v0  ;;  %v8666_v49 = vsel %vm8649_vm2, %v17539_v37, %v15844_v6  ;;  %v8667_v19 = vsel %vm8649_vm2, %v17540_v51, %v15866_v53  ;;  %v17541_v2 = vld [vmem:[#allocation129_spill] sm:$0xff]  ;;  %v8669_v3 = vsel %vm8649_vm2, %v17542_v56, %v15892_v34  ;;  %v17543_v53 = vld [vmem:[#allocation132_spill] sm:$0xff] }
 0x4cc   : > { %8699 = vst [vmem:[%s16151_s11 + $0x48] sm:$0xff] %v8659_v4  ;;  %8700 = vst [vmem:[%s16151_s11 + $0x50] sm:$0xff] %v8660_v10  ;;  %v8668_v45 = vsel %vm8649_vm2, %v17541_v2, %v15882_v61  ;;  %v8670_v6 = vsel %vm8649_vm2, %v17543_v53, %v15902_v41  ;;  %v17544_v61 = vld [vmem:[#allocation133_spill] sm:$0xff]  ;;  %v17545_v34 = vld [vmem:[#allocation144_spill] sm:$0xff]  ;;  %v8673_v18 = vsel %vm8649_vm2, %v17547_v42, %v17546_v8 }
 0x4cd   : > { %8701 = vst [vmem:[%s16151_s11 + $0x58] sm:$0xff] %v8661_v29  ;;  %8702 = vst [vmem:[%s16151_s11 + $0x60] sm:$0xff] %v8662_v39  ;;  %v8671_v26 = vsel %vm8649_vm2, %v17544_v61, %v15929_v46  ;;  %v8672_v16 = vsel %vm8649_vm2, %v17545_v34, %v15934_v43  ;;  %v17548_v41 = vld [vmem:[#allocation67_spill] sm:$0xff]  ;;  %v17550_v57 = vld [vmem:[#allocation73_spill] sm:$0xff]  ;;  %v8677_v15 = vsel %vm8649_vm2, %v17553_v24, %v15998_v27 }
 0x4ce   : > { %8703 = vst [vmem:[%s16151_s11 + $0x68] sm:$0xff] %v8663_v58  ;;  %8704 = vst [vmem:[%s16151_s11 + $0x70] sm:$0xff] %v8664_v20  ;;  %v17549_v30 = vld [vmem:[#allocation147_spill] sm:$0xff]  ;;  %v17551_v43 = vld [vmem:[#allocation149_spill] sm:$0xff]  ;;  %v8678_v25 = vsel %vm8649_vm2, %v17554_v59, %v16002_v21 }
 0x4cf   : > { %8705 = vst [vmem:[%s16151_s11 + $0x78] sm:$0xff] %v8665_v62  ;;  %8706 = vst [vmem:[%s16151_s11 + $0x80] sm:$0xff] %v8666_v49  ;;  %v8674_v46 = vsel %vm8649_vm2, %v17549_v30, %v17548_v41  ;;  %v8675_v35 = vsel %vm8649_vm2, %v17551_v43, %v17550_v57  ;;  %v17552_v44 = vld [vmem:[#allocation152_spill] sm:$0xff]  ;;  %v17556_v1 = vld [vmem:[#allocation163_spill] sm:$0xff] }
 0x4d0   : > { %8707 = vst [vmem:[%s16151_s11 + $0x88] sm:$0xff] %v8667_v19  ;;  %8708 = vst [vmem:[%s16151_s11 + $0x90] sm:$0xff] %v8668_v45  ;;  %v8676_v50 = vsel %vm8649_vm2, %v17552_v44, %v15983_v5  ;;  %v17555_v28 = vld [vmem:[#allocation160_spill] sm:$0xff]  ;;  %v8680_v27 = vsel %vm8649_vm2, %v17556_v1, %v16013_v47  ;;  %v17557_v55 = vld [vmem:[#allocation165_spill] sm:$0xff] }
 0x4d1   : > { %8709 = vst [vmem:[%s16151_s11 + $0x98] sm:$0xff] %v8669_v3  ;;  %8710 = vst [vmem:[%s16151_s11 + $0xa0] sm:$0xff] %v8670_v6  ;;  %v8679_v5 = vsel %vm8649_vm2, %v17555_v28, %v16009_v14  ;;  %v8681_v0 = vsel %vm8649_vm2, %v17557_v55, %v16081_v23  ;;  %v17558_v21 = vld [vmem:[#allocation48_spill] sm:$0xff]  ;;  %v17559_v47 = vld [vmem:[#allocation49_spill] sm:$0xff] }
 0x4d2   : > { %8711 = vst [vmem:[%s16151_s11 + $0xa8] sm:$0xff] %v8671_v26  ;;  %8712 = vst [vmem:[%s16151_s11 + $0xb0] sm:$0xff] %v8672_v16  ;;  %v8682_v14 = vsel %vm8649_vm2, %v17558_v21, %v16085_v22  ;;  %v8683_v23 = vsel %vm8649_vm2, %v17559_v47, %v16091_v32  ;;  %v17560_v63 = vld [vmem:[#allocation169_spill] sm:$0xff]  ;;  %v17561_v4 = vld [vmem:[#allocation170_spill] sm:$0xff] }
 0x4d3   : > { %8713 = vst [vmem:[%s16151_s11 + $0xb8] sm:$0xff] %v8673_v18  ;;  %8714 = vst [vmem:[%s16151_s11 + $0xc0] sm:$0xff] %v8674_v46  ;;  %v8684_v54 = vsel %vm8649_vm2, %v17560_v63, %v16095_v7  ;;  %v8685_v9 = vsel %vm8649_vm2, %v17561_v4, %v16099_v38  ;;  %v17562_v22 = vld [vmem:[#allocation50_spill] sm:$0xff]  ;;  %v17563_v7 = vld [vmem:[#allocation52_spill] sm:$0xff] }
 0x4d4   : > { %8715 = vst [vmem:[%s16151_s11 + $0xc8] sm:$0xff] %v8675_v35  ;;  %8716 = vst [vmem:[%s16151_s11 + $0xd0] sm:$0xff] %v8676_v50  ;;  %v8686_v32 = vsel %vm8649_vm2, %v17562_v22, %v16103_v52  ;;  %v8687_v40 = vsel %vm8649_vm2, %v17563_v7, %v16107_v17  ;;  %v17564_v38 = vld [vmem:[#allocation60_spill] sm:$0xff]  ;;  %v17565_v60 = vld [vmem:[#allocation65_spill] sm:$0xff] }
 0x4d5   : > { %8717 = vst [vmem:[%s16151_s11 + $0xd8] sm:$0xff] %v8677_v15  ;;  %8718 = vst [vmem:[%s16151_s11 + $0xe0] sm:$0xff] %v8678_v25  ;;  %v8688_v10 = vsel %vm8649_vm2, %v17564_v38, %v16111_v33  ;;  %v8689_v29 = vsel %vm8649_vm2, %v17565_v60, %v16115_v13 }
 0x4d6   : > { %8719 = vst [vmem:[%s16151_s11 + $0xe8] sm:$0xff] %v8679_v5  ;;  %8720 = vst [vmem:[%s16151_s11 + $0xf0] sm:$0xff] %v8680_v27 }
 0x4d7   : > { %8721 = vst [vmem:[%s16151_s11 + $0xf8] sm:$0xff] %v8681_v0  ;;  %8722 = vst [vmem:[%s16151_s11 + $0x100] sm:$0xff] %v8682_v14 }
 0x4d8   : > { %8723 = vst [vmem:[%s16151_s11 + $0x108] sm:$0xff] %v8683_v23  ;;  %8724 = vst [vmem:[%s16151_s11 + $0x110] sm:$0xff] %v8684_v54 }
 0x4d9   : > { %8725 = vst [vmem:[%s16151_s11 + $0x118] sm:$0xff] %v8685_v9  ;;  %8726 = vst [vmem:[%s16151_s11 + $0x120] sm:$0xff] %v8686_v32 }
 0x4da   : > { %8727 = vst [vmem:[%s16151_s11 + $0x128] sm:$0xff] %v8687_v40  ;;  %8728 = vst [vmem:[%s16151_s11 + $0x130] sm:$0xff] %v8688_v10 }
 0x4db   : > { %8729 = vst [vmem:[%s16151_s11 + $0x138] sm:$0xff] %v8689_v29 }
 0x4dc   : > { %9559 = shalt.err (!%p9556_p4)
}
 0x4dd   : > { %s9560_s25 = scalar_lea.hbm %s16284_s20, 5120  ;;  %s9564_s28 = scalar_lea.hbm %s16376_s1, 20480 }
 0x4de   : > { %p9561_p7 = scmp.ne.s32.totalorder %s16284_s20, %s9560_s25  ;;  %p9565_p13 = scmp.lt.u32.totalorder %s16284_s20, %s16376_s1 }
 0x4df   : > { %p9566_p1 = scmp.lt.u32.totalorder %s9564_s28, %s9560_s25  ;;  %p9568_p5 = scmp.lt.u32.totalorder %s9560_s25, %s16284_s20 }
 0x4e0   : > { %p9562_p8 = pnand %p9561_p7, %p17566_p6 }
 0x4e1   : > { %p9567_p0 = por %p9566_p1, %p9565_p13 }
 0x4e2   : > { %p9563_p11 = pneg %p9562_p8 }
 0x4e3   : > { %p9569_p9 = por %p9568_p5, %p9567_p0 }
 0x4e5   : > { %p9570_p10 = pnand %p9569_p9, %p9563_p11 }
 0x4e7   : > { %9573 = shalt.err (!%p9570_p10)
}
 0x4e8   : > { %s9623_s2 = smov 128   ;;  %s9624_s3 = smov 8  }
 0x4e9   : > { %9302 = dma.vmem_to_hbm [thread:$0]  (%p17566_p6), %s16286_s14, 5120, %s16284_s20, %s16334_s10, %s9623_s2, %s9623_s2, %s9624_s3  }
 0x4ea PF: > { %p9314_p12 = scmp.ge.s32.totalorder %s9612_s9, 2  ;;  %s8759_s4 = sand.u32 1, %s9600_s6  }
 0x4eb   : > { %p17567_p2 = scmp.ne.s32.totalorder %s16787_s17, 0  ;;  %s8760_s5 = scalar_lea.sflag [#allocation4], %s8759_s4 }
 0x4ed   : > { %p9309_p3 = pnand %p9314_p12, %p17567_p2 }
 0x4ef   : > { %9595 = dma.done.wait (!%p9309_p3), %s8760_s5, 5120  }
 0x4f0   : > { %9597 = vsyncadd (!%p9309_p3), %s8760_s5, 4294962176  ;;  %p12_p4 = scmp.ge.s32.totalorder %s9660_s12, 6   ;;  %s17568_s6 = smov %s9604_s7 }
 0x4f1   : > { %s17569_s7 = smov %s9608_s8  ;;  %s17570_s8 = smov %s9671_s15 }
 0x4f2   : > { %s17571_s9 = smov %s9660_s12  ;;  %14 = sbr.rel (!%p12_p4) target bundleno = 4 (0x4), region = 61 }
 0x4f9   :  { %8765 = vsyncpa [#allocation3], 1 }
 0x4fa   :  { %8767 = vsyncpa [#allocation3 + $0x1], 1 }
 0x4fb   :  { %8768 = vsyncpa [#allocation4], 1 }
 0x4fc   :  { %8770 = vsyncpa [#allocation4 + $0x1], 1 }

</bundles_post_ra>
